<compile_context>
chip_gen: v7x
topology: tpu7x:2x2x1
jax: 0.10.0
libtpu: 0.0.40
codegen_flags: <defaults>
</compile_context>

<pallas_src>
import functools

import jax
import jax.numpy as jnp
from jax.experimental import pallas as pl
from jax.experimental.pallas import tpu as pltpu


# ----------------------------- Pallas kernels ------------------------------

def _matmul_bias_act_kernel(x_ref, w_ref, b_ref, o_ref, *, relu):
    """Single-K-block y = x @ w + b (optional ReLU); f32 MXU accumulation,
    result written straight to the output block (no scratch accumulator)."""
    r = jnp.dot(x_ref[...], w_ref[...], preferred_element_type=jnp.float32)
    r = r + b_ref[...].astype(jnp.float32)
    if relu:
        r = jnp.maximum(r, 0.0)
    o_ref[...] = r.astype(o_ref.dtype)


def matmul_bias_act(x, w, b, *, relu, out_dtype, tm=None):
    """y = act(x @ w + b) with K in a single block; optional parallel M tiling
    (used by the convs so v7x's two TensorCores can split the batch)."""
    M, K = x.shape
    Kw, N = w.shape
    assert K == Kw
    if tm is None:
        tm = M
    assert M % tm == 0
    return pl.pallas_call(
        functools.partial(_matmul_bias_act_kernel, relu=relu),
        out_shape=jax.ShapeDtypeStruct((M, N), out_dtype),
        grid_spec=pltpu.PrefetchScalarGridSpec(
            num_scalar_prefetch=0,
            grid=(M // tm,),
            in_specs=[
                pl.BlockSpec((tm, K), lambda i: (i, 0)),
                pl.BlockSpec((K, N), lambda i: (0, 0)),
                pl.BlockSpec((1, N), lambda i: (0, 0)),
            ],
            out_specs=pl.BlockSpec((tm, N), lambda i: (i, 0)),
        ),
        compiler_params=pltpu.CompilerParams(
            dimension_semantics=("parallel",),
            vmem_limit_bytes=32 * 1024 * 1024,
        ),
    )(x, w, b.reshape(1, N))


def _fc_tiled_kernel(x_ref, w_ref, b_ref, o_ref, acc_ref, *, relu):
    """One (n, k) tile of y = x @ w + b; bias folded into the k==0 acc init,
    activation + store only on the last K step."""
    k = pl.program_id(1)

    @pl.when(k == 0)
    def _():
        acc_ref[...] = jnp.zeros_like(acc_ref) + b_ref[...].astype(jnp.float32)

    acc_ref[...] += jnp.dot(x_ref[...], w_ref[...],
                            preferred_element_type=jnp.float32)

    @pl.when(k == pl.num_programs(1) - 1)
    def _():
        r = acc_ref[...]
        if relu:
            r = jnp.maximum(r, 0.0)
        o_ref[...] = r.astype(o_ref.dtype)


def linear_tiled_pallas(x, w, b, *, relu, tk, tn, out_dtype=jnp.float32):
    """y = act(x @ w + b), grid = (N-tiles [parallel], K-tiles [reduction])."""
    M, K = x.shape
    Kw, N = w.shape
    assert K == Kw and K % tk == 0 and N % tn == 0
    nk, nn = K // tk, N // tn
    return pl.pallas_call(
        functools.partial(_fc_tiled_kernel, relu=relu),
        out_shape=jax.ShapeDtypeStruct((M, N), out_dtype),
        grid_spec=pltpu.PrefetchScalarGridSpec(
            num_scalar_prefetch=0,
            grid=(nn, nk),
            in_specs=[
                pl.BlockSpec((M, tk), lambda n, k: (0, k)),
                pl.BlockSpec((tk, tn), lambda n, k: (k, n)),
                pl.BlockSpec((1, tn), lambda n, k: (0, n)),
            ],
            out_specs=pl.BlockSpec((M, tn), lambda n, k: (0, n)),
            scratch_shapes=[pltpu.VMEM((M, tn), jnp.float32)],
        ),
        compiler_params=pltpu.CompilerParams(
            # "parallel" N axis -> the two v7x TensorCores each stream half of
            # the bf16 fc1 weight; K stays "arbitrary" (sequential reduction).
            dimension_semantics=("parallel", "arbitrary"),
            # Double-buffered (tk, tn) bf16 weight tiles ~= 13 MiB total; 32 MiB
            # leaves headroom on v7x's 64 MiB physical VMEM (v5e/v6e: 128 MiB).
            vmem_limit_bytes=32 * 1024 * 1024,
        ),
    )(x, w, b.reshape(1, N))


def _halfmax_kernel(x_ref, o_ref):
    """o = max(x[:, :n], x[:, n:]) with n = o.shape[-1] (lane-aligned halves)."""
    x = x_ref[...]
    n = o_ref.shape[-1]
    o_ref[...] = jnp.maximum(x[:, :n], x[:, n:])


def maxpool2x2_pallas(y_flat, n_batch):
    """2x2 / stride-2 max pool of the conv2 output.

    y_flat: (N*28*28, 128) with rows ordered (b, h, w) and channels on lanes.
    Returns (N, 14*14*128) flattened in (h2, w2, c) order.  Both pooling steps
    are lane-aligned half-maxes over *free* row-major reshapes, so there are no
    strided HBM reads and no 4x slice materialization.
    """
    dt = y_flat.dtype
    xw = y_flat.reshape(n_batch * 28 * 14, 256)          # pair (w, w+1) on lanes
    yw = pl.pallas_call(
        _halfmax_kernel,
        out_shape=jax.ShapeDtypeStruct((n_batch * 28 * 14, 128), dt))(xw)
    xh = yw.reshape(n_batch * 14, 2 * 14 * 128)          # pair (h, h+1) on lanes
    yh = pl.pallas_call(
        _halfmax_kernel,
        out_shape=jax.ShapeDtypeStruct((n_batch * 14, 14 * 128), dt))(xh)
    return yh.reshape(n_batch, 14 * 14 * 128)


# ------------------------------ JAX-side glue -------------------------------

def _im2col_3x3_same(x):
    """x:(N,H,W,C) -> (N*H*W, 9*C) patches (padding=1), ordered [kh, kw, cin]."""
    N, H, W, C = x.shape
    xp = jnp.pad(x, ((0, 0), (1, 1), (1, 1), (0, 0)))
    cols = [xp[:, kh:kh + H, kw:kw + W, :] for kh in range(3) for kw in range(3)]
    return jnp.concatenate(cols, axis=-1).reshape(N * H * W, 9 * C)
    # TODO(synk): replace this materialized im2col (and the conv1->conv2 HBM
    # bounce) with in-kernel 9-tap accumulation over a padded VMEM tile.


def conv3x3_relu_pallas(x_nhwc, w_k, b, *, tm=None):
    """3x3 'same' conv + bias + ReLU. w_k: (9*Cin, Cout) im2col-layout weight."""
    N, H, W, Cin = x_nhwc.shape
    Cout = w_k.shape[1]
    patches = _im2col_3x3_same(x_nhwc)                       # (N*H*W, 9*Cin)
    y = matmul_bias_act(patches, w_k, b, relu=True,
                        out_dtype=jnp.bfloat16, tm=tm)
    return y.reshape(N, H, W, Cout)


def init_params(key):
    """Deterministic synthetic parameters with PyTorch-convention shapes (f32)."""
    ks = jax.random.split(key, 8)
    w1 = jax.random.normal(ks[0], (64, 1, 3, 3), jnp.float32) * (1.0 / 3.0)
    b1 = jax.random.normal(ks[1], (64,), jnp.float32) * 0.01
    w2 = jax.random.normal(ks[2], (128, 64, 3, 3), jnp.float32) * (1.0 / 24.0)
    b2 = jax.random.normal(ks[3], (128,), jnp.float32) * 0.01
    wd1 = jax.random.normal(ks[4], (1024, 14 * 14 * 128), jnp.float32) * (1.0 / 158.0)
    bd1 = jax.random.normal(ks[5], (1024,), jnp.float32) * 0.01
    wd2 = jax.random.normal(ks[6], (10, 1024), jnp.float32) * (1.0 / 32.0)
    bd2 = jax.random.normal(ks[7], (10,), jnp.float32) * 0.01
    return (w1, b1, w2, b2, wd1, bd1, wd2, bd2)


def prepare_params(params):
    """One-time conversion of PyTorch-layout f32 params to kernel layout.

    - conv weights -> (9*Cin, Cout) im2col layout, bf16 (f32 accumulation).
    - fc1 weight   -> (25088, 1024) bf16, with its input columns PERMUTED from
      PyTorch's (c, h, w) flatten order to the kernel's pooled-NHWC (h, w, c)
      order so no activation transpose is needed at runtime.  bf16 halves the
      ~100 MB HBM stream that dominates end-to-end time at small batch.
    - biases stay f32; fc2 weight stays f32 (tiny).
    """
    w1, b1, w2, b2, wd1, bd1, wd2, bd2 = params
    w1k = jnp.transpose(w1, (2, 3, 1, 0)).reshape(9 * 1, 64).astype(jnp.bfloat16)
    w2k = jnp.transpose(w2, (2, 3, 1, 0)).reshape(9 * 64, 128).astype(jnp.bfloat16)
    wd1k = jnp.transpose(wd1.reshape(1024, 128, 14, 14), (2, 3, 1, 0))
    wd1k = wd1k.reshape(14 * 14 * 128, 1024).astype(jnp.bfloat16)
    wd2k = jnp.transpose(wd2, (1, 0))                        # (1024, 10) f32
    return (w1k, b1, w2k, b2, wd1k, bd1, wd2k, bd2)


@jax.jit
def model_forward(x_nchw, kparams):
    """Pallas implementation of Model.forward. x_nchw: (N,1,28,28) float32."""
    w1k, b1, w2k, b2, wd1k, bd1, wd2k, bd2 = kparams
    N = x_nchw.shape[0]
    x = jnp.transpose(x_nchw, (0, 2, 3, 1)).astype(jnp.bfloat16)   # NHWC, bf16
    y = conv3x3_relu_pallas(x, w1k, b1, tm=28 * 28)                # (N,28,28,64)
    y = conv3x3_relu_pallas(y, w2k, b2, tm=28 * 28)                # (N,28,28,128)
    y = maxpool2x2_pallas(y.reshape(N * 28 * 28, 128), N)          # (N, 25088)
    # fc1: bf16 weight stream, f32 accumulation, bias in acc init, ReLU fused.
    h = linear_tiled_pallas(y, wd1k, bd1, relu=True, tk=6272, tn=512)  # (N,1024)
    # TODO(synk): Dropout(p=0.5) is identity in eval/inference mode; training-
    # mode random masking is intentionally omitted.
    return matmul_bias_act(h, wd2k, bd2, relu=False,
                           out_dtype=jnp.float32)                  # (N, 10)


def reference_forward(x_nchw, params):
    """Pure-JAX (XLA, f32) reference of the PyTorch forward, for verification."""
    w1, b1, w2, b2, wd1, bd1, wd2, bd2 = params
    dn = ("NCHW", "OIHW", "NCHW")
    y = jax.lax.conv_general_dilated(x_nchw, w1, (1, 1), ((1, 1), (1, 1)),
                                     dimension_numbers=dn)
    y = jax.nn.relu(y + b1[None, :, None, None])
    y = jax.lax.conv_general_dilated(y, w2, (1, 1), ((1, 1), (1, 1)),
                                     dimension_numbers=dn)
    y = jax.nn.relu(y + b2[None, :, None, None])
    N, C, H, W = y.shape
    y = y.reshape(N, C, H // 2, 2, W // 2, 2).max(axis=(3, 5))
    y = y.reshape(N, -1)
    y = jax.nn.relu(y @ wd1.T + bd1)
    return y @ wd2.T + bd2


if __name__ == "__main__":
    key = jax.random.PRNGKey(0)
    k_x, k_p = jax.random.split(key)
    # MNIST-shaped input; H=W=28 is required by the 14*14*128 flatten.
    x = jax.random.normal(k_x, (2, 1, 28, 28), jnp.float32)
    params = init_params(k_p)
    kparams = prepare_params(params)         # one-time weight layout/dtype prep

    out = jax.block_until_ready(model_forward(x, kparams))
    assert out.shape == (2, 10) and out.dtype == jnp.float32

    ref = jax.block_until_ready(reference_forward(x, params))
    max_diff = float(jnp.max(jnp.abs(out - ref)))
    # bf16 weights/operands (f32 accumulation) give ~5e-3 abs error on O(1)
    # logits, well inside the 2e-2 tolerance.
    assert jnp.allclose(out, ref, rtol=2e-2, atol=2e-2), f"max abs diff {max_diff}"

    print("KERNEL_OK")
</pallas_src>

<mosaic_0001>
module attributes {stable_mosaic.version = 11 : i64} {
  func.func @_matmul_bias_act_kernel(%arg0: i32, %arg1: memref<784x9xbf16, #tpu.memory_space<vmem>>, %arg2: memref<9x64xbf16, #tpu.memory_space<vmem>>, %arg3: memref<1x64xf32, #tpu.memory_space<vmem>>, %arg4: memref<784x64xbf16, #tpu.memory_space<vmem>>) attributes {dimension_semantics = [#tpu.dimension_semantics<parallel>], iteration_bounds = array<i64: 2>, scalar_prefetch = 0 : i64, scratch_operands = 0 : i64, tpu.core_type = #tpu.core_type<tc>, window_params = [{transform_indices = @transform_0, window_bounds = array<i64: 784, 9>}, {pipeline_mode = #tpu.pipeline_mode<synchronous>, transform_indices = @transform_1, window_bounds = array<i64: 9, 64>}, {pipeline_mode = #tpu.pipeline_mode<synchronous>, transform_indices = @transform_2, window_bounds = array<i64: 1, 64>}, {transform_indices = @transform_3, window_bounds = array<i64: 784, 64>}]} {
    %c0 = arith.constant 0 : index
    %c0_0 = arith.constant 0 : index
    %0 = vector.load %arg1[%c0, %c0_0] : memref<784x9xbf16, #tpu.memory_space<vmem>>, vector<784x9xbf16>
    %c0_1 = arith.constant 0 : index
    %c0_2 = arith.constant 0 : index
    %1 = vector.load %arg2[%c0_1, %c0_2] : memref<9x64xbf16, #tpu.memory_space<vmem>>, vector<9x64xbf16>
    %cst = arith.constant dense<0.000000e+00> : vector<784x64xf32>
    %2 = tpu.matmul %0, %1, %cst {dimension_numbers = #tpu.dot_dimension_numbers<[1], [0], [0], [1], [0, 0, 1, 1], [], []>} : vector<784x9xbf16>, vector<9x64xbf16>, vector<784x64xf32> -> vector<784x64xf32>
    %c0_3 = arith.constant 0 : index
    %c0_4 = arith.constant 0 : index
    %3 = vector.load %arg3[%c0_3, %c0_4] : memref<1x64xf32, #tpu.memory_space<vmem>>, vector<1x64xf32>
    %4 = vector.broadcast %3 : vector<1x64xf32> to vector<784x64xf32>
    %5 = arith.addf %2, %4 : vector<784x64xf32>
    %cst_5 = arith.constant 0.000000e+00 : f32
    %6 = vector.broadcast %cst_5 : f32 to vector<784x64xf32>
    %7 = arith.maximumf %5, %6 : vector<784x64xf32>
    %8 = arith.truncf %7 : vector<784x64xf32> to vector<784x64xbf16>
    %c0_6 = arith.constant 0 : index
    %c0_7 = arith.constant 0 : index
    %9 = vector.load %arg4[%c0_6, %c0_7] : memref<784x64xbf16, #tpu.memory_space<vmem>>, vector<784x64xbf16>
    tpu.vector_store %arg4[%c0_6, %c0_7], %8 {strides = array<i32>} : memref<784x64xbf16, #tpu.memory_space<vmem>>, vector<784x64xbf16>,
    return
  }
  func.func @transform_0(%arg0: i32) -> (i32, i32) {
    %c0_i32 = arith.constant 0 : i32
    %c0_i32_0 = arith.constant 0 : i32
    return %arg0, %c0_i32 : i32, i32
  }
  func.func @transform_1(%arg0: i32) -> (i32, i32) {
    %c0_i32 = arith.constant 0 : i32
    %c0_i32_0 = arith.constant 0 : i32
    %c0_i32_1 = arith.constant 0 : i32
    return %c0_i32, %c0_i32_0 : i32, i32
  }
  func.func @transform_2(%arg0: i32) -> (i32, i32) {
    %c0_i32 = arith.constant 0 : i32
    %c0_i32_0 = arith.constant 0 : i32
    %c0_i32_1 = arith.constant 0 : i32
    return %c0_i32, %c0_i32_0 : i32, i32
  }
  func.func @transform_3(%arg0: i32) -> (i32, i32) {
    %c0_i32 = arith.constant 0 : i32
    %c0_i32_0 = arith.constant 0 : i32
    return %arg0, %c0_i32 : i32, i32
  }
}

module attributes {stable_mosaic.version = 11 : i64} {
  func.func @_matmul_bias_act_kernel(%arg0: i32, %arg1: memref<784x576xbf16, #tpu.memory_space<vmem>>, %arg2: memref<576x128xbf16, #tpu.memory_space<vmem>>, %arg3: memref<1x128xf32, #tpu.memory_space<vmem>>, %arg4: memref<784x128xbf16, #tpu.memory_space<vmem>>) attributes {dimension_semantics = [#tpu.dimension_semantics<parallel>], iteration_bounds = array<i64: 2>, scalar_prefetch = 0 : i64, scratch_operands = 0 : i64, tpu.core_type = #tpu.core_type<tc>, window_params = [{transform_indices = @transform_0, window_bounds = array<i64: 784, 576>}, {pipeline_mode = #tpu.pipeline_mode<synchronous>, transform_indices = @transform_1, window_bounds = array<i64: 576, 128>}, {pipeline_mode = #tpu.pipeline_mode<synchronous>, transform_indices = @transform_2, window_bounds = array<i64: 1, 128>}, {transform_indices = @transform_3, window_bounds = array<i64: 784, 128>}]} {
    %c0 = arith.constant 0 : index
    %c0_0 = arith.constant 0 : index
    %0 = vector.load %arg1[%c0, %c0_0] : memref<784x576xbf16, #tpu.memory_space<vmem>>, vector<784x576xbf16>
    %c0_1 = arith.constant 0 : index
    %c0_2 = arith.constant 0 : index
    %1 = vector.load %arg2[%c0_1, %c0_2] : memref<576x128xbf16, #tpu.memory_space<vmem>>, vector<576x128xbf16>
    %cst = arith.constant dense<0.000000e+00> : vector<784x128xf32>
    %2 = tpu.matmul %0, %1, %cst {dimension_numbers = #tpu.dot_dimension_numbers<[1], [0], [0], [1], [0, 0, 1, 1], [], []>} : vector<784x576xbf16>, vector<576x128xbf16>, vector<784x128xf32> -> vector<784x128xf32>
    %c0_3 = arith.constant 0 : index
    %c0_4 = arith.constant 0 : index
    %3 = vector.load %arg3[%c0_3, %c0_4] : memref<1x128xf32, #tpu.memory_space<vmem>>, vector<1x128xf32>
    %4 = vector.broadcast %3 : vector<1x128xf32> to vector<784x128xf32>
    %5 = arith.addf %2, %4 : vector<784x128xf32>
    %cst_5 = arith.constant 0.000000e+00 : f32
    %6 = vector.broadcast %cst_5 : f32 to vector<784x128xf32>
    %7 = arith.maximumf %5, %6 : vector<784x128xf32>
    %8 = arith.truncf %7 : vector<784x128xf32> to vector<784x128xbf16>
    %c0_6 = arith.constant 0 : index
    %c0_7 = arith.constant 0 : index
    %9 = vector.load %arg4[%c0_6, %c0_7] : memref<784x128xbf16, #tpu.memory_space<vmem>>, vector<784x128xbf16>
    tpu.vector_store %arg4[%c0_6, %c0_7], %8 {strides = array<i32>} : memref<784x128xbf16, #tpu.memory_space<vmem>>, vector<784x128xbf16>,
    return
  }
  func.func @transform_0(%arg0: i32) -> (i32, i32) {
    %c0_i32 = arith.constant 0 : i32
    %c0_i32_0 = arith.constant 0 : i32
    return %arg0, %c0_i32 : i32, i32
  }
  func.func @transform_1(%arg0: i32) -> (i32, i32) {
    %c0_i32 = arith.constant 0 : i32
    %c0_i32_0 = arith.constant 0 : i32
    %c0_i32_1 = arith.constant 0 : i32
    return %c0_i32, %c0_i32_0 : i32, i32
  }
  func.func @transform_2(%arg0: i32) -> (i32, i32) {
    %c0_i32 = arith.constant 0 : i32
    %c0_i32_0 = arith.constant 0 : i32
    %c0_i32_1 = arith.constant 0 : i32
    return %c0_i32, %c0_i32_0 : i32, i32
  }
  func.func @transform_3(%arg0: i32) -> (i32, i32) {
    %c0_i32 = arith.constant 0 : i32
    %c0_i32_0 = arith.constant 0 : i32
    return %arg0, %c0_i32 : i32, i32
  }
}

module attributes {stable_mosaic.version = 11 : i64} {
  func.func @_halfmax_kernel(%arg0: memref<784x256xbf16, #tpu.memory_space<vmem>>, %arg1: memref<784x128xbf16, #tpu.memory_space<vmem>>) attributes {dimension_semantics = [], scalar_prefetch = 0 : i64, scratch_operands = 0 : i64, tpu.core_type = #tpu.core_type<tc>} {
    %c0 = arith.constant 0 : index
    %c0_0 = arith.constant 0 : index
    %0 = vector.load %arg0[%c0, %c0_0] : memref<784x256xbf16, #tpu.memory_space<vmem>>, vector<784x256xbf16>
    %1 = vector.extract_strided_slice %0 {offsets = [0, 0], sizes = [784, 128], strides = [1, 1]} : vector<784x256xbf16> to vector<784x128xbf16>
    %2 = vector.extract_strided_slice %0 {offsets = [0, 128], sizes = [784, 128], strides = [1, 1]} : vector<784x256xbf16> to vector<784x128xbf16>
    %3 = arith.maximumf %1, %2 : vector<784x128xbf16>
    %c0_1 = arith.constant 0 : index
    %c0_2 = arith.constant 0 : index
    %4 = vector.load %arg1[%c0_1, %c0_2] : memref<784x128xbf16, #tpu.memory_space<vmem>>, vector<784x128xbf16>
    tpu.vector_store %arg1[%c0_1, %c0_2], %3 {strides = array<i32>} : memref<784x128xbf16, #tpu.memory_space<vmem>>, vector<784x128xbf16>,
    return
  }
}

module attributes {stable_mosaic.version = 11 : i64} {
  func.func @_halfmax_kernel(%arg0: memref<28x3584xbf16, #tpu.memory_space<vmem>>, %arg1: memref<28x1792xbf16, #tpu.memory_space<vmem>>) attributes {dimension_semantics = [], scalar_prefetch = 0 : i64, scratch_operands = 0 : i64, tpu.core_type = #tpu.core_type<tc>} {
    %c0 = arith.constant 0 : index
    %c0_0 = arith.constant 0 : index
    %0 = vector.load %arg0[%c0, %c0_0] : memref<28x3584xbf16, #tpu.memory_space<vmem>>, vector<28x3584xbf16>
    %1 = vector.extract_strided_slice %0 {offsets = [0, 0], sizes = [28, 1792], strides = [1, 1]} : vector<28x3584xbf16> to vector<28x1792xbf16>
    %2 = vector.extract_strided_slice %0 {offsets = [0, 1792], sizes = [28, 1792], strides = [1, 1]} : vector<28x3584xbf16> to vector<28x1792xbf16>
    %3 = arith.maximumf %1, %2 : vector<28x1792xbf16>
    %c0_1 = arith.constant 0 : index
    %c0_2 = arith.constant 0 : index
    %4 = vector.load %arg1[%c0_1, %c0_2] : memref<28x1792xbf16, #tpu.memory_space<vmem>>, vector<28x1792xbf16>
    tpu.vector_store %arg1[%c0_1, %c0_2], %3 {strides = array<i32>} : memref<28x1792xbf16, #tpu.memory_space<vmem>>, vector<28x1792xbf16>,
    return
  }
}

module attributes {stable_mosaic.version = 11 : i64} {
  func.func @_fc_tiled_kernel(%arg0: i32, %arg1: i32, %arg2: memref<2x6272xbf16, #tpu.memory_space<vmem>>, %arg3: memref<6272x512xbf16, #tpu.memory_space<vmem>>, %arg4: memref<1x512xf32, #tpu.memory_space<vmem>>, %arg5: memref<2x512xf32, #tpu.memory_space<vmem>>, %arg6: memref<2x512xf32, #tpu.memory_space<vmem>>) attributes {dimension_semantics = [#tpu.dimension_semantics<parallel>, #tpu.dimension_semantics<arbitrary>], iteration_bounds = array<i64: 2, 4>, scalar_prefetch = 0 : i64, scratch_operands = 1 : i64, tpu.core_type = #tpu.core_type<tc>, window_params = [{transform_indices = @transform_0, window_bounds = array<i64: 2, 6272>}, {transform_indices = @transform_1, window_bounds = array<i64: 6272, 512>}, {transform_indices = @transform_2, window_bounds = array<i64: 1, 512>}, {transform_indices = @transform_3, window_bounds = array<i64: 2, 512>}]} {
    %c0_i32 = arith.constant 0 : i32
    %0 = arith.cmpi eq, %arg1, %c0_i32 : i32
    %1 = arith.extui %0 : i1 to i32
    %c0_i32_0 = arith.constant 0 : i32
    %2 = arith.cmpi ne, %1, %c0_i32_0 : i32
    scf.if %2 {
      %cst_9 = arith.constant 0.000000e+00 : f32
      %12 = vector.broadcast %cst_9 : f32 to vector<2x512xf32>
      %c0_10 = arith.constant 0 : index
      %c0_11 = arith.constant 0 : index
      %13 = vector.load %arg4[%c0_10, %c0_11] : memref<1x512xf32, #tpu.memory_space<vmem>>, vector<1x512xf32>
      %14 = vector.broadcast %13 : vector<1x512xf32> to vector<2x512xf32>
      %15 = arith.addf %12, %14 : vector<2x512xf32>
      %c0_12 = arith.constant 0 : index
      %c0_13 = arith.constant 0 : index
      %16 = vector.load %arg6[%c0_12, %c0_13] : memref<2x512xf32, #tpu.memory_space<vmem>>, vector<2x512xf32>
      tpu.vector_store %arg6[%c0_12, %c0_13], %15 {strides = array<i32>} : memref<2x512xf32, #tpu.memory_space<vmem>>, vector<2x512xf32>,
    } else {
    }
    %c0 = arith.constant 0 : index
    %c0_1 = arith.constant 0 : index
    %3 = vector.load %arg6[%c0, %c0_1] : memref<2x512xf32, #tpu.memory_space<vmem>>, vector<2x512xf32>
    %c0_2 = arith.constant 0 : index
    %c0_3 = arith.constant 0 : index
    %4 = vector.load %arg2[%c0_2, %c0_3] : memref<2x6272xbf16, #tpu.memory_space<vmem>>, vector<2x6272xbf16>
    %c0_4 = arith.constant 0 : index
    %c0_5 = arith.constant 0 : index
    %5 = vector.load %arg3[%c0_4, %c0_5] : memref<6272x512xbf16, #tpu.memory_space<vmem>>, vector<6272x512xbf16>
    %cst = arith.constant dense<0.000000e+00> : vector<2x512xf32>
    %6 = tpu.matmul %4, %5, %cst {dimension_numbers = #tpu.dot_dimension_numbers<[1], [0], [0], [1], [0, 0, 1, 1], [], []>} : vector<2x6272xbf16>, vector<6272x512xbf16>, vector<2x512xf32> -> vector<2x512xf32>
    %7 = arith.addf %3, %6 : vector<2x512xf32>
    %c0_6 = arith.constant 0 : index
    %c0_7 = arith.constant 0 : index
    %8 = vector.load %arg6[%c0_6, %c0_7] : memref<2x512xf32, #tpu.memory_space<vmem>>, vector<2x512xf32>
    tpu.vector_store %arg6[%c0_6, %c0_7], %7 {strides = array<i32>} : memref<2x512xf32, #tpu.memory_space<vmem>>, vector<2x512xf32>,
    %c3_i32 = arith.constant 3 : i32
    %9 = arith.cmpi eq, %arg1, %c3_i32 : i32
    %10 = arith.extui %9 : i1 to i32
    %c0_i32_8 = arith.constant 0 : i32
    %11 = arith.cmpi ne, %10, %c0_i32_8 : i32
    scf.if %11 {
      %c0_9 = arith.constant 0 : index
      %c0_10 = arith.constant 0 : index
      %12 = vector.load %arg6[%c0_9, %c0_10] : memref<2x512xf32, #tpu.memory_space<vmem>>, vector<2x512xf32>
      %cst_11 = arith.constant 0.000000e+00 : f32
      %13 = vector.broadcast %cst_11 : f32 to vector<2x512xf32>
      %14 = arith.maximumf %12, %13 : vector<2x512xf32>
      %c0_12 = arith.constant 0 : index
      %c0_13 = arith.constant 0 : index
      %15 = vector.load %arg5[%c0_12, %c0_13] : memref<2x512xf32, #tpu.memory_space<vmem>>, vector<2x512xf32>
      tpu.vector_store %arg5[%c0_12, %c0_13], %14 {strides = array<i32>} : memref<2x512xf32, #tpu.memory_space<vmem>>, vector<2x512xf32>,
    } else {
    }
    return
  }
  func.func @transform_0(%arg0: i32, %arg1: i32) -> (i32, i32) {
    %c0_i32 = arith.constant 0 : i32
    %c0_i32_0 = arith.constant 0 : i32
    return %c0_i32, %arg1 : i32, i32
  }
  func.func @transform_1(%arg0: i32, %arg1: i32) -> (i32, i32) {
    %c0_i32 = arith.constant 0 : i32
    return %arg1, %arg0 : i32, i32
  }
  func.func @transform_2(%arg0: i32, %arg1: i32) -> (i32, i32) {
    %c0_i32 = arith.constant 0 : i32
    %c0_i32_0 = arith.constant 0 : i32
    return %c0_i32, %arg0 : i32, i32
  }
  func.func @transform_3(%arg0: i32, %arg1: i32) -> (i32, i32) {
    %c0_i32 = arith.constant 0 : i32
    %c0_i32_0 = arith.constant 0 : i32
    return %c0_i32, %arg0 : i32, i32
  }
}

module attributes {stable_mosaic.version = 11 : i64} {
  func.func @_matmul_bias_act_kernel(%arg0: i32, %arg1: memref<2x1024xf32, #tpu.memory_space<vmem>>, %arg2: memref<1024x10xf32, #tpu.memory_space<vmem>>, %arg3: memref<1x10xf32, #tpu.memory_space<vmem>>, %arg4: memref<2x10xf32, #tpu.memory_space<vmem>>) attributes {dimension_semantics = [#tpu.dimension_semantics<parallel>], iteration_bounds = array<i64: 1>, scalar_prefetch = 0 : i64, scratch_operands = 0 : i64, tpu.core_type = #tpu.core_type<tc>, window_params = [{transform_indices = @transform_0, window_bounds = array<i64: 2, 1024>}, {pipeline_mode = #tpu.pipeline_mode<synchronous>, transform_indices = @transform_1, window_bounds = array<i64: 1024, 10>}, {pipeline_mode = #tpu.pipeline_mode<synchronous>, transform_indices = @transform_2, window_bounds = array<i64: 1, 10>}, {transform_indices = @transform_3, window_bounds = array<i64: 2, 10>}]} {
    %c0 = arith.constant 0 : index
    %c0_0 = arith.constant 0 : index
    %0 = vector.load %arg1[%c0, %c0_0] : memref<2x1024xf32, #tpu.memory_space<vmem>>, vector<2x1024xf32>
    %c0_1 = arith.constant 0 : index
    %c0_2 = arith.constant 0 : index
    %1 = vector.load %arg2[%c0_1, %c0_2] : memref<1024x10xf32, #tpu.memory_space<vmem>>, vector<1024x10xf32>
    %cst = arith.constant dense<0.000000e+00> : vector<2x10xf32>
    %2 = tpu.matmul %0, %1, %cst {dimension_numbers = #tpu.dot_dimension_numbers<[1], [0], [0], [1], [0, 0, 1, 1], [], []>} : vector<2x1024xf32>, vector<1024x10xf32>, vector<2x10xf32> -> vector<2x10xf32>
    %c0_3 = arith.constant 0 : index
    %c0_4 = arith.constant 0 : index
    %3 = vector.load %arg3[%c0_3, %c0_4] : memref<1x10xf32, #tpu.memory_space<vmem>>, vector<1x10xf32>
    %4 = vector.broadcast %3 : vector<1x10xf32> to vector<2x10xf32>
    %5 = arith.addf %2, %4 : vector<2x10xf32>
    %c0_5 = arith.constant 0 : index
    %c0_6 = arith.constant 0 : index
    %6 = vector.load %arg4[%c0_5, %c0_6] : memref<2x10xf32, #tpu.memory_space<vmem>>, vector<2x10xf32>
    tpu.vector_store %arg4[%c0_5, %c0_6], %5 {strides = array<i32>} : memref<2x10xf32, #tpu.memory_space<vmem>>, vector<2x10xf32>,
    return
  }
  func.func @transform_0(%arg0: i32) -> (i32, i32) {
    %c0_i32 = arith.constant 0 : i32
    %c0_i32_0 = arith.constant 0 : i32
    return %arg0, %c0_i32 : i32, i32
  }
  func.func @transform_1(%arg0: i32) -> (i32, i32) {
    %c0_i32 = arith.constant 0 : i32
    %c0_i32_0 = arith.constant 0 : i32
    %c0_i32_1 = arith.constant 0 : i32
    return %c0_i32, %c0_i32_0 : i32, i32
  }
  func.func @transform_2(%arg0: i32) -> (i32, i32) {
    %c0_i32 = arith.constant 0 : i32
    %c0_i32_0 = arith.constant 0 : i32
    %c0_i32_1 = arith.constant 0 : i32
    return %c0_i32, %c0_i32_0 : i32, i32
  }
  func.func @transform_3(%arg0: i32) -> (i32, i32) {
    %c0_i32 = arith.constant 0 : i32
    %c0_i32_0 = arith.constant 0 : i32
    return %arg0, %c0_i32 : i32, i32
  }
}

</mosaic_0001>

<bundles_post_ra>
// kernel: model_forward.6
= control target key start
LH: loop header
LB: loop body
LE: loop exit
PB: predicated region body
PF: predicated region fallthrough
CT: control target
= control target key end

     0   :  { %8 = vsyncpa [#allocation3], 0  ;;  %s3154_s0 = inlined_call_operand.vmem [shape: bf16[1568,9], index: 0, kind: input, shape index: {}]   ;;  %s3155_s1 = inlined_call_operand.hbm [shape: bf16[9,64], index: 1, kind: input, shape index: {}]   ;;  %s3156_s2 = inlined_call_operand.hbm [shape: f32[1,64], index: 2, kind: input, shape index: {}]   ;;  %s3157_s3 = inlined_call_operand.vmem [shape: bf16[1568,64], index: 3, kind: output, shape index: {}]  }
   0x1   :  { %9 = vsyncpa [#allocation5], 0  ;;  %s2550_s12 = smov 0  }
   0x2 LB: > { %s1807_s13 = sadd.s32 4294967295, %s2521_s12   ;;  %p1809_p0 = scmp.ge.s32.totalorder %s2521_s12, 1  ;;  %s2521_s12 = sphi %s2550_s12, %s15_s12  }
   0x3   : > { %p114_p1 = scmp.lt.s32.totalorder %s2521_s12, 3  ;;  %s2523_s14 = smov [#allocation2]  }
   0x4   : > { %s126_s15 = sshll.u32 %s2523_s14, 4  ;;  %p2564_p3 = scmp.eq.s32.totalorder %s1807_s13, 0  ;;  %s127_s15 = int_to_ptr.vmem [resolvable:$true] %s126_s15 }
   0x5   : > { %p2558_p2 = pnand %p1809_p0, %p114_p1  ;;  %s2524_s18 = smov [#allocation4]  }
   0x6   : > { %s3162_s17 = scalar_select %p2564_p3, 1, 0 }
   0x7   : > { %s3161_s16 = scalar_select %p2558_p2, 1, 0 }
   0x8   : > { %p2374_p4 = pneg %p2558_p2  ;;  %s140_s19 = sshll.u32 %s2524_s18, 4  ;;  %s2576_s19 = int_to_ptr.vmem [resolvable:$true] %s140_s19 }
   0x9   : > { %s2451_s23 = scalar_lea.hbm %s3155_s1, 128 }
   0xa   : > { %p2572_p5 = pnand %p2564_p3, %p2374_p4  ;;  %p2452_p6 = scmp.ne.s32.totalorder %s3155_s1, %s2451_s23 }
   0xb   : > { %p2458_p10 = scmp.lt.u32.totalorder %s2451_s23, %s3155_s1 }
   0xc   : > { %p2453_p7 = pneg %p2572_p5 }
   0xe   : > { %p2454_p8 = pnand %p2453_p7, %p2452_p6 }
  0x10   : > { %p2455_p9 = pneg %p2454_p8 }
  0x12   : > { %p2460_p11 = pnand %p2458_p10, %p2455_p9 }
  0x14   : > { %2463 = shalt.err (!%p2460_p11)
}
  0x15   : > { %s2464_s28 = scalar_lea.vmem %s127_s15, 128  ;;  %p2472_p1 = scmp.lt.s32.totalorder %s127_s15, %s127_s15 }
  0x16   : > { %p2465_p12 = scmp.ne.s32.totalorder %s127_s15, %s2464_s28  ;;  %p2473_p4 = scmp.lt.s32.totalorder %s2464_s28, %s2464_s28 }
  0x18   : > { %p2467_p13 = pnand %p2465_p12, %p2453_p7  ;;  %p2474_p3 = por %p2473_p4, %p2472_p1 }
  0x1a   : > { %p2468_p0 = pneg %p2467_p13 }
  0x1c   : > { %p2475_p2 = pnand %p2474_p3, %p2468_p0 }
  0x1e   : > { %2478 = shalt.err (!%p2475_p2)
}
  0x1f   : > { %s2525_s29 = smov 64   ;;  %s2526_s30 = smov 4  }
  0x20   : > { %2377 = dma.hbm_to_vmem [thread:$0]  (!%p2572_p5), %s3155_s1, 128, %s127_s15, [#allocation3], %s2525_s29, %s2525_s29, %s2526_s30  }
  0x21   : > { %s2479_s8 = scalar_lea.hbm %s3156_s2, 16 }
  0x22   : > { %p2480_p6 = scmp.ne.s32.totalorder %s3156_s2, %s2479_s8  ;;  %p2486_p8 = scmp.lt.u32.totalorder %s2479_s8, %s3156_s2 }
  0x24   : > { %p2482_p2 = pnand %p2480_p6, %p2453_p7 }
  0x26   : > { %p2483_p3 = pneg %p2482_p2 }
  0x28   : > { %p2488_p9 = pnand %p2486_p8, %p2483_p3 }
  0x2a   : > { %2491 = shalt.err (!%p2488_p9)
}
  0x2b   : > { %s2492_s15 = scalar_lea.vmem %s2576_s19, 16  ;;  %s2499_s18 = scalar_lea.vmem %s2576_s19, 32 }
  0x2c   : > { %p2493_p10 = scmp.ne.s32.totalorder %s2576_s19, %s2492_s15  ;;  %p2500_p13 = scmp.lt.s32.totalorder %s2576_s19, %s2576_s19 }
  0x2d   : > { %p2501_p0 = scmp.lt.s32.totalorder %s2499_s18, %s2492_s15 }
  0x2e   : > { %p2495_p11 = pnand %p2493_p10, %p2453_p7 }
  0x2f   : > { %p2502_p1 = por %p2501_p0, %p2500_p13 }
  0x30   : > { %p2496_p12 = pneg %p2495_p11 }
  0x32   : > { %p2503_p4 = pnand %p2502_p1, %p2496_p12 }
  0x34   : > { %2506 = shalt.err (!%p2503_p4)
}
  0x35   : > { %2380 = dma.hbm_to_vmem [thread:$0]  (!%p2572_p5), %s3156_s2, 16, %s2576_s19, [#allocation5]  }
  0x36   : > { %p3164_p6 = scmp.ne.s32.totalorder %s3161_s16, 0 }
  0x37   : > { %p3165_p7 = scmp.ne.s32.totalorder (!%p3164_p6), %s3162_s17, 0 }
  0x38   : > { %162 = sbr.rel (%p3164_p6) target bundleno = 488 (0x1e8), region = 32 }
  0x3f   : > { %2512 = dma.done.wait (%p3165_p7), [#allocation3], 128  }
  0x40   : > { %2514 = vsyncadd (%p3165_p7), [#allocation3], 4294967168 }
  0x41   : > { %2516 = dma.done.wait (%p3165_p7), [#allocation5], 16  }
  0x42   : > { %2518 = vsyncadd (%p3165_p7), [#allocation5], 4294967280  ;;  %vm708_vm0 = vcmask 1043456   ;;  %v2527_v0 = vmov 0.0   ;;  %s190_s16 = smul.u32 98, %s1807_s13  ;;  %vm2528_vm1 = vmmov 0  }
  0x43   : > { %2166 = vmatprep.subr.bf16.mxu0 %v2527_v0  ;;  %2364 = vmatprep.subr.bf16.mxu1 %v2527_v0  ;;  %vm709_vm2 = vcmask 1044480   ;;  %v2529_v1 = vmov 65535   ;;  %v2400_v4 = vld [vmem:[#allocation2] sm:$0x1f]   ;;  %vm560_vm3 = vcmask 72704   ;;  %vm1630_vm4 = vcmask 519168  }
  0x44   : > { %2168 = vmatprep.mubr.msk.bf16.mxu0 %vm2528_vm1, %v2527_v0  ;;  %2268 = vmatprep.mubr.msk.bf16.mxu1 %vm2528_vm1, %v2527_v0  ;;  %v710_v2 = vsel %vm708_vm0, 4294967295, %v2529_v1  ;;  %p191_p5 = scmp.lt.s32.totalorder %s190_s16, 195  ;;  %v2846_v55 = vld [vmem:[#allocation4] ss:$0 sm:$0xff] }
  0x45   : > { %v711_v3 = vsel %vm709_vm2, %v710_v2, 0 }
  0x46   : > { %s3167_s16 = smov (!%p191_p5, %s190_s16), 195  ;;  %v713_v5 = vand.u32 %v2400_v4, %v711_v3 }
  0x47   : > { %s1816_s13 = sshll.u32 %s3167_s16, 2 }
  0x48   : > { %s2652_s20 = scalar_lea.vmem %s3154_s0, %s1816_s13  ;;  %2167 = vmatpush3.bf16.msra.mxu0 %v713_v5  ;;  %2365 = vmatpush3.bf16.msra.mxu1 %v713_v5  ;;  %s2857_s25 = scalar_lea.vmem %s3157_s3, %s1816_s13 }
  0x49   : > { %v2401_v6 = vld [vmem:[%s2652_s20] sm:$0xff]   ;;  %v2402_v7 = vld [vmem:[%s2652_s20 + $0xc8] sm:$0xff]   ;;  %v2404_v9 = vld [vmem:[%s2652_s20 + $0xd0] sm:$0xff]  }
  0x4a   : > { %v2403_v8 = vld [vmem:[%s2652_s20 + $0x8] sm:$0xff]   ;;  %v2405_v10 = vld [vmem:[%s2652_s20 + $0x10] sm:$0xff]   ;;  %v2406_v11 = vld [vmem:[%s2652_s20 + $0xd8] sm:$0xff]  }
  0x4b   : > { %2169 = vmatmul.mubr.msk.bf16.vlgmr.msra.gmra.mrb[0].mxu0 %vm560_vm3, %v2401_v6  ;;  %2269 = vmatmul.mubr.msk.bf16.vlgmr.msra.gmra.mrb[0].mxu1 %vm560_vm3, %v2402_v7  ;;  %v2407_v12 = vld [vmem:[%s2652_s20 + $0x18] sm:$0xff]   ;;  %v2408_v13 = vld [vmem:[%s2652_s20 + $0xe0] sm:$0xff]   ;;  %v2410_v15 = vld [vmem:[%s2652_s20 + $0xe8] sm:$0xff]  }
  0x4c   : > { %2172 = vmatprep.mubr.msk.bf16.mxu0 %vm2528_vm1, %v2527_v0  ;;  %2272 = vmatprep.mubr.msk.bf16.mxu1 %vm2528_vm1, %v2527_v0  ;;  %v2409_v14 = vld [vmem:[%s2652_s20 + $0x20] sm:$0xff]   ;;  %v2411_v16 = vld [vmem:[%s2652_s20 + $0x28] sm:$0xff]   ;;  %v2412_v17 = vld [vmem:[%s2652_s20 + $0xf0] sm:$0xff]  }
  0x4d   : > { %v2413_v18 = vld [vmem:[%s2652_s20 + $0x30] sm:$0xff]   ;;  %v2414_v19 = vld [vmem:[%s2652_s20 + $0xf8] sm:$0xff]   ;;  %v2416_v21 = vld [vmem:[%s2652_s20 + $0x100] sm:$0xff]  }
  0x4e   : > { %v2415_v20 = vld [vmem:[%s2652_s20 + $0x38] sm:$0xff]   ;;  %v2417_v22 = vld [vmem:[%s2652_s20 + $0x40] sm:$0xff]   ;;  %v2418_v23 = vld [vmem:[%s2652_s20 + $0x108] sm:$0xff]  }
  0x4f   : > { %v2419_v24 = vld [vmem:[%s2652_s20 + $0x48] sm:$0xff]   ;;  %v2420_v25 = vld [vmem:[%s2652_s20 + $0x110] sm:$0xff]   ;;  %v2422_v27 = vld [vmem:[%s2652_s20 + $0x118] sm:$0xff]  }
  0x50   : > { %v2421_v26 = vld [vmem:[%s2652_s20 + $0x50] sm:$0xff]   ;;  %v2423_v28 = vld [vmem:[%s2652_s20 + $0x58] sm:$0xff]   ;;  %v2424_v29 = vld [vmem:[%s2652_s20 + $0x120] sm:$0xff]  }
  0x51   : > { %v2425_v30 = vld [vmem:[%s2652_s20 + $0x60] sm:$0xff]   ;;  %v2426_v31 = vld [vmem:[%s2652_s20 + $0x128] sm:$0xff]   ;;  %v2428_v33 = vld [vmem:[%s2652_s20 + $0x130] sm:$0xff]  }
  0x52   : > { %v2427_v32 = vld [vmem:[%s2652_s20 + $0x68] sm:$0xff]   ;;  %v2429_v34 = vld [vmem:[%s2652_s20 + $0x70] sm:$0xff]   ;;  %v2430_v35 = vld [vmem:[%s2652_s20 + $0x138] sm:$0xff]  }
  0x53   : > { %2173 = vmatmul.mubr.msk.bf16.gmra.mrb[4].mxu0 %vm560_vm3, %v2403_v8  ;;  %2273 = vmatmul.mubr.msk.bf16.gmra.mrb[4].mxu1 %vm560_vm3, %v2404_v9  ;;  %v2431_v36 = vld [vmem:[%s2652_s20 + $0x78] sm:$0xff]   ;;  %v2432_v37 = vld [vmem:[%s2652_s20 + $0x140] sm:$0xff]   ;;  %v2434_v39 = vld [vmem:[%s2652_s20 + $0x148] sm:$0xff]  }
  0x54   : > { %2176 = vmatprep.mubr.msk.bf16.mxu0 %vm2528_vm1, %v2527_v0  ;;  %2276 = vmatprep.mubr.msk.bf16.mxu1 %vm2528_vm1, %v2527_v0  ;;  %v2433_v38 = vld [vmem:[%s2652_s20 + $0x80] sm:$0xff]   ;;  %v2435_v40 = vld [vmem:[%s2652_s20 + $0x88] sm:$0xff]   ;;  %v2436_v41 = vld [vmem:[%s2652_s20 + $0x150] sm:$0xff]  }
  0x55   : > { %v2437_v42 = vld [vmem:[%s2652_s20 + $0x90] sm:$0xff]   ;;  %v2438_v43 = vld [vmem:[%s2652_s20 + $0x158] sm:$0xff]   ;;  %v2440_v45 = vld [vmem:[%s2652_s20 + $0x160] sm:$0xff]  }
  0x56   : > { %v2439_v44 = vld [vmem:[%s2652_s20 + $0x98] sm:$0xff]   ;;  %v2441_v46 = vld [vmem:[%s2652_s20 + $0xa0] sm:$0xff]   ;;  %v2442_v47 = vld [vmem:[%s2652_s20 + $0x168] sm:$0xff]  }
  0x57   : > { %v2443_v48 = vld [vmem:[%s2652_s20 + $0xa8] sm:$0xff]   ;;  %v2444_v49 = vld [vmem:[%s2652_s20 + $0x170] sm:$0xff]   ;;  %v2446_v51 = vld [vmem:[%s2652_s20 + $0x178] sm:$0xff]  }
  0x58   : > { %v2445_v50 = vld [vmem:[%s2652_s20 + $0xb0] sm:$0xff]   ;;  %v2447_v52 = vld [vmem:[%s2652_s20 + $0xb8] sm:$0xff]   ;;  %v2448_v53 = vld [vmem:[%s2652_s20 + $0x180] sm:$0xff]  }
  0x59   : > { %v2449_v54 = vld [vmem:[%s2652_s20 + $0xc0] sm:$0xff]  }
  0x5b   : > { %2177 = vmatmul.mubr.msk.bf16.gmra.mrb[8].mxu0 %vm560_vm3, %v2405_v10  ;;  %2277 = vmatmul.mubr.msk.bf16.gmra.mrb[8].mxu1 %vm560_vm3, %v2406_v11 }
  0x5c   : > { %2180 = vmatprep.mubr.msk.bf16.mxu0 %vm2528_vm1, %v2527_v0  ;;  %2280 = vmatprep.mubr.msk.bf16.mxu1 %vm2528_vm1, %v2527_v0 }
  0x63   : > { %2181 = vmatmul.mubr.msk.bf16.gmra.mrb[12].mxu0 %vm560_vm3, %v2407_v12  ;;  %2281 = vmatmul.mubr.msk.bf16.gmra.mrb[12].mxu1 %vm560_vm3, %v2408_v13 }
  0x64   : > { %2184 = vmatprep.mubr.msk.bf16.mxu0 %vm2528_vm1, %v2527_v0  ;;  %2284 = vmatprep.mubr.msk.bf16.mxu1 %vm2528_vm1, %v2527_v0 }
  0x6b   : > { %2185 = vmatmul.mubr.msk.bf16.gmra.mrb[16].mxu0 %vm560_vm3, %v2409_v14  ;;  %2285 = vmatmul.mubr.msk.bf16.gmra.mrb[16].mxu1 %vm560_vm3, %v2410_v15 }
  0x6c   : > { %2188 = vmatprep.mubr.msk.bf16.mxu0 %vm2528_vm1, %v2527_v0  ;;  %2288 = vmatprep.mubr.msk.bf16.mxu1 %vm2528_vm1, %v2527_v0 }
  0x73   : > { %2189 = vmatmul.mubr.msk.bf16.gmra.mrb[20].mxu0 %vm560_vm3, %v2411_v16  ;;  %2289 = vmatmul.mubr.msk.bf16.gmra.mrb[20].mxu1 %vm560_vm3, %v2412_v17 }
  0x74   : > { %2192 = vmatprep.mubr.msk.bf16.mxu0 %vm2528_vm1, %v2527_v0  ;;  %2292 = vmatprep.mubr.msk.bf16.mxu1 %vm2528_vm1, %v2527_v0 }
  0x7b   : > { %2193 = vmatmul.mubr.msk.bf16.gmra.mrb[24].mxu0 %vm560_vm3, %v2413_v18  ;;  %2293 = vmatmul.mubr.msk.bf16.gmra.mrb[24].mxu1 %vm560_vm3, %v2414_v19 }
  0x7c   : > { %2196 = vmatprep.mubr.msk.bf16.mxu0 %vm2528_vm1, %v2527_v0  ;;  %2296 = vmatprep.mubr.msk.bf16.mxu1 %vm2528_vm1, %v2527_v0 }
  0x83   : > { %2197 = vmatmul.mubr.msk.bf16.gmra.mrb[28].mxu0 %vm560_vm3, %v2415_v20  ;;  %2297 = vmatmul.mubr.msk.bf16.gmra.mrb[28].mxu1 %vm560_vm3, %v2416_v21 }
  0x84   : > { %2200 = vmatprep.mubr.msk.bf16.mxu0 %vm2528_vm1, %v2527_v0  ;;  %2300 = vmatprep.mubr.msk.bf16.mxu1 %vm2528_vm1, %v2527_v0 }
  0x8b   : > { %2201 = vmatmul.mubr.msk.bf16.gmra.mrb[32].mxu0 %vm560_vm3, %v2417_v22  ;;  %2301 = vmatmul.mubr.msk.bf16.gmra.mrb[32].mxu1 %vm560_vm3, %v2418_v23 }
  0x8c   : > { %2204 = vmatprep.mubr.msk.bf16.mxu0 %vm2528_vm1, %v2527_v0  ;;  %2304 = vmatprep.mubr.msk.bf16.mxu1 %vm2528_vm1, %v2527_v0 }
  0x93   : > { %2205 = vmatmul.mubr.msk.bf16.gmra.mrb[36].mxu0 %vm560_vm3, %v2419_v24  ;;  %2305 = vmatmul.mubr.msk.bf16.gmra.mrb[36].mxu1 %vm560_vm3, %v2420_v25 }
  0x94   : > { %2208 = vmatprep.mubr.msk.bf16.mxu0 %vm2528_vm1, %v2527_v0  ;;  %2308 = vmatprep.mubr.msk.bf16.mxu1 %vm2528_vm1, %v2527_v0 }
  0x9b   : > { %2209 = vmatmul.mubr.msk.bf16.gmra.mrb[40].mxu0 %vm560_vm3, %v2421_v26  ;;  %2309 = vmatmul.mubr.msk.bf16.gmra.mrb[40].mxu1 %vm560_vm3, %v2422_v27 }
  0x9c   : > { %2212 = vmatprep.mubr.msk.bf16.mxu0 %vm2528_vm1, %v2527_v0  ;;  %2312 = vmatprep.mubr.msk.bf16.mxu1 %vm2528_vm1, %v2527_v0 }
  0xa3   : > { %2213 = vmatmul.mubr.msk.bf16.gmra.mrb[44].mxu0 %vm560_vm3, %v2423_v28  ;;  %2313 = vmatmul.mubr.msk.bf16.gmra.mrb[44].mxu1 %vm560_vm3, %v2424_v29 }
  0xa4   : > { %2216 = vmatprep.mubr.msk.bf16.mxu0 %vm2528_vm1, %v2527_v0  ;;  %2316 = vmatprep.mubr.msk.bf16.mxu1 %vm2528_vm1, %v2527_v0 }
  0xab   : > { %2217 = vmatmul.mubr.msk.bf16.gmra.mrb[48].mxu0 %vm560_vm3, %v2425_v30  ;;  %2317 = vmatmul.mubr.msk.bf16.gmra.mrb[48].mxu1 %vm560_vm3, %v2426_v31 }
  0xac   : > { %2220 = vmatprep.mubr.msk.bf16.mxu0 %vm2528_vm1, %v2527_v0  ;;  %2320 = vmatprep.mubr.msk.bf16.mxu1 %vm2528_vm1, %v2527_v0 }
  0xb3   : > { %2221 = vmatmul.mubr.msk.bf16.gmra.mrb[52].mxu0 %vm560_vm3, %v2427_v32  ;;  %2321 = vmatmul.mubr.msk.bf16.gmra.mrb[52].mxu1 %vm560_vm3, %v2428_v33 }
  0xb4   : > { %2224 = vmatprep.mubr.msk.bf16.mxu0 %vm2528_vm1, %v2527_v0  ;;  %2324 = vmatprep.mubr.msk.bf16.mxu1 %vm2528_vm1, %v2527_v0 }
  0xbb   : > { %2225 = vmatmul.mubr.msk.bf16.gmra.mrb[56].mxu0 %vm560_vm3, %v2429_v34  ;;  %2325 = vmatmul.mubr.msk.bf16.gmra.mrb[56].mxu1 %vm560_vm3, %v2430_v35 }
  0xbc   : > { %2228 = vmatprep.mubr.msk.bf16.mxu0 %vm2528_vm1, %v2527_v0  ;;  %2328 = vmatprep.mubr.msk.bf16.mxu1 %vm2528_vm1, %v2527_v0 }
  0xc3   : > { %2229 = vmatmul.mubr.msk.bf16.gmra.mrb[60].mxu0 %vm560_vm3, %v2431_v36  ;;  %2329 = vmatmul.mubr.msk.bf16.gmra.mrb[60].mxu1 %vm560_vm3, %v2432_v37 }
  0xc4   : > { %2232 = vmatprep.mubr.msk.bf16.mxu0 %vm2528_vm1, %v2527_v0  ;;  %2332 = vmatprep.mubr.msk.bf16.mxu1 %vm2528_vm1, %v2527_v0 }
  0xcb   : > { %2233 = vmatmul.mubr.msk.bf16.gmra.mrb[64].mxu0 %vm560_vm3, %v2433_v38  ;;  %2333 = vmatmul.mubr.msk.bf16.gmra.mrb[64].mxu1 %vm560_vm3, %v2434_v39 }
  0xcc   : > { %2236 = vmatprep.mubr.msk.bf16.mxu0 %vm2528_vm1, %v2527_v0  ;;  %2336 = vmatprep.mubr.msk.bf16.mxu1 %vm2528_vm1, %v2527_v0 }
  0xd3   : > { %2237 = vmatmul.mubr.msk.bf16.gmra.mrb[68].mxu0 %vm560_vm3, %v2435_v40  ;;  %2337 = vmatmul.mubr.msk.bf16.gmra.mrb[68].mxu1 %vm560_vm3, %v2436_v41 }
  0xd4   : > { %2240 = vmatprep.mubr.msk.bf16.mxu0 %vm2528_vm1, %v2527_v0  ;;  %2340 = vmatprep.mubr.msk.bf16.mxu1 %vm2528_vm1, %v2527_v0 }
  0xdb   : > { %2241 = vmatmul.mubr.msk.bf16.gmra.mrb[72].mxu0 %vm560_vm3, %v2437_v42  ;;  %2341 = vmatmul.mubr.msk.bf16.gmra.mrb[72].mxu1 %vm560_vm3, %v2438_v43 }
  0xdc   : > { %2244 = vmatprep.mubr.msk.bf16.mxu0 %vm2528_vm1, %v2527_v0  ;;  %2344 = vmatprep.mubr.msk.bf16.mxu1 %vm2528_vm1, %v2527_v0 }
  0xe3   : > { %2245 = vmatmul.mubr.msk.bf16.gmra.mrb[76].mxu0 %vm560_vm3, %v2439_v44  ;;  %2345 = vmatmul.mubr.msk.bf16.gmra.mrb[76].mxu1 %vm560_vm3, %v2440_v45 }
  0xe4   : > { %2248 = vmatprep.mubr.msk.bf16.mxu0 %vm2528_vm1, %v2527_v0  ;;  %2348 = vmatprep.mubr.msk.bf16.mxu1 %vm2528_vm1, %v2527_v0 }
  0xeb   : > { %2249 = vmatmul.mubr.msk.bf16.gmra.mrb[80].mxu0 %vm560_vm3, %v2441_v46  ;;  %2349 = vmatmul.mubr.msk.bf16.gmra.mrb[80].mxu1 %vm560_vm3, %v2442_v47 }
  0xec   : > { %2252 = vmatprep.mubr.msk.bf16.mxu0 %vm2528_vm1, %v2527_v0  ;;  %2352 = vmatprep.mubr.msk.bf16.mxu1 %vm2528_vm1, %v2527_v0 }
  0xf3   : > { %2253 = vmatmul.mubr.msk.bf16.gmra.mrb[84].mxu0 %vm560_vm3, %v2443_v48  ;;  %2353 = vmatmul.mubr.msk.bf16.gmra.mrb[84].mxu1 %vm560_vm3, %v2444_v49 }
  0xf4   : > { %2256 = vmatprep.mubr.msk.bf16.mxu0 %vm2528_vm1, %v2527_v0  ;;  %2356 = vmatprep.mubr.msk.bf16.mxu1 %vm2528_vm1, %v2527_v0 }
  0xfb   : > { %2257 = vmatmul.mubr.msk.bf16.gmra.mrb[88].mxu0 %vm560_vm3, %v2445_v50  ;;  %2357 = vmatmul.mubr.msk.bf16.gmra.mrb[88].mxu1 %vm560_vm3, %v2446_v51 }
  0xfc   : > { %2260 = vmatprep.mubr.msk.bf16.mxu0 %vm2528_vm1, %v2527_v0  ;;  %2360 = vmatprep.mubr.msk.bf16.mxu1 %vm2528_vm1, %v2527_v0 }
 0x103   : > { %2261 = vmatmul.mubr.msk.bf16.gmra.mrb[92].mxu0 %vm560_vm3, %v2447_v52  ;;  %2361 = vmatmul.mubr.msk.bf16.gmra.mrb[92].mxu1 %vm560_vm3, %v2448_v53 }
 0x104   : > { %2264 = vmatprep.mubr.msk.bf16.mxu0 %vm2528_vm1, %v2527_v0 }
 0x10b   : > { %2265 = vmatmul.mubr.msk.bf16.gmra.mrb[96].mxu0 %vm560_vm3, %v2449_v54 }
 0x11e   : > { %v749_v56 = vpop.f32.mrb[0].mxu0  ;;  %v949_v57 = vpop.f32.mrb[0].mxu1 }
 0x11f   : > { %v750_v58 = vadd.f32 %v2846_v55, %v749_v56  ;;  %v2170_v59 = vpop.f32.mrb[1].mxu0  ;;  %v950_v60 = vadd.f32 %v2846_v55, %v949_v57  ;;  %v2270_v61 = vpop.f32.mrb[1].mxu1 }
 0x120   : > { %v752_v62 = vpop.f32.mrb[2].mxu0  ;;  %v952_v63 = vpop.f32.mrb[2].mxu1 }
 0x121   : > { %v1140_v1 = vmax.f32 %v750_v58, 0.0  ;;  %v753_v2 = vadd.f32 %v2846_v55, %v752_v62  ;;  %v2171_v0 = vpop.f32.mrb[3].mxu0  ;;  %v1190_v3 = vmax.f32 %v950_v60, 0.0  ;;  %v953_v4 = vadd.f32 %v2846_v55, %v952_v63  ;;  %v2271_v5 = vpop.f32.mrb[3].mxu1 }
 0x123   : > { %v2018_v6 = vpack.c.bf16 %v1140_v1, %v1140_v1  ;;  %v1141_v7 = vmax.f32 %v753_v2, 0.0  ;;  %v2068_v8 = vpack.c.bf16 %v1190_v3, %v1190_v3  ;;  %v1191_v9 = vmax.f32 %v953_v4, 0.0 }
 0x125   : > { %1631 = vst.msk [vmem:[%s2857_s25] sm:$0xf] %vm1630_vm4, %v2018_v6  ;;  %v2019_v10 = vpack.c.bf16 %v1141_v7, %v1141_v7  ;;  %1681 = vst.msk [vmem:[%s2857_s25 + $0xc8] sm:$0xf] %vm1630_vm4, %v2068_v8  ;;  %v2069_v11 = vpack.c.bf16 %v1191_v9, %v1191_v9 }
 0x126   : > { %v757_v12 = vpop.f32.mrb[4].mxu0  ;;  %v957_v13 = vpop.f32.mrb[4].mxu1 }
 0x127   : > { %1632 = vst.msk [vmem:[%s2857_s25 + $0x4] sm:$0xf] %vm1630_vm4, %v2019_v10  ;;  %1682 = vst.msk [vmem:[%s2857_s25 + $0xcc] sm:$0xf] %vm1630_vm4, %v2069_v11  ;;  %v758_v14 = vadd.f32 %v2846_v55, %v757_v12  ;;  %v2174_v15 = vpop.f32.mrb[5].mxu0  ;;  %v958_v16 = vadd.f32 %v2846_v55, %v957_v13  ;;  %v2274_v17 = vpop.f32.mrb[5].mxu1 }
 0x128   : > { %v760_v18 = vpop.f32.mrb[6].mxu0  ;;  %v960_v19 = vpop.f32.mrb[6].mxu1 }
 0x129   : > { %v1142_v20 = vmax.f32 %v758_v14, 0.0  ;;  %v761_v21 = vadd.f32 %v2846_v55, %v760_v18  ;;  %v2175_v22 = vpop.f32.mrb[7].mxu0  ;;  %v1192_v23 = vmax.f32 %v958_v16, 0.0  ;;  %v961_v24 = vadd.f32 %v2846_v55, %v960_v19  ;;  %v2275_v25 = vpop.f32.mrb[7].mxu1 }
 0x12b   : > { %v2020_v26 = vpack.c.bf16 %v1142_v20, %v1142_v20  ;;  %v1143_v27 = vmax.f32 %v761_v21, 0.0  ;;  %v2070_v28 = vpack.c.bf16 %v1192_v23, %v1192_v23  ;;  %v1193_v29 = vmax.f32 %v961_v24, 0.0 }
 0x12d   : > { %1633 = vst.msk [vmem:[%s2857_s25 + $0x8] sm:$0xf] %vm1630_vm4, %v2020_v26  ;;  %v2021_v30 = vpack.c.bf16 %v1143_v27, %v1143_v27  ;;  %1683 = vst.msk [vmem:[%s2857_s25 + $0xd0] sm:$0xf] %vm1630_vm4, %v2070_v28  ;;  %v2071_v31 = vpack.c.bf16 %v1193_v29, %v1193_v29 }
 0x12e   : > { %v765_v32 = vpop.f32.mrb[8].mxu0  ;;  %v965_v33 = vpop.f32.mrb[8].mxu1 }
 0x12f   : > { %1634 = vst.msk [vmem:[%s2857_s25 + $0xc] sm:$0xf] %vm1630_vm4, %v2021_v30  ;;  %1684 = vst.msk [vmem:[%s2857_s25 + $0xd4] sm:$0xf] %vm1630_vm4, %v2071_v31  ;;  %v766_v34 = vadd.f32 %v2846_v55, %v765_v32  ;;  %v2178_v35 = vpop.f32.mrb[9].mxu0  ;;  %v966_v36 = vadd.f32 %v2846_v55, %v965_v33  ;;  %v2278_v37 = vpop.f32.mrb[9].mxu1 }
 0x130   : > { %v768_v38 = vpop.f32.mrb[10].mxu0  ;;  %v968_v39 = vpop.f32.mrb[10].mxu1 }
 0x131   : > { %v1144_v40 = vmax.f32 %v766_v34, 0.0  ;;  %v769_v41 = vadd.f32 %v2846_v55, %v768_v38  ;;  %v2179_v42 = vpop.f32.mrb[11].mxu0  ;;  %v1194_v43 = vmax.f32 %v966_v36, 0.0  ;;  %v969_v44 = vadd.f32 %v2846_v55, %v968_v39  ;;  %v2279_v45 = vpop.f32.mrb[11].mxu1 }
 0x133   : > { %v2022_v46 = vpack.c.bf16 %v1144_v40, %v1144_v40  ;;  %v1145_v47 = vmax.f32 %v769_v41, 0.0  ;;  %v2072_v48 = vpack.c.bf16 %v1194_v43, %v1194_v43  ;;  %v1195_v49 = vmax.f32 %v969_v44, 0.0 }
 0x135   : > { %1635 = vst.msk [vmem:[%s2857_s25 + $0x10] sm:$0xf] %vm1630_vm4, %v2022_v46  ;;  %v2023_v50 = vpack.c.bf16 %v1145_v47, %v1145_v47  ;;  %1685 = vst.msk [vmem:[%s2857_s25 + $0xd8] sm:$0xf] %vm1630_vm4, %v2072_v48  ;;  %v2073_v51 = vpack.c.bf16 %v1195_v49, %v1195_v49 }
 0x136   : > { %v773_v52 = vpop.f32.mrb[12].mxu0  ;;  %v973_v53 = vpop.f32.mrb[12].mxu1 }
 0x137   : > { %1636 = vst.msk [vmem:[%s2857_s25 + $0x14] sm:$0xf] %vm1630_vm4, %v2023_v50  ;;  %1686 = vst.msk [vmem:[%s2857_s25 + $0xdc] sm:$0xf] %vm1630_vm4, %v2073_v51  ;;  %v774_v54 = vadd.f32 %v2846_v55, %v773_v52  ;;  %v2182_v56 = vpop.f32.mrb[13].mxu0  ;;  %v974_v57 = vadd.f32 %v2846_v55, %v973_v53  ;;  %v2282_v58 = vpop.f32.mrb[13].mxu1 }
 0x138   : > { %v776_v59 = vpop.f32.mrb[14].mxu0  ;;  %v976_v60 = vpop.f32.mrb[14].mxu1 }
 0x139   : > { %v1146_v61 = vmax.f32 %v774_v54, 0.0  ;;  %v777_v62 = vadd.f32 %v2846_v55, %v776_v59  ;;  %v2183_v63 = vpop.f32.mrb[15].mxu0  ;;  %v1196_v1 = vmax.f32 %v974_v57, 0.0  ;;  %v977_v2 = vadd.f32 %v2846_v55, %v976_v60  ;;  %v2283_v0 = vpop.f32.mrb[15].mxu1 }
 0x13b   : > { %v2024_v3 = vpack.c.bf16 %v1146_v61, %v1146_v61  ;;  %v1147_v4 = vmax.f32 %v777_v62, 0.0  ;;  %v2074_v5 = vpack.c.bf16 %v1196_v1, %v1196_v1  ;;  %v1197_v6 = vmax.f32 %v977_v2, 0.0 }
 0x13d   : > { %1637 = vst.msk [vmem:[%s2857_s25 + $0x18] sm:$0xf] %vm1630_vm4, %v2024_v3  ;;  %v2025_v7 = vpack.c.bf16 %v1147_v4, %v1147_v4  ;;  %1687 = vst.msk [vmem:[%s2857_s25 + $0xe0] sm:$0xf] %vm1630_vm4, %v2074_v5  ;;  %v2075_v8 = vpack.c.bf16 %v1197_v6, %v1197_v6 }
 0x13e   : > { %v781_v9 = vpop.f32.mrb[16].mxu0  ;;  %v981_v10 = vpop.f32.mrb[16].mxu1 }
 0x13f   : > { %1638 = vst.msk [vmem:[%s2857_s25 + $0x1c] sm:$0xf] %vm1630_vm4, %v2025_v7  ;;  %1688 = vst.msk [vmem:[%s2857_s25 + $0xe4] sm:$0xf] %vm1630_vm4, %v2075_v8  ;;  %v782_v11 = vadd.f32 %v2846_v55, %v781_v9  ;;  %v2186_v12 = vpop.f32.mrb[17].mxu0  ;;  %v982_v13 = vadd.f32 %v2846_v55, %v981_v10  ;;  %v2286_v14 = vpop.f32.mrb[17].mxu1 }
 0x140   : > { %v784_v15 = vpop.f32.mrb[18].mxu0  ;;  %v984_v16 = vpop.f32.mrb[18].mxu1 }
 0x141   : > { %v1148_v17 = vmax.f32 %v782_v11, 0.0  ;;  %v785_v18 = vadd.f32 %v2846_v55, %v784_v15  ;;  %v2187_v19 = vpop.f32.mrb[19].mxu0  ;;  %v1198_v20 = vmax.f32 %v982_v13, 0.0  ;;  %v985_v21 = vadd.f32 %v2846_v55, %v984_v16  ;;  %v2287_v22 = vpop.f32.mrb[19].mxu1 }
 0x143   : > { %v2026_v23 = vpack.c.bf16 %v1148_v17, %v1148_v17  ;;  %v1149_v24 = vmax.f32 %v785_v18, 0.0  ;;  %v2076_v25 = vpack.c.bf16 %v1198_v20, %v1198_v20  ;;  %v1199_v26 = vmax.f32 %v985_v21, 0.0 }
 0x145   : > { %1639 = vst.msk [vmem:[%s2857_s25 + $0x20] sm:$0xf] %vm1630_vm4, %v2026_v23  ;;  %v2027_v27 = vpack.c.bf16 %v1149_v24, %v1149_v24  ;;  %1689 = vst.msk [vmem:[%s2857_s25 + $0xe8] sm:$0xf] %vm1630_vm4, %v2076_v25  ;;  %v2077_v28 = vpack.c.bf16 %v1199_v26, %v1199_v26 }
 0x146   : > { %v789_v29 = vpop.f32.mrb[20].mxu0  ;;  %v989_v30 = vpop.f32.mrb[20].mxu1 }
 0x147   : > { %1640 = vst.msk [vmem:[%s2857_s25 + $0x24] sm:$0xf] %vm1630_vm4, %v2027_v27  ;;  %1690 = vst.msk [vmem:[%s2857_s25 + $0xec] sm:$0xf] %vm1630_vm4, %v2077_v28  ;;  %v790_v31 = vadd.f32 %v2846_v55, %v789_v29  ;;  %v2190_v32 = vpop.f32.mrb[21].mxu0  ;;  %v990_v33 = vadd.f32 %v2846_v55, %v989_v30  ;;  %v2290_v34 = vpop.f32.mrb[21].mxu1 }
 0x148   : > { %v792_v35 = vpop.f32.mrb[22].mxu0  ;;  %v992_v36 = vpop.f32.mrb[22].mxu1 }
 0x149   : > { %v1150_v37 = vmax.f32 %v790_v31, 0.0  ;;  %v793_v38 = vadd.f32 %v2846_v55, %v792_v35  ;;  %v2191_v39 = vpop.f32.mrb[23].mxu0  ;;  %v1200_v40 = vmax.f32 %v990_v33, 0.0  ;;  %v993_v41 = vadd.f32 %v2846_v55, %v992_v36  ;;  %v2291_v42 = vpop.f32.mrb[23].mxu1 }
 0x14b   : > { %v2028_v43 = vpack.c.bf16 %v1150_v37, %v1150_v37  ;;  %v1151_v44 = vmax.f32 %v793_v38, 0.0  ;;  %v2078_v45 = vpack.c.bf16 %v1200_v40, %v1200_v40  ;;  %v1201_v46 = vmax.f32 %v993_v41, 0.0 }
 0x14d   : > { %1641 = vst.msk [vmem:[%s2857_s25 + $0x28] sm:$0xf] %vm1630_vm4, %v2028_v43  ;;  %v2029_v47 = vpack.c.bf16 %v1151_v44, %v1151_v44  ;;  %1691 = vst.msk [vmem:[%s2857_s25 + $0xf0] sm:$0xf] %vm1630_vm4, %v2078_v45  ;;  %v2079_v48 = vpack.c.bf16 %v1201_v46, %v1201_v46 }
 0x14e   : > { %v797_v49 = vpop.f32.mrb[24].mxu0  ;;  %v997_v50 = vpop.f32.mrb[24].mxu1 }
 0x14f   : > { %1642 = vst.msk [vmem:[%s2857_s25 + $0x2c] sm:$0xf] %vm1630_vm4, %v2029_v47  ;;  %1692 = vst.msk [vmem:[%s2857_s25 + $0xf4] sm:$0xf] %vm1630_vm4, %v2079_v48  ;;  %v798_v51 = vadd.f32 %v2846_v55, %v797_v49  ;;  %v2194_v52 = vpop.f32.mrb[25].mxu0  ;;  %v998_v53 = vadd.f32 %v2846_v55, %v997_v50  ;;  %v2294_v54 = vpop.f32.mrb[25].mxu1 }
 0x150   : > { %v800_v56 = vpop.f32.mrb[26].mxu0  ;;  %v1000_v57 = vpop.f32.mrb[26].mxu1 }
 0x151   : > { %v1152_v58 = vmax.f32 %v798_v51, 0.0  ;;  %v801_v59 = vadd.f32 %v2846_v55, %v800_v56  ;;  %v2195_v60 = vpop.f32.mrb[27].mxu0  ;;  %v1202_v61 = vmax.f32 %v998_v53, 0.0  ;;  %v1001_v62 = vadd.f32 %v2846_v55, %v1000_v57  ;;  %v2295_v63 = vpop.f32.mrb[27].mxu1 }
 0x153   : > { %v2030_v1 = vpack.c.bf16 %v1152_v58, %v1152_v58  ;;  %v1153_v2 = vmax.f32 %v801_v59, 0.0  ;;  %v2080_v0 = vpack.c.bf16 %v1202_v61, %v1202_v61  ;;  %v1203_v3 = vmax.f32 %v1001_v62, 0.0 }
 0x155   : > { %1643 = vst.msk [vmem:[%s2857_s25 + $0x30] sm:$0xf] %vm1630_vm4, %v2030_v1  ;;  %v2031_v4 = vpack.c.bf16 %v1153_v2, %v1153_v2  ;;  %1693 = vst.msk [vmem:[%s2857_s25 + $0xf8] sm:$0xf] %vm1630_vm4, %v2080_v0  ;;  %v2081_v5 = vpack.c.bf16 %v1203_v3, %v1203_v3 }
 0x156   : > { %v805_v6 = vpop.f32.mrb[28].mxu0  ;;  %v1005_v7 = vpop.f32.mrb[28].mxu1 }
 0x157   : > { %1644 = vst.msk [vmem:[%s2857_s25 + $0x34] sm:$0xf] %vm1630_vm4, %v2031_v4  ;;  %1694 = vst.msk [vmem:[%s2857_s25 + $0xfc] sm:$0xf] %vm1630_vm4, %v2081_v5  ;;  %v806_v8 = vadd.f32 %v2846_v55, %v805_v6  ;;  %v2198_v9 = vpop.f32.mrb[29].mxu0  ;;  %v1006_v10 = vadd.f32 %v2846_v55, %v1005_v7  ;;  %v2298_v11 = vpop.f32.mrb[29].mxu1 }
 0x158   : > { %v808_v12 = vpop.f32.mrb[30].mxu0  ;;  %v1008_v13 = vpop.f32.mrb[30].mxu1 }
 0x159   : > { %v1154_v14 = vmax.f32 %v806_v8, 0.0  ;;  %v809_v15 = vadd.f32 %v2846_v55, %v808_v12  ;;  %v2199_v16 = vpop.f32.mrb[31].mxu0  ;;  %v1204_v17 = vmax.f32 %v1006_v10, 0.0  ;;  %v1009_v18 = vadd.f32 %v2846_v55, %v1008_v13  ;;  %v2299_v19 = vpop.f32.mrb[31].mxu1 }
 0x15b   : > { %v2032_v20 = vpack.c.bf16 %v1154_v14, %v1154_v14  ;;  %v1155_v21 = vmax.f32 %v809_v15, 0.0  ;;  %v2082_v22 = vpack.c.bf16 %v1204_v17, %v1204_v17  ;;  %v1205_v23 = vmax.f32 %v1009_v18, 0.0 }
 0x15d   : > { %1645 = vst.msk [vmem:[%s2857_s25 + $0x38] sm:$0xf] %vm1630_vm4, %v2032_v20  ;;  %v2033_v24 = vpack.c.bf16 %v1155_v21, %v1155_v21  ;;  %1695 = vst.msk [vmem:[%s2857_s25 + $0x100] sm:$0xf] %vm1630_vm4, %v2082_v22  ;;  %v2083_v25 = vpack.c.bf16 %v1205_v23, %v1205_v23 }
 0x15e   : > { %v813_v26 = vpop.f32.mrb[32].mxu0  ;;  %v1013_v27 = vpop.f32.mrb[32].mxu1 }
 0x15f   : > { %1646 = vst.msk [vmem:[%s2857_s25 + $0x3c] sm:$0xf] %vm1630_vm4, %v2033_v24  ;;  %1696 = vst.msk [vmem:[%s2857_s25 + $0x104] sm:$0xf] %vm1630_vm4, %v2083_v25  ;;  %v814_v28 = vadd.f32 %v2846_v55, %v813_v26  ;;  %v2202_v29 = vpop.f32.mrb[33].mxu0  ;;  %v1014_v30 = vadd.f32 %v2846_v55, %v1013_v27  ;;  %v2302_v31 = vpop.f32.mrb[33].mxu1 }
 0x160   : > { %v816_v32 = vpop.f32.mrb[34].mxu0  ;;  %v1016_v33 = vpop.f32.mrb[34].mxu1 }
 0x161   : > { %v1156_v34 = vmax.f32 %v814_v28, 0.0  ;;  %v817_v35 = vadd.f32 %v2846_v55, %v816_v32  ;;  %v2203_v36 = vpop.f32.mrb[35].mxu0  ;;  %v1206_v37 = vmax.f32 %v1014_v30, 0.0  ;;  %v1017_v38 = vadd.f32 %v2846_v55, %v1016_v33  ;;  %v2303_v39 = vpop.f32.mrb[35].mxu1 }
 0x163   : > { %v2034_v40 = vpack.c.bf16 %v1156_v34, %v1156_v34  ;;  %v1157_v41 = vmax.f32 %v817_v35, 0.0  ;;  %v2084_v42 = vpack.c.bf16 %v1206_v37, %v1206_v37  ;;  %v1207_v43 = vmax.f32 %v1017_v38, 0.0 }
 0x165   : > { %1647 = vst.msk [vmem:[%s2857_s25 + $0x40] sm:$0xf] %vm1630_vm4, %v2034_v40  ;;  %v2035_v44 = vpack.c.bf16 %v1157_v41, %v1157_v41  ;;  %1697 = vst.msk [vmem:[%s2857_s25 + $0x108] sm:$0xf] %vm1630_vm4, %v2084_v42  ;;  %v2085_v45 = vpack.c.bf16 %v1207_v43, %v1207_v43 }
 0x166   : > { %v821_v46 = vpop.f32.mrb[36].mxu0  ;;  %v1021_v47 = vpop.f32.mrb[36].mxu1 }
 0x167   : > { %1648 = vst.msk [vmem:[%s2857_s25 + $0x44] sm:$0xf] %vm1630_vm4, %v2035_v44  ;;  %1698 = vst.msk [vmem:[%s2857_s25 + $0x10c] sm:$0xf] %vm1630_vm4, %v2085_v45  ;;  %v822_v48 = vadd.f32 %v2846_v55, %v821_v46  ;;  %v2206_v49 = vpop.f32.mrb[37].mxu0  ;;  %v1022_v50 = vadd.f32 %v2846_v55, %v1021_v47  ;;  %v2306_v51 = vpop.f32.mrb[37].mxu1 }
 0x168   : > { %v824_v52 = vpop.f32.mrb[38].mxu0  ;;  %v1024_v53 = vpop.f32.mrb[38].mxu1 }
 0x169   : > { %v1158_v54 = vmax.f32 %v822_v48, 0.0  ;;  %v825_v56 = vadd.f32 %v2846_v55, %v824_v52  ;;  %v2207_v57 = vpop.f32.mrb[39].mxu0  ;;  %v1208_v58 = vmax.f32 %v1022_v50, 0.0  ;;  %v1025_v59 = vadd.f32 %v2846_v55, %v1024_v53  ;;  %v2307_v60 = vpop.f32.mrb[39].mxu1 }
 0x16b   : > { %v2036_v61 = vpack.c.bf16 %v1158_v54, %v1158_v54  ;;  %v1159_v62 = vmax.f32 %v825_v56, 0.0  ;;  %v2086_v63 = vpack.c.bf16 %v1208_v58, %v1208_v58  ;;  %v1209_v1 = vmax.f32 %v1025_v59, 0.0 }
 0x16d   : > { %1649 = vst.msk [vmem:[%s2857_s25 + $0x48] sm:$0xf] %vm1630_vm4, %v2036_v61  ;;  %v2037_v2 = vpack.c.bf16 %v1159_v62, %v1159_v62  ;;  %1699 = vst.msk [vmem:[%s2857_s25 + $0x110] sm:$0xf] %vm1630_vm4, %v2086_v63  ;;  %v2087_v0 = vpack.c.bf16 %v1209_v1, %v1209_v1 }
 0x16e   : > { %v829_v3 = vpop.f32.mrb[40].mxu0  ;;  %v1029_v4 = vpop.f32.mrb[40].mxu1 }
 0x16f   : > { %1650 = vst.msk [vmem:[%s2857_s25 + $0x4c] sm:$0xf] %vm1630_vm4, %v2037_v2  ;;  %1700 = vst.msk [vmem:[%s2857_s25 + $0x114] sm:$0xf] %vm1630_vm4, %v2087_v0  ;;  %v830_v5 = vadd.f32 %v2846_v55, %v829_v3  ;;  %v2210_v6 = vpop.f32.mrb[41].mxu0  ;;  %v1030_v7 = vadd.f32 %v2846_v55, %v1029_v4  ;;  %v2310_v8 = vpop.f32.mrb[41].mxu1 }
 0x170   : > { %v832_v9 = vpop.f32.mrb[42].mxu0  ;;  %v1032_v10 = vpop.f32.mrb[42].mxu1 }
 0x171   : > { %v1160_v11 = vmax.f32 %v830_v5, 0.0  ;;  %v833_v12 = vadd.f32 %v2846_v55, %v832_v9  ;;  %v2211_v13 = vpop.f32.mrb[43].mxu0  ;;  %v1210_v14 = vmax.f32 %v1030_v7, 0.0  ;;  %v1033_v15 = vadd.f32 %v2846_v55, %v1032_v10  ;;  %v2311_v16 = vpop.f32.mrb[43].mxu1 }
 0x173   : > { %v2038_v17 = vpack.c.bf16 %v1160_v11, %v1160_v11  ;;  %v1161_v18 = vmax.f32 %v833_v12, 0.0  ;;  %v2088_v19 = vpack.c.bf16 %v1210_v14, %v1210_v14  ;;  %v1211_v20 = vmax.f32 %v1033_v15, 0.0 }
 0x175   : > { %1651 = vst.msk [vmem:[%s2857_s25 + $0x50] sm:$0xf] %vm1630_vm4, %v2038_v17  ;;  %v2039_v21 = vpack.c.bf16 %v1161_v18, %v1161_v18  ;;  %1701 = vst.msk [vmem:[%s2857_s25 + $0x118] sm:$0xf] %vm1630_vm4, %v2088_v19  ;;  %v2089_v22 = vpack.c.bf16 %v1211_v20, %v1211_v20 }
 0x176   : > { %v837_v23 = vpop.f32.mrb[44].mxu0  ;;  %v1037_v24 = vpop.f32.mrb[44].mxu1 }
 0x177   : > { %1652 = vst.msk [vmem:[%s2857_s25 + $0x54] sm:$0xf] %vm1630_vm4, %v2039_v21  ;;  %1702 = vst.msk [vmem:[%s2857_s25 + $0x11c] sm:$0xf] %vm1630_vm4, %v2089_v22  ;;  %v838_v25 = vadd.f32 %v2846_v55, %v837_v23  ;;  %v2214_v26 = vpop.f32.mrb[45].mxu0  ;;  %v1038_v27 = vadd.f32 %v2846_v55, %v1037_v24  ;;  %v2314_v28 = vpop.f32.mrb[45].mxu1 }
 0x178   : > { %v840_v29 = vpop.f32.mrb[46].mxu0  ;;  %v1040_v30 = vpop.f32.mrb[46].mxu1 }
 0x179   : > { %v1162_v31 = vmax.f32 %v838_v25, 0.0  ;;  %v841_v32 = vadd.f32 %v2846_v55, %v840_v29  ;;  %v2215_v33 = vpop.f32.mrb[47].mxu0  ;;  %v1212_v34 = vmax.f32 %v1038_v27, 0.0  ;;  %v1041_v35 = vadd.f32 %v2846_v55, %v1040_v30  ;;  %v2315_v36 = vpop.f32.mrb[47].mxu1 }
 0x17b   : > { %v2040_v37 = vpack.c.bf16 %v1162_v31, %v1162_v31  ;;  %v1163_v38 = vmax.f32 %v841_v32, 0.0  ;;  %v2090_v39 = vpack.c.bf16 %v1212_v34, %v1212_v34  ;;  %v1213_v40 = vmax.f32 %v1041_v35, 0.0 }
 0x17d   : > { %1653 = vst.msk [vmem:[%s2857_s25 + $0x58] sm:$0xf] %vm1630_vm4, %v2040_v37  ;;  %v2041_v41 = vpack.c.bf16 %v1163_v38, %v1163_v38  ;;  %1703 = vst.msk [vmem:[%s2857_s25 + $0x120] sm:$0xf] %vm1630_vm4, %v2090_v39  ;;  %v2091_v42 = vpack.c.bf16 %v1213_v40, %v1213_v40 }
 0x17e   : > { %v845_v43 = vpop.f32.mrb[48].mxu0  ;;  %v1045_v44 = vpop.f32.mrb[48].mxu1 }
 0x17f   : > { %1654 = vst.msk [vmem:[%s2857_s25 + $0x5c] sm:$0xf] %vm1630_vm4, %v2041_v41  ;;  %1704 = vst.msk [vmem:[%s2857_s25 + $0x124] sm:$0xf] %vm1630_vm4, %v2091_v42  ;;  %v846_v45 = vadd.f32 %v2846_v55, %v845_v43  ;;  %v2218_v46 = vpop.f32.mrb[49].mxu0  ;;  %v1046_v47 = vadd.f32 %v2846_v55, %v1045_v44  ;;  %v2318_v48 = vpop.f32.mrb[49].mxu1 }
 0x180   : > { %v848_v49 = vpop.f32.mrb[50].mxu0  ;;  %v1048_v50 = vpop.f32.mrb[50].mxu1 }
 0x181   : > { %v1164_v51 = vmax.f32 %v846_v45, 0.0  ;;  %v849_v52 = vadd.f32 %v2846_v55, %v848_v49  ;;  %v2219_v53 = vpop.f32.mrb[51].mxu0  ;;  %v1214_v54 = vmax.f32 %v1046_v47, 0.0  ;;  %v1049_v56 = vadd.f32 %v2846_v55, %v1048_v50  ;;  %v2319_v57 = vpop.f32.mrb[51].mxu1 }
 0x183   : > { %v2042_v58 = vpack.c.bf16 %v1164_v51, %v1164_v51  ;;  %v1165_v59 = vmax.f32 %v849_v52, 0.0  ;;  %v2092_v60 = vpack.c.bf16 %v1214_v54, %v1214_v54  ;;  %v1215_v61 = vmax.f32 %v1049_v56, 0.0 }
 0x185   : > { %1655 = vst.msk [vmem:[%s2857_s25 + $0x60] sm:$0xf] %vm1630_vm4, %v2042_v58  ;;  %v2043_v62 = vpack.c.bf16 %v1165_v59, %v1165_v59  ;;  %1705 = vst.msk [vmem:[%s2857_s25 + $0x128] sm:$0xf] %vm1630_vm4, %v2092_v60  ;;  %v2093_v63 = vpack.c.bf16 %v1215_v61, %v1215_v61 }
 0x186   : > { %v853_v1 = vpop.f32.mrb[52].mxu0  ;;  %v1053_v2 = vpop.f32.mrb[52].mxu1 }
 0x187   : > { %1656 = vst.msk [vmem:[%s2857_s25 + $0x64] sm:$0xf] %vm1630_vm4, %v2043_v62  ;;  %1706 = vst.msk [vmem:[%s2857_s25 + $0x12c] sm:$0xf] %vm1630_vm4, %v2093_v63  ;;  %v854_v0 = vadd.f32 %v2846_v55, %v853_v1  ;;  %v2222_v3 = vpop.f32.mrb[53].mxu0  ;;  %v1054_v4 = vadd.f32 %v2846_v55, %v1053_v2  ;;  %v2322_v5 = vpop.f32.mrb[53].mxu1 }
 0x188   : > { %v856_v6 = vpop.f32.mrb[54].mxu0  ;;  %v1056_v7 = vpop.f32.mrb[54].mxu1 }
 0x189   : > { %v1166_v8 = vmax.f32 %v854_v0, 0.0  ;;  %v857_v9 = vadd.f32 %v2846_v55, %v856_v6  ;;  %v2223_v10 = vpop.f32.mrb[55].mxu0  ;;  %v1216_v11 = vmax.f32 %v1054_v4, 0.0  ;;  %v1057_v12 = vadd.f32 %v2846_v55, %v1056_v7  ;;  %v2323_v13 = vpop.f32.mrb[55].mxu1 }
 0x18b   : > { %v2044_v14 = vpack.c.bf16 %v1166_v8, %v1166_v8  ;;  %v1167_v15 = vmax.f32 %v857_v9, 0.0  ;;  %v2094_v16 = vpack.c.bf16 %v1216_v11, %v1216_v11  ;;  %v1217_v17 = vmax.f32 %v1057_v12, 0.0 }
 0x18d   : > { %1657 = vst.msk [vmem:[%s2857_s25 + $0x68] sm:$0xf] %vm1630_vm4, %v2044_v14  ;;  %v2045_v18 = vpack.c.bf16 %v1167_v15, %v1167_v15  ;;  %1707 = vst.msk [vmem:[%s2857_s25 + $0x130] sm:$0xf] %vm1630_vm4, %v2094_v16  ;;  %v2095_v19 = vpack.c.bf16 %v1217_v17, %v1217_v17 }
 0x18e   : > { %v861_v20 = vpop.f32.mrb[56].mxu0  ;;  %v1061_v21 = vpop.f32.mrb[56].mxu1 }
 0x18f   : > { %1658 = vst.msk [vmem:[%s2857_s25 + $0x6c] sm:$0xf] %vm1630_vm4, %v2045_v18  ;;  %1708 = vst.msk [vmem:[%s2857_s25 + $0x134] sm:$0xf] %vm1630_vm4, %v2095_v19  ;;  %v862_v22 = vadd.f32 %v2846_v55, %v861_v20  ;;  %v2226_v23 = vpop.f32.mrb[57].mxu0  ;;  %v1062_v24 = vadd.f32 %v2846_v55, %v1061_v21  ;;  %v2326_v25 = vpop.f32.mrb[57].mxu1 }
 0x190   : > { %v864_v26 = vpop.f32.mrb[58].mxu0  ;;  %v1064_v27 = vpop.f32.mrb[58].mxu1 }
 0x191   : > { %v1168_v28 = vmax.f32 %v862_v22, 0.0  ;;  %v865_v29 = vadd.f32 %v2846_v55, %v864_v26  ;;  %v2227_v30 = vpop.f32.mrb[59].mxu0  ;;  %v1218_v31 = vmax.f32 %v1062_v24, 0.0  ;;  %v1065_v32 = vadd.f32 %v2846_v55, %v1064_v27  ;;  %v2327_v33 = vpop.f32.mrb[59].mxu1 }
 0x193   : > { %v2046_v34 = vpack.c.bf16 %v1168_v28, %v1168_v28  ;;  %v1169_v35 = vmax.f32 %v865_v29, 0.0  ;;  %v2096_v36 = vpack.c.bf16 %v1218_v31, %v1218_v31  ;;  %v1219_v37 = vmax.f32 %v1065_v32, 0.0 }
 0x195   : > { %1659 = vst.msk [vmem:[%s2857_s25 + $0x70] sm:$0xf] %vm1630_vm4, %v2046_v34  ;;  %v2047_v38 = vpack.c.bf16 %v1169_v35, %v1169_v35  ;;  %1709 = vst.msk [vmem:[%s2857_s25 + $0x138] sm:$0xf] %vm1630_vm4, %v2096_v36  ;;  %v2097_v39 = vpack.c.bf16 %v1219_v37, %v1219_v37 }
 0x196   : > { %v869_v40 = vpop.f32.mrb[60].mxu0  ;;  %v1069_v41 = vpop.f32.mrb[60].mxu1 }
 0x197   : > { %1660 = vst.msk [vmem:[%s2857_s25 + $0x74] sm:$0xf] %vm1630_vm4, %v2047_v38  ;;  %1710 = vst.msk [vmem:[%s2857_s25 + $0x13c] sm:$0xf] %vm1630_vm4, %v2097_v39  ;;  %v870_v42 = vadd.f32 %v2846_v55, %v869_v40  ;;  %v2230_v43 = vpop.f32.mrb[61].mxu0  ;;  %v1070_v44 = vadd.f32 %v2846_v55, %v1069_v41  ;;  %v2330_v45 = vpop.f32.mrb[61].mxu1 }
 0x198   : > { %v872_v46 = vpop.f32.mrb[62].mxu0  ;;  %v1072_v47 = vpop.f32.mrb[62].mxu1 }
 0x199   : > { %v1170_v48 = vmax.f32 %v870_v42, 0.0  ;;  %v873_v49 = vadd.f32 %v2846_v55, %v872_v46  ;;  %v2231_v50 = vpop.f32.mrb[63].mxu0  ;;  %v1220_v51 = vmax.f32 %v1070_v44, 0.0  ;;  %v1073_v52 = vadd.f32 %v2846_v55, %v1072_v47  ;;  %v2331_v53 = vpop.f32.mrb[63].mxu1 }
 0x19b   : > { %v2048_v54 = vpack.c.bf16 %v1170_v48, %v1170_v48  ;;  %v1171_v56 = vmax.f32 %v873_v49, 0.0  ;;  %v2098_v57 = vpack.c.bf16 %v1220_v51, %v1220_v51  ;;  %v1221_v58 = vmax.f32 %v1073_v52, 0.0 }
 0x19d   : > { %1661 = vst.msk [vmem:[%s2857_s25 + $0x78] sm:$0xf] %vm1630_vm4, %v2048_v54  ;;  %v2049_v59 = vpack.c.bf16 %v1171_v56, %v1171_v56  ;;  %1711 = vst.msk [vmem:[%s2857_s25 + $0x140] sm:$0xf] %vm1630_vm4, %v2098_v57  ;;  %v2099_v60 = vpack.c.bf16 %v1221_v58, %v1221_v58 }
 0x19e   : > { %v877_v61 = vpop.f32.mrb[64].mxu0  ;;  %v1077_v62 = vpop.f32.mrb[64].mxu1 }
 0x19f   : > { %1662 = vst.msk [vmem:[%s2857_s25 + $0x7c] sm:$0xf] %vm1630_vm4, %v2049_v59  ;;  %1712 = vst.msk [vmem:[%s2857_s25 + $0x144] sm:$0xf] %vm1630_vm4, %v2099_v60  ;;  %v878_v63 = vadd.f32 %v2846_v55, %v877_v61  ;;  %v2234_v1 = vpop.f32.mrb[65].mxu0  ;;  %v1078_v2 = vadd.f32 %v2846_v55, %v1077_v62  ;;  %v2334_v0 = vpop.f32.mrb[65].mxu1 }
 0x1a0   : > { %v880_v3 = vpop.f32.mrb[66].mxu0  ;;  %v1080_v4 = vpop.f32.mrb[66].mxu1 }
 0x1a1   : > { %v1172_v5 = vmax.f32 %v878_v63, 0.0  ;;  %v881_v6 = vadd.f32 %v2846_v55, %v880_v3  ;;  %v2235_v7 = vpop.f32.mrb[67].mxu0  ;;  %v1222_v8 = vmax.f32 %v1078_v2, 0.0  ;;  %v1081_v9 = vadd.f32 %v2846_v55, %v1080_v4  ;;  %v2335_v10 = vpop.f32.mrb[67].mxu1 }
 0x1a3   : > { %v2050_v11 = vpack.c.bf16 %v1172_v5, %v1172_v5  ;;  %v1173_v12 = vmax.f32 %v881_v6, 0.0  ;;  %v2100_v13 = vpack.c.bf16 %v1222_v8, %v1222_v8  ;;  %v1223_v14 = vmax.f32 %v1081_v9, 0.0 }
 0x1a5   : > { %1663 = vst.msk [vmem:[%s2857_s25 + $0x80] sm:$0xf] %vm1630_vm4, %v2050_v11  ;;  %v2051_v15 = vpack.c.bf16 %v1173_v12, %v1173_v12  ;;  %1713 = vst.msk [vmem:[%s2857_s25 + $0x148] sm:$0xf] %vm1630_vm4, %v2100_v13  ;;  %v2101_v16 = vpack.c.bf16 %v1223_v14, %v1223_v14 }
 0x1a6   : > { %v885_v17 = vpop.f32.mrb[68].mxu0  ;;  %v1085_v18 = vpop.f32.mrb[68].mxu1 }
 0x1a7   : > { %1664 = vst.msk [vmem:[%s2857_s25 + $0x84] sm:$0xf] %vm1630_vm4, %v2051_v15  ;;  %1714 = vst.msk [vmem:[%s2857_s25 + $0x14c] sm:$0xf] %vm1630_vm4, %v2101_v16  ;;  %v886_v19 = vadd.f32 %v2846_v55, %v885_v17  ;;  %v2238_v20 = vpop.f32.mrb[69].mxu0  ;;  %v1086_v21 = vadd.f32 %v2846_v55, %v1085_v18  ;;  %v2338_v22 = vpop.f32.mrb[69].mxu1 }
 0x1a8   : > { %v888_v23 = vpop.f32.mrb[70].mxu0  ;;  %v1088_v24 = vpop.f32.mrb[70].mxu1 }
 0x1a9   : > { %v1174_v25 = vmax.f32 %v886_v19, 0.0  ;;  %v889_v26 = vadd.f32 %v2846_v55, %v888_v23  ;;  %v2239_v27 = vpop.f32.mrb[71].mxu0  ;;  %v1224_v28 = vmax.f32 %v1086_v21, 0.0  ;;  %v1089_v29 = vadd.f32 %v2846_v55, %v1088_v24  ;;  %v2339_v30 = vpop.f32.mrb[71].mxu1 }
 0x1ab   : > { %v2052_v31 = vpack.c.bf16 %v1174_v25, %v1174_v25  ;;  %v1175_v32 = vmax.f32 %v889_v26, 0.0  ;;  %v2102_v33 = vpack.c.bf16 %v1224_v28, %v1224_v28  ;;  %v1225_v34 = vmax.f32 %v1089_v29, 0.0 }
 0x1ad   : > { %1665 = vst.msk [vmem:[%s2857_s25 + $0x88] sm:$0xf] %vm1630_vm4, %v2052_v31  ;;  %v2053_v35 = vpack.c.bf16 %v1175_v32, %v1175_v32  ;;  %1715 = vst.msk [vmem:[%s2857_s25 + $0x150] sm:$0xf] %vm1630_vm4, %v2102_v33  ;;  %v2103_v36 = vpack.c.bf16 %v1225_v34, %v1225_v34 }
 0x1ae   : > { %v893_v37 = vpop.f32.mrb[72].mxu0  ;;  %v1093_v38 = vpop.f32.mrb[72].mxu1 }
 0x1af   : > { %1666 = vst.msk [vmem:[%s2857_s25 + $0x8c] sm:$0xf] %vm1630_vm4, %v2053_v35  ;;  %1716 = vst.msk [vmem:[%s2857_s25 + $0x154] sm:$0xf] %vm1630_vm4, %v2103_v36  ;;  %v894_v39 = vadd.f32 %v2846_v55, %v893_v37  ;;  %v2242_v40 = vpop.f32.mrb[73].mxu0  ;;  %v1094_v41 = vadd.f32 %v2846_v55, %v1093_v38  ;;  %v2342_v42 = vpop.f32.mrb[73].mxu1 }
 0x1b0   : > { %v896_v43 = vpop.f32.mrb[74].mxu0  ;;  %v1096_v44 = vpop.f32.mrb[74].mxu1 }
 0x1b1   : > { %v1176_v45 = vmax.f32 %v894_v39, 0.0  ;;  %v897_v46 = vadd.f32 %v2846_v55, %v896_v43  ;;  %v2243_v47 = vpop.f32.mrb[75].mxu0  ;;  %v1226_v48 = vmax.f32 %v1094_v41, 0.0  ;;  %v1097_v49 = vadd.f32 %v2846_v55, %v1096_v44  ;;  %v2343_v50 = vpop.f32.mrb[75].mxu1  ;;  %v3109_v43 = vld [vmem:[#allocation4] ss:$0 sm:$0xff] }
 0x1b3   : > { %v2054_v51 = vpack.c.bf16 %v1176_v45, %v1176_v45  ;;  %v1177_v52 = vmax.f32 %v897_v46, 0.0  ;;  %v2104_v53 = vpack.c.bf16 %v1226_v48, %v1226_v48  ;;  %v1227_v54 = vmax.f32 %v1097_v49, 0.0 }
 0x1b5   : > { %1667 = vst.msk [vmem:[%s2857_s25 + $0x90] sm:$0xf] %vm1630_vm4, %v2054_v51  ;;  %v2055_v56 = vpack.c.bf16 %v1177_v52, %v1177_v52  ;;  %1717 = vst.msk [vmem:[%s2857_s25 + $0x158] sm:$0xf] %vm1630_vm4, %v2104_v53  ;;  %v2105_v57 = vpack.c.bf16 %v1227_v54, %v1227_v54 }
 0x1b6   : > { %v901_v58 = vpop.f32.mrb[76].mxu0  ;;  %v1101_v59 = vpop.f32.mrb[76].mxu1 }
 0x1b7   : > { %1668 = vst.msk [vmem:[%s2857_s25 + $0x94] sm:$0xf] %vm1630_vm4, %v2055_v56  ;;  %1718 = vst.msk [vmem:[%s2857_s25 + $0x15c] sm:$0xf] %vm1630_vm4, %v2105_v57  ;;  %v902_v60 = vadd.f32 %v2846_v55, %v901_v58  ;;  %v2246_v61 = vpop.f32.mrb[77].mxu0  ;;  %v1102_v62 = vadd.f32 %v2846_v55, %v1101_v59  ;;  %v2346_v63 = vpop.f32.mrb[77].mxu1 }
 0x1b8   : > { %v904_v1 = vpop.f32.mrb[78].mxu0  ;;  %v1104_v2 = vpop.f32.mrb[78].mxu1 }
 0x1b9   : > { %v1178_v0 = vmax.f32 %v902_v60, 0.0  ;;  %v905_v3 = vadd.f32 %v2846_v55, %v904_v1  ;;  %v2247_v4 = vpop.f32.mrb[79].mxu0  ;;  %v1228_v5 = vmax.f32 %v1102_v62, 0.0  ;;  %v1105_v6 = vadd.f32 %v2846_v55, %v1104_v2  ;;  %v2347_v7 = vpop.f32.mrb[79].mxu1 }
 0x1bb   : > { %v2056_v8 = vpack.c.bf16 %v1178_v0, %v1178_v0  ;;  %v1179_v9 = vmax.f32 %v905_v3, 0.0  ;;  %v2106_v10 = vpack.c.bf16 %v1228_v5, %v1228_v5  ;;  %v1229_v11 = vmax.f32 %v1105_v6, 0.0 }
 0x1bd   : > { %1669 = vst.msk [vmem:[%s2857_s25 + $0x98] sm:$0xf] %vm1630_vm4, %v2056_v8  ;;  %v2057_v12 = vpack.c.bf16 %v1179_v9, %v1179_v9  ;;  %1719 = vst.msk [vmem:[%s2857_s25 + $0x160] sm:$0xf] %vm1630_vm4, %v2106_v10  ;;  %v2107_v13 = vpack.c.bf16 %v1229_v11, %v1229_v11 }
 0x1be   : > { %v909_v14 = vpop.f32.mrb[80].mxu0  ;;  %v1109_v15 = vpop.f32.mrb[80].mxu1 }
 0x1bf   : > { %1670 = vst.msk [vmem:[%s2857_s25 + $0x9c] sm:$0xf] %vm1630_vm4, %v2057_v12  ;;  %1720 = vst.msk [vmem:[%s2857_s25 + $0x164] sm:$0xf] %vm1630_vm4, %v2107_v13  ;;  %v910_v16 = vadd.f32 %v2846_v55, %v909_v14  ;;  %v2250_v17 = vpop.f32.mrb[81].mxu0  ;;  %v1110_v18 = vadd.f32 %v2846_v55, %v1109_v15  ;;  %v2350_v19 = vpop.f32.mrb[81].mxu1 }
 0x1c0   : > { %v912_v20 = vpop.f32.mrb[82].mxu0  ;;  %v1112_v21 = vpop.f32.mrb[82].mxu1 }
 0x1c1   : > { %v1180_v22 = vmax.f32 %v910_v16, 0.0  ;;  %v913_v23 = vadd.f32 %v2846_v55, %v912_v20  ;;  %v2251_v24 = vpop.f32.mrb[83].mxu0  ;;  %v1230_v25 = vmax.f32 %v1110_v18, 0.0  ;;  %v1113_v26 = vadd.f32 %v2846_v55, %v1112_v21  ;;  %v2351_v27 = vpop.f32.mrb[83].mxu1 }
 0x1c3   : > { %v2058_v28 = vpack.c.bf16 %v1180_v22, %v1180_v22  ;;  %v1181_v29 = vmax.f32 %v913_v23, 0.0  ;;  %v2108_v30 = vpack.c.bf16 %v1230_v25, %v1230_v25  ;;  %v1231_v31 = vmax.f32 %v1113_v26, 0.0 }
 0x1c5   : > { %1671 = vst.msk [vmem:[%s2857_s25 + $0xa0] sm:$0xf] %vm1630_vm4, %v2058_v28  ;;  %v2059_v32 = vpack.c.bf16 %v1181_v29, %v1181_v29  ;;  %1721 = vst.msk [vmem:[%s2857_s25 + $0x168] sm:$0xf] %vm1630_vm4, %v2108_v30  ;;  %v2109_v33 = vpack.c.bf16 %v1231_v31, %v1231_v31 }
 0x1c6   : > { %v917_v34 = vpop.f32.mrb[84].mxu0  ;;  %v1117_v35 = vpop.f32.mrb[84].mxu1 }
 0x1c7   : > { %1672 = vst.msk [vmem:[%s2857_s25 + $0xa4] sm:$0xf] %vm1630_vm4, %v2059_v32  ;;  %1722 = vst.msk [vmem:[%s2857_s25 + $0x16c] sm:$0xf] %vm1630_vm4, %v2109_v33  ;;  %v918_v36 = vadd.f32 %v2846_v55, %v917_v34  ;;  %v2254_v37 = vpop.f32.mrb[85].mxu0  ;;  %v1118_v38 = vadd.f32 %v2846_v55, %v1117_v35  ;;  %v2354_v39 = vpop.f32.mrb[85].mxu1 }
 0x1c8   : > { %v920_v40 = vpop.f32.mrb[86].mxu0  ;;  %v1120_v41 = vpop.f32.mrb[86].mxu1 }
 0x1c9   : > { %v1182_v42 = vmax.f32 %v918_v36, 0.0  ;;  %v921_v44 = vadd.f32 %v3109_v43, %v920_v40  ;;  %v2255_v45 = vpop.f32.mrb[87].mxu0  ;;  %v1232_v46 = vmax.f32 %v1118_v38, 0.0  ;;  %v1121_v47 = vadd.f32 %v3109_v43, %v1120_v41  ;;  %v2355_v48 = vpop.f32.mrb[87].mxu1 }
 0x1cb   : > { %v2060_v49 = vpack.c.bf16 %v1182_v42, %v1182_v42  ;;  %v1183_v50 = vmax.f32 %v921_v44, 0.0  ;;  %v2110_v51 = vpack.c.bf16 %v1232_v46, %v1232_v46  ;;  %v1233_v55 = vmax.f32 %v1121_v47, 0.0 }
 0x1cd   : > { %1673 = vst.msk [vmem:[%s2857_s25 + $0xa8] sm:$0xf] %vm1630_vm4, %v2060_v49  ;;  %v2061_v52 = vpack.c.bf16 %v1183_v50, %v1183_v50  ;;  %1723 = vst.msk [vmem:[%s2857_s25 + $0x170] sm:$0xf] %vm1630_vm4, %v2110_v51  ;;  %v2111_v53 = vpack.c.bf16 %v1233_v55, %v1233_v55 }
 0x1ce   : > { %v925_v54 = vpop.f32.mrb[88].mxu0  ;;  %v1125_v56 = vpop.f32.mrb[88].mxu1 }
 0x1cf   : > { %1674 = vst.msk [vmem:[%s2857_s25 + $0xac] sm:$0xf] %vm1630_vm4, %v2061_v52  ;;  %1724 = vst.msk [vmem:[%s2857_s25 + $0x174] sm:$0xf] %vm1630_vm4, %v2111_v53  ;;  %v926_v57 = vadd.f32 %v3109_v43, %v925_v54  ;;  %v2258_v58 = vpop.f32.mrb[89].mxu0  ;;  %v1126_v59 = vadd.f32 %v3109_v43, %v1125_v56  ;;  %v2358_v60 = vpop.f32.mrb[89].mxu1 }
 0x1d0   : > { %v928_v61 = vpop.f32.mrb[90].mxu0  ;;  %v1128_v62 = vpop.f32.mrb[90].mxu1 }
 0x1d1   : > { %v1184_v63 = vmax.f32 %v926_v57, 0.0  ;;  %v929_v1 = vadd.f32 %v3109_v43, %v928_v61  ;;  %v2259_v2 = vpop.f32.mrb[91].mxu0  ;;  %v1234_v0 = vmax.f32 %v1126_v59, 0.0  ;;  %v1129_v3 = vadd.f32 %v3109_v43, %v1128_v62  ;;  %v2359_v4 = vpop.f32.mrb[91].mxu1 }
 0x1d3   : > { %v2062_v5 = vpack.c.bf16 %v1184_v63, %v1184_v63  ;;  %v1185_v6 = vmax.f32 %v929_v1, 0.0  ;;  %v2112_v7 = vpack.c.bf16 %v1234_v0, %v1234_v0  ;;  %v1235_v8 = vmax.f32 %v1129_v3, 0.0 }
 0x1d5   : > { %1675 = vst.msk [vmem:[%s2857_s25 + $0xb0] sm:$0xf] %vm1630_vm4, %v2062_v5  ;;  %v2063_v9 = vpack.c.bf16 %v1185_v6, %v1185_v6  ;;  %1725 = vst.msk [vmem:[%s2857_s25 + $0x178] sm:$0xf] %vm1630_vm4, %v2112_v7  ;;  %v2113_v10 = vpack.c.bf16 %v1235_v8, %v1235_v8 }
 0x1d6   : > { %v933_v11 = vpop.f32.mrb[92].mxu0  ;;  %v1133_v12 = vpop.f32.mrb[92].mxu1 }
 0x1d7   : > { %1676 = vst.msk [vmem:[%s2857_s25 + $0xb4] sm:$0xf] %vm1630_vm4, %v2063_v9  ;;  %1726 = vst.msk [vmem:[%s2857_s25 + $0x17c] sm:$0xf] %vm1630_vm4, %v2113_v10  ;;  %v934_v13 = vadd.f32 %v3109_v43, %v933_v11  ;;  %v2262_v14 = vpop.f32.mrb[93].mxu0  ;;  %v1134_v15 = vadd.f32 %v3109_v43, %v1133_v12  ;;  %v2362_v16 = vpop.f32.mrb[93].mxu1 }
 0x1d8   : > { %v936_v17 = vpop.f32.mrb[94].mxu0  ;;  %v1136_v18 = vpop.f32.mrb[94].mxu1 }
 0x1d9   : > { %v1186_v19 = vmax.f32 %v934_v13, 0.0  ;;  %v937_v20 = vadd.f32 %v3109_v43, %v936_v17  ;;  %v2263_v21 = vpop.f32.mrb[95].mxu0  ;;  %v1236_v22 = vmax.f32 %v1134_v15, 0.0  ;;  %v1137_v23 = vadd.f32 %v3109_v43, %v1136_v18  ;;  %v2363_v24 = vpop.f32.mrb[95].mxu1 }
 0x1db   : > { %v2064_v25 = vpack.c.bf16 %v1186_v19, %v1186_v19  ;;  %v1187_v26 = vmax.f32 %v937_v20, 0.0  ;;  %v2114_v27 = vpack.c.bf16 %v1236_v22, %v1236_v22  ;;  %v1237_v28 = vmax.f32 %v1137_v23, 0.0 }
 0x1dd   : > { %1677 = vst.msk [vmem:[%s2857_s25 + $0xb8] sm:$0xf] %vm1630_vm4, %v2064_v25  ;;  %v2065_v29 = vpack.c.bf16 %v1187_v26, %v1187_v26  ;;  %1727 = vst.msk [vmem:[%s2857_s25 + $0x180] sm:$0xf] %vm1630_vm4, %v2114_v27  ;;  %v2115_v30 = vpack.c.bf16 %v1237_v28, %v1237_v28 }
 0x1de   : > { %v941_v31 = vpop.f32.mrb[96].mxu0 }
 0x1df   : > { %1678 = vst.msk [vmem:[%s2857_s25 + $0xbc] sm:$0xf] %vm1630_vm4, %v2065_v29  ;;  %1728 = vst.msk [vmem:[%s2857_s25 + $0x184] sm:$0xf] %vm1630_vm4, %v2115_v30  ;;  %v942_v32 = vadd.f32 %v3109_v43, %v941_v31  ;;  %v2266_v33 = vpop.f32.mrb[97].mxu0 }
 0x1e0   : > { %v944_v34 = vpop.f32.mrb[98].mxu0 }
 0x1e1   : > { %v1188_v35 = vmax.f32 %v942_v32, 0.0  ;;  %v945_v36 = vadd.f32 %v3109_v43, %v944_v34  ;;  %v2267_v37 = vpop.f32.mrb[99].mxu0 }
 0x1e3   : > { %v2066_v38 = vpack.c.bf16 %v1188_v35, %v1188_v35  ;;  %v1189_v39 = vmax.f32 %v945_v36, 0.0 }
 0x1e5   : > { %1679 = vst.msk [vmem:[%s2857_s25 + $0xc0] sm:$0xf] %vm1630_vm4, %v2066_v38  ;;  %v2067_v40 = vpack.c.bf16 %v1189_v39, %v1189_v39 }
 0x1e7   : > { %1680 = vst.msk [vmem:[%s2857_s25 + $0xc4] sm:$0xf] %vm1630_vm4, %v2067_v40 }
 0x1e8 PF: > { %s15_s12 = sadd.s32 1, %s2521_s12  }
 0x1e9   : > { %p12_p2 = scmp.ge.s32.totalorder %s15_s12, 4  }
 0x1eb   :  { %14 = sbr.rel (!%p12_p2) target bundleno = 2 (0x2), region = 71 }
 0x1f2   :  { %1751 = vsyncpa [#allocation3], 1 }
 0x1f3   :  { %1753 = vsyncpa [#allocation3 + $0x1], 1 }
 0x1f4   :  { %1754 = vsyncpa [#allocation5], 1 }

// kernel: model_forward.8
= control target key start
LH: loop header
LB: loop body
LE: loop exit
PB: predicated region body
PF: predicated region fallthrough
CT: control target
= control target key end

     0   :  { %s1393_s0 = inlined_call_operand.vmem [shape: bf16[784,256], index: 0, kind: input, shape index: {}]   ;;  %s1394_s1 = inlined_call_operand.vmem [shape: bf16[784,128], index: 1, kind: output, shape index: {}]  }
   0x1   :  { %v8_v0 = vld [vmem:[%s1393_s0] sm:$0xff]  ;;  %v9_v1 = vld [vmem:[%s1393_s0 + $0x8] sm:$0xff]  ;;  %v10_v2 = vld [vmem:[%s1393_s0 + $0x10] sm:$0xff] }
   0x2   :  { %v204_v3 = vrot.slane %v8_v0, 4  ;;  %v205_v4 = vrot.slane %v9_v1, 4  ;;  %v11_v5 = vld [vmem:[%s1393_s0 + $0x18] sm:$0xff]  ;;  %v206_v6 = vrot.slane %v10_v2, 4  ;;  %v12_v7 = vld [vmem:[%s1393_s0 + $0x20] sm:$0xff]  ;;  %v13_v8 = vld [vmem:[%s1393_s0 + $0x28] sm:$0xff] }
   0x3   :  { %v207_v9 = vrot.slane %v11_v5, 4  ;;  %v208_v10 = vrot.slane %v12_v7, 4  ;;  %v209_v11 = vrot.slane %v13_v8, 4  ;;  %v14_v12 = vld [vmem:[%s1393_s0 + $0x30] sm:$0xff]  ;;  %v15_v13 = vld [vmem:[%s1393_s0 + $0x38] sm:$0xff]  ;;  %v16_v14 = vld [vmem:[%s1393_s0 + $0x40] sm:$0xff] }
   0x4   :  { %v400_v15 = vmax.bf16 %v204_v3, %v8_v0  ;;  %v401_v16 = vmax.bf16 %v205_v4, %v9_v1  ;;  %v402_v17 = vmax.bf16 %v206_v6, %v10_v2  ;;  %v210_v18 = vrot.slane %v14_v12, 4  ;;  %v17_v19 = vld [vmem:[%s1393_s0 + $0x48] sm:$0xff]  ;;  %v18_v20 = vld [vmem:[%s1393_s0 + $0x50] sm:$0xff]  ;;  %v19_v25 = vld [vmem:[%s1393_s0 + $0x58] sm:$0xff] }
   0x5   :  { %v403_v21 = vmax.bf16 %v207_v9, %v11_v5  ;;  %v404_v22 = vmax.bf16 %v208_v10, %v12_v7  ;;  %v405_v23 = vmax.bf16 %v209_v11, %v13_v8  ;;  %v211_v24 = vrot.slane %v15_v13, 4  ;;  %v20_v26 = vld [vmem:[%s1393_s0 + $0x60] sm:$0xff]  ;;  %v21_v31 = vld [vmem:[%s1393_s0 + $0x68] sm:$0xff]  ;;  %v22_v32 = vld [vmem:[%s1393_s0 + $0x70] sm:$0xff] }
   0x6   :  { %v845_v27 = vcombine.low %v400_v15, %v401_v16  ;;  %v406_v28 = vmax.bf16 %v210_v18, %v14_v12  ;;  %v212_v29 = vrot.slane %v16_v14, 4  ;;  %v213_v30 = vrot.slane %v17_v19, 4  ;;  %v23_v37 = vld [vmem:[%s1393_s0 + $0x78] sm:$0xff]  ;;  %v24_v42 = vld [vmem:[%s1393_s0 + $0x80] sm:$0xff]  ;;  %v25_v43 = vld [vmem:[%s1393_s0 + $0x88] sm:$0xff] }
   0x7   :  { %v846_v33 = vcombine.low %v402_v17, %v403_v21  ;;  %v848_v34 = vcombine.low %v404_v22, %v405_v23  ;;  %v407_v35 = vmax.bf16 %v211_v24, %v15_v13  ;;  %v214_v36 = vrot.slane %v18_v20, 4  ;;  %v26_v48 = vld [vmem:[%s1393_s0 + $0x90] sm:$0xff]  ;;  %v27_v49 = vld [vmem:[%s1393_s0 + $0x98] sm:$0xff]  ;;  %v28_v54 = vld [vmem:[%s1393_s0 + $0xa0] sm:$0xff] }
   0x8   :  { %604 = vst [vmem:[%s1394_s1] sm:$0xff] %v845_v27   ;;  %v408_v38 = vmax.bf16 %v212_v29, %v16_v14  ;;  %v409_v39 = vmax.bf16 %v213_v30, %v17_v19  ;;  %v215_v40 = vrot.slane %v19_v25, 4  ;;  %v216_v41 = vrot.slane %v20_v26, 4  ;;  %v29_v59 = vld [vmem:[%s1393_s0 + $0xa8] sm:$0xff]  ;;  %v30_v0 = vld [vmem:[%s1393_s0 + $0xb0] sm:$0xff]  ;;  %v31_v1 = vld [vmem:[%s1393_s0 + $0xb8] sm:$0xff] }
   0x9   :  { %847 = vst [vmem:[%s1394_s1 + $0x8] sm:$0xff] %v846_v33   ;;  %849 = vst [vmem:[%s1394_s1 + $0x10] sm:$0xff] %v848_v34   ;;  %v850_v44 = vcombine.low %v406_v28, %v407_v35  ;;  %v410_v45 = vmax.bf16 %v214_v36, %v18_v20  ;;  %v217_v46 = vrot.slane %v21_v31, 4  ;;  %v218_v47 = vrot.slane %v22_v32, 4  ;;  %v32_v6 = vld [vmem:[%s1393_s0 + $0xc0] sm:$0xff]  ;;  %v33_v7 = vld [vmem:[%s1393_s0 + $0xc8] sm:$0xff] }
   0xa   :  { %v852_v50 = vcombine.low %v408_v38, %v409_v39  ;;  %v411_v51 = vmax.bf16 %v215_v40, %v19_v25  ;;  %v412_v52 = vmax.bf16 %v216_v41, %v20_v26  ;;  %v219_v53 = vrot.slane %v23_v37, 4  ;;  %v34_v12 = vld [vmem:[%s1393_s0 + $0xd0] sm:$0xff]  ;;  %v35_v13 = vld [vmem:[%s1393_s0 + $0xd8] sm:$0xff]  ;;  %v36_v18 = vld [vmem:[%s1393_s0 + $0xe0] sm:$0xff] }
   0xb   :  { %851 = vst [vmem:[%s1394_s1 + $0x18] sm:$0xff] %v850_v44   ;;  %v413_v55 = vmax.bf16 %v217_v46, %v21_v31  ;;  %v414_v56 = vmax.bf16 %v218_v47, %v22_v32  ;;  %v220_v57 = vrot.slane %v24_v42, 4  ;;  %v221_v58 = vrot.slane %v25_v43, 4  ;;  %v37_v23 = vld [vmem:[%s1393_s0 + $0xe8] sm:$0xff]  ;;  %v38_v28 = vld [vmem:[%s1393_s0 + $0xf0] sm:$0xff]  ;;  %v39_v29 = vld [vmem:[%s1393_s0 + $0xf8] sm:$0xff] }
   0xc   :  { %853 = vst [vmem:[%s1394_s1 + $0x20] sm:$0xff] %v852_v50   ;;  %v854_v60 = vcombine.low %v410_v45, %v411_v51  ;;  %v415_v61 = vmax.bf16 %v219_v53, %v23_v37  ;;  %v222_v62 = vrot.slane %v26_v48, 4  ;;  %v223_v63 = vrot.slane %v27_v49, 4  ;;  %v40_v34 = vld [vmem:[%s1393_s0 + $0x100] sm:$0xff]  ;;  %v41_v35 = vld [vmem:[%s1393_s0 + $0x108] sm:$0xff]  ;;  %v42_v40 = vld [vmem:[%s1393_s0 + $0x110] sm:$0xff] }
   0xd   :  { %v856_v2 = vcombine.low %v412_v52, %v413_v55  ;;  %v416_v3 = vmax.bf16 %v220_v57, %v24_v42  ;;  %v417_v4 = vmax.bf16 %v221_v58, %v25_v43  ;;  %v224_v5 = vrot.slane %v28_v54, 4  ;;  %v43_v41 = vld [vmem:[%s1393_s0 + $0x118] sm:$0xff]  ;;  %v44_v46 = vld [vmem:[%s1393_s0 + $0x120] sm:$0xff]  ;;  %v45_v51 = vld [vmem:[%s1393_s0 + $0x128] sm:$0xff] }
   0xe   :  { %855 = vst [vmem:[%s1394_s1 + $0x28] sm:$0xff] %v854_v60   ;;  %v858_v8 = vcombine.low %v414_v56, %v415_v61  ;;  %v418_v9 = vmax.bf16 %v222_v62, %v26_v48  ;;  %v419_v10 = vmax.bf16 %v223_v63, %v27_v49  ;;  %v225_v11 = vrot.slane %v29_v59, 4  ;;  %v46_v56 = vld [vmem:[%s1393_s0 + $0x130] sm:$0xff]  ;;  %v47_v57 = vld [vmem:[%s1393_s0 + $0x138] sm:$0xff]  ;;  %v48_v62 = vld [vmem:[%s1393_s0 + $0x140] sm:$0xff] }
   0xf   :  { %857 = vst [vmem:[%s1394_s1 + $0x30] sm:$0xff] %v856_v2   ;;  %v860_v14 = vcombine.low %v416_v3, %v417_v4  ;;  %v420_v15 = vmax.bf16 %v224_v5, %v28_v54  ;;  %v226_v16 = vrot.slane %v30_v0, 4  ;;  %v227_v17 = vrot.slane %v31_v1, 4  ;;  %v49_v63 = vld [vmem:[%s1393_s0 + $0x148] sm:$0xff]  ;;  %v50_v4 = vld [vmem:[%s1393_s0 + $0x150] sm:$0xff]  ;;  %v51_v5 = vld [vmem:[%s1393_s0 + $0x158] sm:$0xff] }
  0x10   :  { %859 = vst [vmem:[%s1394_s1 + $0x38] sm:$0xff] %v858_v8   ;;  %v862_v19 = vcombine.low %v418_v9, %v419_v10  ;;  %v421_v20 = vmax.bf16 %v225_v11, %v29_v59  ;;  %v228_v21 = vrot.slane %v32_v6, 4  ;;  %v229_v22 = vrot.slane %v33_v7, 4  ;;  %v52_v10 = vld [vmem:[%s1393_s0 + $0x160] sm:$0xff] }
  0x11   :  { %861 = vst [vmem:[%s1394_s1 + $0x40] sm:$0xff] %v860_v14   ;;  %v422_v24 = vmax.bf16 %v226_v16, %v30_v0  ;;  %v423_v25 = vmax.bf16 %v227_v17, %v31_v1  ;;  %v230_v26 = vrot.slane %v34_v12, 4  ;;  %v231_v27 = vrot.slane %v35_v13, 4 }
  0x12   :  { %863 = vst [vmem:[%s1394_s1 + $0x48] sm:$0xff] %v862_v19   ;;  %v864_v30 = vcombine.low %v420_v15, %v421_v20  ;;  %v424_v31 = vmax.bf16 %v228_v21, %v32_v6  ;;  %v425_v32 = vmax.bf16 %v229_v22, %v33_v7  ;;  %v232_v33 = vrot.slane %v36_v18, 4  ;;  %v53_v15 = vld [vmem:[%s1393_s0 + $0x168] sm:$0xff]  ;;  %v54_v20 = vld [vmem:[%s1393_s0 + $0x170] sm:$0xff]  ;;  %v55_v21 = vld [vmem:[%s1393_s0 + $0x178] sm:$0xff] }
  0x13   :  { %v866_v36 = vcombine.low %v422_v24, %v423_v25  ;;  %v426_v37 = vmax.bf16 %v230_v26, %v34_v12  ;;  %v427_v38 = vmax.bf16 %v231_v27, %v35_v13  ;;  %v233_v39 = vrot.slane %v37_v23, 4  ;;  %v56_v26 = vld [vmem:[%s1393_s0 + $0x180] sm:$0xff]  ;;  %v57_v27 = vld [vmem:[%s1393_s0 + $0x188] sm:$0xff] }
  0x14   :  { %865 = vst [vmem:[%s1394_s1 + $0x50] sm:$0xff] %v864_v30   ;;  %v868_v42 = vcombine.low %v424_v31, %v425_v32  ;;  %v428_v43 = vmax.bf16 %v232_v33, %v36_v18  ;;  %v234_v44 = vrot.slane %v38_v28, 4  ;;  %v235_v45 = vrot.slane %v39_v29, 4  ;;  %v58_v32 = vld [vmem:[%s1393_s0 + $0x190] sm:$0xff]  ;;  %v59_v33 = vld [vmem:[%s1393_s0 + $0x198] sm:$0xff] }
  0x15   :  { %867 = vst [vmem:[%s1394_s1 + $0x58] sm:$0xff] %v866_v36   ;;  %v870_v47 = vcombine.low %v426_v37, %v427_v38  ;;  %v429_v48 = vmax.bf16 %v233_v39, %v37_v23  ;;  %v236_v49 = vrot.slane %v40_v34, 4  ;;  %v237_v50 = vrot.slane %v41_v35, 4  ;;  %v60_v38 = vld [vmem:[%s1393_s0 + $0x1a0] sm:$0xff] }
  0x16   :  { %869 = vst [vmem:[%s1394_s1 + $0x60] sm:$0xff] %v868_v42   ;;  %v430_v52 = vmax.bf16 %v234_v44, %v38_v28  ;;  %v431_v53 = vmax.bf16 %v235_v45, %v39_v29  ;;  %v238_v54 = vrot.slane %v42_v40, 4  ;;  %v239_v55 = vrot.slane %v43_v41, 4 }
  0x17   :  { %871 = vst [vmem:[%s1394_s1 + $0x68] sm:$0xff] %v870_v47   ;;  %v872_v58 = vcombine.low %v428_v43, %v429_v48  ;;  %v432_v59 = vmax.bf16 %v236_v49, %v40_v34  ;;  %v433_v60 = vmax.bf16 %v237_v50, %v41_v35  ;;  %v240_v61 = vrot.slane %v44_v46, 4  ;;  %v61_v43 = vld [vmem:[%s1393_s0 + $0x1a8] sm:$0xff]  ;;  %v62_v48 = vld [vmem:[%s1393_s0 + $0x1b0] sm:$0xff]  ;;  %v63_v49 = vld [vmem:[%s1393_s0 + $0x1b8] sm:$0xff] }
  0x18   :  { %v874_v0 = vcombine.low %v430_v52, %v431_v53  ;;  %v434_v1 = vmax.bf16 %v238_v54, %v42_v40  ;;  %v435_v2 = vmax.bf16 %v239_v55, %v43_v41  ;;  %v241_v3 = vrot.slane %v45_v51, 4  ;;  %v64_v54 = vld [vmem:[%s1393_s0 + $0x1c0] sm:$0xff]  ;;  %v65_v55 = vld [vmem:[%s1393_s0 + $0x1c8] sm:$0xff] }
  0x19   :  { %873 = vst [vmem:[%s1394_s1 + $0x70] sm:$0xff] %v872_v58   ;;  %v876_v6 = vcombine.low %v432_v59, %v433_v60  ;;  %v436_v7 = vmax.bf16 %v240_v61, %v44_v46  ;;  %v242_v8 = vrot.slane %v46_v56, 4  ;;  %v243_v9 = vrot.slane %v47_v57, 4  ;;  %v66_v60 = vld [vmem:[%s1393_s0 + $0x1d0] sm:$0xff]  ;;  %v67_v61 = vld [vmem:[%s1393_s0 + $0x1d8] sm:$0xff] }
  0x1a   :  { %875 = vst [vmem:[%s1394_s1 + $0x78] sm:$0xff] %v874_v0   ;;  %v878_v11 = vcombine.low %v434_v1, %v435_v2  ;;  %v437_v12 = vmax.bf16 %v241_v3, %v45_v51  ;;  %v244_v13 = vrot.slane %v48_v62, 4  ;;  %v245_v14 = vrot.slane %v49_v63, 4  ;;  %v68_v2 = vld [vmem:[%s1393_s0 + $0x1e0] sm:$0xff] }
  0x1b   :  { %877 = vst [vmem:[%s1394_s1 + $0x80] sm:$0xff] %v876_v6   ;;  %v438_v16 = vmax.bf16 %v242_v8, %v46_v56  ;;  %v439_v17 = vmax.bf16 %v243_v9, %v47_v57  ;;  %v246_v18 = vrot.slane %v50_v4, 4  ;;  %v247_v19 = vrot.slane %v51_v5, 4 }
  0x1c   :  { %879 = vst [vmem:[%s1394_s1 + $0x88] sm:$0xff] %v878_v11   ;;  %v880_v22 = vcombine.low %v436_v7, %v437_v12  ;;  %v440_v23 = vmax.bf16 %v244_v13, %v48_v62  ;;  %v441_v24 = vmax.bf16 %v245_v14, %v49_v63  ;;  %v248_v25 = vrot.slane %v52_v10, 4  ;;  %v69_v7 = vld [vmem:[%s1393_s0 + $0x1e8] sm:$0xff]  ;;  %v70_v12 = vld [vmem:[%s1393_s0 + $0x1f0] sm:$0xff]  ;;  %v71_v13 = vld [vmem:[%s1393_s0 + $0x1f8] sm:$0xff] }
  0x1d   :  { %v882_v28 = vcombine.low %v438_v16, %v439_v17  ;;  %v442_v29 = vmax.bf16 %v246_v18, %v50_v4  ;;  %v443_v30 = vmax.bf16 %v247_v19, %v51_v5  ;;  %v249_v31 = vrot.slane %v53_v15, 4  ;;  %v72_v18 = vld [vmem:[%s1393_s0 + $0x200] sm:$0xff]  ;;  %v73_v19 = vld [vmem:[%s1393_s0 + $0x208] sm:$0xff] }
  0x1e   :  { %881 = vst [vmem:[%s1394_s1 + $0x90] sm:$0xff] %v880_v22   ;;  %v884_v34 = vcombine.low %v440_v23, %v441_v24  ;;  %v444_v35 = vmax.bf16 %v248_v25, %v52_v10  ;;  %v250_v36 = vrot.slane %v54_v20, 4  ;;  %v251_v37 = vrot.slane %v55_v21, 4  ;;  %v74_v24 = vld [vmem:[%s1393_s0 + $0x210] sm:$0xff]  ;;  %v75_v25 = vld [vmem:[%s1393_s0 + $0x218] sm:$0xff] }
  0x1f   :  { %883 = vst [vmem:[%s1394_s1 + $0x98] sm:$0xff] %v882_v28   ;;  %v886_v39 = vcombine.low %v442_v29, %v443_v30  ;;  %v445_v40 = vmax.bf16 %v249_v31, %v53_v15  ;;  %v252_v41 = vrot.slane %v56_v26, 4  ;;  %v253_v42 = vrot.slane %v57_v27, 4  ;;  %v76_v30 = vld [vmem:[%s1393_s0 + $0x220] sm:$0xff] }
  0x20   :  { %885 = vst [vmem:[%s1394_s1 + $0xa0] sm:$0xff] %v884_v34   ;;  %v446_v44 = vmax.bf16 %v250_v36, %v54_v20  ;;  %v447_v45 = vmax.bf16 %v251_v37, %v55_v21  ;;  %v254_v46 = vrot.slane %v58_v32, 4  ;;  %v255_v47 = vrot.slane %v59_v33, 4 }
  0x21   :  { %887 = vst [vmem:[%s1394_s1 + $0xa8] sm:$0xff] %v886_v39   ;;  %v888_v50 = vcombine.low %v444_v35, %v445_v40  ;;  %v448_v51 = vmax.bf16 %v252_v41, %v56_v26  ;;  %v449_v52 = vmax.bf16 %v253_v42, %v57_v27  ;;  %v256_v53 = vrot.slane %v60_v38, 4  ;;  %v77_v35 = vld [vmem:[%s1393_s0 + $0x228] sm:$0xff]  ;;  %v78_v40 = vld [vmem:[%s1393_s0 + $0x230] sm:$0xff]  ;;  %v79_v41 = vld [vmem:[%s1393_s0 + $0x238] sm:$0xff] }
  0x22   :  { %v890_v56 = vcombine.low %v446_v44, %v447_v45  ;;  %v450_v57 = vmax.bf16 %v254_v46, %v58_v32  ;;  %v451_v58 = vmax.bf16 %v255_v47, %v59_v33  ;;  %v257_v59 = vrot.slane %v61_v43, 4  ;;  %v80_v46 = vld [vmem:[%s1393_s0 + $0x240] sm:$0xff]  ;;  %v81_v47 = vld [vmem:[%s1393_s0 + $0x248] sm:$0xff] }
  0x23   :  { %889 = vst [vmem:[%s1394_s1 + $0xb0] sm:$0xff] %v888_v50   ;;  %v892_v62 = vcombine.low %v448_v51, %v449_v52  ;;  %v452_v63 = vmax.bf16 %v256_v53, %v60_v38  ;;  %v258_v0 = vrot.slane %v62_v48, 4  ;;  %v259_v1 = vrot.slane %v63_v49, 4  ;;  %v82_v52 = vld [vmem:[%s1393_s0 + $0x250] sm:$0xff]  ;;  %v83_v53 = vld [vmem:[%s1393_s0 + $0x258] sm:$0xff] }
  0x24   :  { %891 = vst [vmem:[%s1394_s1 + $0xb8] sm:$0xff] %v890_v56   ;;  %v894_v3 = vcombine.low %v450_v57, %v451_v58  ;;  %v453_v4 = vmax.bf16 %v257_v59, %v61_v43  ;;  %v260_v5 = vrot.slane %v64_v54, 4  ;;  %v261_v6 = vrot.slane %v65_v55, 4  ;;  %v84_v58 = vld [vmem:[%s1393_s0 + $0x260] sm:$0xff] }
  0x25   :  { %893 = vst [vmem:[%s1394_s1 + $0xc0] sm:$0xff] %v892_v62   ;;  %v454_v8 = vmax.bf16 %v258_v0, %v62_v48  ;;  %v455_v9 = vmax.bf16 %v259_v1, %v63_v49  ;;  %v262_v10 = vrot.slane %v66_v60, 4  ;;  %v263_v11 = vrot.slane %v67_v61, 4 }
  0x26   :  { %895 = vst [vmem:[%s1394_s1 + $0xc8] sm:$0xff] %v894_v3   ;;  %v896_v14 = vcombine.low %v452_v63, %v453_v4  ;;  %v456_v15 = vmax.bf16 %v260_v5, %v64_v54  ;;  %v457_v16 = vmax.bf16 %v261_v6, %v65_v55  ;;  %v264_v17 = vrot.slane %v68_v2, 4  ;;  %v85_v63 = vld [vmem:[%s1393_s0 + $0x268] sm:$0xff]  ;;  %v86_v4 = vld [vmem:[%s1393_s0 + $0x270] sm:$0xff]  ;;  %v87_v5 = vld [vmem:[%s1393_s0 + $0x278] sm:$0xff] }
  0x27   :  { %v898_v20 = vcombine.low %v454_v8, %v455_v9  ;;  %v458_v21 = vmax.bf16 %v262_v10, %v66_v60  ;;  %v459_v22 = vmax.bf16 %v263_v11, %v67_v61  ;;  %v265_v23 = vrot.slane %v69_v7, 4  ;;  %v88_v10 = vld [vmem:[%s1393_s0 + $0x280] sm:$0xff]  ;;  %v89_v11 = vld [vmem:[%s1393_s0 + $0x288] sm:$0xff] }
  0x28   :  { %897 = vst [vmem:[%s1394_s1 + $0xd0] sm:$0xff] %v896_v14   ;;  %v900_v26 = vcombine.low %v456_v15, %v457_v16  ;;  %v460_v27 = vmax.bf16 %v264_v17, %v68_v2  ;;  %v266_v28 = vrot.slane %v70_v12, 4  ;;  %v267_v29 = vrot.slane %v71_v13, 4  ;;  %v90_v16 = vld [vmem:[%s1393_s0 + $0x290] sm:$0xff]  ;;  %v91_v17 = vld [vmem:[%s1393_s0 + $0x298] sm:$0xff] }
  0x29   :  { %899 = vst [vmem:[%s1394_s1 + $0xd8] sm:$0xff] %v898_v20   ;;  %v902_v31 = vcombine.low %v458_v21, %v459_v22  ;;  %v461_v32 = vmax.bf16 %v265_v23, %v69_v7  ;;  %v268_v33 = vrot.slane %v72_v18, 4  ;;  %v269_v34 = vrot.slane %v73_v19, 4  ;;  %v92_v22 = vld [vmem:[%s1393_s0 + $0x2a0] sm:$0xff] }
  0x2a   :  { %901 = vst [vmem:[%s1394_s1 + $0xe0] sm:$0xff] %v900_v26   ;;  %v462_v36 = vmax.bf16 %v266_v28, %v70_v12  ;;  %v463_v37 = vmax.bf16 %v267_v29, %v71_v13  ;;  %v270_v38 = vrot.slane %v74_v24, 4  ;;  %v271_v39 = vrot.slane %v75_v25, 4 }
  0x2b   :  { %903 = vst [vmem:[%s1394_s1 + $0xe8] sm:$0xff] %v902_v31   ;;  %v904_v42 = vcombine.low %v460_v27, %v461_v32  ;;  %v464_v43 = vmax.bf16 %v268_v33, %v72_v18  ;;  %v465_v44 = vmax.bf16 %v269_v34, %v73_v19  ;;  %v272_v45 = vrot.slane %v76_v30, 4  ;;  %v93_v27 = vld [vmem:[%s1393_s0 + $0x2a8] sm:$0xff]  ;;  %v94_v32 = vld [vmem:[%s1393_s0 + $0x2b0] sm:$0xff]  ;;  %v95_v33 = vld [vmem:[%s1393_s0 + $0x2b8] sm:$0xff] }
  0x2c   :  { %v906_v48 = vcombine.low %v462_v36, %v463_v37  ;;  %v466_v49 = vmax.bf16 %v270_v38, %v74_v24  ;;  %v467_v50 = vmax.bf16 %v271_v39, %v75_v25  ;;  %v273_v51 = vrot.slane %v77_v35, 4  ;;  %v96_v38 = vld [vmem:[%s1393_s0 + $0x2c0] sm:$0xff]  ;;  %v97_v39 = vld [vmem:[%s1393_s0 + $0x2c8] sm:$0xff] }
  0x2d   :  { %905 = vst [vmem:[%s1394_s1 + $0xf0] sm:$0xff] %v904_v42   ;;  %v908_v54 = vcombine.low %v464_v43, %v465_v44  ;;  %v468_v55 = vmax.bf16 %v272_v45, %v76_v30  ;;  %v274_v56 = vrot.slane %v78_v40, 4  ;;  %v275_v57 = vrot.slane %v79_v41, 4  ;;  %v98_v44 = vld [vmem:[%s1393_s0 + $0x2d0] sm:$0xff]  ;;  %v99_v45 = vld [vmem:[%s1393_s0 + $0x2d8] sm:$0xff] }
  0x2e   :  { %907 = vst [vmem:[%s1394_s1 + $0xf8] sm:$0xff] %v906_v48   ;;  %v910_v59 = vcombine.low %v466_v49, %v467_v50  ;;  %v469_v60 = vmax.bf16 %v273_v51, %v77_v35  ;;  %v276_v61 = vrot.slane %v80_v46, 4  ;;  %v277_v62 = vrot.slane %v81_v47, 4  ;;  %v100_v50 = vld [vmem:[%s1393_s0 + $0x2e0] sm:$0xff] }
  0x2f   :  { %909 = vst [vmem:[%s1394_s1 + $0x100] sm:$0xff] %v908_v54   ;;  %v470_v0 = vmax.bf16 %v274_v56, %v78_v40  ;;  %v471_v1 = vmax.bf16 %v275_v57, %v79_v41  ;;  %v278_v2 = vrot.slane %v82_v52, 4  ;;  %v279_v3 = vrot.slane %v83_v53, 4 }
  0x30   :  { %911 = vst [vmem:[%s1394_s1 + $0x108] sm:$0xff] %v910_v59   ;;  %v912_v6 = vcombine.low %v468_v55, %v469_v60  ;;  %v472_v7 = vmax.bf16 %v276_v61, %v80_v46  ;;  %v473_v8 = vmax.bf16 %v277_v62, %v81_v47  ;;  %v280_v9 = vrot.slane %v84_v58, 4  ;;  %v101_v55 = vld [vmem:[%s1393_s0 + $0x2e8] sm:$0xff]  ;;  %v102_v60 = vld [vmem:[%s1393_s0 + $0x2f0] sm:$0xff]  ;;  %v103_v61 = vld [vmem:[%s1393_s0 + $0x2f8] sm:$0xff] }
  0x31   :  { %v914_v12 = vcombine.low %v470_v0, %v471_v1  ;;  %v474_v13 = vmax.bf16 %v278_v2, %v82_v52  ;;  %v475_v14 = vmax.bf16 %v279_v3, %v83_v53  ;;  %v281_v15 = vrot.slane %v85_v63, 4  ;;  %v104_v2 = vld [vmem:[%s1393_s0 + $0x300] sm:$0xff]  ;;  %v105_v3 = vld [vmem:[%s1393_s0 + $0x308] sm:$0xff] }
  0x32   :  { %913 = vst [vmem:[%s1394_s1 + $0x110] sm:$0xff] %v912_v6   ;;  %v916_v18 = vcombine.low %v472_v7, %v473_v8  ;;  %v476_v19 = vmax.bf16 %v280_v9, %v84_v58  ;;  %v282_v20 = vrot.slane %v86_v4, 4  ;;  %v283_v21 = vrot.slane %v87_v5, 4 }
  0x33   :  { %915 = vst [vmem:[%s1394_s1 + $0x118] sm:$0xff] %v914_v12   ;;  %v918_v23 = vcombine.low %v474_v13, %v475_v14  ;;  %v477_v24 = vmax.bf16 %v281_v15, %v85_v63  ;;  %v284_v25 = vrot.slane %v88_v10, 4  ;;  %v285_v26 = vrot.slane %v89_v11, 4 }
  0x34   :  { %917 = vst [vmem:[%s1394_s1 + $0x120] sm:$0xff] %v916_v18   ;;  %v478_v28 = vmax.bf16 %v282_v20, %v86_v4  ;;  %v479_v29 = vmax.bf16 %v283_v21, %v87_v5  ;;  %v286_v30 = vrot.slane %v90_v16, 4  ;;  %v287_v31 = vrot.slane %v91_v17, 4 }
  0x35   :  { %919 = vst [vmem:[%s1394_s1 + $0x128] sm:$0xff] %v918_v23   ;;  %v920_v34 = vcombine.low %v476_v19, %v477_v24  ;;  %v480_v35 = vmax.bf16 %v284_v25, %v88_v10  ;;  %v481_v36 = vmax.bf16 %v285_v26, %v89_v11  ;;  %v288_v37 = vrot.slane %v92_v22, 4 }
  0x36   :  { %v922_v40 = vcombine.low %v478_v28, %v479_v29  ;;  %v482_v41 = vmax.bf16 %v286_v30, %v90_v16  ;;  %v483_v42 = vmax.bf16 %v287_v31, %v91_v17  ;;  %v289_v43 = vrot.slane %v93_v27, 4 }
  0x37   :  { %921 = vst [vmem:[%s1394_s1 + $0x130] sm:$0xff] %v920_v34   ;;  %v924_v46 = vcombine.low %v480_v35, %v481_v36  ;;  %v484_v47 = vmax.bf16 %v288_v37, %v92_v22  ;;  %v290_v48 = vrot.slane %v94_v32, 4  ;;  %v291_v49 = vrot.slane %v95_v33, 4 }
  0x38   :  { %923 = vst [vmem:[%s1394_s1 + $0x138] sm:$0xff] %v922_v40   ;;  %v926_v51 = vcombine.low %v482_v41, %v483_v42  ;;  %v485_v52 = vmax.bf16 %v289_v43, %v93_v27  ;;  %v292_v53 = vrot.slane %v96_v38, 4  ;;  %v293_v54 = vrot.slane %v97_v39, 4 }
  0x39   :  { %925 = vst [vmem:[%s1394_s1 + $0x140] sm:$0xff] %v924_v46   ;;  %v486_v56 = vmax.bf16 %v290_v48, %v94_v32  ;;  %v487_v57 = vmax.bf16 %v291_v49, %v95_v33  ;;  %v294_v58 = vrot.slane %v98_v44, 4  ;;  %v295_v59 = vrot.slane %v99_v45, 4 }
  0x3a   :  { %927 = vst [vmem:[%s1394_s1 + $0x148] sm:$0xff] %v926_v51   ;;  %v928_v62 = vcombine.low %v484_v47, %v485_v52  ;;  %v488_v63 = vmax.bf16 %v292_v53, %v96_v38  ;;  %v489_v0 = vmax.bf16 %v293_v54, %v97_v39  ;;  %v296_v1 = vrot.slane %v100_v50, 4 }
  0x3b   :  { %v930_v4 = vcombine.low %v486_v56, %v487_v57  ;;  %v490_v5 = vmax.bf16 %v294_v58, %v98_v44  ;;  %v491_v6 = vmax.bf16 %v295_v59, %v99_v45  ;;  %v297_v7 = vrot.slane %v101_v55, 4 }
  0x3c   :  { %929 = vst [vmem:[%s1394_s1 + $0x150] sm:$0xff] %v928_v62   ;;  %v932_v8 = vcombine.low %v488_v63, %v489_v0  ;;  %v492_v9 = vmax.bf16 %v296_v1, %v100_v50  ;;  %v298_v10 = vrot.slane %v102_v60, 4  ;;  %v299_v11 = vrot.slane %v103_v61, 4 }
  0x3d   :  { %931 = vst [vmem:[%s1394_s1 + $0x158] sm:$0xff] %v930_v4   ;;  %v934_v12 = vcombine.low %v490_v5, %v491_v6  ;;  %v493_v13 = vmax.bf16 %v297_v7, %v101_v55  ;;  %v300_v14 = vrot.slane %v104_v2, 4  ;;  %v301_v15 = vrot.slane %v105_v3, 4 }
  0x3e   :  { %933 = vst [vmem:[%s1394_s1 + $0x160] sm:$0xff] %v932_v8   ;;  %v494_v16 = vmax.bf16 %v298_v10, %v102_v60  ;;  %v495_v17 = vmax.bf16 %v299_v11, %v103_v61 }
  0x3f   :  { %935 = vst [vmem:[%s1394_s1 + $0x168] sm:$0xff] %v934_v12   ;;  %v936_v18 = vcombine.low %v492_v9, %v493_v13  ;;  %v496_v19 = vmax.bf16 %v300_v14, %v104_v2  ;;  %v497_v20 = vmax.bf16 %v301_v15, %v105_v3 }
  0x40   :  { %v938_v21 = vcombine.low %v494_v16, %v495_v17 }
  0x41   :  { %937 = vst [vmem:[%s1394_s1 + $0x170] sm:$0xff] %v936_v18   ;;  %v940_v22 = vcombine.low %v496_v19, %v497_v20 }
  0x42   :  { %939 = vst [vmem:[%s1394_s1 + $0x178] sm:$0xff] %v938_v21  }
  0x43   :  { %941 = vst [vmem:[%s1394_s1 + $0x180] sm:$0xff] %v940_v22  }

// kernel: model_forward.7
= control target key start
LH: loop header
LB: loop body
LE: loop exit
PB: predicated region body
PF: predicated region fallthrough
CT: control target
= control target key end

     0   :  { %8 = vsyncpa [#allocation3], 0  ;;  %s7051_s0 = inlined_call_operand.vmem [shape: bf16[1568,576], index: 0, kind: input, shape index: {}]   ;;  %s7052_s1 = inlined_call_operand.hbm [shape: bf16[576,128], index: 1, kind: input, shape index: {}]   ;;  %s7053_s2 = inlined_call_operand.hbm [shape: f32[1,128], index: 2, kind: input, shape index: {}]   ;;  %s7054_s3 = inlined_call_operand.vmem [shape: bf16[1568,128], index: 3, kind: output, shape index: {}]  }
   0x1   :  { %9 = vsyncpa [#allocation5], 0  ;;  %s6137_s12 = smov 0  }
   0x2 LB: > { %s4109_s13 = sadd.s32 4294967295, %s6108_s12   ;;  %p4111_p0 = scmp.ge.s32.totalorder %s6108_s12, 1  ;;  %s6108_s12 = sphi %s6137_s12, %s15_s12  }
   0x3   : > { %p114_p1 = scmp.lt.s32.totalorder %s6108_s12, 3  ;;  %s6110_s14 = smov [#allocation2]  }
   0x4   : > { %s126_s15 = sshll.u32 %s6110_s14, 4  ;;  %p6151_p3 = scmp.eq.s32.totalorder %s4109_s13, 0  ;;  %s127_s15 = int_to_ptr.vmem [resolvable:$true] %s126_s15 }
   0x5   : > { %p6145_p2 = pnand %p4111_p0, %p114_p1  ;;  %s6111_s18 = smov [#allocation4]  }
   0x6   : > { %s7061_s17 = scalar_select %p6151_p3, 1, 0 }
   0x7   : > { %s7060_s16 = scalar_select %p6145_p2, 1, 0 }
   0x8   : > { %p5632_p4 = pneg %p6145_p2  ;;  %s140_s19 = sshll.u32 %s6111_s18, 4  ;;  %s6163_s19 = int_to_ptr.vmem [resolvable:$true] %s140_s19 }
   0x9   : > { %s6038_s23 = scalar_lea.hbm %s7052_s1, 4608 }
   0xa   : > { %p6159_p5 = pnand %p6151_p3, %p5632_p4  ;;  %p6039_p6 = scmp.ne.s32.totalorder %s7052_s1, %s6038_s23 }
   0xb   : > { %p6045_p10 = scmp.lt.u32.totalorder %s6038_s23, %s7052_s1 }
   0xc   : > { %p6040_p7 = pneg %p6159_p5 }
   0xe   : > { %p6041_p8 = pnand %p6040_p7, %p6039_p6 }
  0x10   : > { %p6042_p9 = pneg %p6041_p8 }
  0x12   : > { %p6047_p11 = pnand %p6045_p10, %p6042_p9 }
  0x14   : > { %6050 = shalt.err (!%p6047_p11)
}
  0x15   : > { %s6051_s28 = scalar_lea.vmem %s127_s15, 4608  ;;  %p6059_p1 = scmp.lt.s32.totalorder %s127_s15, %s127_s15 }
  0x16   : > { %p6052_p12 = scmp.ne.s32.totalorder %s127_s15, %s6051_s28  ;;  %p6060_p4 = scmp.lt.s32.totalorder %s6051_s28, %s6051_s28 }
  0x18   : > { %p6054_p13 = pnand %p6052_p12, %p6040_p7  ;;  %p6061_p3 = por %p6060_p4, %p6059_p1 }
  0x1a   : > { %p6055_p0 = pneg %p6054_p13 }
  0x1c   : > { %p6062_p2 = pnand %p6061_p3, %p6055_p0 }
  0x1e   : > { %6065 = shalt.err (!%p6062_p2)
}
  0x1f   : > { %s6112_s29 = smov 64   ;;  %s6113_s30 = smov 4  }
  0x20   : > { %5635 = dma.hbm_to_vmem [thread:$0]  (!%p6159_p5), %s7052_s1, 4608, %s127_s15, [#allocation3], %s6112_s29, %s6112_s29, %s6113_s30  }
  0x21   : > { %s6066_s8 = scalar_lea.hbm %s7053_s2, 16 }
  0x22   : > { %p6067_p6 = scmp.ne.s32.totalorder %s7053_s2, %s6066_s8  ;;  %p6073_p8 = scmp.lt.u32.totalorder %s6066_s8, %s7053_s2 }
  0x24   : > { %p6069_p2 = pnand %p6067_p6, %p6040_p7 }
  0x26   : > { %p6070_p3 = pneg %p6069_p2 }
  0x28   : > { %p6075_p9 = pnand %p6073_p8, %p6070_p3 }
  0x2a   : > { %6078 = shalt.err (!%p6075_p9)
}
  0x2b   : > { %s6079_s15 = scalar_lea.vmem %s6163_s19, 16  ;;  %s6086_s18 = scalar_lea.vmem %s6163_s19, 32 }
  0x2c   : > { %p6080_p10 = scmp.ne.s32.totalorder %s6163_s19, %s6079_s15  ;;  %p6087_p13 = scmp.lt.s32.totalorder %s6163_s19, %s6163_s19 }
  0x2d   : > { %p6088_p0 = scmp.lt.s32.totalorder %s6086_s18, %s6079_s15 }
  0x2e   : > { %p6082_p11 = pnand %p6080_p10, %p6040_p7 }
  0x2f   : > { %p6089_p1 = por %p6088_p0, %p6087_p13 }
  0x30   : > { %p6083_p12 = pneg %p6082_p11 }
  0x32   : > { %p6090_p4 = pnand %p6089_p1, %p6083_p12 }
  0x34   : > { %6093 = shalt.err (!%p6090_p4)
}
  0x35   : > { %5638 = dma.hbm_to_vmem [thread:$0]  (!%p6159_p5), %s7053_s2, 16, %s6163_s19, [#allocation5]  }
  0x36   : > { %p7063_p6 = scmp.ne.s32.totalorder %s7060_s16, 0 }
  0x37   : > { %p7064_p7 = scmp.ne.s32.totalorder (!%p7063_p6), %s7061_s17, 0 }
  0x38   : > { %163 = sbr.rel (%p7063_p6) target bundleno = 936 (0x3a8), region = 32 }
  0x3f   : > { %6099 = dma.done.wait (%p7064_p7), [#allocation3], 4608  }
  0x40   : > { %6101 = vsyncadd (%p7064_p7), [#allocation3], 4294962688 }
  0x41   : > { %6103 = dma.done.wait (%p7064_p7), [#allocation5], 16  }
  0x42   : > { %6105 = vsyncadd (%p7064_p7), [#allocation5], 4294967280  ;;  %v6114_v0 = vmov 0   ;;  %v5658_v1 = vld [vmem:[#allocation2] sm:$0xff]   ;;  %v5660_v3 = vld [vmem:[#allocation2 + $0x8] sm:$0xff]   ;;  %s192_s16 = smul.u32 98, %s4109_s13 }
  0x43   : > { %2168 = vmatprep.subr.bf16.mxu1 %v6114_v0  ;;  %2593 = vmatprep.subr.bf16.mxu0 %v6114_v0  ;;  %v6225_v2 = vld [vmem:[#allocation2 + $0x80] sm:$0xff]   ;;  %v6229_v4 = vld [vmem:[#allocation2 + $0x88] sm:$0xff]   ;;  %v5662_v5 = vld [vmem:[#allocation2 + $0x10] sm:$0xff]   ;;  %v7058_v39 = vmov 0.0   ;;  %vm6116_vm0 = vmmov 0   ;;  %vm2020_vm1 = vcmask 523264  }
  0x44   : > { %2169 = vmatpush1.bf16.msra.mxu1 %v5658_v1  ;;  %2594 = vmatpush1.bf16.msra.mxu0 %v6225_v2  ;;  %v6234_v6 = vld [vmem:[#allocation2 + $0x90] sm:$0xff]   ;;  %v5664_v7 = vld [vmem:[#allocation2 + $0x18] sm:$0xff]   ;;  %v5666_v9 = vld [vmem:[#allocation2 + $0x20] sm:$0xff]   ;;  %p193_p5 = scmp.lt.s32.totalorder %s192_s16, 195 }
  0x45   : > { %2170 = vmatprep.subr.bf16.mxu1 %v6114_v0  ;;  %2595 = vmatprep.subr.bf16.mxu0 %v6114_v0  ;;  %v6239_v8 = vld [vmem:[#allocation2 + $0x98] sm:$0xff]   ;;  %v6246_v10 = vld [vmem:[#allocation2 + $0xa0] sm:$0xff]   ;;  %v5668_v11 = vld [vmem:[#allocation2 + $0x28] sm:$0xff]  }
  0x46   : > { %v6251_v12 = vld [vmem:[#allocation2 + $0xa8] sm:$0xff]   ;;  %v5670_v13 = vld [vmem:[#allocation2 + $0x30] sm:$0xff]   ;;  %s7067_s16 = smov (!%p193_p5, %s192_s16), 195  ;;  %v5672_v15 = vld [vmem:[#allocation2 + $0x38] sm:$0xff]  }
  0x47   : > { %v6258_v14 = vld [vmem:[#allocation2 + $0xb0] sm:$0xff]   ;;  %s5623_s13 = smul.u32 20, %s7067_s16  ;;  %v6264_v16 = vld [vmem:[#allocation2 + $0xb8] sm:$0xff]   ;;  %v5674_v17 = vld [vmem:[#allocation2 + $0x40] sm:$0xff]   ;;  %s4119_s23 = sshll.u32 %s7067_s16, 2 }
  0x48   : > { %2171 = vmatpush1.bf16.msra.mxu1 %v5660_v3  ;;  %2596 = vmatpush1.bf16.msra.mxu0 %v6229_v4  ;;  %v6274_v18 = vld [vmem:[#allocation2 + $0xc0] sm:$0xff]   ;;  %v5676_v20 = vld [vmem:[#allocation2 + $0x48] sm:$0xff]   ;;  %v5678_v23 = vld [vmem:[#allocation2 + $0x50] sm:$0xff]   ;;  %s6728_s26 = scalar_lea.vmem %s7054_s3, %s4119_s23 }
  0x49   : > { %2172 = vmatprep.subr.bf16.mxu1 %v6114_v0  ;;  %2597 = vmatprep.subr.bf16.mxu0 %v6114_v0  ;;  %s6270_s20 = scalar_lea.vmem %s7051_s0, %s5623_s13  ;;  %v6281_v22 = vld [vmem:[#allocation2 + $0xc8] sm:$0xff]   ;;  %v6286_v24 = vld [vmem:[#allocation2 + $0xd0] sm:$0xff]   ;;  %v5680_v25 = vld [vmem:[#allocation2 + $0x58] sm:$0xff]  }
  0x4a   : > { %v5692_v19 = vld [vmem:[%s6270_s20 + $0x4] ss:$20 sps:$4 sm:$0xff]   ;;  %v5695_v21 = vld [vmem:[%s6270_s20 + $0xc] ss:$20 sps:$4 sm:$0xff]   ;;  %v5686_v31 = vld [vmem:[#allocation2 + $0x70] sm:$0xff]  }
  0x4b   : > { %2200 = vmatprep.mubr.bf16.mxu1 %v5692_v19  ;;  %2625 = vmatprep.mubr.bf16.mxu0 %v5695_v21  ;;  %v6291_v26 = vld [vmem:[#allocation2 + $0xd8] sm:$0xff]   ;;  %v5682_v27 = vld [vmem:[#allocation2 + $0x60] sm:$0xff]   ;;  %v5684_v29 = vld [vmem:[#allocation2 + $0x68] sm:$0xff]  }
  0x4c   : > { %2173 = vmatpush1.bf16.msra.mxu1 %v5662_v5  ;;  %2598 = vmatpush1.bf16.msra.mxu0 %v6234_v6  ;;  %v6296_v28 = vld [vmem:[#allocation2 + $0xe0] sm:$0xff]   ;;  %v6301_v30 = vld [vmem:[#allocation2 + $0xe8] sm:$0xff]   ;;  %v6306_v32 = vld [vmem:[#allocation2 + $0xf0] sm:$0xff]  }
  0x4d   : > { %2174 = vmatprep.subr.bf16.mxu1 %v6114_v0  ;;  %2599 = vmatprep.subr.bf16.mxu0 %v6114_v0  ;;  %v5688_v33 = vld [vmem:[#allocation2 + $0x78] sm:$0xff]   ;;  %v5690_v35 = vld [vmem:[%s6270_s20] ss:$20 sps:$4 sm:$0xff]   ;;  %v5733_v41 = vld [vmem:[#allocation2 + $0x108] sm:$0xff]  }
  0x4e   : > { %v6311_v34 = vld [vmem:[#allocation2 + $0xf8] sm:$0xff]   ;;  %v5697_v37 = vld [vmem:[%s6270_s20 + $0x2c] ss:$20 sps:$4 sm:$0xff]   ;;  %v5699_v40 = vld [vmem:[%s6270_s20 + $0x34] ss:$20 sps:$4 sm:$0xff]  }
  0x4f   : > { %v5693_v36 = vld [vmem:[%s6270_s20 + $0x8] ss:$20 sps:$4 sm:$0xff]   ;;  %v5696_v38 = vld [vmem:[#allocation2 + $0x100] sm:$0xff]   ;;  %v5770_v46 = vld [vmem:[#allocation2 + $0x110] sm:$0xff]  }
  0x50   : > { %2175 = vmatpush1.bf16.msra.mxu1 %v5664_v7  ;;  %2600 = vmatpush1.bf16.msra.mxu0 %v6239_v8  ;;  %v5701_v42 = vld [vmem:[%s6270_s20 + $0x28] ss:$20 sps:$4 sm:$0xff]   ;;  %v5702_v43 = vld [vmem:[%s6270_s20 + $0x30] ss:$20 sps:$4 sm:$0xff]   ;;  %v5708_v48 = vld [vmem:[%s6270_s20 + $0x58] ss:$20 sps:$4 sm:$0xff]  }
  0x51   : > { %2176 = vmatprep.subr.bf16.mxu1 %v6114_v0  ;;  %2601 = vmatprep.subr.bf16.mxu0 %v6114_v0  ;;  %v5703_v44 = vld [vmem:[%s6270_s20 + $0x54] ss:$20 sps:$4 sm:$0xff]   ;;  %v5705_v45 = vld [vmem:[%s6270_s20 + $0x5c] ss:$20 sps:$4 sm:$0xff]   ;;  %v5711_v50 = vld [vmem:[%s6270_s20 + $0x84] ss:$20 sps:$4 sm:$0xff]  }
  0x52   : > { %v5707_v47 = vld [vmem:[%s6270_s20 + $0x50] ss:$20 sps:$4 sm:$0xff]   ;;  %v5713_v51 = vld [vmem:[%s6270_s20 + $0x78] ss:$20 sps:$4 sm:$0xff]   ;;  %v5714_v52 = vld [vmem:[%s6270_s20 + $0x80] ss:$20 sps:$4 sm:$0xff]  }
  0x53   : > { %v5709_v49 = vld [vmem:[%s6270_s20 + $0x7c] ss:$20 sps:$4 sm:$0xff]   ;;  %v5715_v53 = vld [vmem:[%s6270_s20 + $0xa4] ss:$20 sps:$4 sm:$0xff]   ;;  %v5717_v54 = vld [vmem:[%s6270_s20 + $0xac] ss:$20 sps:$4 sm:$0xff]  }
  0x54   : > { %2177 = vmatpush1.bf16.msra.mxu1 %v5666_v9  ;;  %2602 = vmatpush1.bf16.msra.mxu0 %v6246_v10  ;;  %v5811_v55 = vld [vmem:[#allocation2 + $0x118] sm:$0xff]   ;;  %v5719_v56 = vld [vmem:[%s6270_s20 + $0xa0] ss:$20 sps:$4 sm:$0xff]   ;;  %v5726_v61 = vld [vmem:[%s6270_s20 + $0xd0] ss:$20 sps:$4 sm:$0xff]  }
  0x55   : > { %2178 = vmatprep.subr.bf16.mxu1 %v6114_v0  ;;  %2603 = vmatprep.subr.bf16.mxu0 %v6114_v0  ;;  %v5720_v57 = vld [vmem:[%s6270_s20 + $0xa8] ss:$20 sps:$4 sm:$0xff]   ;;  %v5721_v58 = vld [vmem:[%s6270_s20 + $0xcc] ss:$20 sps:$4 sm:$0xff]   ;;  %v5731_v1 = vld [vmem:[%s6270_s20 + $0xf0] ss:$20 sps:$4 sm:$0xff]  }
  0x56   : > { %v5723_v59 = vld [vmem:[%s6270_s20 + $0xd4] ss:$20 sps:$4 sm:$0xff]   ;;  %v5729_v63 = vld [vmem:[%s6270_s20 + $0xfc] ss:$20 sps:$4 sm:$0xff]   ;;  %v5738_v5 = vld [vmem:[%s6270_s20 + $0x118] ss:$20 sps:$4 sm:$0xff]  }
  0x57   : > { %v5725_v60 = vld [vmem:[%s6270_s20 + $0xc8] ss:$20 sps:$4 sm:$0xff]   ;;  %v5740_v7 = vld [vmem:[%s6270_s20 + $0x144] ss:$20 sps:$4 sm:$0xff]   ;;  %v5744_v9 = vld [vmem:[%s6270_s20 + $0x140] ss:$20 sps:$4 sm:$0xff]  }
  0x58   : > { %2179 = vmatpush1.bf16.msra.mxu1 %v5668_v11  ;;  %2604 = vmatpush1.bf16.msra.mxu0 %v6251_v12  ;;  %v5727_v62 = vld [vmem:[%s6270_s20 + $0xf4] ss:$20 sps:$4 sm:$0xff]   ;;  %v5734_v3 = vld [vmem:[%s6270_s20 + $0x11c] ss:$20 sps:$4 sm:$0xff]   ;;  %v5746_v11 = vld [vmem:[%s6270_s20 + $0x16c] ss:$20 sps:$4 sm:$0xff]  }
  0x59   : > { %2180 = vmatprep.subr.bf16.mxu1 %v6114_v0  ;;  %2605 = vmatprep.subr.bf16.mxu0 %v6114_v0  ;;  %v5760_v19 = vld [vmem:[%s6270_s20 + $0x1c4] ss:$20 sps:$4 sm:$0xff]   ;;  %v5763_v21 = vld [vmem:[%s6270_s20 + $0x1c0] ss:$20 sps:$4 sm:$0xff]  }
  0x5c   : > { %2181 = vmatpush1.bf16.msra.mxu1 %v5670_v13  ;;  %2606 = vmatpush1.bf16.msra.mxu0 %v6258_v14  ;;  %v5750_v13 = vld [vmem:[%s6270_s20 + $0x168] ss:$20 sps:$4 sm:$0xff]  }
  0x5d   : > { %2182 = vmatprep.subr.bf16.mxu1 %v6114_v0  ;;  %2607 = vmatprep.subr.bf16.mxu0 %v6114_v0 }
  0x60   : > { %2183 = vmatpush1.bf16.msra.mxu1 %v5672_v15  ;;  %2608 = vmatpush1.bf16.msra.mxu0 %v6264_v16  ;;  %v5752_v15 = vld [vmem:[%s6270_s20 + $0x194] ss:$20 sps:$4 sm:$0xff]  }
  0x61   : > { %2184 = vmatprep.subr.bf16.mxu1 %v6114_v0  ;;  %2609 = vmatprep.subr.bf16.mxu0 %v6114_v0 }
  0x64   : > { %2185 = vmatpush1.bf16.msra.mxu1 %v5674_v17  ;;  %2610 = vmatpush1.bf16.msra.mxu0 %v6274_v18  ;;  %v5757_v17 = vld [vmem:[%s6270_s20 + $0x198] ss:$20 sps:$4 sm:$0xff]  }
  0x65   : > { %2186 = vmatprep.subr.bf16.mxu1 %v6114_v0  ;;  %2611 = vmatprep.subr.bf16.mxu0 %v6114_v0 }
  0x68   : > { %2187 = vmatpush1.bf16.msra.mxu1 %v5676_v20  ;;  %2612 = vmatpush1.bf16.msra.mxu0 %v6281_v22  ;;  %v5762_v20 = vld [vmem:[%s6270_s20 + $0x1b8] ss:$20 sps:$4 sm:$0xff]  }
  0x69   : > { %2188 = vmatprep.subr.bf16.mxu1 %v6114_v0  ;;  %2613 = vmatprep.subr.bf16.mxu0 %v6114_v0 }
  0x6c   : > { %2189 = vmatpush1.bf16.msra.mxu1 %v5678_v23  ;;  %2614 = vmatpush1.bf16.msra.mxu0 %v6286_v24  ;;  %v5766_v23 = vld [vmem:[%s6270_s20 + $0x1ec] ss:$20 sps:$4 sm:$0xff]  }
  0x6d   : > { %2190 = vmatprep.subr.bf16.mxu1 %v6114_v0  ;;  %2615 = vmatprep.subr.bf16.mxu0 %v6114_v0 }
  0x70   : > { %2191 = vmatpush1.bf16.msra.mxu1 %v5680_v25  ;;  %2616 = vmatpush1.bf16.msra.mxu0 %v6291_v26  ;;  %v5769_v25 = vld [vmem:[%s6270_s20 + $0x1e8] ss:$20 sps:$4 sm:$0xff]  }
  0x71   : > { %2192 = vmatprep.subr.bf16.mxu1 %v6114_v0  ;;  %2617 = vmatprep.subr.bf16.mxu0 %v6114_v0 }
  0x74   : > { %2193 = vmatpush1.bf16.msra.mxu1 %v5682_v27  ;;  %2618 = vmatpush1.bf16.msra.mxu0 %v6296_v28  ;;  %v5773_v27 = vld [vmem:[%s6270_s20 + $0x214] ss:$20 sps:$4 sm:$0xff]  }
  0x75   : > { %2194 = vmatprep.subr.bf16.mxu1 %v6114_v0  ;;  %2619 = vmatprep.subr.bf16.mxu0 %v6114_v0 }
  0x78   : > { %2195 = vmatpush1.bf16.msra.mxu1 %v5684_v29  ;;  %2620 = vmatpush1.bf16.msra.mxu0 %v6301_v30  ;;  %v5776_v29 = vld [vmem:[%s6270_s20 + $0x210] ss:$20 sps:$4 sm:$0xff]  }
  0x79   : > { %2196 = vmatprep.subr.bf16.mxu1 %v6114_v0  ;;  %2621 = vmatprep.subr.bf16.mxu0 %v6114_v0 }
  0x7c   : > { %2197 = vmatpush1.bf16.msra.mxu1 %v5686_v31  ;;  %2622 = vmatpush1.bf16.msra.mxu0 %v6306_v32  ;;  %v5779_v31 = vld [vmem:[%s6270_s20 + $0x23c] ss:$20 sps:$4 sm:$0xff]  }
  0x7d   : > { %2198 = vmatprep.subr.bf16.mxu1 %v6114_v0  ;;  %2623 = vmatprep.subr.bf16.mxu0 %v6114_v0 }
  0x80   : > { %2199 = vmatpush1.bf16.msra.mxu1 %v5688_v33  ;;  %2624 = vmatpush1.bf16.msra.mxu0 %v6311_v34  ;;  %v5782_v33 = vld [vmem:[%s6270_s20 + $0x238] ss:$20 sps:$4 sm:$0xff]  }
  0x81   : > { %5199 = vmatprep.subr.bf16.mxu1 %v6114_v0  ;;  %4995 = vmatprep.subr.bf16.mxu0 %v7058_v39 }
  0x83   : > { %2201 = vmatmul.mubr.bf16.vlgmr.msra.gmra.mrb[0].mxu1 %v5690_v35  ;;  %2626 = vmatmul.mubr.bf16.vlgmr.msra.gmra.mrb[0].mxu0 %v5693_v36  ;;  %v5785_v35 = vld [vmem:[%s6270_s20 + $0x264] ss:$20 sps:$4 sm:$0xff]  }
  0x84   : > { %2208 = vmatprep.mubr.bf16.mxu1 %v5697_v37  ;;  %4996 = vmatpush3.bf16.msra.mxu0 %v5696_v38  ;;  %v5787_v36 = vld [vmem:[%s6270_s20 + $0x258] ss:$20 sps:$4 sm:$0xff]   ;;  %v5788_v37 = vld [vmem:[%s6270_s20 + $0x260] ss:$20 sps:$4 sm:$0xff]  }
  0x85   : > { %5215 = vmatpush1.bf16.msra.mxu1 %v6225_v2  ;;  %2633 = vmatprep.mubr.bf16.mxu0 %v5699_v40  ;;  %v5732_v2 = vld [vmem:[%s6270_s20 + $0xf8] ss:$20 sps:$4 sm:$0xff]  }
  0x86   : > { %5200 = vmatprep.subr.bf16.mxu1 %v6114_v0  ;;  %4997 = vmatprep.subr.bf16.mxu0 %v7058_v39  ;;  %v5789_v38 = vld [vmem:[%s6270_s20 + $0x284] ss:$20 sps:$4 sm:$0xff]   ;;  %v5791_v40 = vld [vmem:[%s6270_s20 + $0x28c] ss:$20 sps:$4 sm:$0xff]  }
  0x88   : > { %4998 = vmatpush3.bf16.msra.mxu0 %v5733_v41  ;;  %v5793_v41 = vld [vmem:[%s6270_s20 + $0x280] ss:$20 sps:$4 sm:$0xff]  }
  0x89   : > { %5216 = vmatpush1.bf16.msra.mxu1 %v6229_v4  ;;  %4999 = vmatprep.subr.bf16.mxu0 %v7058_v39  ;;  %v5736_v4 = vld [vmem:[%s6270_s20 + $0x124] ss:$20 sps:$4 sm:$0xff]  }
  0x8a   : > { %5201 = vmatprep.subr.bf16.mxu1 %v6114_v0 }
  0x8b   : > { %2209 = vmatmul.mubr.bf16.gmra.mrb[4].mxu1 %v5701_v42  ;;  %2634 = vmatmul.mubr.bf16.gmra.mrb[4].mxu0 %v5702_v43  ;;  %v5794_v42 = vld [vmem:[%s6270_s20 + $0x288] ss:$20 sps:$4 sm:$0xff]   ;;  %v5795_v43 = vld [vmem:[%s6270_s20 + $0x2ac] ss:$20 sps:$4 sm:$0xff]  }
  0x8c   : > { %2216 = vmatprep.mubr.bf16.mxu1 %v5703_v44  ;;  %2641 = vmatprep.mubr.bf16.mxu0 %v5705_v45  ;;  %v5797_v44 = vld [vmem:[%s6270_s20 + $0x2b4] ss:$20 sps:$4 sm:$0xff]  }
  0x8d   : > { %5217 = vmatpush1.bf16.msra.mxu1 %v6234_v6  ;;  %5000 = vmatpush3.bf16.msra.mxu0 %v5770_v46  ;;  %v5739_v6 = vld [vmem:[%s6270_s20 + $0x120] ss:$20 sps:$4 sm:$0xff]   ;;  %v5799_v45 = vld [vmem:[%s6270_s20 + $0x2a8] ss:$20 sps:$4 sm:$0xff]   ;;  %v5800_v46 = vld [vmem:[%s6270_s20 + $0x2b0] ss:$20 sps:$4 sm:$0xff]  }
  0x8e   : > { %5202 = vmatprep.subr.bf16.mxu1 %v6114_v0  ;;  %5001 = vmatprep.subr.bf16.mxu0 %v7058_v39 }
  0x91   : > { %5218 = vmatpush1.bf16.msra.mxu1 %v6239_v8  ;;  %5002 = vmatpush3.bf16.msra.mxu0 %v5811_v55  ;;  %v5742_v8 = vld [vmem:[%s6270_s20 + $0x14c] ss:$20 sps:$4 sm:$0xff]   ;;  %v5814_v55 = vld [vmem:[%s6270_s20 + $0x324] ss:$20 sps:$4 sm:$0xff]  }
  0x92   : > { %5203 = vmatprep.subr.bf16.mxu1 %v6114_v0 }
  0x93   : > { %2217 = vmatmul.mubr.bf16.gmra.mrb[8].mxu1 %v5707_v47  ;;  %2642 = vmatmul.mubr.bf16.gmra.mrb[8].mxu0 %v5708_v48  ;;  %v5801_v47 = vld [vmem:[%s6270_s20 + $0x2d4] ss:$20 sps:$4 sm:$0xff]   ;;  %v5803_v48 = vld [vmem:[%s6270_s20 + $0x2dc] ss:$20 sps:$4 sm:$0xff]  }
  0x94   : > { %2224 = vmatprep.mubr.bf16.mxu1 %v5709_v49  ;;  %2649 = vmatprep.mubr.bf16.mxu0 %v5711_v50  ;;  %v5805_v49 = vld [vmem:[%s6270_s20 + $0x2d0] ss:$20 sps:$4 sm:$0xff]   ;;  %v5806_v50 = vld [vmem:[%s6270_s20 + $0x2d8] ss:$20 sps:$4 sm:$0xff]  }
  0x95   : > { %5219 = vmatpush1.bf16.msra.mxu1 %v6246_v10  ;;  %v5745_v10 = vld [vmem:[%s6270_s20 + $0x148] ss:$20 sps:$4 sm:$0xff]  }
  0x96   : > { %5204 = vmatprep.subr.bf16.mxu1 %v6114_v0 }
  0x99   : > { %5220 = vmatpush1.bf16.msra.mxu1 %v6251_v12  ;;  %v5748_v12 = vld [vmem:[%s6270_s20 + $0x174] ss:$20 sps:$4 sm:$0xff]  }
  0x9a   : > { %5205 = vmatprep.subr.bf16.mxu1 %v6114_v0 }
  0x9b   : > { %2225 = vmatmul.mubr.bf16.gmra.mrb[12].mxu1 %v5713_v51  ;;  %2650 = vmatmul.mubr.bf16.gmra.mrb[12].mxu0 %v5714_v52  ;;  %v5807_v51 = vld [vmem:[%s6270_s20 + $0x2fc] ss:$20 sps:$4 sm:$0xff]   ;;  %v5809_v52 = vld [vmem:[%s6270_s20 + $0x304] ss:$20 sps:$4 sm:$0xff]  }
  0x9c   : > { %2232 = vmatprep.mubr.bf16.mxu1 %v5715_v53  ;;  %2657 = vmatprep.mubr.bf16.mxu0 %v5717_v54  ;;  %v5812_v53 = vld [vmem:[%s6270_s20 + $0x2f8] ss:$20 sps:$4 sm:$0xff]   ;;  %v5813_v54 = vld [vmem:[%s6270_s20 + $0x300] ss:$20 sps:$4 sm:$0xff]  }
  0x9d   : > { %5221 = vmatpush1.bf16.msra.mxu1 %v6258_v14  ;;  %v5751_v14 = vld [vmem:[%s6270_s20 + $0x170] ss:$20 sps:$4 sm:$0xff]  }
  0x9e   : > { %5206 = vmatprep.subr.bf16.mxu1 %v6114_v0 }
  0xa1   : > { %5222 = vmatpush1.bf16.msra.mxu1 %v6264_v16  ;;  %v5754_v16 = vld [vmem:[%s6270_s20 + $0x19c] ss:$20 sps:$4 sm:$0xff]  }
  0xa2   : > { %5207 = vmatprep.subr.bf16.mxu1 %v6114_v0 }
  0xa3   : > { %2233 = vmatmul.mubr.bf16.gmra.mrb[16].mxu1 %v5719_v56  ;;  %2658 = vmatmul.mubr.bf16.gmra.mrb[16].mxu0 %v5720_v57  ;;  %v5816_v56 = vld [vmem:[%s6270_s20 + $0x32c] ss:$20 sps:$4 sm:$0xff]  }
  0xa4   : > { %2240 = vmatprep.mubr.bf16.mxu1 %v5721_v58  ;;  %2665 = vmatprep.mubr.bf16.mxu0 %v5723_v59  ;;  %v5818_v57 = vld [vmem:[%s6270_s20 + $0x320] ss:$20 sps:$4 sm:$0xff]   ;;  %v5819_v58 = vld [vmem:[%s6270_s20 + $0x328] ss:$20 sps:$4 sm:$0xff]  }
  0xa5   : > { %5223 = vmatpush1.bf16.msra.mxu1 %v6274_v18  ;;  %v5758_v18 = vld [vmem:[%s6270_s20 + $0x1bc] ss:$20 sps:$4 sm:$0xff]   ;;  %v5820_v59 = vld [vmem:[%s6270_s20 + $0x34c] ss:$20 sps:$4 sm:$0xff]  }
  0xa6   : > { %5208 = vmatprep.subr.bf16.mxu1 %v6114_v0 }
  0xa9   : > { %5224 = vmatpush1.bf16.msra.mxu1 %v6281_v22  ;;  %v5764_v22 = vld [vmem:[%s6270_s20 + $0x1e4] ss:$20 sps:$4 sm:$0xff]  }
  0xaa   : > { %5209 = vmatprep.subr.bf16.mxu1 %v6114_v0 }
  0xab   : > { %2241 = vmatmul.mubr.bf16.gmra.mrb[20].mxu1 %v5725_v60  ;;  %2666 = vmatmul.mubr.bf16.gmra.mrb[20].mxu0 %v5726_v61  ;;  %v5822_v60 = vld [vmem:[%s6270_s20 + $0x354] ss:$20 sps:$4 sm:$0xff]  }
  0xac   : > { %2248 = vmatprep.mubr.bf16.mxu1 %v5727_v62  ;;  %2673 = vmatprep.mubr.bf16.mxu0 %v5729_v63  ;;  %v5824_v61 = vld [vmem:[%s6270_s20 + $0x348] ss:$20 sps:$4 sm:$0xff]   ;;  %v5825_v62 = vld [vmem:[%s6270_s20 + $0x350] ss:$20 sps:$4 sm:$0xff]  }
  0xad   : > { %5225 = vmatpush1.bf16.msra.mxu1 %v6286_v24  ;;  %v5768_v24 = vld [vmem:[%s6270_s20 + $0x1e0] ss:$20 sps:$4 sm:$0xff]  }
  0xae   : > { %5210 = vmatprep.subr.bf16.mxu1 %v6114_v0  ;;  %v5826_v63 = vld [vmem:[%s6270_s20 + $0x374] ss:$20 sps:$4 sm:$0xff]  }
  0xb1   : > { %5226 = vmatpush1.bf16.msra.mxu1 %v6291_v26  ;;  %v5771_v26 = vld [vmem:[%s6270_s20 + $0x20c] ss:$20 sps:$4 sm:$0xff]  }
  0xb2   : > { %5211 = vmatprep.subr.bf16.mxu1 %v6114_v0 }
  0xb3   : > { %2249 = vmatmul.mubr.bf16.gmra.mrb[24].mxu1 %v5731_v1  ;;  %2674 = vmatmul.mubr.bf16.gmra.mrb[24].mxu0 %v5732_v2  ;;  %v5828_v1 = vld [vmem:[%s6270_s20 + $0x37c] ss:$20 sps:$4 sm:$0xff]  }
  0xb4   : > { %2256 = vmatprep.mubr.bf16.mxu1 %v5734_v3  ;;  %2681 = vmatprep.mubr.bf16.mxu0 %v5736_v4  ;;  %v5830_v2 = vld [vmem:[%s6270_s20 + $0x370] ss:$20 sps:$4 sm:$0xff]   ;;  %v5831_v3 = vld [vmem:[%s6270_s20 + $0x378] ss:$20 sps:$4 sm:$0xff]  }
  0xb5   : > { %5227 = vmatpush1.bf16.msra.mxu1 %v6296_v28  ;;  %v5775_v28 = vld [vmem:[%s6270_s20 + $0x208] ss:$20 sps:$4 sm:$0xff]  }
  0xb6   : > { %5212 = vmatprep.subr.bf16.mxu1 %v6114_v0  ;;  %v5832_v4 = vld [vmem:[%s6270_s20 + $0x39c] ss:$20 sps:$4 sm:$0xff]  }
  0xb9   : > { %5228 = vmatpush1.bf16.msra.mxu1 %v6301_v30  ;;  %v5777_v30 = vld [vmem:[%s6270_s20 + $0x234] ss:$20 sps:$4 sm:$0xff]  }
  0xba   : > { %5213 = vmatprep.subr.bf16.mxu1 %v6114_v0 }
  0xbb   : > { %2257 = vmatmul.mubr.bf16.gmra.mrb[28].mxu1 %v5738_v5  ;;  %2682 = vmatmul.mubr.bf16.gmra.mrb[28].mxu0 %v5739_v6  ;;  %v5834_v5 = vld [vmem:[%s6270_s20 + $0x3a4] ss:$20 sps:$4 sm:$0xff]  }
  0xbc   : > { %2264 = vmatprep.mubr.bf16.mxu1 %v5740_v7  ;;  %2689 = vmatprep.mubr.bf16.mxu0 %v5742_v8  ;;  %v5836_v6 = vld [vmem:[%s6270_s20 + $0x398] ss:$20 sps:$4 sm:$0xff]   ;;  %v5837_v7 = vld [vmem:[%s6270_s20 + $0x3a0] ss:$20 sps:$4 sm:$0xff]  }
  0xbd   : > { %5229 = vmatpush1.bf16.msra.mxu1 %v6306_v32  ;;  %v5781_v32 = vld [vmem:[%s6270_s20 + $0x230] ss:$20 sps:$4 sm:$0xff]  }
  0xbe   : > { %5214 = vmatprep.subr.bf16.mxu1 %v6114_v0  ;;  %v5756_v0 = vld [vmem:[%s6270_s20 + $0x190] ss:$20 sps:$4 sm:$0xff]  }
  0xbf   : > { %v5838_v8 = vld [vmem:[%s6270_s20 + $0x3c4] ss:$20 sps:$4 sm:$0xff]  }
  0xc1   : > { %5230 = vmatpush1.bf16.msra.mxu1 %v6311_v34  ;;  %v5783_v34 = vld [vmem:[%s6270_s20 + $0x25c] ss:$20 sps:$4 sm:$0xff]  }
  0xc3   : > { %2265 = vmatmul.mubr.bf16.gmra.mrb[32].mxu1 %v5744_v9  ;;  %2690 = vmatmul.mubr.bf16.gmra.mrb[32].mxu0 %v5745_v10  ;;  %v5840_v9 = vld [vmem:[%s6270_s20 + $0x3cc] ss:$20 sps:$4 sm:$0xff]  }
  0xc4   : > { %2272 = vmatprep.mubr.bf16.mxu1 %v5746_v11  ;;  %2697 = vmatprep.mubr.bf16.mxu0 %v5748_v12  ;;  %v5842_v10 = vld [vmem:[%s6270_s20 + $0x3c0] ss:$20 sps:$4 sm:$0xff]   ;;  %v5843_v11 = vld [vmem:[%s6270_s20 + $0x3c8] ss:$20 sps:$4 sm:$0xff]  }
  0xc5   : > { %v5844_v12 = vld [vmem:[%s6270_s20 + $0x3ec] ss:$20 sps:$4 sm:$0xff]  }
  0xcb   : > { %2273 = vmatmul.mubr.bf16.gmra.mrb[36].mxu1 %v5750_v13  ;;  %2698 = vmatmul.mubr.bf16.gmra.mrb[36].mxu0 %v5751_v14  ;;  %v5846_v13 = vld [vmem:[%s6270_s20 + $0x3e8] ss:$20 sps:$4 sm:$0xff]   ;;  %v5847_v14 = vld [vmem:[%s6270_s20 + $0x10] ss:$20 sps:$4 sm:$0xff]  }
  0xcc   : > { %2280 = vmatprep.mubr.bf16.mxu1 %v5752_v15  ;;  %2705 = vmatprep.mubr.bf16.mxu0 %v5754_v16  ;;  %v5848_v15 = vld [vmem:[%s6270_s20 + $0x414] ss:$20 sps:$4 sm:$0xff]   ;;  %v5850_v16 = vld [vmem:[%s6270_s20 + $0x410] ss:$20 sps:$4 sm:$0xff]  }
  0xd3   : > { %2281 = vmatmul.mubr.bf16.gmra.mrb[40].mxu1 %v5756_v0  ;;  %2706 = vmatmul.mubr.bf16.gmra.mrb[40].mxu0 %v5757_v17  ;;  %v5851_v0 = vld [vmem:[%s6270_s20 + $0x38] ss:$20 sps:$4 sm:$0xff]   ;;  %v5852_v17 = vld [vmem:[%s6270_s20 + $0x43c] ss:$20 sps:$4 sm:$0xff]  }
  0xd4   : > { %2288 = vmatprep.mubr.bf16.mxu1 %v5758_v18  ;;  %2713 = vmatprep.mubr.bf16.mxu0 %v5760_v19 }
  0xdb   : > { %2289 = vmatmul.mubr.bf16.gmra.mrb[44].mxu1 %v5762_v20  ;;  %2714 = vmatmul.mubr.bf16.gmra.mrb[44].mxu0 %v5763_v21  ;;  %v5854_v20 = vld [vmem:[%s6270_s20 + $0x438] ss:$20 sps:$4 sm:$0xff]   ;;  %v5855_v21 = vld [vmem:[%s6270_s20 + $0x60] ss:$20 sps:$4 sm:$0xff]  }
  0xdc   : > { %2296 = vmatprep.mubr.bf16.mxu1 %v5764_v22  ;;  %2721 = vmatprep.mubr.bf16.mxu0 %v5766_v23  ;;  %v5856_v23 = vld [vmem:[%s6270_s20 + $0x464] ss:$20 sps:$4 sm:$0xff]  }
  0xe3   : > { %2297 = vmatmul.mubr.bf16.gmra.mrb[48].mxu1 %v5768_v24  ;;  %2722 = vmatmul.mubr.bf16.gmra.mrb[48].mxu0 %v5769_v25 }
  0xe4   : > { %2304 = vmatprep.mubr.bf16.mxu1 %v5771_v26  ;;  %2729 = vmatprep.mubr.bf16.mxu0 %v5773_v27  ;;  %v5858_v27 = vld [vmem:[%s6270_s20 + $0x460] ss:$20 sps:$4 sm:$0xff]  }
  0xeb   : > { %2305 = vmatmul.mubr.bf16.gmra.mrb[52].mxu1 %v5775_v28  ;;  %2730 = vmatmul.mubr.bf16.gmra.mrb[52].mxu0 %v5776_v29  ;;  %v5859_v28 = vld [vmem:[%s6270_s20 + $0x88] ss:$20 sps:$4 sm:$0xff]  }
  0xec   : > { %2312 = vmatprep.mubr.bf16.mxu1 %v5777_v30  ;;  %2737 = vmatprep.mubr.bf16.mxu0 %v5779_v31  ;;  %v5860_v30 = vld [vmem:[%s6270_s20 + $0x48c] ss:$20 sps:$4 sm:$0xff]  }
  0xf3   : > { %2313 = vmatmul.mubr.bf16.gmra.mrb[56].mxu1 %v5781_v32  ;;  %2738 = vmatmul.mubr.bf16.gmra.mrb[56].mxu0 %v5782_v33 }
  0xf4   : > { %2320 = vmatprep.mubr.bf16.mxu1 %v5783_v34  ;;  %2745 = vmatprep.mubr.bf16.mxu0 %v5785_v35  ;;  %v5862_v34 = vld [vmem:[%s6270_s20 + $0x488] ss:$20 sps:$4 sm:$0xff]   ;;  %v5863_v35 = vld [vmem:[%s6270_s20 + $0xb0] ss:$20 sps:$4 sm:$0xff]  }
  0xfb   : > { %2321 = vmatmul.mubr.bf16.gmra.mrb[60].mxu1 %v5787_v36  ;;  %2746 = vmatmul.mubr.bf16.gmra.mrb[60].mxu0 %v5788_v37  ;;  %v5864_v37 = vld [vmem:[%s6270_s20 + $0x4b4] ss:$20 sps:$4 sm:$0xff]  }
  0xfc   : > { %2328 = vmatprep.mubr.bf16.mxu1 %v5789_v38  ;;  %2753 = vmatprep.mubr.bf16.mxu0 %v5791_v40 }
 0x103   : > { %2329 = vmatmul.mubr.bf16.gmra.mrb[64].mxu1 %v5793_v41  ;;  %2754 = vmatmul.mubr.bf16.gmra.mrb[64].mxu0 %v5794_v42  ;;  %v5866_v42 = vld [vmem:[%s6270_s20 + $0x4b0] ss:$20 sps:$4 sm:$0xff]  }
 0x104   : > { %2336 = vmatprep.mubr.bf16.mxu1 %v5795_v43  ;;  %2761 = vmatprep.mubr.bf16.mxu0 %v5797_v44  ;;  %v5867_v43 = vld [vmem:[%s6270_s20 + $0xd8] ss:$20 sps:$4 sm:$0xff]  }
 0x10b   : > { %2337 = vmatmul.mubr.bf16.gmra.mrb[68].mxu1 %v5799_v45  ;;  %2762 = vmatmul.mubr.bf16.gmra.mrb[68].mxu0 %v5800_v46  ;;  %v5868_v45 = vld [vmem:[%s6270_s20 + $0x4dc] ss:$20 sps:$4 sm:$0xff]  }
 0x10c   : > { %2344 = vmatprep.mubr.bf16.mxu1 %v5801_v47  ;;  %2769 = vmatprep.mubr.bf16.mxu0 %v5803_v48 }
 0x113   : > { %2345 = vmatmul.mubr.bf16.gmra.mrb[72].mxu1 %v5805_v49  ;;  %2770 = vmatmul.mubr.bf16.gmra.mrb[72].mxu0 %v5806_v50  ;;  %v5870_v49 = vld [vmem:[%s6270_s20 + $0x4d8] ss:$20 sps:$4 sm:$0xff]   ;;  %v5871_v50 = vld [vmem:[%s6270_s20 + $0x100] ss:$20 sps:$4 sm:$0xff]  }
 0x114   : > { %2352 = vmatprep.mubr.bf16.mxu1 %v5807_v51  ;;  %2777 = vmatprep.mubr.bf16.mxu0 %v5809_v52  ;;  %v5872_v52 = vld [vmem:[%s6270_s20 + $0x504] ss:$20 sps:$4 sm:$0xff]  }
 0x11b   : > { %2353 = vmatmul.mubr.bf16.gmra.mrb[76].mxu1 %v5812_v53  ;;  %2778 = vmatmul.mubr.bf16.gmra.mrb[76].mxu0 %v5813_v54 }
 0x11c   : > { %2360 = vmatprep.mubr.bf16.mxu1 %v5814_v55  ;;  %2785 = vmatprep.mubr.bf16.mxu0 %v5816_v56  ;;  %v5874_v56 = vld [vmem:[%s6270_s20 + $0x500] ss:$20 sps:$4 sm:$0xff]  }
 0x123   : > { %2361 = vmatmul.mubr.bf16.gmra.mrb[80].mxu1 %v5818_v57  ;;  %2786 = vmatmul.mubr.bf16.gmra.mrb[80].mxu0 %v5819_v58  ;;  %v5875_v57 = vld [vmem:[%s6270_s20 + $0x128] ss:$20 sps:$4 sm:$0xff]  }
 0x124   : > { %2368 = vmatprep.mubr.bf16.mxu1 %v5820_v59  ;;  %2793 = vmatprep.mubr.bf16.mxu0 %v5822_v60  ;;  %v5876_v59 = vld [vmem:[%s6270_s20 + $0x52c] ss:$20 sps:$4 sm:$0xff]  }
 0x12b   : > { %2369 = vmatmul.mubr.bf16.gmra.mrb[84].mxu1 %v5824_v61  ;;  %2794 = vmatmul.mubr.bf16.gmra.mrb[84].mxu0 %v5825_v62 }
 0x12c   : > { %2376 = vmatprep.mubr.bf16.mxu1 %v5826_v63  ;;  %2801 = vmatprep.mubr.bf16.mxu0 %v5828_v1  ;;  %v5878_v63 = vld [vmem:[%s6270_s20 + $0x528] ss:$20 sps:$4 sm:$0xff]   ;;  %v5879_v1 = vld [vmem:[%s6270_s20 + $0x150] ss:$20 sps:$4 sm:$0xff]  }
 0x133   : > { %2377 = vmatmul.mubr.bf16.gmra.mrb[88].mxu1 %v5830_v2  ;;  %2802 = vmatmul.mubr.bf16.gmra.mrb[88].mxu0 %v5831_v3  ;;  %v5880_v3 = vld [vmem:[%s6270_s20 + $0x554] ss:$20 sps:$4 sm:$0xff]  }
 0x134   : > { %2384 = vmatprep.mubr.bf16.mxu1 %v5832_v4  ;;  %2809 = vmatprep.mubr.bf16.mxu0 %v5834_v5 }
 0x13b   : > { %2385 = vmatmul.mubr.bf16.gmra.mrb[92].mxu1 %v5836_v6  ;;  %2810 = vmatmul.mubr.bf16.gmra.mrb[92].mxu0 %v5837_v7  ;;  %v5882_v7 = vld [vmem:[%s6270_s20 + $0x550] ss:$20 sps:$4 sm:$0xff]  }
 0x13c   : > { %2392 = vmatprep.mubr.bf16.mxu1 %v5838_v8  ;;  %2817 = vmatprep.mubr.bf16.mxu0 %v5840_v9  ;;  %v5883_v8 = vld [vmem:[%s6270_s20 + $0x178] ss:$20 sps:$4 sm:$0xff]  }
 0x143   : > { %2393 = vmatmul.mubr.bf16.gmra.mrb[96].mxu1 %v5842_v10  ;;  %2818 = vmatmul.mubr.bf16.gmra.mrb[96].mxu0 %v5843_v11  ;;  %v5884_v10 = vld [vmem:[%s6270_s20 + $0x57c] ss:$20 sps:$4 sm:$0xff]  }
 0x144   : > { %2400 = vmatprep.mubr.bf16.mxu1 %v5844_v12  ;;  %5003 = vmatprep.mubr.msk.bf16.mxu0 %vm6116_vm0, %v7058_v39 }
 0x14b   : > { %2401 = vmatmul.mubr.bf16.gmra.mrb[100].mxu1 %v5846_v13  ;;  %5004 = vmatmul.mubr.msk.bf16.vlgmr.msra.gmra.mrb[0].mxu0 %vm2020_vm1, %v5847_v14  ;;  %v5886_v14 = vld [vmem:[%s6270_s20 + $0x578] ss:$20 sps:$4 sm:$0xff]  }
 0x14c   : > { %2408 = vmatprep.mubr.bf16.mxu1 %v5848_v15  ;;  %5007 = vmatprep.mubr.msk.bf16.mxu0 %vm6116_vm0, %v7058_v39  ;;  %v5887_v15 = vld [vmem:[%s6270_s20 + $0x1a0] ss:$20 sps:$4 sm:$0xff]  }
 0x153   : > { %2409 = vmatmul.mubr.bf16.gmra.mrb[104].mxu1 %v5850_v16  ;;  %5008 = vmatmul.mubr.msk.bf16.gmra.mrb[4].mxu0 %vm2020_vm1, %v5851_v0  ;;  %v5888_v0 = vld [vmem:[%s6270_s20 + $0x5a4] ss:$20 sps:$4 sm:$0xff]  }
 0x154   : > { %2416 = vmatprep.mubr.bf16.mxu1 %v5852_v17  ;;  %5011 = vmatprep.mubr.msk.bf16.mxu0 %vm6116_vm0, %v7058_v39 }
 0x156   : > { %v6464_v18 = vpop.f32.mrb[0].mxu1 }
 0x157   : > { %v2204_v19 = vpop.f32.mrb[1].mxu1 }
 0x158   : > { %v6468_v22 = vpop.f32.mrb[2].mxu1 }
 0x159   : > { %v2207_v24 = vpop.f32.mrb[3].mxu1 }
 0x15b   : > { %2417 = vmatmul.mubr.bf16.gmra.mrb[108].mxu1 %v5854_v20  ;;  %5012 = vmatmul.mubr.msk.bf16.gmra.mrb[8].mxu0 %vm2020_vm1, %v5855_v21  ;;  %v5890_v21 = vld [vmem:[%s6270_s20 + $0x5a0] ss:$20 sps:$4 sm:$0xff]  }
 0x15c   : > { %2424 = vmatprep.mubr.bf16.mxu1 %v5856_v23  ;;  %5015 = vmatprep.mubr.msk.bf16.mxu0 %vm6116_vm0, %v7058_v39  ;;  %v5891_v23 = vld [vmem:[%s6270_s20 + $0x1c8] ss:$20 sps:$4 sm:$0xff]  }
 0x15e   : > { %v6474_v25 = vpop.f32.mrb[4].mxu1 }
 0x15f   : > { %v2212_v26 = vpop.f32.mrb[5].mxu1 }
 0x160   : > { %v6478_v29 = vpop.f32.mrb[6].mxu1  ;;  %v5892_v26 = vld [vmem:[%s6270_s20 + $0x5cc] ss:$20 sps:$4 sm:$0xff]  }
 0x161   : > { %v2215_v31 = vpop.f32.mrb[7].mxu1 }
 0x162   : > { %v5894_v31 = vld [vmem:[%s6270_s20 + $0x5c8] ss:$20 sps:$4 sm:$0xff]  }
 0x163   : > { %2425 = vmatmul.mubr.bf16.gmra.mrb[112].mxu1 %v5858_v27  ;;  %5016 = vmatmul.mubr.msk.bf16.gmra.mrb[12].mxu0 %vm2020_vm1, %v5859_v28 }
 0x164   : > { %2432 = vmatprep.mubr.bf16.mxu1 %v5860_v30  ;;  %5019 = vmatprep.mubr.msk.bf16.mxu0 %vm6116_vm0, %v7058_v39 }
 0x166   : > { %v6484_v32 = vpop.f32.mrb[8].mxu1 }
 0x167   : > { %v2220_v33 = vpop.f32.mrb[9].mxu1 }
 0x168   : > { %v6488_v36 = vpop.f32.mrb[10].mxu1  ;;  %v5895_v33 = vld [vmem:[%s6270_s20 + $0x1f0] ss:$20 sps:$4 sm:$0xff]  }
 0x169   : > { %v2223_v38 = vpop.f32.mrb[11].mxu1 }
 0x16b   : > { %2433 = vmatmul.mubr.bf16.gmra.mrb[116].mxu1 %v5862_v34  ;;  %5020 = vmatmul.mubr.msk.bf16.gmra.mrb[16].mxu0 %vm2020_vm1, %v5863_v35  ;;  %v5896_v35 = vld [vmem:[%s6270_s20 + $0x5f4] ss:$20 sps:$4 sm:$0xff]  }
 0x16c   : > { %2440 = vmatprep.mubr.bf16.mxu1 %v5864_v37  ;;  %5023 = vmatprep.mubr.msk.bf16.mxu0 %vm6116_vm0, %v7058_v39 }
 0x16e   : > { %v6494_v40 = vpop.f32.mrb[12].mxu1 }
 0x16f   : > { %v2228_v41 = vpop.f32.mrb[13].mxu1 }
 0x170   : > { %v6498_v44 = vpop.f32.mrb[14].mxu1 }
 0x171   : > { %v2231_v46 = vpop.f32.mrb[15].mxu1 }
 0x172   : > { %v5900_v46 = vld [vmem:[%s6270_s20 + $0x61c] ss:$20 sps:$4 sm:$0xff]  }
 0x173   : > { %2441 = vmatmul.mubr.bf16.gmra.mrb[120].mxu1 %v5866_v42  ;;  %5024 = vmatmul.mubr.msk.bf16.gmra.mrb[20].mxu0 %vm2020_vm1, %v5867_v43  ;;  %v5898_v42 = vld [vmem:[%s6270_s20 + $0x5f0] ss:$20 sps:$4 sm:$0xff]   ;;  %v5899_v43 = vld [vmem:[%s6270_s20 + $0x218] ss:$20 sps:$4 sm:$0xff]  }
 0x174   : > { %2448 = vmatprep.mubr.bf16.mxu1 %v5868_v45  ;;  %5027 = vmatprep.mubr.msk.bf16.mxu0 %vm6116_vm0, %v7058_v39 }
 0x176   : > { %v6504_v47 = vpop.f32.mrb[16].mxu1 }
 0x177   : > { %v2236_v48 = vpop.f32.mrb[17].mxu1 }
 0x178   : > { %v6508_v51 = vpop.f32.mrb[18].mxu1 }
 0x179   : > { %v2239_v53 = vpop.f32.mrb[19].mxu1 }
 0x17a   : > { %v5903_v53 = vld [vmem:[%s6270_s20 + $0x240] ss:$20 sps:$4 sm:$0xff]  }
 0x17b   : > { %2449 = vmatmul.mubr.bf16.gmra.mrb[124].mxu1 %v5870_v49  ;;  %5028 = vmatmul.mubr.msk.bf16.gmra.mrb[24].mxu0 %vm2020_vm1, %v5871_v50 }
 0x17c   : > { %2456 = vmatprep.mubr.bf16.mxu1 %v5872_v52  ;;  %5031 = vmatprep.mubr.msk.bf16.mxu0 %vm6116_vm0, %v7058_v39  ;;  %v5902_v52 = vld [vmem:[%s6270_s20 + $0x618] ss:$20 sps:$4 sm:$0xff]  }
 0x17e   : > { %v6514_v54 = vpop.f32.mrb[20].mxu1 }
 0x17f   : > { %v2244_v55 = vpop.f32.mrb[21].mxu1 }
 0x180   : > { %v6518_v58 = vpop.f32.mrb[22].mxu1 }
 0x181   : > { %v2247_v60 = vpop.f32.mrb[23].mxu1 }
 0x183   : > { %2457 = vmatmul.mubr.bf16.gmra.mrb[128].mxu1 %v5874_v56  ;;  %5032 = vmatmul.mubr.msk.bf16.gmra.mrb[28].mxu0 %vm2020_vm1, %v5875_v57  ;;  %v5904_v56 = vld [vmem:[%s6270_s20 + $0x644] ss:$20 sps:$4 sm:$0xff]  }
 0x184   : > { %2464 = vmatprep.mubr.bf16.mxu1 %v5876_v59  ;;  %5035 = vmatprep.mubr.msk.bf16.mxu0 %vm6116_vm0, %v7058_v39 }
 0x186   : > { %v6524_v61 = vpop.f32.mrb[24].mxu1 }
 0x187   : > { %v2252_v62 = vpop.f32.mrb[25].mxu1 }
 0x188   : > { %v6528_v2 = vpop.f32.mrb[26].mxu1  ;;  %v5906_v62 = vld [vmem:[%s6270_s20 + $0x640] ss:$20 sps:$4 sm:$0xff]  }
 0x189   : > { %v2255_v4 = vpop.f32.mrb[27].mxu1 }
 0x18b   : > { %2465 = vmatmul.mubr.bf16.gmra.mrb[132].mxu1 %v5878_v63  ;;  %5036 = vmatmul.mubr.msk.bf16.gmra.mrb[32].mxu0 %vm2020_vm1, %v5879_v1  ;;  %v5907_v63 = vld [vmem:[%s6270_s20 + $0x268] ss:$20 sps:$4 sm:$0xff]  }
 0x18c   : > { %2472 = vmatprep.mubr.bf16.mxu1 %v5880_v3  ;;  %5039 = vmatprep.mubr.msk.bf16.mxu0 %vm6116_vm0, %v7058_v39  ;;  %v5908_v3 = vld [vmem:[%s6270_s20 + $0x66c] ss:$20 sps:$4 sm:$0xff]  }
 0x18e   : > { %v6534_v5 = vpop.f32.mrb[28].mxu1 }
 0x18f   : > { %v2260_v6 = vpop.f32.mrb[29].mxu1 }
 0x190   : > { %v6538_v9 = vpop.f32.mrb[30].mxu1 }
 0x191   : > { %v2263_v11 = vpop.f32.mrb[31].mxu1 }
 0x193   : > { %2473 = vmatmul.mubr.bf16.gmra.mrb[136].mxu1 %v5882_v7  ;;  %5040 = vmatmul.mubr.msk.bf16.gmra.mrb[36].mxu0 %vm2020_vm1, %v5883_v8  ;;  %v5910_v8 = vld [vmem:[%s6270_s20 + $0x668] ss:$20 sps:$4 sm:$0xff]  }
 0x194   : > { %2480 = vmatprep.mubr.bf16.mxu1 %v5884_v10  ;;  %5043 = vmatprep.mubr.msk.bf16.mxu0 %vm6116_vm0, %v7058_v39  ;;  %v5911_v10 = vld [vmem:[%s6270_s20 + $0x290] ss:$20 sps:$4 sm:$0xff]  }
 0x196   : > { %v6544_v12 = vpop.f32.mrb[32].mxu1 }
 0x197   : > { %v2268_v13 = vpop.f32.mrb[33].mxu1 }
 0x198   : > { %v6548_v16 = vpop.f32.mrb[34].mxu1  ;;  %v5912_v13 = vld [vmem:[%s6270_s20 + $0x694] ss:$20 sps:$4 sm:$0xff]  }
 0x199   : > { %v2271_v17 = vpop.f32.mrb[35].mxu1 }
 0x19a   : > { %v5914_v17 = vld [vmem:[%s6270_s20 + $0x690] ss:$20 sps:$4 sm:$0xff]  }
 0x19b   : > { %2481 = vmatmul.mubr.bf16.gmra.mrb[140].mxu1 %v5886_v14  ;;  %5044 = vmatmul.mubr.msk.bf16.gmra.mrb[40].mxu0 %vm2020_vm1, %v5887_v15 }
 0x19c   : > { %2488 = vmatprep.mubr.bf16.mxu1 %v5888_v0  ;;  %5047 = vmatprep.mubr.msk.bf16.mxu0 %vm6116_vm0, %v7058_v39 }
 0x19e   : > { %v6554_v19 = vpop.f32.mrb[36].mxu1 }
 0x19f   : > { %v2276_v20 = vpop.f32.mrb[37].mxu1 }
 0x1a0   : > { %v6558_v24 = vpop.f32.mrb[38].mxu1  ;;  %v5915_v20 = vld [vmem:[%s6270_s20 + $0x2b8] ss:$20 sps:$4 sm:$0xff]  }
 0x1a1   : > { %v2279_v27 = vpop.f32.mrb[39].mxu1 }
 0x1a3   : > { %2489 = vmatmul.mubr.bf16.gmra.mrb[144].mxu1 %v5890_v21  ;;  %5048 = vmatmul.mubr.msk.bf16.gmra.mrb[44].mxu0 %vm2020_vm1, %v5891_v23  ;;  %v5916_v23 = vld [vmem:[%s6270_s20 + $0x6bc] ss:$20 sps:$4 sm:$0xff]  }
 0x1a4   : > { %2496 = vmatprep.mubr.bf16.mxu1 %v5892_v26  ;;  %5051 = vmatprep.mubr.msk.bf16.mxu0 %vm6116_vm0, %v7058_v39 }
 0x1a6   : > { %v6564_v28 = vpop.f32.mrb[40].mxu1 }
 0x1a7   : > { %v2284_v30 = vpop.f32.mrb[41].mxu1 }
 0x1a8   : > { %v6568_v34 = vpop.f32.mrb[42].mxu1 }
 0x1a9   : > { %v2287_v37 = vpop.f32.mrb[43].mxu1 }
 0x1aa   : > { %v5920_v37 = vld [vmem:[%s6270_s20 + $0x6e4] ss:$20 sps:$4 sm:$0xff]  }
 0x1ab   : > { %2497 = vmatmul.mubr.bf16.gmra.mrb[148].mxu1 %v5894_v31  ;;  %5052 = vmatmul.mubr.msk.bf16.gmra.mrb[48].mxu0 %vm2020_vm1, %v5895_v33  ;;  %v5918_v31 = vld [vmem:[%s6270_s20 + $0x6b8] ss:$20 sps:$4 sm:$0xff]   ;;  %v5919_v33 = vld [vmem:[%s6270_s20 + $0x2e0] ss:$20 sps:$4 sm:$0xff]  }
 0x1ac   : > { %2504 = vmatprep.mubr.bf16.mxu1 %v5896_v35  ;;  %5055 = vmatprep.mubr.msk.bf16.mxu0 %vm6116_vm0, %v7058_v39 }
 0x1ae   : > { %v6574_v38 = vpop.f32.mrb[44].mxu1 }
 0x1af   : > { %v2292_v41 = vpop.f32.mrb[45].mxu1 }
 0x1b0   : > { %v6578_v45 = vpop.f32.mrb[46].mxu1 }
 0x1b1   : > { %v2295_v48 = vpop.f32.mrb[47].mxu1 }
 0x1b2   : > { %v5923_v48 = vld [vmem:[%s6270_s20 + $0x308] ss:$20 sps:$4 sm:$0xff]  }
 0x1b3   : > { %2505 = vmatmul.mubr.bf16.gmra.mrb[152].mxu1 %v5898_v42  ;;  %5056 = vmatmul.mubr.msk.bf16.gmra.mrb[52].mxu0 %vm2020_vm1, %v5899_v43 }
 0x1b4   : > { %2512 = vmatprep.mubr.bf16.mxu1 %v5900_v46  ;;  %5059 = vmatprep.mubr.msk.bf16.mxu0 %vm6116_vm0, %v7058_v39  ;;  %v5922_v46 = vld [vmem:[%s6270_s20 + $0x6e0] ss:$20 sps:$4 sm:$0xff]  }
 0x1b6   : > { %v6584_v49 = vpop.f32.mrb[48].mxu1 }
 0x1b7   : > { %v2300_v50 = vpop.f32.mrb[49].mxu1 }
 0x1b8   : > { %v6588_v55 = vpop.f32.mrb[50].mxu1 }
 0x1b9   : > { %v2303_v57 = vpop.f32.mrb[51].mxu1 }
 0x1bb   : > { %2513 = vmatmul.mubr.bf16.gmra.mrb[156].mxu1 %v5902_v52  ;;  %5060 = vmatmul.mubr.msk.bf16.gmra.mrb[56].mxu0 %vm2020_vm1, %v5903_v53  ;;  %v5924_v52 = vld [vmem:[%s6270_s20 + $0x70c] ss:$20 sps:$4 sm:$0xff]  }
 0x1bc   : > { %2520 = vmatprep.mubr.bf16.mxu1 %v5904_v56  ;;  %5063 = vmatprep.mubr.msk.bf16.mxu0 %vm6116_vm0, %v7058_v39 }
 0x1be   : > { %v6594_v59 = vpop.f32.mrb[52].mxu1 }
 0x1bf   : > { %v2308_v60 = vpop.f32.mrb[53].mxu1 }
 0x1c0   : > { %v6598_v1 = vpop.f32.mrb[54].mxu1  ;;  %v5926_v60 = vld [vmem:[%s6270_s20 + $0x708] ss:$20 sps:$4 sm:$0xff]  }
 0x1c1   : > { %v2311_v4 = vpop.f32.mrb[55].mxu1 }
 0x1c3   : > { %2521 = vmatmul.mubr.bf16.gmra.mrb[160].mxu1 %v5906_v62  ;;  %5064 = vmatmul.mubr.msk.bf16.gmra.mrb[60].mxu0 %vm2020_vm1, %v5907_v63  ;;  %v5927_v62 = vld [vmem:[%s6270_s20 + $0x330] ss:$20 sps:$4 sm:$0xff]  }
 0x1c4   : > { %2528 = vmatprep.mubr.bf16.mxu1 %v5908_v3  ;;  %5067 = vmatprep.mubr.msk.bf16.mxu0 %vm6116_vm0, %v7058_v39  ;;  %v5928_v3 = vld [vmem:[%s6270_s20 + $0x734] ss:$20 sps:$4 sm:$0xff]  }
 0x1c6   : > { %v6604_v6 = vpop.f32.mrb[56].mxu1 }
 0x1c7   : > { %v2316_v7 = vpop.f32.mrb[57].mxu1 }
 0x1c8   : > { %v6608_v11 = vpop.f32.mrb[58].mxu1 }
 0x1c9   : > { %v2319_v14 = vpop.f32.mrb[59].mxu1 }
 0x1cb   : > { %2529 = vmatmul.mubr.bf16.gmra.mrb[164].mxu1 %v5910_v8  ;;  %5068 = vmatmul.mubr.msk.bf16.gmra.mrb[64].mxu0 %vm2020_vm1, %v5911_v10  ;;  %v5930_v10 = vld [vmem:[%s6270_s20 + $0x730] ss:$20 sps:$4 sm:$0xff]  }
 0x1cc   : > { %2536 = vmatprep.mubr.bf16.mxu1 %v5912_v13  ;;  %5071 = vmatprep.mubr.msk.bf16.mxu0 %vm6116_vm0, %v7058_v39  ;;  %v5931_v13 = vld [vmem:[%s6270_s20 + $0x358] ss:$20 sps:$4 sm:$0xff]  }
 0x1ce   : > { %v6614_v15 = vpop.f32.mrb[60].mxu1 }
 0x1cf   : > { %v2324_v0 = vpop.f32.mrb[61].mxu1 }
 0x1d0   : > { %v6618_v21 = vpop.f32.mrb[62].mxu1  ;;  %v5932_v0 = vld [vmem:[%s6270_s20 + $0x75c] ss:$20 sps:$4 sm:$0xff]  }
 0x1d1   : > { %v2327_v26 = vpop.f32.mrb[63].mxu1 }
 0x1d2   : > { %v5934_v26 = vld [vmem:[%s6270_s20 + $0x758] ss:$20 sps:$4 sm:$0xff]  }
 0x1d3   : > { %2537 = vmatmul.mubr.bf16.gmra.mrb[168].mxu1 %v5914_v17  ;;  %5072 = vmatmul.mubr.msk.bf16.gmra.mrb[68].mxu0 %vm2020_vm1, %v5915_v20 }
 0x1d4   : > { %2544 = vmatprep.mubr.bf16.mxu1 %v5916_v23  ;;  %5075 = vmatprep.mubr.msk.bf16.mxu0 %vm6116_vm0, %v7058_v39 }
 0x1d6   : > { %v6624_v27 = vpop.f32.mrb[64].mxu1 }
 0x1d7   : > { %v2332_v30 = vpop.f32.mrb[65].mxu1 }
 0x1d8   : > { %v6628_v35 = vpop.f32.mrb[66].mxu1  ;;  %v5935_v30 = vld [vmem:[%s6270_s20 + $0x380] ss:$20 sps:$4 sm:$0xff]  }
 0x1d9   : > { %v2335_v41 = vpop.f32.mrb[67].mxu1 }
 0x1db   : > { %2545 = vmatmul.mubr.bf16.gmra.mrb[172].mxu1 %v5918_v31  ;;  %5076 = vmatmul.mubr.msk.bf16.gmra.mrb[72].mxu0 %vm2020_vm1, %v5919_v33  ;;  %v5936_v33 = vld [vmem:[%s6270_s20 + $0x784] ss:$20 sps:$4 sm:$0xff]  }
 0x1dc   : > { %2552 = vmatprep.mubr.bf16.mxu1 %v5920_v37  ;;  %5079 = vmatprep.mubr.msk.bf16.mxu0 %vm6116_vm0, %v7058_v39 }
 0x1de   : > { %v6634_v42 = vpop.f32.mrb[68].mxu1 }
 0x1df   : > { %v2340_v43 = vpop.f32.mrb[69].mxu1 }
 0x1e0   : > { %v6638_v50 = vpop.f32.mrb[70].mxu1 }
 0x1e1   : > { %v2343_v53 = vpop.f32.mrb[71].mxu1 }
 0x1e2   : > { %v5942_v53 = vld [vmem:[%s6270_s20 + $0x3f4] ss:$20 sps:$4 sm:$0xff]  }
 0x1e3   : > { %2553 = vmatmul.mubr.bf16.gmra.mrb[176].mxu1 %v5922_v46  ;;  %5080 = vmatmul.mubr.msk.bf16.gmra.mrb[76].mxu0 %vm2020_vm1, %v5923_v48  ;;  %v5938_v46 = vld [vmem:[%s6270_s20 + $0x780] ss:$20 sps:$4 sm:$0xff]   ;;  %v5939_v48 = vld [vmem:[%s6270_s20 + $0x3a8] ss:$20 sps:$4 sm:$0xff]  }
 0x1e4   : > { %2560 = vmatprep.mubr.bf16.mxu1 %v5924_v52  ;;  %5083 = vmatprep.mubr.msk.bf16.mxu0 %vm6116_vm0, %v7058_v39 }
 0x1e6   : > { %v6644_v56 = vpop.f32.mrb[72].mxu1 }
 0x1e7   : > { %v2348_v57 = vpop.f32.mrb[73].mxu1 }
 0x1e8   : > { %v6648_v63 = vpop.f32.mrb[74].mxu1 }
 0x1e9   : > { %v2351_v4 = vpop.f32.mrb[75].mxu1 }
 0x1ea   : > { %v5943_v4 = vld [vmem:[%s6270_s20 + $0x3d0] ss:$20 sps:$4 sm:$0xff]  }
 0x1eb   : > { %2561 = vmatmul.mubr.bf16.gmra.mrb[180].mxu1 %v5926_v60  ;;  %5084 = vmatmul.mubr.msk.bf16.gmra.mrb[80].mxu0 %vm2020_vm1, %v5927_v62  ;;  %v5940_v62 = vld [vmem:[%s6270_s20 + $0x3f0] ss:$20 sps:$4 sm:$0xff]  }
 0x1ec   : > { %2568 = vmatprep.mubr.bf16.mxu1 %v5928_v3  ;;  %5087 = vmatprep.mubr.msk.bf16.mxu0 %vm6116_vm0, %v7058_v39 }
 0x1ee   : > { %v6654_v7 = vpop.f32.mrb[76].mxu1 }
 0x1ef   : > { %v2356_v8 = vpop.f32.mrb[77].mxu1 }
 0x1f0   : > { %v6658_v14 = vpop.f32.mrb[78].mxu1 }
 0x1f1   : > { %v2359_v17 = vpop.f32.mrb[79].mxu1 }
 0x1f3   : > { %2569 = vmatmul.mubr.bf16.gmra.mrb[184].mxu1 %v5930_v10  ;;  %5088 = vmatmul.mubr.msk.bf16.gmra.mrb[84].mxu0 %vm2020_vm1, %v5931_v13  ;;  %v5944_v10 = vld [vmem:[%s6270_s20 + $0x41c] ss:$20 sps:$4 sm:$0xff]  }
 0x1f4   : > { %2576 = vmatprep.mubr.bf16.mxu1 %v5932_v0  ;;  %5091 = vmatprep.mubr.msk.bf16.mxu0 %vm6116_vm0, %v7058_v39 }
 0x1f6   : > { %v6664_v20 = vpop.f32.mrb[80].mxu1 }
 0x1f7   : > { %v2364_v23 = vpop.f32.mrb[81].mxu1 }
 0x1f8   : > { %v6668_v31 = vpop.f32.mrb[82].mxu1  ;;  %v5946_v23 = vld [vmem:[%s6270_s20 + $0x418] ss:$20 sps:$4 sm:$0xff]  }
 0x1f9   : > { %v2367_v37 = vpop.f32.mrb[83].mxu1 }
 0x1fb   : > { %2577 = vmatmul.mubr.bf16.gmra.mrb[188].mxu1 %v5934_v26  ;;  %5092 = vmatmul.mubr.msk.bf16.gmra.mrb[88].mxu0 %vm2020_vm1, %v5935_v30  ;;  %v5947_v26 = vld [vmem:[%s6270_s20 + $0x3f8] ss:$20 sps:$4 sm:$0xff]  }
 0x1fc   : > { %2584 = vmatprep.mubr.bf16.mxu1 %v5936_v33  ;;  %5095 = vmatprep.mubr.msk.bf16.mxu0 %vm6116_vm0, %v7058_v39  ;;  %v5948_v33 = vld [vmem:[%s6270_s20 + $0x444] ss:$20 sps:$4 sm:$0xff]  }
 0x1fe   : > { %v6674_v41 = vpop.f32.mrb[84].mxu1 }
 0x1ff   : > { %v2372_v43 = vpop.f32.mrb[85].mxu1 }
 0x200   : > { %v6678_v52 = vpop.f32.mrb[86].mxu1 }
 0x201   : > { %v2375_v57 = vpop.f32.mrb[87].mxu1 }
 0x203   : > { %2585 = vmatmul.mubr.bf16.gmra.mrb[192].mxu1 %v5938_v46  ;;  %5096 = vmatmul.mubr.msk.bf16.gmra.mrb[92].mxu0 %vm2020_vm1, %v5939_v48  ;;  %v5950_v48 = vld [vmem:[%s6270_s20 + $0x440] ss:$20 sps:$4 sm:$0xff]  }
 0x204   : > { %2825 = vmatprep.mubr.bf16.mxu1 %v5942_v53  ;;  %5099 = vmatprep.mubr.msk.bf16.mxu0 %vm6116_vm0, %v7058_v39  ;;  %v5951_v53 = vld [vmem:[%s6270_s20 + $0x420] ss:$20 sps:$4 sm:$0xff]  }
 0x206   : > { %v6684_v60 = vpop.f32.mrb[88].mxu1 }
 0x207   : > { %v2380_v3 = vpop.f32.mrb[89].mxu1 }
 0x208   : > { %v6688_v8 = vpop.f32.mrb[90].mxu1 }
 0x209   : > { %v2383_v13 = vpop.f32.mrb[91].mxu1 }
 0x20b   : > { %2826 = vmatmul.mubr.bf16.vlgmr.msra.gmra.mrb[100].mxu1 %v5940_v62  ;;  %5100 = vmatmul.mubr.msk.bf16.gmra.mrb[96].mxu0 %vm2020_vm1, %v5943_v4  ;;  %v5952_v62 = vld [vmem:[%s6270_s20 + $0x46c] ss:$20 sps:$4 sm:$0xff]  }
 0x20c   : > { %2833 = vmatprep.mubr.bf16.mxu1 %v5944_v10  ;;  %5103 = vmatprep.mubr.msk.bf16.mxu0 %vm6116_vm0, %v7058_v39  ;;  %v6711_v4 = vld [vmem:[#allocation4] ss:$0 sm:$0xff] }
 0x20d   : > { %v2203_v10 = vadd.f32 %v6711_v4, %v6464_v18  ;;  %v7065_v18 = vmov 0.0  }
 0x20e   : > { %v6694_v0 = vpop.f32.mrb[92].mxu1 }
 0x20f   : > { %v2388_v17 = vpop.f32.mrb[93].mxu1 }
 0x210   : > { %v6698_v30 = vpop.f32.mrb[94].mxu1  ;;  %v5954_v17 = vld [vmem:[%s6270_s20 + $0x468] ss:$20 sps:$4 sm:$0xff]  }
 0x211   : > { %v2391_v37 = vpop.f32.mrb[95].mxu1 }
 0x212   : > { %v5955_v37 = vld [vmem:[%s6270_s20 + $0x448] ss:$20 sps:$4 sm:$0xff]  }
 0x213   : > { %2834 = vmatmul.mubr.bf16.gmra.mrb[104].mxu1 %v5946_v23  ;;  %5104 = vmatmul.mubr.msk.bf16.gmra.mrb[100].mxu0 %vm2020_vm1, %v5947_v26  ;;  %v2206_v23 = vadd.f32 %v6711_v4, %v6468_v22  ;;  %v2211_v22 = vadd.f32 %v6711_v4, %v6474_v25 }
 0x214   : > { %2841 = vmatprep.mubr.bf16.mxu1 %v5948_v33  ;;  %5107 = vmatprep.mubr.msk.bf16.mxu0 %vm6116_vm0, %v7058_v39 }
 0x216   : > { %v6704_v43 = vpop.f32.mrb[96].mxu1 }
 0x217   : > { %v2396_v46 = vpop.f32.mrb[97].mxu1 }
 0x218   : > { %v6708_v57 = vpop.f32.mrb[98].mxu1  ;;  %v5956_v46 = vld [vmem:[%s6270_s20 + $0x494] ss:$20 sps:$4 sm:$0xff]  }
 0x219   : > { %v2399_v3 = vpop.f32.mrb[99].mxu1 }
 0x21b   : > { %2842 = vmatmul.mubr.bf16.gmra.mrb[108].mxu1 %v5950_v48  ;;  %5108 = vmatmul.mubr.msk.bf16.gmra.mrb[104].mxu0 %vm2020_vm1, %v5951_v53 }
 0x21c   : > { %2849 = vmatprep.mubr.bf16.mxu1 %v5952_v62  ;;  %5111 = vmatprep.mubr.msk.bf16.mxu0 %vm6116_vm0, %v7058_v39 }
 0x21e   : > { %v3052_v13 = vpop.f32.mrb[0].mxu0 }
 0x21f   : > { %v5232_v26 = vadd.f32 %v3052_v13, %v2203_v10  ;;  %v5005_v33 = vpop.f32.mrb[1].mxu0 }
 0x220   : > { %v3055_v48 = vpop.f32.mrb[2].mxu0 }
 0x221   : > { %v5234_v53 = vadd.f32 %v3055_v48, %v2206_v23  ;;  %v5006_v62 = vpop.f32.mrb[3].mxu0  ;;  %v3443_v3 = vmax.f32 %v5232_v26, 0.0  ;;  %v2214_v23 = vadd.f32 %v6711_v4, %v6478_v29  ;;  %v2219_v29 = vadd.f32 %v6711_v4, %v6484_v32 }
 0x223   : > { %2850 = vmatmul.mubr.bf16.gmra.mrb[112].mxu1 %v5954_v17  ;;  %v3444_v39 = vmax.f32 %v5234_v53, 0.0  ;;  %5112 = vmatmul.mubr.msk.bf16.gmra.mrb[108].mxu0 %vm2020_vm1, %v5955_v37  ;;  %v5958_v17 = vld [vmem:[%s6270_s20 + $0x490] ss:$20 sps:$4 sm:$0xff]  }
 0x224   : > { %2857 = vmatprep.mubr.bf16.mxu1 %v5956_v46  ;;  %5115 = vmatprep.mubr.msk.bf16.mxu0 %vm6116_vm0, %v7065_v18  ;;  %v5959_v37 = vld [vmem:[%s6270_s20 + $0x470] ss:$20 sps:$4 sm:$0xff]  }
 0x225   : > { %v4652_v10 = vpack.c.bf16 %v3444_v39, %v3443_v3  ;;  %v5960_v46 = vld [vmem:[%s6270_s20 + $0x4bc] ss:$20 sps:$4 sm:$0xff]  }
 0x226   : > { %v3060_v13 = vpop.f32.mrb[4].mxu0 }
 0x227   : > { %4653 = vst [vmem:[%s6728_s26] sm:$0xff] %v4652_v10   ;;  %v5236_v26 = vadd.f32 %v3060_v13, %v2211_v22  ;;  %v5009_v33 = vpop.f32.mrb[5].mxu0  ;;  %v5962_v10 = vld [vmem:[%s6270_s20 + $0x4b8] ss:$20 sps:$4 sm:$0xff]   ;;  %v2222_v13 = vadd.f32 %v6711_v4, %v6488_v36  ;;  %v2227_v36 = vadd.f32 %v6711_v4, %v6494_v40 }
 0x228   : > { %v3063_v48 = vpop.f32.mrb[6].mxu0  ;;  %v5964_v33 = vld [vmem:[%s6270_s20 + $0x4e4] ss:$20 sps:$4 sm:$0xff]  }
 0x229   : > { %v5238_v53 = vadd.f32 %v3063_v48, %v2214_v23  ;;  %v5010_v62 = vpop.f32.mrb[7].mxu0  ;;  %v3445_v25 = vmax.f32 %v5236_v26, 0.0  ;;  %v5963_v26 = vld [vmem:[%s6270_s20 + $0x498] ss:$20 sps:$4 sm:$0xff]  }
 0x22b   : > { %2858 = vmatmul.mubr.bf16.gmra.mrb[116].mxu1 %v5958_v17  ;;  %v3446_v39 = vmax.f32 %v5238_v53, 0.0  ;;  %5116 = vmatmul.mubr.msk.bf16.gmra.mrb[112].mxu0 %vm2020_vm1, %v5959_v37 }
 0x22c   : > { %2865 = vmatprep.mubr.bf16.mxu1 %v5960_v46  ;;  %5119 = vmatprep.mubr.msk.bf16.mxu0 %vm6116_vm0, %v7065_v18 }
 0x22d   : > { %v4657_v3 = vpack.c.bf16 %v3446_v39, %v3445_v25  ;;  %v5966_v39 = vld [vmem:[%s6270_s20 + $0x4e0] ss:$20 sps:$4 sm:$0xff]  }
 0x22e   : > { %v3068_v22 = vpop.f32.mrb[8].mxu0 }
 0x22f   : > { %4894 = vst [vmem:[%s6728_s26 + $0x8] sm:$0xff] %v4657_v3   ;;  %v5240_v23 = vadd.f32 %v3068_v22, %v2219_v29  ;;  %v5013_v17 = vpop.f32.mrb[9].mxu0  ;;  %v2230_v29 = vadd.f32 %v6711_v4, %v6498_v44  ;;  %v2235_v44 = vadd.f32 %v6711_v4, %v6504_v47 }
 0x230   : > { %v3071_v37 = vpop.f32.mrb[10].mxu0 }
 0x231   : > { %v5242_v46 = vadd.f32 %v3071_v37, %v2222_v13  ;;  %v5014_v48 = vpop.f32.mrb[11].mxu0  ;;  %v3447_v32 = vmax.f32 %v5240_v23, 0.0  ;;  %v5968_v13 = vld [vmem:[%s6270_s20 + $0x50c] ss:$20 sps:$4 sm:$0xff]  }
 0x232   : > { %v5970_v48 = vld [vmem:[%s6270_s20 + $0x508] ss:$20 sps:$4 sm:$0xff]  }
 0x233   : > { %2866 = vmatmul.mubr.bf16.gmra.mrb[120].mxu1 %v5962_v10  ;;  %v3448_v53 = vmax.f32 %v5242_v46, 0.0  ;;  %5120 = vmatmul.mubr.msk.bf16.gmra.mrb[116].mxu0 %vm2020_vm1, %v5963_v26  ;;  %v5967_v10 = vld [vmem:[%s6270_s20 + $0x4c0] ss:$20 sps:$4 sm:$0xff]  }
 0x234   : > { %2873 = vmatprep.mubr.bf16.mxu1 %v5964_v33  ;;  %5123 = vmatprep.mubr.msk.bf16.mxu0 %vm6116_vm0, %v7065_v18 }
 0x235   : > { %v4662_v62 = vpack.c.bf16 %v3448_v53, %v3447_v32  ;;  %v2238_v32 = vadd.f32 %v6711_v4, %v6508_v51  ;;  %v2243_v51 = vadd.f32 %v6711_v4, %v6514_v54 }
 0x236   : > { %v3076_v25 = vpop.f32.mrb[12].mxu0 }
 0x237   : > { %4895 = vst [vmem:[%s6728_s26 + $0x10] sm:$0xff] %v4662_v62   ;;  %v5244_v3 = vadd.f32 %v3076_v25, %v2227_v36  ;;  %v5017_v22 = vpop.f32.mrb[13].mxu0  ;;  %v5971_v62 = vld [vmem:[%s6270_s20 + $0x4e8] ss:$20 sps:$4 sm:$0xff]  }
 0x238   : > { %v3079_v23 = vpop.f32.mrb[14].mxu0  ;;  %v5972_v25 = vld [vmem:[%s6270_s20 + $0x534] ss:$20 sps:$4 sm:$0xff]  }
 0x239   : > { %v5246_v17 = vadd.f32 %v3079_v23, %v2230_v29  ;;  %v5018_v26 = vpop.f32.mrb[15].mxu0  ;;  %v3449_v40 = vmax.f32 %v5244_v3, 0.0  ;;  %v5974_v23 = vld [vmem:[%s6270_s20 + $0x530] ss:$20 sps:$4 sm:$0xff]  }
 0x23b   : > { %2874 = vmatmul.mubr.bf16.gmra.mrb[124].mxu1 %v5966_v39  ;;  %v3450_v33 = vmax.f32 %v5246_v17, 0.0  ;;  %5124 = vmatmul.mubr.msk.bf16.gmra.mrb[120].mxu0 %vm2020_vm1, %v5967_v10  ;;  %v2246_v17 = vadd.f32 %v6711_v4, %v6518_v58  ;;  %v2251_v58 = vadd.f32 %v6711_v4, %v6524_v61 }
 0x23c   : > { %2881 = vmatprep.mubr.bf16.mxu1 %v5968_v13  ;;  %5127 = vmatprep.mubr.msk.bf16.mxu0 %vm6116_vm0, %v7065_v18 }
 0x23d   : > { %v4667_v37 = vpack.c.bf16 %v3450_v33, %v3449_v40  ;;  %v5975_v33 = vld [vmem:[%s6270_s20 + $0x510] ss:$20 sps:$4 sm:$0xff]  }
 0x23e   : > { %v3084_v46 = vpop.f32.mrb[16].mxu0 }
 0x23f   : > { %4896 = vst [vmem:[%s6728_s26 + $0x18] sm:$0xff] %v4667_v37   ;;  %v5248_v53 = vadd.f32 %v3084_v46, %v2235_v44  ;;  %v5021_v36 = vpop.f32.mrb[17].mxu0  ;;  %v5976_v44 = vld [vmem:[%s6270_s20 + $0x55c] ss:$20 sps:$4 sm:$0xff]  }
 0x240   : > { %v3087_v39 = vpop.f32.mrb[18].mxu0 }
 0x241   : > { %v5250_v29 = vadd.f32 %v3087_v39, %v2238_v32  ;;  %v5022_v3 = vpop.f32.mrb[19].mxu0  ;;  %v3451_v47 = vmax.f32 %v5248_v53, 0.0 }
 0x242   : > { %v5979_v3 = vld [vmem:[%s6270_s20 + $0x538] ss:$20 sps:$4 sm:$0xff]  }
 0x243   : > { %2882 = vmatmul.mubr.bf16.gmra.mrb[128].mxu1 %v5970_v48  ;;  %v3452_v22 = vmax.f32 %v5250_v29, 0.0  ;;  %5128 = vmatmul.mubr.msk.bf16.gmra.mrb[124].mxu0 %vm2020_vm1, %v5971_v62  ;;  %v5978_v62 = vld [vmem:[%s6270_s20 + $0x558] ss:$20 sps:$4 sm:$0xff]  }
 0x244   : > { %2889 = vmatprep.mubr.bf16.mxu1 %v5972_v25  ;;  %5131 = vmatprep.mubr.msk.bf16.mxu0 %vm6116_vm0, %v7065_v18  ;;  %v2254_v25 = vadd.f32 %v6711_v4, %v6528_v2  ;;  %v2259_v2 = vadd.f32 %v6711_v4, %v6534_v5 }
 0x245   : > { %v4672_v10 = vpack.c.bf16 %v3452_v22, %v3451_v47  ;;  %v5980_v47 = vld [vmem:[%s6270_s20 + $0x584] ss:$20 sps:$4 sm:$0xff]  }
 0x246   : > { %v3092_v13 = vpop.f32.mrb[20].mxu0 }
 0x247   : > { %4897 = vst [vmem:[%s6728_s26 + $0x20] sm:$0xff] %v4672_v10   ;;  %v5252_v26 = vadd.f32 %v3092_v13, %v2243_v51  ;;  %v5025_v40 = vpop.f32.mrb[21].mxu0 }
 0x248   : > { %v3095_v37 = vpop.f32.mrb[22].mxu0  ;;  %v2262_v40 = vadd.f32 %v6711_v4, %v6538_v9  ;;  %v2267_v9 = vadd.f32 %v6711_v4, %v6544_v12 }
 0x249   : > { %v5254_v46 = vadd.f32 %v3095_v37, %v2246_v17  ;;  %v5026_v48 = vpop.f32.mrb[23].mxu0  ;;  %v3453_v54 = vmax.f32 %v5252_v26, 0.0  ;;  %v5982_v26 = vld [vmem:[%s6270_s20 + $0x580] ss:$20 sps:$4 sm:$0xff]  }
 0x24a   : > { %v5983_v37 = vld [vmem:[%s6270_s20 + $0x560] ss:$20 sps:$4 sm:$0xff]  }
 0x24b   : > { %2890 = vmatmul.mubr.bf16.gmra.mrb[132].mxu1 %v5974_v23  ;;  %v3454_v32 = vmax.f32 %v5254_v46, 0.0  ;;  %5132 = vmatmul.mubr.msk.bf16.gmra.mrb[128].mxu0 %vm2020_vm1, %v5975_v33  ;;  %v5984_v46 = vld [vmem:[%s6270_s20 + $0x5ac] ss:$20 sps:$4 sm:$0xff]  }
 0x24c   : > { %2897 = vmatprep.mubr.bf16.mxu1 %v5976_v44  ;;  %5135 = vmatprep.mubr.msk.bf16.mxu0 %vm6116_vm0, %v7065_v18 }
 0x24d   : > { %v4677_v53 = vpack.c.bf16 %v3454_v32, %v3453_v54 }
 0x24e   : > { %v3100_v36 = vpop.f32.mrb[24].mxu0 }
 0x24f   : > { %4898 = vst [vmem:[%s6728_s26 + $0x28] sm:$0xff] %v4677_v53   ;;  %v5256_v39 = vadd.f32 %v3100_v36, %v2251_v58  ;;  %v5029_v29 = vpop.f32.mrb[25].mxu0 }
 0x250   : > { %v3103_v22 = vpop.f32.mrb[26].mxu0 }
 0x251   : > { %v5258_v51 = vadd.f32 %v3103_v22, %v2254_v25  ;;  %v5030_v10 = vpop.f32.mrb[27].mxu0  ;;  %v3455_v61 = vmax.f32 %v5256_v39, 0.0  ;;  %v2270_v25 = vadd.f32 %v6711_v4, %v6548_v16  ;;  %v2275_v16 = vadd.f32 %v6711_v4, %v6554_v19 }
 0x253   : > { %2898 = vmatmul.mubr.bf16.gmra.mrb[136].mxu1 %v5978_v62  ;;  %v3456_v13 = vmax.f32 %v5258_v51, 0.0  ;;  %5136 = vmatmul.mubr.msk.bf16.gmra.mrb[132].mxu0 %vm2020_vm1, %v5979_v3  ;;  %v5986_v62 = vld [vmem:[%s6270_s20 + $0x5a8] ss:$20 sps:$4 sm:$0xff]  }
 0x254   : > { %2905 = vmatprep.mubr.bf16.mxu1 %v5980_v47  ;;  %5139 = vmatprep.mubr.msk.bf16.mxu0 %vm6116_vm0, %v7065_v18  ;;  %v5987_v3 = vld [vmem:[%s6270_s20 + $0x588] ss:$20 sps:$4 sm:$0xff]  }
 0x255   : > { %v4682_v23 = vpack.c.bf16 %v3456_v13, %v3455_v61  ;;  %v5988_v47 = vld [vmem:[%s6270_s20 + $0x5d4] ss:$20 sps:$4 sm:$0xff]  }
 0x256   : > { %v3108_v17 = vpop.f32.mrb[28].mxu0 }
 0x257   : > { %4899 = vst [vmem:[%s6728_s26 + $0x30] sm:$0xff] %v4682_v23   ;;  %v5260_v33 = vadd.f32 %v3108_v17, %v2259_v2  ;;  %v5033_v44 = vpop.f32.mrb[29].mxu0  ;;  %v5990_v23 = vld [vmem:[%s6270_s20 + $0x5d0] ss:$20 sps:$4 sm:$0xff]   ;;  %v2278_v17 = vadd.f32 %v6711_v4, %v6558_v24  ;;  %v2283_v24 = vadd.f32 %v6711_v4, %v6564_v28 }
 0x258   : > { %v3111_v48 = vpop.f32.mrb[30].mxu0  ;;  %v5992_v44 = vld [vmem:[%s6270_s20 + $0x5fc] ss:$20 sps:$4 sm:$0xff]  }
 0x259   : > { %v5262_v54 = vadd.f32 %v3111_v48, %v2262_v40  ;;  %v5034_v32 = vpop.f32.mrb[31].mxu0  ;;  %v3457_v5 = vmax.f32 %v5260_v33, 0.0  ;;  %v5991_v33 = vld [vmem:[%s6270_s20 + $0x5b0] ss:$20 sps:$4 sm:$0xff]  }
 0x25b   : > { %2906 = vmatmul.mubr.bf16.gmra.mrb[140].mxu1 %v5982_v26  ;;  %v3458_v58 = vmax.f32 %v5262_v54, 0.0  ;;  %5140 = vmatmul.mubr.msk.bf16.gmra.mrb[136].mxu0 %vm2020_vm1, %v5983_v37 }
 0x25c   : > { %2913 = vmatprep.mubr.bf16.mxu1 %v5984_v46  ;;  %5143 = vmatprep.mubr.msk.bf16.mxu0 %vm6116_vm0, %v7065_v18 }
 0x25d   : > { %v4687_v53 = vpack.c.bf16 %v3458_v58, %v3457_v5  ;;  %v5994_v58 = vld [vmem:[%s6270_s20 + $0x5f8] ss:$20 sps:$4 sm:$0xff]  }
 0x25e   : > { %v3116_v36 = vpop.f32.mrb[32].mxu0 }
 0x25f   : > { %4900 = vst [vmem:[%s6728_s26 + $0x38] sm:$0xff] %v4687_v53   ;;  %v5264_v39 = vadd.f32 %v3116_v36, %v2267_v9  ;;  %v5037_v29 = vpop.f32.mrb[33].mxu0  ;;  %v2286_v9 = vadd.f32 %v6711_v4, %v6568_v34  ;;  %v2291_v34 = vadd.f32 %v6711_v4, %v6574_v38 }
 0x260   : > { %v3119_v22 = vpop.f32.mrb[34].mxu0 }
 0x261   : > { %v5266_v51 = vadd.f32 %v3119_v22, %v2270_v25  ;;  %v5038_v10 = vpop.f32.mrb[35].mxu0  ;;  %v3459_v12 = vmax.f32 %v5264_v39, 0.0  ;;  %v5996_v25 = vld [vmem:[%s6270_s20 + $0x624] ss:$20 sps:$4 sm:$0xff]  }
 0x262   : > { %v5998_v10 = vld [vmem:[%s6270_s20 + $0x620] ss:$20 sps:$4 sm:$0xff]  }
 0x263   : > { %2914 = vmatmul.mubr.bf16.gmra.mrb[144].mxu1 %v5986_v62  ;;  %v3460_v61 = vmax.f32 %v5266_v51, 0.0  ;;  %5144 = vmatmul.mubr.msk.bf16.gmra.mrb[140].mxu0 %vm2020_vm1, %v5987_v3  ;;  %v5995_v62 = vld [vmem:[%s6270_s20 + $0x5d8] ss:$20 sps:$4 sm:$0xff]  }
 0x264   : > { %2921 = vmatprep.mubr.bf16.mxu1 %v5988_v47  ;;  %5147 = vmatprep.mubr.msk.bf16.mxu0 %vm6116_vm0, %v7065_v18 }
 0x265   : > { %v4692_v13 = vpack.c.bf16 %v3460_v61, %v3459_v12  ;;  %v2294_v12 = vadd.f32 %v6711_v4, %v6578_v45  ;;  %v2299_v45 = vadd.f32 %v6711_v4, %v6584_v49 }
 0x266   : > { %v3124_v2 = vpop.f32.mrb[36].mxu0 }
 0x267   : > { %4901 = vst [vmem:[%s6728_s26 + $0x40] sm:$0xff] %v4692_v13   ;;  %v5268_v26 = vadd.f32 %v3124_v2, %v2275_v16  ;;  %v5041_v40 = vpop.f32.mrb[37].mxu0  ;;  %v5999_v13 = vld [vmem:[%s6270_s20 + $0x600] ss:$20 sps:$4 sm:$0xff]  }
 0x268   : > { %v3127_v37 = vpop.f32.mrb[38].mxu0  ;;  %v6000_v2 = vld [vmem:[%s6270_s20 + $0x64c] ss:$20 sps:$4 sm:$0xff]  }
 0x269   : > { %v5270_v46 = vadd.f32 %v3127_v37, %v2278_v17  ;;  %v5042_v48 = vpop.f32.mrb[39].mxu0  ;;  %v3461_v19 = vmax.f32 %v5268_v26, 0.0  ;;  %v6002_v37 = vld [vmem:[%s6270_s20 + $0x648] ss:$20 sps:$4 sm:$0xff]  }
 0x26b   : > { %2922 = vmatmul.mubr.bf16.gmra.mrb[148].mxu1 %v5990_v23  ;;  %v3462_v54 = vmax.f32 %v5270_v46, 0.0  ;;  %5148 = vmatmul.mubr.msk.bf16.gmra.mrb[144].mxu0 %vm2020_vm1, %v5991_v33  ;;  %v2302_v46 = vadd.f32 %v6711_v4, %v6588_v55  ;;  %v2307_v55 = vadd.f32 %v6711_v4, %v6594_v59 }
 0x26c   : > { %2929 = vmatprep.mubr.bf16.mxu1 %v5992_v44  ;;  %5151 = vmatprep.mubr.msk.bf16.mxu0 %vm6116_vm0, %v7065_v18 }
 0x26d   : > { %v4697_v32 = vpack.c.bf16 %v3462_v54, %v3461_v19  ;;  %v6003_v54 = vld [vmem:[%s6270_s20 + $0x628] ss:$20 sps:$4 sm:$0xff]  }
 0x26e   : > { %v3132_v5 = vpop.f32.mrb[40].mxu0 }
 0x26f   : > { %4902 = vst [vmem:[%s6728_s26 + $0x48] sm:$0xff] %v4697_v32   ;;  %v5272_v53 = vadd.f32 %v3132_v5, %v2283_v24  ;;  %v5045_v36 = vpop.f32.mrb[41].mxu0  ;;  %v6004_v24 = vld [vmem:[%s6270_s20 + $0x674] ss:$20 sps:$4 sm:$0xff]  }
 0x270   : > { %v3135_v39 = vpop.f32.mrb[42].mxu0 }
 0x271   : > { %v5274_v29 = vadd.f32 %v3135_v39, %v2286_v9  ;;  %v5046_v3 = vpop.f32.mrb[43].mxu0  ;;  %v3463_v28 = vmax.f32 %v5272_v53, 0.0 }
 0x272   : > { %v6007_v3 = vld [vmem:[%s6270_s20 + $0x650] ss:$20 sps:$4 sm:$0xff]  }
 0x273   : > { %2930 = vmatmul.mubr.bf16.gmra.mrb[152].mxu1 %v5994_v58  ;;  %v3464_v47 = vmax.f32 %v5274_v29, 0.0  ;;  %5152 = vmatmul.mubr.msk.bf16.gmra.mrb[148].mxu0 %vm2020_vm1, %v5995_v62  ;;  %v6006_v62 = vld [vmem:[%s6270_s20 + $0x670] ss:$20 sps:$4 sm:$0xff]  }
 0x274   : > { %2937 = vmatprep.mubr.bf16.mxu1 %v5996_v25  ;;  %5155 = vmatprep.mubr.msk.bf16.mxu0 %vm6116_vm0, %v7065_v18  ;;  %v2310_v25 = vadd.f32 %v6711_v4, %v6598_v1  ;;  %v2315_v1 = vadd.f32 %v6711_v4, %v6604_v6 }
 0x275   : > { %v4702_v22 = vpack.c.bf16 %v3464_v47, %v3463_v28  ;;  %v6008_v28 = vld [vmem:[%s6270_s20 + $0x69c] ss:$20 sps:$4 sm:$0xff]  }
 0x276   : > { %v3140_v51 = vpop.f32.mrb[44].mxu0 }
 0x277   : > { %4903 = vst [vmem:[%s6728_s26 + $0x50] sm:$0xff] %v4702_v22   ;;  %v5276_v61 = vadd.f32 %v3140_v51, %v2291_v34  ;;  %v5049_v16 = vpop.f32.mrb[45].mxu0 }
 0x278   : > { %v3143_v23 = vpop.f32.mrb[46].mxu0  ;;  %v2318_v16 = vadd.f32 %v6711_v4, %v6608_v11  ;;  %v2323_v11 = vadd.f32 %v6711_v4, %v6614_v15 }
 0x279   : > { %v5278_v17 = vadd.f32 %v3143_v23, %v2294_v12  ;;  %v5050_v26 = vpop.f32.mrb[47].mxu0  ;;  %v3465_v38 = vmax.f32 %v5276_v61, 0.0  ;;  %v6010_v61 = vld [vmem:[%s6270_s20 + $0x698] ss:$20 sps:$4 sm:$0xff]  }
 0x27a   : > { %v6011_v23 = vld [vmem:[%s6270_s20 + $0x678] ss:$20 sps:$4 sm:$0xff]  }
 0x27b   : > { %2938 = vmatmul.mubr.bf16.gmra.mrb[156].mxu1 %v5998_v10  ;;  %v3466_v40 = vmax.f32 %v5278_v17, 0.0  ;;  %5156 = vmatmul.mubr.msk.bf16.gmra.mrb[152].mxu0 %vm2020_vm1, %v5999_v13  ;;  %v6012_v17 = vld [vmem:[%s6270_s20 + $0x6c4] ss:$20 sps:$4 sm:$0xff]  }
 0x27c   : > { %2945 = vmatprep.mubr.bf16.mxu1 %v6000_v2  ;;  %5159 = vmatprep.mubr.msk.bf16.mxu0 %vm6116_vm0, %v7065_v18 }
 0x27d   : > { %v4707_v33 = vpack.c.bf16 %v3466_v40, %v3465_v38 }
 0x27e   : > { %v3148_v44 = vpop.f32.mrb[48].mxu0 }
 0x27f   : > { %4904 = vst [vmem:[%s6728_s26 + $0x58] sm:$0xff] %v4707_v33   ;;  %v5280_v48 = vadd.f32 %v3148_v44, %v2299_v45  ;;  %v5053_v19 = vpop.f32.mrb[49].mxu0 }
 0x280   : > { %v3151_v32 = vpop.f32.mrb[50].mxu0 }
 0x281   : > { %v5282_v5 = vadd.f32 %v3151_v32, %v2302_v46  ;;  %v5054_v58 = vpop.f32.mrb[51].mxu0  ;;  %v3467_v49 = vmax.f32 %v5280_v48, 0.0  ;;  %v2326_v46 = vadd.f32 %v6711_v4, %v6618_v21  ;;  %v2331_v21 = vadd.f32 %v6711_v4, %v6624_v27 }
 0x283   : > { %2946 = vmatmul.mubr.bf16.gmra.mrb[160].mxu1 %v6002_v37  ;;  %v3468_v9 = vmax.f32 %v5282_v5, 0.0  ;;  %5160 = vmatmul.mubr.msk.bf16.gmra.mrb[156].mxu0 %vm2020_vm1, %v6003_v54  ;;  %v6014_v37 = vld [vmem:[%s6270_s20 + $0x6c0] ss:$20 sps:$4 sm:$0xff]  }
 0x284   : > { %2953 = vmatprep.mubr.bf16.mxu1 %v6004_v24  ;;  %5163 = vmatprep.mubr.msk.bf16.mxu0 %vm6116_vm0, %v7065_v18  ;;  %v6015_v54 = vld [vmem:[%s6270_s20 + $0x6a0] ss:$20 sps:$4 sm:$0xff]  }
 0x285   : > { %v4712_v53 = vpack.c.bf16 %v3468_v9, %v3467_v49  ;;  %v6016_v24 = vld [vmem:[%s6270_s20 + $0x6ec] ss:$20 sps:$4 sm:$0xff]  }
 0x286   : > { %v3156_v36 = vpop.f32.mrb[52].mxu0 }
 0x287   : > { %4905 = vst [vmem:[%s6728_s26 + $0x60] sm:$0xff] %v4712_v53   ;;  %v5284_v39 = vadd.f32 %v3156_v36, %v2307_v55  ;;  %v5057_v29 = vpop.f32.mrb[53].mxu0  ;;  %v6018_v53 = vld [vmem:[%s6270_s20 + $0x6e8] ss:$20 sps:$4 sm:$0xff]   ;;  %v2334_v36 = vadd.f32 %v6711_v4, %v6628_v35  ;;  %v2339_v35 = vadd.f32 %v6711_v4, %v6634_v42 }
 0x288   : > { %v3159_v47 = vpop.f32.mrb[54].mxu0  ;;  %v6020_v29 = vld [vmem:[%s6270_s20 + $0x714] ss:$20 sps:$4 sm:$0xff]  }
 0x289   : > { %v5286_v34 = vadd.f32 %v3159_v47, %v2310_v25  ;;  %v5058_v22 = vpop.f32.mrb[55].mxu0  ;;  %v3469_v59 = vmax.f32 %v5284_v39, 0.0  ;;  %v6019_v39 = vld [vmem:[%s6270_s20 + $0x6c8] ss:$20 sps:$4 sm:$0xff]  }
 0x28b   : > { %2954 = vmatmul.mubr.bf16.gmra.mrb[164].mxu1 %v6006_v62  ;;  %v3470_v51 = vmax.f32 %v5286_v34, 0.0  ;;  %5164 = vmatmul.mubr.msk.bf16.gmra.mrb[160].mxu0 %vm2020_vm1, %v6007_v3 }
 0x28c   : > { %2961 = vmatprep.mubr.bf16.mxu1 %v6008_v28  ;;  %5167 = vmatprep.mubr.msk.bf16.mxu0 %vm6116_vm0, %v7065_v18 }
 0x28d   : > { %v4717_v10 = vpack.c.bf16 %v3470_v51, %v3469_v59  ;;  %v6022_v51 = vld [vmem:[%s6270_s20 + $0x710] ss:$20 sps:$4 sm:$0xff]  }
 0x28e   : > { %v3164_v12 = vpop.f32.mrb[56].mxu0 }
 0x28f   : > { %4906 = vst [vmem:[%s6728_s26 + $0x68] sm:$0xff] %v4717_v10   ;;  %v5288_v13 = vadd.f32 %v3164_v12, %v2315_v1  ;;  %v5061_v2 = vpop.f32.mrb[57].mxu0  ;;  %v2342_v1 = vadd.f32 %v6711_v4, %v6638_v50  ;;  %v2347_v50 = vadd.f32 %v6711_v4, %v6644_v56 }
 0x290   : > { %v3167_v26 = vpop.f32.mrb[58].mxu0 }
 0x291   : > { %v5290_v38 = vadd.f32 %v3167_v26, %v2318_v16  ;;  %v5062_v40 = vpop.f32.mrb[59].mxu0  ;;  %v3471_v6 = vmax.f32 %v5288_v13, 0.0  ;;  %v6024_v16 = vld [vmem:[%s6270_s20 + $0x73c] ss:$20 sps:$4 sm:$0xff]  }
 0x292   : > { %v6026_v40 = vld [vmem:[%s6270_s20 + $0x738] ss:$20 sps:$4 sm:$0xff]  }
 0x293   : > { %2962 = vmatmul.mubr.bf16.gmra.mrb[168].mxu1 %v6010_v61  ;;  %v3472_v45 = vmax.f32 %v5290_v38, 0.0  ;;  %5168 = vmatmul.mubr.msk.bf16.gmra.mrb[164].mxu0 %vm2020_vm1, %v6011_v23  ;;  %v6023_v61 = vld [vmem:[%s6270_s20 + $0x6f0] ss:$20 sps:$4 sm:$0xff]  }
 0x294   : > { %2969 = vmatprep.mubr.bf16.mxu1 %v6012_v17  ;;  %5171 = vmatprep.mubr.msk.bf16.mxu0 %vm6116_vm0, %v7065_v18 }
 0x295   : > { %v4722_v33 = vpack.c.bf16 %v3472_v45, %v3471_v6  ;;  %v2350_v6 = vadd.f32 %v6711_v4, %v6648_v63  ;;  %v2355_v63 = vadd.f32 %v6711_v4, %v6654_v7 }
 0x296   : > { %v3172_v44 = vpop.f32.mrb[60].mxu0 }
 0x297   : > { %4907 = vst [vmem:[%s6728_s26 + $0x70] sm:$0xff] %v4722_v33   ;;  %v5292_v48 = vadd.f32 %v3172_v44, %v2323_v11  ;;  %v5065_v19 = vpop.f32.mrb[61].mxu0  ;;  %v6027_v33 = vld [vmem:[%s6270_s20 + $0x718] ss:$20 sps:$4 sm:$0xff]  }
 0x298   : > { %v3175_v32 = vpop.f32.mrb[62].mxu0  ;;  %v6028_v44 = vld [vmem:[%s6270_s20 + $0x764] ss:$20 sps:$4 sm:$0xff]  }
 0x299   : > { %v5294_v5 = vadd.f32 %v3175_v32, %v2326_v46  ;;  %v5066_v58 = vpop.f32.mrb[63].mxu0  ;;  %v3473_v15 = vmax.f32 %v5292_v48, 0.0  ;;  %v6030_v32 = vld [vmem:[%s6270_s20 + $0x760] ss:$20 sps:$4 sm:$0xff]  }
 0x29b   : > { %2970 = vmatmul.mubr.bf16.gmra.mrb[172].mxu1 %v6014_v37  ;;  %v3474_v49 = vmax.f32 %v5294_v5, 0.0  ;;  %5172 = vmatmul.mubr.msk.bf16.gmra.mrb[168].mxu0 %vm2020_vm1, %v6015_v54  ;;  %v2358_v5 = vadd.f32 %v6711_v4, %v6658_v14  ;;  %v2363_v14 = vadd.f32 %v6711_v4, %v6664_v20  ;;  %v2371_v20 = vadd.f32 %v6711_v4, %v6674_v41 }
 0x29c   : > { %2977 = vmatprep.mubr.bf16.mxu1 %v6016_v24  ;;  %5175 = vmatprep.mubr.msk.bf16.mxu0 %vm6116_vm0, %v7065_v18  ;;  %v2379_v41 = vadd.f32 %v6711_v4, %v6684_v60  ;;  %v2390_v60 = vadd.f32 %v6711_v4, %v6698_v30 }
 0x29d   : > { %v4727_v9 = vpack.c.bf16 %v3474_v49, %v3473_v15  ;;  %v6031_v49 = vld [vmem:[%s6270_s20 + $0x740] ss:$20 sps:$4 sm:$0xff]  }
 0x29e   : > { %v3180_v55 = vpop.f32.mrb[64].mxu0 }
 0x29f   : > { %4908 = vst [vmem:[%s6728_s26 + $0x78] sm:$0xff] %v4727_v9   ;;  %v5296_v62 = vadd.f32 %v3180_v55, %v2331_v21  ;;  %v5069_v25 = vpop.f32.mrb[65].mxu0  ;;  %v6032_v21 = vld [vmem:[%s6270_s20 + $0x78c] ss:$20 sps:$4 sm:$0xff]  }
 0x2a0   : > { %v3183_v3 = vpop.f32.mrb[66].mxu0 }
 0x2a1   : > { %v5298_v28 = vadd.f32 %v3183_v3, %v2334_v36  ;;  %v5070_v47 = vpop.f32.mrb[67].mxu0  ;;  %v3475_v27 = vmax.f32 %v5296_v62, 0.0 }
 0x2a2   : > { %v6035_v47 = vld [vmem:[%s6270_s20 + $0x768] ss:$20 sps:$4 sm:$0xff]  }
 0x2a3   : > { %2978 = vmatmul.mubr.bf16.gmra.mrb[176].mxu1 %v6018_v53  ;;  %v3476_v34 = vmax.f32 %v5298_v28, 0.0  ;;  %5176 = vmatmul.mubr.msk.bf16.gmra.mrb[172].mxu0 %vm2020_vm1, %v6019_v39  ;;  %v6034_v39 = vld [vmem:[%s6270_s20 + $0x788] ss:$20 sps:$4 sm:$0xff]  }
 0x2a4   : > { %2985 = vmatprep.mubr.bf16.mxu1 %v6020_v29  ;;  %5179 = vmatprep.mubr.msk.bf16.mxu0 %vm6116_vm0, %v7065_v18  ;;  %v2366_v29 = vadd.f32 %v6711_v4, %v6668_v31 }
 0x2a5   : > { %v4732_v22 = vpack.c.bf16 %v3476_v34, %v3475_v27 }
 0x2a6   : > { %v3188_v59 = vpop.f32.mrb[68].mxu0 }
 0x2a7   : > { %4909 = vst [vmem:[%s6728_s26 + $0x80] sm:$0xff] %v4732_v22   ;;  %v5300_v10 = vadd.f32 %v3188_v59, %v2339_v35  ;;  %v5073_v12 = vpop.f32.mrb[69].mxu0 }
 0x2a8   : > { %v3191_v13 = vpop.f32.mrb[70].mxu0 }
 0x2a9   : > { %v5302_v2 = vadd.f32 %v3191_v13, %v2342_v1  ;;  %v5074_v23 = vpop.f32.mrb[71].mxu0  ;;  %v3477_v42 = vmax.f32 %v5300_v10, 0.0  ;;  %v2374_v1 = vadd.f32 %v6711_v4, %v6678_v52  ;;  %v2382_v52 = vadd.f32 %v6711_v4, %v6688_v8 }
 0x2ab   : > { %2986 = vmatmul.mubr.bf16.gmra.mrb[180].mxu1 %v6022_v51  ;;  %v3478_v17 = vmax.f32 %v5302_v2, 0.0  ;;  %5180 = vmatmul.mubr.msk.bf16.gmra.mrb[176].mxu0 %vm2020_vm1, %v6023_v61  ;;  %v6036_v61 = vld [vmem:[%s6270_s20 + $0x790] ss:$20 sps:$4 sm:$0xff]  }
 0x2ac   : > { %2993 = vmatprep.mubr.bf16.mxu1 %v6024_v16  ;;  %5183 = vmatprep.mubr.msk.bf16.mxu0 %vm6116_vm0, %v7065_v18 }
 0x2ad   : > { %v4737_v26 = vpack.c.bf16 %v3478_v17, %v3477_v42 }
 0x2ae   : > { %v3196_v38 = vpop.f32.mrb[72].mxu0 }
 0x2af   : > { %4910 = vst [vmem:[%s6728_s26 + $0x88] sm:$0xff] %v4737_v26   ;;  %v5304_v45 = vadd.f32 %v3196_v38, %v2347_v50  ;;  %v5077_v11 = vpop.f32.mrb[73].mxu0 }
 0x2b0   : > { %v3199_v37 = vpop.f32.mrb[74].mxu0 }
 0x2b1   : > { %v5306_v46 = vadd.f32 %v3199_v37, %v2350_v6  ;;  %v5078_v48 = vpop.f32.mrb[75].mxu0  ;;  %v3479_v56 = vmax.f32 %v5304_v45, 0.0 }
 0x2b3   : > { %2994 = vmatmul.mubr.bf16.gmra.mrb[184].mxu1 %v6026_v40  ;;  %v3480_v19 = vmax.f32 %v5306_v46, 0.0  ;;  %5184 = vmatmul.mubr.msk.bf16.gmra.mrb[180].mxu0 %vm2020_vm1, %v6027_v33  ;;  %v2387_v33 = vadd.f32 %v6711_v4, %v6694_v0 }
 0x2b4   : > { %3001 = vmatprep.mubr.bf16.mxu1 %v6028_v44  ;;  %5187 = vmatprep.mubr.msk.bf16.mxu0 %vm6116_vm0, %v7065_v18 }
 0x2b5   : > { %v4742_v54 = vpack.c.bf16 %v3480_v19, %v3479_v56 }
 0x2b6   : > { %v3204_v24 = vpop.f32.mrb[76].mxu0 }
 0x2b7   : > { %4911 = vst [vmem:[%s6728_s26 + $0x90] sm:$0xff] %v4742_v54   ;;  %v5308_v58 = vadd.f32 %v3204_v24, %v2355_v63  ;;  %v5081_v15 = vpop.f32.mrb[77].mxu0  ;;  %v2395_v24 = vadd.f32 %v6711_v4, %v6704_v43 }
 0x2b8   : > { %v3207_v9 = vpop.f32.mrb[78].mxu0  ;;  %v2398_v15 = vadd.f32 %v6711_v4, %v6708_v57 }
 0x2b9   : > { %v5310_v55 = vadd.f32 %v3207_v9, %v2358_v5  ;;  %v5082_v53 = vpop.f32.mrb[79].mxu0  ;;  %v3481_v36 = vmax.f32 %v5308_v58, 0.0 }
 0x2bb   : > { %3002 = vmatmul.mubr.bf16.gmra.mrb[188].mxu1 %v6030_v32  ;;  %v3482_v7 = vmax.f32 %v5310_v55, 0.0  ;;  %5188 = vmatmul.mubr.msk.bf16.gmra.mrb[184].mxu0 %vm2020_vm1, %v6031_v49 }
 0x2bc   : > { %3009 = vmatprep.mubr.bf16.mxu1 %v6032_v21  ;;  %5191 = vmatprep.mubr.msk.bf16.mxu0 %vm6116_vm0, %v7065_v18 }
 0x2bd   : > { %v4747_v62 = vpack.c.bf16 %v3482_v7, %v3481_v36 }
 0x2be   : > { %v3212_v25 = vpop.f32.mrb[80].mxu0 }
 0x2bf   : > { %4912 = vst [vmem:[%s6728_s26 + $0x98] sm:$0xff] %v4747_v62   ;;  %v5312_v3 = vadd.f32 %v3212_v25, %v2363_v14  ;;  %v5085_v28 = vpop.f32.mrb[81].mxu0 }
 0x2c0   : > { %v3215_v27 = vpop.f32.mrb[82].mxu0 }
 0x2c1   : > { %v5314_v34 = vadd.f32 %v3215_v27, %v2366_v29  ;;  %v5086_v35 = vpop.f32.mrb[83].mxu0  ;;  %v3483_v22 = vmax.f32 %v5312_v3, 0.0 }
 0x2c3   : > { %3010 = vmatmul.mubr.bf16.gmra.mrb[192].mxu1 %v6034_v39  ;;  %v3484_v59 = vmax.f32 %v5314_v34, 0.0  ;;  %5192 = vmatmul.mubr.msk.bf16.gmra.mrb[188].mxu0 %vm2020_vm1, %v6035_v47 }
 0x2c4   : > { %5195 = vmatprep.mubr.msk.bf16.mxu0 %vm6116_vm0, %v7065_v18 }
 0x2c5   : > { %v4752_v31 = vpack.c.bf16 %v3484_v59, %v3483_v22 }
 0x2c6   : > { %v3220_v51 = vpop.f32.mrb[84].mxu0 }
 0x2c7   : > { %4913 = vst [vmem:[%s6728_s26 + $0xa0] sm:$0xff] %v4752_v31   ;;  %v5316_v10 = vadd.f32 %v3220_v51, %v2371_v20  ;;  %v5089_v12 = vpop.f32.mrb[85].mxu0 }
 0x2c8   : > { %v3223_v16 = vpop.f32.mrb[86].mxu0 }
 0x2c9   : > { %v5318_v13 = vadd.f32 %v3223_v16, %v2374_v1  ;;  %v5090_v2 = vpop.f32.mrb[87].mxu0  ;;  %v3485_v23 = vmax.f32 %v5316_v10, 0.0 }
 0x2cb   : > { %v3486_v42 = vmax.f32 %v5318_v13, 0.0  ;;  %5196 = vmatmul.mubr.msk.bf16.gmra.mrb[192].mxu0 %vm2020_vm1, %v6036_v61 }
 0x2cd   : > { %v4757_v18 = vpack.c.bf16 %v3486_v42, %v3485_v23 }
 0x2ce   : > { %v3228_v17 = vpop.f32.mrb[88].mxu0 }
 0x2cf   : > { %4914 = vst [vmem:[%s6728_s26 + $0xa8] sm:$0xff] %v4757_v18   ;;  %v5320_v50 = vadd.f32 %v3228_v17, %v2379_v41  ;;  %v5093_v26 = vpop.f32.mrb[89].mxu0 }
 0x2d0   : > { %v3231_v38 = vpop.f32.mrb[90].mxu0 }
 0x2d1   : > { %v5322_v40 = vadd.f32 %v3231_v38, %v2382_v52  ;;  %v5094_v6 = vpop.f32.mrb[91].mxu0  ;;  %v3487_v45 = vmax.f32 %v5320_v50, 0.0 }
 0x2d3   : > { %v3488_v11 = vmax.f32 %v5322_v40, 0.0 }
 0x2d5   : > { %v4762_v44 = vpack.c.bf16 %v3488_v11, %v3487_v45 }
 0x2d6   : > { %v3236_v37 = vpop.f32.mrb[92].mxu0 }
 0x2d7   : > { %4915 = vst [vmem:[%s6728_s26 + $0xb0] sm:$0xff] %v4762_v44   ;;  %v5324_v46 = vadd.f32 %v3236_v37, %v2387_v33  ;;  %v5097_v8 = vpop.f32.mrb[93].mxu0 }
 0x2d8   : > { %v3239_v48 = vpop.f32.mrb[94].mxu0 }
 0x2d9   : > { %v5326_v56 = vadd.f32 %v3239_v48, %v2390_v60  ;;  %v5098_v19 = vpop.f32.mrb[95].mxu0  ;;  %v3489_v63 = vmax.f32 %v5324_v46, 0.0 }
 0x2db   : > { %v3490_v54 = vmax.f32 %v5326_v56, 0.0 }
 0x2dd   : > { %v4767_v32 = vpack.c.bf16 %v3490_v54, %v3489_v63 }
 0x2de   : > { %v2827_v5 = vpop.f32.mrb[100].mxu1  ;;  %v3244_v0 = vpop.f32.mrb[96].mxu0 }
 0x2df   : > { %v2829_v58 = vpop.f32.mrb[101].mxu1  ;;  %4916 = vst [vmem:[%s6728_s26 + $0xb8] sm:$0xff] %v4767_v32   ;;  %v5328_v30 = vadd.f32 %v3244_v0, %v2395_v24  ;;  %v5101_v49 = vpop.f32.mrb[97].mxu0  ;;  %v5331_v43 = vadd.f32 %v6711_v4, %v2827_v5 }
 0x2e0   : > { %v2830_v21 = vpop.f32.mrb[102].mxu1  ;;  %v3247_v9 = vpop.f32.mrb[98].mxu0 }
 0x2e1   : > { %v2832_v55 = vpop.f32.mrb[103].mxu1  ;;  %v5330_v53 = vadd.f32 %v3247_v9, %v2398_v15  ;;  %v5102_v36 = vpop.f32.mrb[99].mxu0  ;;  %v3491_v7 = vmax.f32 %v5328_v30, 0.0  ;;  %v5333_v3 = vadd.f32 %v6711_v4, %v2830_v21 }
 0x2e2   : > { %v6985_v36 = vld [vmem:[#allocation4] ss:$0 sm:$0xff] }
 0x2e3   : > { %v3492_v14 = vmax.f32 %v5330_v53, 0.0 }
 0x2e5   : > { %v4772_v62 = vpack.c.bf16 %v3492_v14, %v3491_v7 }
 0x2e6   : > { %v2835_v25 = vpop.f32.mrb[104].mxu1  ;;  %v3252_v39 = vpop.f32.mrb[100].mxu0 }
 0x2e7   : > { %v2837_v29 = vpop.f32.mrb[105].mxu1  ;;  %4917 = vst [vmem:[%s6728_s26 + $0xc0] sm:$0xff] %v4772_v62   ;;  %v5332_v57 = vadd.f32 %v5331_v43, %v3252_v39  ;;  %v5105_v28 = vpop.f32.mrb[101].mxu0  ;;  %v5335_v31 = vadd.f32 %v6711_v4, %v2835_v25 }
 0x2e8   : > { %v2838_v47 = vpop.f32.mrb[106].mxu1  ;;  %v3255_v27 = vpop.f32.mrb[102].mxu0 }
 0x2e9   : > { %v2840_v34 = vpop.f32.mrb[107].mxu1  ;;  %v5334_v35 = vadd.f32 %v5333_v3, %v3255_v27  ;;  %v5106_v22 = vpop.f32.mrb[103].mxu0  ;;  %v3493_v59 = vmax.f32 %v5332_v57, 0.0  ;;  %v5337_v61 = vadd.f32 %v6711_v4, %v2838_v47 }
 0x2eb   : > { %v3494_v20 = vmax.f32 %v5334_v35, 0.0 }
 0x2ed   : > { %v4777_v51 = vpack.c.bf16 %v3494_v20, %v3493_v59 }
 0x2ee   : > { %v2843_v1 = vpop.f32.mrb[108].mxu1  ;;  %v3260_v10 = vpop.f32.mrb[104].mxu0 }
 0x2ef   : > { %v2845_v12 = vpop.f32.mrb[109].mxu1  ;;  %4918 = vst [vmem:[%s6728_s26 + $0xc8] sm:$0xff] %v4777_v51   ;;  %v5336_v16 = vadd.f32 %v5335_v31, %v3260_v10  ;;  %v5109_v13 = vpop.f32.mrb[105].mxu0  ;;  %v5339_v50 = vadd.f32 %v6711_v4, %v2843_v1 }
 0x2f0   : > { %v2846_v2 = vpop.f32.mrb[110].mxu1  ;;  %v3263_v23 = vpop.f32.mrb[106].mxu0 }
 0x2f1   : > { %v2848_v42 = vpop.f32.mrb[111].mxu1  ;;  %v5338_v41 = vadd.f32 %v5337_v61, %v3263_v23  ;;  %v5110_v18 = vpop.f32.mrb[107].mxu0  ;;  %v3495_v17 = vmax.f32 %v5336_v16, 0.0  ;;  %v5341_v45 = vadd.f32 %v6711_v4, %v2846_v2 }
 0x2f3   : > { %v3496_v52 = vmax.f32 %v5338_v41, 0.0 }
 0x2f5   : > { %v4782_v26 = vpack.c.bf16 %v3496_v52, %v3495_v17 }
 0x2f6   : > { %v2851_v38 = vpop.f32.mrb[112].mxu1  ;;  %v3268_v40 = vpop.f32.mrb[108].mxu0 }
 0x2f7   : > { %v2853_v6 = vpop.f32.mrb[113].mxu1  ;;  %4919 = vst [vmem:[%s6728_s26 + $0xd0] sm:$0xff] %v4782_v26   ;;  %v5340_v11 = vadd.f32 %v5339_v50, %v3268_v40  ;;  %v5113_v33 = vpop.f32.mrb[109].mxu0  ;;  %v5343_v19 = vadd.f32 %v6711_v4, %v2851_v38 }
 0x2f8   : > { %v2854_v44 = vpop.f32.mrb[114].mxu1  ;;  %v3271_v37 = vpop.f32.mrb[110].mxu0 }
 0x2f9   : > { %v2856_v60 = vpop.f32.mrb[115].mxu1  ;;  %v5342_v46 = vadd.f32 %v5341_v45, %v3271_v37  ;;  %v5114_v8 = vpop.f32.mrb[111].mxu0  ;;  %v3497_v48 = vmax.f32 %v5340_v11, 0.0  ;;  %v5345_v5 = vadd.f32 %v6711_v4, %v2854_v44 }
 0x2fb   : > { %v3498_v56 = vmax.f32 %v5342_v46, 0.0 }
 0x2fd   : > { %v4787_v63 = vpack.c.bf16 %v3498_v56, %v3497_v48 }
 0x2fe   : > { %v2859_v54 = vpop.f32.mrb[116].mxu1  ;;  %v3276_v24 = vpop.f32.mrb[112].mxu0 }
 0x2ff   : > { %v2861_v32 = vpop.f32.mrb[117].mxu1  ;;  %4920 = vst [vmem:[%s6728_s26 + $0xd8] sm:$0xff] %v4787_v63   ;;  %v5344_v0 = vadd.f32 %v5343_v19, %v3276_v24  ;;  %v5117_v58 = vpop.f32.mrb[113].mxu0  ;;  %v5347_v7 = vadd.f32 %v6985_v36, %v2859_v54 }
 0x300   : > { %v2862_v15 = vpop.f32.mrb[118].mxu1  ;;  %v3279_v30 = vpop.f32.mrb[114].mxu0 }
 0x301   : > { %v2864_v49 = vpop.f32.mrb[119].mxu1  ;;  %v5346_v21 = vadd.f32 %v5345_v5, %v3279_v30  ;;  %v5118_v9 = vpop.f32.mrb[115].mxu0  ;;  %v3499_v55 = vmax.f32 %v5344_v0, 0.0  ;;  %v5349_v4 = vadd.f32 %v6985_v36, %v2862_v15 }
 0x303   : > { %v3500_v53 = vmax.f32 %v5346_v21, 0.0 }
 0x305   : > { %v4792_v14 = vpack.c.bf16 %v3500_v53, %v3499_v55 }
 0x306   : > { %v2867_v43 = vpop.f32.mrb[120].mxu1  ;;  %v3284_v62 = vpop.f32.mrb[116].mxu0 }
 0x307   : > { %v2869_v25 = vpop.f32.mrb[121].mxu1  ;;  %4921 = vst [vmem:[%s6728_s26 + $0xe0] sm:$0xff] %v4792_v14   ;;  %v5348_v39 = vadd.f32 %v5347_v7, %v3284_v62  ;;  %v5121_v29 = vpop.f32.mrb[117].mxu0  ;;  %v5351_v22 = vadd.f32 %v6985_v36, %v2867_v43 }
 0x308   : > { %v2870_v3 = vpop.f32.mrb[122].mxu1  ;;  %v3287_v57 = vpop.f32.mrb[118].mxu0 }
 0x309   : > { %v2872_v28 = vpop.f32.mrb[123].mxu1  ;;  %v5350_v47 = vadd.f32 %v5349_v4, %v3287_v57  ;;  %v5122_v27 = vpop.f32.mrb[119].mxu0  ;;  %v3501_v34 = vmax.f32 %v5348_v39, 0.0  ;;  %v5353_v1 = vadd.f32 %v6985_v36, %v2870_v3 }
 0x30b   : > { %v3502_v35 = vmax.f32 %v5350_v47, 0.0 }
 0x30d   : > { %v4797_v59 = vpack.c.bf16 %v3502_v35, %v3501_v34 }
 0x30e   : > { %v2875_v20 = vpop.f32.mrb[124].mxu1  ;;  %v3292_v31 = vpop.f32.mrb[120].mxu0 }
 0x30f   : > { %v2877_v51 = vpop.f32.mrb[125].mxu1  ;;  %4922 = vst [vmem:[%s6728_s26 + $0xe8] sm:$0xff] %v4797_v59   ;;  %v5352_v10 = vadd.f32 %v5351_v22, %v3292_v31  ;;  %v5125_v12 = vpop.f32.mrb[121].mxu0  ;;  %v5355_v18 = vadd.f32 %v6985_v36, %v2875_v20 }
 0x310   : > { %v2878_v61 = vpop.f32.mrb[126].mxu1  ;;  %v3295_v16 = vpop.f32.mrb[122].mxu0 }
 0x311   : > { %v2880_v13 = vpop.f32.mrb[127].mxu1  ;;  %v5354_v2 = vadd.f32 %v5353_v1, %v3295_v16  ;;  %v5126_v23 = vpop.f32.mrb[123].mxu0  ;;  %v3503_v42 = vmax.f32 %v5352_v10, 0.0  ;;  %v5357_v38 = vadd.f32 %v6985_v36, %v2878_v61 }
 0x313   : > { %v3504_v41 = vmax.f32 %v5354_v2, 0.0 }
 0x315   : > { %v4802_v17 = vpack.c.bf16 %v3504_v41, %v3503_v42 }
 0x316   : > { %v2883_v52 = vpop.f32.mrb[128].mxu1  ;;  %v3300_v50 = vpop.f32.mrb[124].mxu0 }
 0x317   : > { %v2885_v26 = vpop.f32.mrb[129].mxu1  ;;  %4923 = vst [vmem:[%s6728_s26 + $0xf0] sm:$0xff] %v4802_v17   ;;  %v5356_v40 = vadd.f32 %v5355_v18, %v3300_v50  ;;  %v5129_v6 = vpop.f32.mrb[125].mxu0  ;;  %v5359_v8 = vadd.f32 %v6985_v36, %v2883_v52 }
 0x318   : > { %v2886_v45 = vpop.f32.mrb[130].mxu1  ;;  %v3303_v11 = vpop.f32.mrb[126].mxu0 }
 0x319   : > { %v2888_v33 = vpop.f32.mrb[131].mxu1  ;;  %v5358_v44 = vadd.f32 %v5357_v38, %v3303_v11  ;;  %v5130_v37 = vpop.f32.mrb[127].mxu0  ;;  %v3505_v60 = vmax.f32 %v5356_v40, 0.0  ;;  %v5361_v54 = vadd.f32 %v6985_v36, %v2886_v45 }
 0x31b   : > { %v3506_v46 = vmax.f32 %v5358_v44, 0.0 }
 0x31d   : > { %v4807_v48 = vpack.c.bf16 %v3506_v46, %v3505_v60 }
 0x31e   : > { %v2891_v56 = vpop.f32.mrb[132].mxu1  ;;  %v3308_v19 = vpop.f32.mrb[128].mxu0 }
 0x31f   : > { %v2893_v63 = vpop.f32.mrb[133].mxu1  ;;  %4924 = vst [vmem:[%s6728_s26 + $0xf8] sm:$0xff] %v4807_v48   ;;  %v5360_v24 = vadd.f32 %v5359_v8, %v3308_v19  ;;  %v5133_v32 = vpop.f32.mrb[129].mxu0  ;;  %v5363_v9 = vadd.f32 %v6985_v36, %v2891_v56 }
 0x320   : > { %v2894_v5 = vpop.f32.mrb[134].mxu1  ;;  %v3311_v0 = vpop.f32.mrb[130].mxu0 }
 0x321   : > { %v2896_v58 = vpop.f32.mrb[135].mxu1  ;;  %v5362_v15 = vadd.f32 %v5361_v54, %v3311_v0  ;;  %v5134_v30 = vpop.f32.mrb[131].mxu0  ;;  %v3507_v49 = vmax.f32 %v5360_v24, 0.0  ;;  %v5365_v43 = vadd.f32 %v6985_v36, %v2894_v5 }
 0x323   : > { %v3508_v21 = vmax.f32 %v5362_v15, 0.0 }
 0x325   : > { %v4812_v55 = vpack.c.bf16 %v3508_v21, %v3507_v49 }
 0x326   : > { %v2899_v53 = vpop.f32.mrb[136].mxu1  ;;  %v3316_v7 = vpop.f32.mrb[132].mxu0 }
 0x327   : > { %v2901_v14 = vpop.f32.mrb[137].mxu1  ;;  %4925 = vst [vmem:[%s6728_s26 + $0x100] sm:$0xff] %v4812_v55   ;;  %v5364_v62 = vadd.f32 %v5363_v9, %v3316_v7  ;;  %v5137_v25 = vpop.f32.mrb[133].mxu0  ;;  %v5367_v27 = vadd.f32 %v6985_v36, %v2899_v53 }
 0x328   : > { %v2902_v4 = vpop.f32.mrb[138].mxu1  ;;  %v3319_v39 = vpop.f32.mrb[134].mxu0 }
 0x329   : > { %v2904_v29 = vpop.f32.mrb[139].mxu1  ;;  %v5366_v3 = vadd.f32 %v5365_v43, %v3319_v39  ;;  %v5138_v57 = vpop.f32.mrb[135].mxu0  ;;  %v3509_v28 = vmax.f32 %v5364_v62, 0.0  ;;  %v5369_v20 = vadd.f32 %v6985_v36, %v2902_v4 }
 0x32b   : > { %v3510_v47 = vmax.f32 %v5366_v3, 0.0 }
 0x32d   : > { %v4817_v34 = vpack.c.bf16 %v3510_v47, %v3509_v28 }
 0x32e   : > { %v2907_v35 = vpop.f32.mrb[140].mxu1  ;;  %v3324_v22 = vpop.f32.mrb[136].mxu0 }
 0x32f   : > { %v2909_v59 = vpop.f32.mrb[141].mxu1  ;;  %4926 = vst [vmem:[%s6728_s26 + $0x108] sm:$0xff] %v4817_v34   ;;  %v5368_v31 = vadd.f32 %v5367_v27, %v3324_v22  ;;  %v5141_v51 = vpop.f32.mrb[137].mxu0  ;;  %v5371_v23 = vadd.f32 %v6985_v36, %v2907_v35 }
 0x330   : > { %v2910_v1 = vpop.f32.mrb[142].mxu1  ;;  %v3327_v10 = vpop.f32.mrb[138].mxu0 }
 0x331   : > { %v2912_v12 = vpop.f32.mrb[143].mxu1  ;;  %v5370_v61 = vadd.f32 %v5369_v20, %v3327_v10  ;;  %v5142_v16 = vpop.f32.mrb[139].mxu0  ;;  %v3511_v13 = vmax.f32 %v5368_v31, 0.0  ;;  %v5373_v52 = vadd.f32 %v6985_v36, %v2910_v1 }
 0x333   : > { %v3512_v2 = vmax.f32 %v5370_v61, 0.0 }
 0x335   : > { %v4822_v42 = vpack.c.bf16 %v3512_v2, %v3511_v13 }
 0x336   : > { %v2915_v41 = vpop.f32.mrb[144].mxu1  ;;  %v3332_v18 = vpop.f32.mrb[140].mxu0 }
 0x337   : > { %v2917_v17 = vpop.f32.mrb[145].mxu1  ;;  %4927 = vst [vmem:[%s6728_s26 + $0x110] sm:$0xff] %v4822_v42   ;;  %v5372_v50 = vadd.f32 %v5371_v23, %v3332_v18  ;;  %v5145_v26 = vpop.f32.mrb[141].mxu0  ;;  %v5375_v37 = vadd.f32 %v6985_v36, %v2915_v41 }
 0x338   : > { %v2918_v38 = vpop.f32.mrb[146].mxu1  ;;  %v3335_v40 = vpop.f32.mrb[142].mxu0 }
 0x339   : > { %v2920_v6 = vpop.f32.mrb[147].mxu1  ;;  %v5374_v45 = vadd.f32 %v5373_v52, %v3335_v40  ;;  %v5146_v11 = vpop.f32.mrb[143].mxu0  ;;  %v3513_v33 = vmax.f32 %v5372_v50, 0.0  ;;  %v5377_v56 = vadd.f32 %v6985_v36, %v2918_v38 }
 0x33b   : > { %v3514_v44 = vmax.f32 %v5374_v45, 0.0 }
 0x33d   : > { %v4827_v60 = vpack.c.bf16 %v3514_v44, %v3513_v33 }
 0x33e   : > { %v2923_v46 = vpop.f32.mrb[148].mxu1  ;;  %v3340_v8 = vpop.f32.mrb[144].mxu0 }
 0x33f   : > { %v2925_v48 = vpop.f32.mrb[149].mxu1  ;;  %4928 = vst [vmem:[%s6728_s26 + $0x118] sm:$0xff] %v4827_v60   ;;  %v5376_v19 = vadd.f32 %v5375_v37, %v3340_v8  ;;  %v5149_v63 = vpop.f32.mrb[145].mxu0  ;;  %v5379_v30 = vadd.f32 %v6985_v36, %v2923_v46 }
 0x340   : > { %v2926_v54 = vpop.f32.mrb[150].mxu1  ;;  %v3343_v24 = vpop.f32.mrb[146].mxu0 }
 0x341   : > { %v2928_v32 = vpop.f32.mrb[151].mxu1  ;;  %v5378_v5 = vadd.f32 %v5377_v56, %v3343_v24  ;;  %v5150_v0 = vpop.f32.mrb[147].mxu0  ;;  %v3515_v58 = vmax.f32 %v5376_v19, 0.0  ;;  %v5381_v53 = vadd.f32 %v6985_v36, %v2926_v54 }
 0x343   : > { %v3516_v15 = vmax.f32 %v5378_v5, 0.0 }
 0x345   : > { %v4832_v49 = vpack.c.bf16 %v3516_v15, %v3515_v58 }
 0x346   : > { %v2931_v21 = vpop.f32.mrb[152].mxu1  ;;  %v3348_v9 = vpop.f32.mrb[148].mxu0 }
 0x347   : > { %v2933_v55 = vpop.f32.mrb[153].mxu1  ;;  %4929 = vst [vmem:[%s6728_s26 + $0x120] sm:$0xff] %v4832_v49   ;;  %v5380_v7 = vadd.f32 %v5379_v30, %v3348_v9  ;;  %v5153_v14 = vpop.f32.mrb[149].mxu0  ;;  %v5383_v57 = vadd.f32 %v6985_v36, %v2931_v21 }
 0x348   : > { %v2934_v43 = vpop.f32.mrb[154].mxu1  ;;  %v3351_v62 = vpop.f32.mrb[150].mxu0 }
 0x349   : > { %v2936_v25 = vpop.f32.mrb[155].mxu1  ;;  %v5382_v4 = vadd.f32 %v5381_v53, %v3351_v62  ;;  %v5154_v39 = vpop.f32.mrb[151].mxu0  ;;  %v3517_v29 = vmax.f32 %v5380_v7, 0.0  ;;  %v5385_v35 = vadd.f32 %v6985_v36, %v2934_v43 }
 0x34b   : > { %v3518_v3 = vmax.f32 %v5382_v4, 0.0 }
 0x34d   : > { %v4837_v28 = vpack.c.bf16 %v3518_v3, %v3517_v29 }
 0x34e   : > { %v2939_v47 = vpop.f32.mrb[156].mxu1  ;;  %v3356_v27 = vpop.f32.mrb[152].mxu0 }
 0x34f   : > { %v2941_v34 = vpop.f32.mrb[157].mxu1  ;;  %4930 = vst [vmem:[%s6728_s26 + $0x128] sm:$0xff] %v4837_v28   ;;  %v5384_v22 = vadd.f32 %v5383_v57, %v3356_v27  ;;  %v5157_v59 = vpop.f32.mrb[153].mxu0  ;;  %v5387_v16 = vadd.f32 %v6985_v36, %v2939_v47 }
 0x350   : > { %v2942_v20 = vpop.f32.mrb[158].mxu1  ;;  %v3359_v31 = vpop.f32.mrb[154].mxu0 }
 0x351   : > { %v2944_v51 = vpop.f32.mrb[159].mxu1  ;;  %v5386_v1 = vadd.f32 %v5385_v35, %v3359_v31  ;;  %v5158_v10 = vpop.f32.mrb[155].mxu0  ;;  %v3519_v12 = vmax.f32 %v5384_v22, 0.0  ;;  %v5389_v41 = vadd.f32 %v6985_v36, %v2942_v20 }
 0x353   : > { %v3520_v61 = vmax.f32 %v5386_v1, 0.0 }
 0x355   : > { %v4842_v13 = vpack.c.bf16 %v3520_v61, %v3519_v12 }
 0x356   : > { %v2947_v2 = vpop.f32.mrb[160].mxu1  ;;  %v3364_v23 = vpop.f32.mrb[156].mxu0 }
 0x357   : > { %v2949_v42 = vpop.f32.mrb[161].mxu1  ;;  %4931 = vst [vmem:[%s6728_s26 + $0x130] sm:$0xff] %v4842_v13   ;;  %v5388_v18 = vadd.f32 %v5387_v16, %v3364_v23  ;;  %v5161_v17 = vpop.f32.mrb[157].mxu0  ;;  %v5391_v11 = vadd.f32 %v6985_v36, %v2947_v2 }
 0x358   : > { %v2950_v52 = vpop.f32.mrb[162].mxu1  ;;  %v3367_v50 = vpop.f32.mrb[158].mxu0 }
 0x359   : > { %v2952_v26 = vpop.f32.mrb[163].mxu1  ;;  %v5390_v38 = vadd.f32 %v5389_v41, %v3367_v50  ;;  %v5162_v40 = vpop.f32.mrb[159].mxu0  ;;  %v3521_v6 = vmax.f32 %v5388_v18, 0.0  ;;  %v5393_v46 = vadd.f32 %v6985_v36, %v2950_v52 }
 0x35b   : > { %v3522_v45 = vmax.f32 %v5390_v38, 0.0 }
 0x35d   : > { %v4847_v33 = vpack.c.bf16 %v3522_v45, %v3521_v6 }
 0x35e   : > { %v2955_v44 = vpop.f32.mrb[164].mxu1  ;;  %v3372_v37 = vpop.f32.mrb[160].mxu0 }
 0x35f   : > { %v2957_v60 = vpop.f32.mrb[165].mxu1  ;;  %4932 = vst [vmem:[%s6728_s26 + $0x138] sm:$0xff] %v4847_v33   ;;  %v5392_v8 = vadd.f32 %v5391_v11, %v3372_v37  ;;  %v5165_v48 = vpop.f32.mrb[161].mxu0  ;;  %v5395_v0 = vadd.f32 %v6985_v36, %v2955_v44 }
 0x360   : > { %v2958_v56 = vpop.f32.mrb[166].mxu1  ;;  %v3375_v19 = vpop.f32.mrb[162].mxu0 }
 0x361   : > { %v2960_v63 = vpop.f32.mrb[167].mxu1  ;;  %v5394_v54 = vadd.f32 %v5393_v46, %v3375_v19  ;;  %v5166_v24 = vpop.f32.mrb[163].mxu0  ;;  %v3523_v32 = vmax.f32 %v5392_v8, 0.0  ;;  %v5397_v21 = vadd.f32 %v6985_v36, %v2958_v56 }
 0x363   : > { %v3524_v5 = vmax.f32 %v5394_v54, 0.0 }
 0x365   : > { %v4852_v58 = vpack.c.bf16 %v3524_v5, %v3523_v32 }
 0x366   : > { %v2963_v15 = vpop.f32.mrb[168].mxu1  ;;  %v3380_v30 = vpop.f32.mrb[164].mxu0 }
 0x367   : > { %v2965_v49 = vpop.f32.mrb[169].mxu1  ;;  %4933 = vst [vmem:[%s6728_s26 + $0x140] sm:$0xff] %v4852_v58   ;;  %v5396_v9 = vadd.f32 %v5395_v0, %v3380_v30  ;;  %v5169_v55 = vpop.f32.mrb[165].mxu0  ;;  %v5399_v39 = vadd.f32 %v6985_v36, %v2963_v15 }
 0x368   : > { %v2966_v53 = vpop.f32.mrb[170].mxu1  ;;  %v3383_v7 = vpop.f32.mrb[166].mxu0 }
 0x369   : > { %v2968_v14 = vpop.f32.mrb[171].mxu1  ;;  %v5398_v43 = vadd.f32 %v5397_v21, %v3383_v7  ;;  %v5170_v62 = vpop.f32.mrb[167].mxu0  ;;  %v3525_v25 = vmax.f32 %v5396_v9, 0.0  ;;  %v5401_v47 = vadd.f32 %v6985_v36, %v2966_v53 }
 0x36b   : > { %v3526_v4 = vmax.f32 %v5398_v43, 0.0 }
 0x36d   : > { %v4857_v29 = vpack.c.bf16 %v3526_v4, %v3525_v25 }
 0x36e   : > { %v2971_v3 = vpop.f32.mrb[172].mxu1  ;;  %v3388_v57 = vpop.f32.mrb[168].mxu0 }
 0x36f   : > { %v2973_v28 = vpop.f32.mrb[173].mxu1  ;;  %4934 = vst [vmem:[%s6728_s26 + $0x148] sm:$0xff] %v4857_v29   ;;  %v5400_v27 = vadd.f32 %v5399_v39, %v3388_v57  ;;  %v5173_v34 = vpop.f32.mrb[169].mxu0  ;;  %v5403_v10 = vadd.f32 %v6985_v36, %v2971_v3 }
 0x370   : > { %v2974_v35 = vpop.f32.mrb[174].mxu1  ;;  %v3391_v22 = vpop.f32.mrb[170].mxu0 }
 0x371   : > { %v2976_v59 = vpop.f32.mrb[175].mxu1  ;;  %v5402_v20 = vadd.f32 %v5401_v47, %v3391_v22  ;;  %v5174_v31 = vpop.f32.mrb[171].mxu0  ;;  %v3527_v51 = vmax.f32 %v5400_v27, 0.0  ;;  %v5405_v2 = vadd.f32 %v6985_v36, %v2974_v35 }
 0x373   : > { %v3528_v1 = vmax.f32 %v5402_v20, 0.0 }
 0x375   : > { %v4862_v12 = vpack.c.bf16 %v3528_v1, %v3527_v51 }
 0x376   : > { %v2979_v61 = vpop.f32.mrb[176].mxu1  ;;  %v3396_v16 = vpop.f32.mrb[172].mxu0 }
 0x377   : > { %v2981_v13 = vpop.f32.mrb[177].mxu1  ;;  %4935 = vst [vmem:[%s6728_s26 + $0x150] sm:$0xff] %v4862_v12   ;;  %v5404_v23 = vadd.f32 %v5403_v10, %v3396_v16  ;;  %v5177_v42 = vpop.f32.mrb[173].mxu0  ;;  %v5407_v40 = vadd.f32 %v6985_v36, %v2979_v61 }
 0x378   : > { %v2982_v41 = vpop.f32.mrb[178].mxu1  ;;  %v3399_v18 = vpop.f32.mrb[174].mxu0 }
 0x379   : > { %v2984_v17 = vpop.f32.mrb[179].mxu1  ;;  %v5406_v52 = vadd.f32 %v5405_v2, %v3399_v18  ;;  %v5178_v50 = vpop.f32.mrb[175].mxu0  ;;  %v3529_v26 = vmax.f32 %v5404_v23, 0.0  ;;  %v5409_v44 = vadd.f32 %v6985_v36, %v2982_v41 }
 0x37b   : > { %v3530_v38 = vmax.f32 %v5406_v52, 0.0 }
 0x37d   : > { %v4867_v6 = vpack.c.bf16 %v3530_v38, %v3529_v26 }
 0x37e   : > { %v2987_v45 = vpop.f32.mrb[180].mxu1  ;;  %v3404_v11 = vpop.f32.mrb[176].mxu0 }
 0x37f   : > { %v2989_v33 = vpop.f32.mrb[181].mxu1  ;;  %4936 = vst [vmem:[%s6728_s26 + $0x158] sm:$0xff] %v4867_v6   ;;  %v5408_v37 = vadd.f32 %v5407_v40, %v3404_v11  ;;  %v5181_v60 = vpop.f32.mrb[177].mxu0  ;;  %v5411_v24 = vadd.f32 %v6985_v36, %v2987_v45 }
 0x380   : > { %v2990_v46 = vpop.f32.mrb[182].mxu1  ;;  %v3407_v8 = vpop.f32.mrb[178].mxu0 }
 0x381   : > { %v2992_v48 = vpop.f32.mrb[183].mxu1  ;;  %v5410_v56 = vadd.f32 %v5409_v44, %v3407_v8  ;;  %v5182_v19 = vpop.f32.mrb[179].mxu0  ;;  %v3531_v63 = vmax.f32 %v5408_v37, 0.0  ;;  %v5413_v15 = vadd.f32 %v6985_v36, %v2990_v46 }
 0x383   : > { %v3532_v54 = vmax.f32 %v5410_v56, 0.0 }
 0x385   : > { %v4872_v32 = vpack.c.bf16 %v3532_v54, %v3531_v63 }
 0x386   : > { %v2995_v5 = vpop.f32.mrb[184].mxu1  ;;  %v3412_v0 = vpop.f32.mrb[180].mxu0 }
 0x387   : > { %v2997_v58 = vpop.f32.mrb[185].mxu1  ;;  %4937 = vst [vmem:[%s6728_s26 + $0x160] sm:$0xff] %v4872_v32   ;;  %v5412_v30 = vadd.f32 %v5411_v24, %v3412_v0  ;;  %v5185_v49 = vpop.f32.mrb[181].mxu0  ;;  %v5415_v62 = vadd.f32 %v6985_v36, %v2995_v5 }
 0x388   : > { %v2998_v21 = vpop.f32.mrb[186].mxu1  ;;  %v3415_v9 = vpop.f32.mrb[182].mxu0 }
 0x389   : > { %v3000_v55 = vpop.f32.mrb[187].mxu1  ;;  %v5414_v53 = vadd.f32 %v5413_v15, %v3415_v9  ;;  %v5186_v7 = vpop.f32.mrb[183].mxu0  ;;  %v3533_v14 = vmax.f32 %v5412_v30, 0.0  ;;  %v5417_v3 = vadd.f32 %v6985_v36, %v2998_v21 }
 0x38b   : > { %v3534_v43 = vmax.f32 %v5414_v53, 0.0 }
 0x38d   : > { %v4877_v25 = vpack.c.bf16 %v3534_v43, %v3533_v14 }
 0x38e   : > { %v3003_v4 = vpop.f32.mrb[188].mxu1  ;;  %v3420_v39 = vpop.f32.mrb[184].mxu0 }
 0x38f   : > { %v3005_v29 = vpop.f32.mrb[189].mxu1  ;;  %4938 = vst [vmem:[%s6728_s26 + $0x168] sm:$0xff] %v4877_v25   ;;  %v5416_v57 = vadd.f32 %v5415_v62, %v3420_v39  ;;  %v5189_v28 = vpop.f32.mrb[185].mxu0  ;;  %v5419_v31 = vadd.f32 %v6985_v36, %v3003_v4 }
 0x390   : > { %v3006_v47 = vpop.f32.mrb[190].mxu1  ;;  %v3423_v27 = vpop.f32.mrb[186].mxu0 }
 0x391   : > { %v3008_v34 = vpop.f32.mrb[191].mxu1  ;;  %v5418_v35 = vadd.f32 %v5417_v3, %v3423_v27  ;;  %v5190_v22 = vpop.f32.mrb[187].mxu0  ;;  %v3535_v59 = vmax.f32 %v5416_v57, 0.0  ;;  %v5421_v61 = vadd.f32 %v6985_v36, %v3006_v47 }
 0x393   : > { %v3536_v20 = vmax.f32 %v5418_v35, 0.0 }
 0x395   : > { %v4882_v51 = vpack.c.bf16 %v3536_v20, %v3535_v59 }
 0x396   : > { %v3011_v1 = vpop.f32.mrb[192].mxu1  ;;  %v3428_v10 = vpop.f32.mrb[188].mxu0 }
 0x397   : > { %v3013_v12 = vpop.f32.mrb[193].mxu1  ;;  %4939 = vst [vmem:[%s6728_s26 + $0x170] sm:$0xff] %v4882_v51   ;;  %v5420_v16 = vadd.f32 %v5419_v31, %v3428_v10  ;;  %v5193_v13 = vpop.f32.mrb[189].mxu0  ;;  %v5423_v50 = vadd.f32 %v6985_v36, %v3011_v1 }
 0x398   : > { %v3014_v2 = vpop.f32.mrb[194].mxu1  ;;  %v3431_v23 = vpop.f32.mrb[190].mxu0 }
 0x399   : > { %v3016_v42 = vpop.f32.mrb[195].mxu1  ;;  %v5422_v41 = vadd.f32 %v5421_v61, %v3431_v23  ;;  %v5194_v18 = vpop.f32.mrb[191].mxu0  ;;  %v3537_v17 = vmax.f32 %v5420_v16, 0.0  ;;  %v5425_v40 = vadd.f32 %v6985_v36, %v3014_v2 }
 0x39b   : > { %v3538_v52 = vmax.f32 %v5422_v41, 0.0 }
 0x39d   : > { %v4887_v26 = vpack.c.bf16 %v3538_v52, %v3537_v17 }
 0x39e   : > { %v3436_v38 = vpop.f32.mrb[192].mxu0 }
 0x39f   : > { %4940 = vst [vmem:[%s6728_s26 + $0x178] sm:$0xff] %v4887_v26   ;;  %v5424_v6 = vadd.f32 %v5423_v50, %v3436_v38  ;;  %v5197_v45 = vpop.f32.mrb[193].mxu0 }
 0x3a0   : > { %v3439_v11 = vpop.f32.mrb[194].mxu0 }
 0x3a1   : > { %v5426_v33 = vadd.f32 %v5425_v40, %v3439_v11  ;;  %v5198_v44 = vpop.f32.mrb[195].mxu0  ;;  %v3539_v37 = vmax.f32 %v5424_v6, 0.0 }
 0x3a3   : > { %v3540_v60 = vmax.f32 %v5426_v33, 0.0 }
 0x3a5   : > { %v4892_v46 = vpack.c.bf16 %v3540_v60, %v3539_v37 }
 0x3a7   : > { %4941 = vst [vmem:[%s6728_s26 + $0x180] sm:$0xff] %v4892_v46  }
 0x3a8 PF: > { %s15_s12 = sadd.s32 1, %s6108_s12  }
 0x3a9   : > { %p12_p2 = scmp.ge.s32.totalorder %s15_s12, 4  }
 0x3ab   :  { %14 = sbr.rel (!%p12_p2) target bundleno = 2 (0x2), region = 71 }
 0x3b2   :  { %4053 = vsyncpa [#allocation3], 1 }
 0x3b3   :  { %4055 = vsyncpa [#allocation3 + $0x1], 1 }
 0x3b4   :  { %4056 = vsyncpa [#allocation5], 1 }

// kernel: model_forward.9
= control target key start
LH: loop header
LB: loop body
LE: loop exit
PB: predicated region body
PF: predicated region fallthrough
CT: control target
= control target key end

     0   :  { %s386_s0 = inlined_call_operand.vmem [shape: bf16[28,3584], index: 0, kind: input, shape index: {}]   ;;  %s387_s1 = inlined_call_operand.vmem [shape: bf16[28,1792], index: 1, kind: output, shape index: {}]  }
   0x1   :  { %v8_v0 = vld [vmem:[%s386_s0] sm:$0xff]  ;;  %v15_v1 = vld [vmem:[%s386_s0 + $0x38] sm:$0xff]  ;;  %v9_v2 = vld [vmem:[%s386_s0 + $0x8] sm:$0xff] }
   0x2   :  { %v64_v3 = vmax.bf16 %v15_v1, %v8_v0  ;;  %v16_v4 = vld [vmem:[%s386_s0 + $0x40] sm:$0xff]  ;;  %v10_v5 = vld [vmem:[%s386_s0 + $0x10] sm:$0xff]  ;;  %v17_v6 = vld [vmem:[%s386_s0 + $0x48] sm:$0xff] }
   0x3   :  { %v65_v7 = vmax.bf16 %v16_v4, %v9_v2  ;;  %v66_v8 = vmax.bf16 %v17_v6, %v10_v5  ;;  %v11_v9 = vld [vmem:[%s386_s0 + $0x18] sm:$0xff]  ;;  %v18_v10 = vld [vmem:[%s386_s0 + $0x50] sm:$0xff]  ;;  %v12_v11 = vld [vmem:[%s386_s0 + $0x20] sm:$0xff] }
   0x4   :  { %92 = vst [vmem:[%s387_s1] sm:$0xff] %v64_v3  ;;  %v67_v12 = vmax.bf16 %v18_v10, %v11_v9  ;;  %v19_v13 = vld [vmem:[%s386_s0 + $0x58] sm:$0xff]  ;;  %v13_v14 = vld [vmem:[%s386_s0 + $0x28] sm:$0xff]  ;;  %v20_v15 = vld [vmem:[%s386_s0 + $0x60] sm:$0xff] }
   0x5   :  { %93 = vst [vmem:[%s387_s1 + $0x8] sm:$0xff] %v65_v7  ;;  %94 = vst [vmem:[%s387_s1 + $0x10] sm:$0xff] %v66_v8  ;;  %v68_v16 = vmax.bf16 %v19_v13, %v12_v11  ;;  %v69_v17 = vmax.bf16 %v20_v15, %v13_v14  ;;  %v14_v18 = vld [vmem:[%s386_s0 + $0x30] sm:$0xff]  ;;  %v21_v19 = vld [vmem:[%s386_s0 + $0x68] sm:$0xff] }
   0x6   :  { %v22_v20 = vld [vmem:[%s386_s0 + $0x70] sm:$0xff]  ;;  %95 = vst [vmem:[%s387_s1 + $0x18] sm:$0xff] %v67_v12  ;;  %v70_v21 = vmax.bf16 %v21_v19, %v14_v18  ;;  %v29_v22 = vld [vmem:[%s386_s0 + $0xa8] sm:$0xff]  ;;  %v23_v23 = vld [vmem:[%s386_s0 + $0x78] sm:$0xff] }
   0x7   :  { %v30_v24 = vld [vmem:[%s386_s0 + $0xb0] sm:$0xff]  ;;  %96 = vst [vmem:[%s387_s1 + $0x20] sm:$0xff] %v68_v16  ;;  %97 = vst [vmem:[%s387_s1 + $0x28] sm:$0xff] %v69_v17  ;;  %v71_v25 = vmax.bf16 %v29_v22, %v22_v20  ;;  %v24_v27 = vld [vmem:[%s386_s0 + $0x80] sm:$0xff] }
   0x8   :  { %v72_v26 = vmax.bf16 %v30_v24, %v23_v23  ;;  %v31_v28 = vld [vmem:[%s386_s0 + $0xb8] sm:$0xff]  ;;  %v25_v29 = vld [vmem:[%s386_s0 + $0x88] sm:$0xff]  ;;  %98 = vst [vmem:[%s387_s1 + $0x30] sm:$0xff] %v70_v21  ;;  %v32_v31 = vld [vmem:[%s386_s0 + $0xc0] sm:$0xff] }
   0x9   :  { %v73_v30 = vmax.bf16 %v31_v28, %v24_v27  ;;  %v26_v32 = vld [vmem:[%s386_s0 + $0x90] sm:$0xff]  ;;  %v33_v33 = vld [vmem:[%s386_s0 + $0xc8] sm:$0xff]  ;;  %99 = vst [vmem:[%s387_s1 + $0x38] sm:$0xff] %v71_v25  ;;  %v74_v34 = vmax.bf16 %v32_v31, %v25_v29  ;;  %v27_v36 = vld [vmem:[%s386_s0 + $0x98] sm:$0xff] }
   0xa   :  { %100 = vst [vmem:[%s387_s1 + $0x40] sm:$0xff] %v72_v26  ;;  %v75_v35 = vmax.bf16 %v33_v33, %v26_v32  ;;  %v34_v37 = vld [vmem:[%s386_s0 + $0xd0] sm:$0xff]  ;;  %v28_v38 = vld [vmem:[%s386_s0 + $0xa0] sm:$0xff]  ;;  %v35_v40 = vld [vmem:[%s386_s0 + $0xd8] sm:$0xff] }
   0xb   :  { %101 = vst [vmem:[%s387_s1 + $0x48] sm:$0xff] %v73_v30  ;;  %v76_v39 = vmax.bf16 %v34_v37, %v27_v36  ;;  %v36_v41 = vld [vmem:[%s386_s0 + $0xe0] sm:$0xff]  ;;  %v43_v42 = vld [vmem:[%s386_s0 + $0x118] sm:$0xff]  ;;  %102 = vst [vmem:[%s387_s1 + $0x50] sm:$0xff] %v74_v34  ;;  %v77_v43 = vmax.bf16 %v35_v40, %v28_v38 }
   0xc   :  { %103 = vst [vmem:[%s387_s1 + $0x58] sm:$0xff] %v75_v35  ;;  %v78_v44 = vmax.bf16 %v43_v42, %v36_v41  ;;  %v37_v45 = vld [vmem:[%s386_s0 + $0xe8] sm:$0xff]  ;;  %v44_v46 = vld [vmem:[%s386_s0 + $0x120] sm:$0xff]  ;;  %v38_v47 = vld [vmem:[%s386_s0 + $0xf0] sm:$0xff] }
   0xd   :  { %104 = vst [vmem:[%s387_s1 + $0x60] sm:$0xff] %v76_v39  ;;  %v79_v48 = vmax.bf16 %v44_v46, %v37_v45  ;;  %v45_v49 = vld [vmem:[%s386_s0 + $0x128] sm:$0xff]  ;;  %v39_v50 = vld [vmem:[%s386_s0 + $0xf8] sm:$0xff]  ;;  %v46_v51 = vld [vmem:[%s386_s0 + $0x130] sm:$0xff] }
   0xe   :  { %105 = vst [vmem:[%s387_s1 + $0x68] sm:$0xff] %v77_v43  ;;  %106 = vst [vmem:[%s387_s1 + $0x70] sm:$0xff] %v78_v44  ;;  %v80_v52 = vmax.bf16 %v45_v49, %v38_v47  ;;  %v81_v53 = vmax.bf16 %v46_v51, %v39_v50  ;;  %v40_v54 = vld [vmem:[%s386_s0 + $0x100] sm:$0xff]  ;;  %v47_v55 = vld [vmem:[%s386_s0 + $0x138] sm:$0xff] }
   0xf   :  { %v41_v56 = vld [vmem:[%s386_s0 + $0x108] sm:$0xff]  ;;  %107 = vst [vmem:[%s387_s1 + $0x78] sm:$0xff] %v79_v48  ;;  %v82_v57 = vmax.bf16 %v47_v55, %v40_v54  ;;  %v48_v58 = vld [vmem:[%s386_s0 + $0x140] sm:$0xff]  ;;  %v42_v59 = vld [vmem:[%s386_s0 + $0x110] sm:$0xff] }
  0x10   :  { %v49_v60 = vld [vmem:[%s386_s0 + $0x148] sm:$0xff]  ;;  %108 = vst [vmem:[%s387_s1 + $0x80] sm:$0xff] %v80_v52  ;;  %109 = vst [vmem:[%s387_s1 + $0x88] sm:$0xff] %v81_v53  ;;  %v83_v61 = vmax.bf16 %v48_v58, %v41_v56  ;;  %v50_v63 = vld [vmem:[%s386_s0 + $0x150] sm:$0x33] }
  0x11   :  { %v84_v62 = vmax.bf16 %v49_v60, %v42_v59  ;;  %v57_v0 = vld [vmem:[%s386_s0 + $0x188] sm:$0x33]  ;;  %v51_v1 = vld [vmem:[%s386_s0 + $0x158] sm:$0x33]  ;;  %110 = vst [vmem:[%s387_s1 + $0x90] sm:$0xff] %v82_v57 }
  0x12   :  { %v85_v2 = vmax.bf16 %v57_v0, %v50_v63  ;;  %v58_v3 = vld [vmem:[%s386_s0 + $0x190] sm:$0x33]  ;;  %v52_v4 = vld [vmem:[%s386_s0 + $0x160] sm:$0x33]  ;;  %v59_v5 = vld [vmem:[%s386_s0 + $0x198] sm:$0x33] }
  0x13   :  { %111 = vst [vmem:[%s387_s1 + $0x98] sm:$0xff] %v83_v61  ;;  %112 = vst [vmem:[%s387_s1 + $0xa0] sm:$0xff] %v84_v62  ;;  %v86_v6 = vmax.bf16 %v58_v3, %v51_v1  ;;  %v87_v7 = vmax.bf16 %v59_v5, %v52_v4  ;;  %v53_v8 = vld [vmem:[%s386_s0 + $0x168] sm:$0x33]  ;;  %v60_v9 = vld [vmem:[%s386_s0 + $0x1a0] sm:$0x33] }
  0x14   :  { %v54_v10 = vld [vmem:[%s386_s0 + $0x170] sm:$0x33]  ;;  %113 = vst [vmem:[%s387_s1 + $0xa8] sm:$0x33] %v85_v2  ;;  %v88_v11 = vmax.bf16 %v60_v9, %v53_v8  ;;  %v61_v12 = vld [vmem:[%s386_s0 + $0x1a8] sm:$0x33] }
  0x15   :  { %v55_v13 = vld [vmem:[%s386_s0 + $0x178] sm:$0x33]  ;;  %v62_v14 = vld [vmem:[%s386_s0 + $0x1b0] sm:$0x33]  ;;  %114 = vst [vmem:[%s387_s1 + $0xb0] sm:$0x33] %v86_v6  ;;  %v89_v15 = vmax.bf16 %v61_v12, %v54_v10 }
  0x16   :  { %115 = vst [vmem:[%s387_s1 + $0xb8] sm:$0x33] %v87_v7  ;;  %v90_v16 = vmax.bf16 %v62_v14, %v55_v13  ;;  %v56_v17 = vld [vmem:[%s386_s0 + $0x180] sm:$0x33]  ;;  %v63_v18 = vld [vmem:[%s386_s0 + $0x1b8] sm:$0x33] }
  0x17   :  { %116 = vst [vmem:[%s387_s1 + $0xc0] sm:$0x33] %v88_v11  ;;  %v91_v19 = vmax.bf16 %v63_v18, %v56_v17  ;;  %117 = vst [vmem:[%s387_s1 + $0xc8] sm:$0x33] %v89_v15 }
  0x18   :  { %118 = vst [vmem:[%s387_s1 + $0xd0] sm:$0x33] %v90_v16 }
  0x19   :  { %119 = vst [vmem:[%s387_s1 + $0xd8] sm:$0x33] %v91_v19 }

// kernel: model_forward.11
= control target key start
LH: loop header
LB: loop body
LE: loop exit
PB: predicated region body
PF: predicated region fallthrough
CT: control target
= control target key end

     0   :  { %v789_v47 = vmov 1983009808   ;;  %v158_v49 = vlaneseq  ;;  %s1227_s0 = inlined_call_operand.vmem [shape: f32[2,1024], index: 0, kind: input, shape index: {}]   ;;  %s1228_s1 = inlined_call_operand.vmem [shape: f32[1024,10], index: 1, kind: input, shape index: {}]   ;;  %s1229_s2 = inlined_call_operand.vmem [shape: f32[1,10], index: 2, kind: input, shape index: {}]   ;;  %s1230_s3 = inlined_call_operand.hbm [shape: f32[2,10], index: 3, kind: output, shape index: {}]  }
   0x1   :  { %v33_v0 = vld [vmem:[%s1228_s1 + $0x80] sm:$0xff]  ;;  %v34_v1 = vld [vmem:[%s1228_s1 + $0x88] sm:$0xff]  ;;  %v35_v11 = vld [vmem:[%s1228_s1 + $0x90] sm:$0xff]  ;;  %v156_v48 = vunpack.c.l.s4 %v789_v47 }
   0x2   :  { %v17_v2 = vld [vmem:[%s1228_s1] sm:$0xff]  ;;  %v633_v3 = vpack.c.bf16 %v34_v1, %v33_v0  ;;  %v18_v4 = vld [vmem:[%s1228_s1 + $0x8] sm:$0xff]  ;;  %v36_v13 = vld [vmem:[%s1228_s1 + $0x98] sm:$0xff]  ;;  %v159_v0 = vshrl.u32 %v158_v49, 7 }
   0x3   :  { %v65_v5 = vld [vmem:[%s1228_s1 + $0x180] sm:$0xff]  ;;  %v66_v6 = vld [vmem:[%s1228_s1 + $0x188] sm:$0xff]  ;;  %v635_v7 = vpack.c.bf16 %v18_v4, %v17_v2  ;;  %v19_v14 = vld [vmem:[%s1228_s1 + $0x10] sm:$0xff]  ;;  %v637_v16 = vpack.c.bf16 %v36_v13, %v35_v11  ;;  %v157_v63 = vunpack.c.0.s8 %v156_v48 }
   0x4   :  { %v665_v8 = vpack.c.bf16 %v66_v6, %v65_v5  ;;  %v49_v9 = vld [vmem:[%s1228_s1 + $0x100] sm:$0xff]  ;;  %v50_v10 = vld [vmem:[%s1228_s1 + $0x108] sm:$0xff]  ;;  %634 = vmatprep.subr.bf16.mxu0 %v633_v3  ;;  %v20_v15 = vld [vmem:[%s1228_s1 + $0x18] sm:$0xff] }
   0x5   :  { %v667_v12 = vpack.c.bf16 %v50_v10, %v49_v9  ;;  %636 = vmatpush3.bf16.msra.mxu0 %v635_v7  ;;  %v639_v17 = vpack.c.bf16 %v20_v15, %v19_v14  ;;  %v67_v18 = vld [vmem:[%s1228_s1 + $0x190] sm:$0xff]  ;;  %v68_v19 = vld [vmem:[%s1228_s1 + $0x198] sm:$0xff]  ;;  %v37_v23 = vld [vmem:[%s1228_s1 + $0xa0] sm:$0xff]  ;;  %v961_v13 = vsub.s32 %v157_v63, %v159_v0 }
   0x6   :  { %666 = vmatprep.subr.bf16.mxu1 %v665_v8  ;;  %v51_v20 = vld [vmem:[%s1228_s1 + $0x110] sm:$0xff]  ;;  %v669_v21 = vpack.c.bf16 %v68_v19, %v67_v18  ;;  %v52_v22 = vld [vmem:[%s1228_s1 + $0x118] sm:$0xff]  ;;  %v38_v24 = vld [vmem:[%s1228_s1 + $0xa8] sm:$0xff]  ;;  %638 = vmatprep.subr.bf16.mxu0 %v637_v16 }
   0x7   :  { %668 = vmatpush3.bf16.msra.mxu1 %v667_v12  ;;  %v671_v25 = vpack.c.bf16 %v52_v22, %v51_v20  ;;  %v641_v26 = vpack.c.bf16 %v38_v24, %v37_v23  ;;  %v21_v27 = vld [vmem:[%s1228_s1 + $0x20] sm:$0xff]  ;;  %v22_v28 = vld [vmem:[%s1228_s1 + $0x28] sm:$0xff]  ;;  %v39_v35 = vld [vmem:[%s1228_s1 + $0xb0] sm:$0xff] }
   0x8   :  { %v69_v29 = vld [vmem:[%s1228_s1 + $0x1a0] sm:$0xff]  ;;  %670 = vmatprep.subr.bf16.mxu1 %v669_v21  ;;  %v70_v30 = vld [vmem:[%s1228_s1 + $0x1a8] sm:$0xff]  ;;  %v643_v33 = vpack.c.bf16 %v22_v28, %v21_v27  ;;  %v40_v36 = vld [vmem:[%s1228_s1 + $0xb8] sm:$0xff] }
   0x9   :  { %v53_v31 = vld [vmem:[%s1228_s1 + $0x120] sm:$0xff]  ;;  %v54_v32 = vld [vmem:[%s1228_s1 + $0x128] sm:$0xff]  ;;  %640 = vmatpush3.bf16.msra.mxu0 %v639_v17  ;;  %v673_v34 = vpack.c.bf16 %v70_v30, %v69_v29  ;;  %v23_v37 = vld [vmem:[%s1228_s1 + $0x30] sm:$0xff]  ;;  %v645_v39 = vpack.c.bf16 %v40_v36, %v39_v35 }
   0xa   :  { %642 = vmatprep.subr.bf16.mxu0 %v641_v26  ;;  %v675_v38 = vpack.c.bf16 %v54_v32, %v53_v31  ;;  %v24_v40 = vld [vmem:[%s1228_s1 + $0x38] sm:$0xff]  ;;  %v71_v41 = vld [vmem:[%s1228_s1 + $0x1b0] sm:$0xff]  ;;  %v41_v46 = vld [vmem:[%s1228_s1 + $0xc0] sm:$0xff] }
   0xb   :  { %672 = vmatpush3.bf16.msra.mxu1 %v671_v25  ;;  %v72_v42 = vld [vmem:[%s1228_s1 + $0x1b8] sm:$0xff]  ;;  %v55_v44 = vld [vmem:[%s1228_s1 + $0x130] sm:$0xff]  ;;  %v42_v50 = vld [vmem:[%s1228_s1 + $0xc8] sm:$0xff]  ;;  %v647_v51 = vpack.c.bf16 %v24_v40, %v23_v37 }
   0xc   :  { %674 = vmatprep.subr.bf16.mxu1 %v673_v34  ;;  %v677_v43 = vpack.c.bf16 %v72_v42, %v71_v41  ;;  %v56_v45 = vld [vmem:[%s1228_s1 + $0x138] sm:$0xff]  ;;  %v73_v52 = vld [vmem:[%s1228_s1 + $0x1c0] sm:$0xff]  ;;  %v74_v53 = vld [vmem:[%s1228_s1 + $0x1c8] sm:$0xff]  ;;  %v649_v55 = vpack.c.bf16 %v42_v50, %v41_v46 }
   0xd   :  { %644 = vmatpush3.bf16.msra.mxu0 %v643_v33  ;;  %v679_v54 = vpack.c.bf16 %v56_v45, %v55_v44  ;;  %v25_v56 = vld [vmem:[%s1228_s1 + $0x40] sm:$0xff]  ;;  %v26_v57 = vld [vmem:[%s1228_s1 + $0x48] sm:$0xff]  ;;  %v681_v59 = vpack.c.bf16 %v74_v53, %v73_v52  ;;  %v43_v61 = vld [vmem:[%s1228_s1 + $0xd0] sm:$0xff] }
   0xe   :  { %646 = vmatprep.subr.bf16.mxu0 %v645_v39  ;;  %v57_v58 = vld [vmem:[%s1228_s1 + $0x140] sm:$0xff]  ;;  %v58_v60 = vld [vmem:[%s1228_s1 + $0x148] sm:$0xff]  ;;  %v44_v62 = vld [vmem:[%s1228_s1 + $0xd8] sm:$0xff]  ;;  %v651_v3 = vpack.c.bf16 %v26_v57, %v25_v56 }
   0xf   :  { %676 = vmatpush3.bf16.msra.mxu1 %v675_v38  ;;  %v75_v1 = vld [vmem:[%s1228_s1 + $0x1d0] sm:$0xff]  ;;  %v76_v2 = vld [vmem:[%s1228_s1 + $0x1d8] sm:$0xff]  ;;  %v683_v4 = vpack.c.bf16 %v58_v60, %v57_v58  ;;  %v653_v5 = vpack.c.bf16 %v44_v62, %v43_v61  ;;  %v45_v11 = vld [vmem:[%s1228_s1 + $0xe0] sm:$0xff] }
  0x10   :  { %678 = vmatprep.subr.bf16.mxu1 %v677_v43  ;;  %v27_v6 = vld [vmem:[%s1228_s1 + $0x50] sm:$0xff]  ;;  %v28_v7 = vld [vmem:[%s1228_s1 + $0x58] sm:$0xff]  ;;  %v685_v9 = vpack.c.bf16 %v76_v2, %v75_v1  ;;  %v46_v12 = vld [vmem:[%s1228_s1 + $0xe8] sm:$0xff] }
  0x11   :  { %648 = vmatpush3.bf16.msra.mxu0 %v647_v51  ;;  %v59_v8 = vld [vmem:[%s1228_s1 + $0x150] sm:$0xff]  ;;  %v60_v10 = vld [vmem:[%s1228_s1 + $0x158] sm:$0xff]  ;;  %v77_v14 = vld [vmem:[%s1228_s1 + $0x1e0] sm:$0xff]  ;;  %v655_v16 = vpack.c.bf16 %v28_v7, %v27_v6  ;;  %v657_v19 = vpack.c.bf16 %v46_v12, %v45_v11 }
  0x12   :  { %650 = vmatprep.subr.bf16.mxu0 %v649_v55  ;;  %v78_v15 = vld [vmem:[%s1228_s1 + $0x1e8] sm:$0xff]  ;;  %v29_v17 = vld [vmem:[%s1228_s1 + $0x60] sm:$0xff]  ;;  %v687_v18 = vpack.c.bf16 %v60_v10, %v59_v8  ;;  %v47_v25 = vld [vmem:[%s1228_s1 + $0xf0] sm:$0xff] }
  0x13   :  { %680 = vmatpush3.bf16.msra.mxu1 %v679_v54  ;;  %v30_v20 = vld [vmem:[%s1228_s1 + $0x68] sm:$0xff]  ;;  %v61_v21 = vld [vmem:[%s1228_s1 + $0x160] sm:$0xff]  ;;  %v689_v23 = vpack.c.bf16 %v78_v15, %v77_v14  ;;  %v48_v26 = vld [vmem:[%s1228_s1 + $0xf8] sm:$0xff] }
  0x14   :  { %682 = vmatprep.subr.bf16.mxu1 %v681_v59  ;;  %v15_v22 = vld [vmem:[%s1227_s0] sm:$0xff]  ;;  %v62_v24 = vld [vmem:[%s1228_s1 + $0x168] sm:$0xff]  ;;  %v79_v29 = vld [vmem:[%s1228_s1 + $0x1f0] sm:$0xff]  ;;  %v659_v31 = vpack.c.bf16 %v30_v20, %v29_v17  ;;  %v661_v35 = vpack.c.bf16 %v48_v26, %v47_v25 }
  0x15   :  { %652 = vmatpush3.bf16.msra.mxu0 %v651_v3  ;;  %v161_v27 = vrot.slane %v15_v22, %v961_v13  ;;  %v154_v28 = vcombine.high %v15_v22, %v15_v22  ;;  %v80_v30 = vld [vmem:[%s1228_s1 + $0x1f8] sm:$0xff]  ;;  %v691_v34 = vpack.c.bf16 %v62_v24, %v61_v21  ;;  %v31_v36 = vld [vmem:[%s1228_s1 + $0x70] sm:$0xff]  ;;  %v97_v41 = vld [vmem:[%s1228_s1 + $0x280] sm:$0xff] }
  0x16   :  { %654 = vmatprep.subr.bf16.mxu0 %v653_v5  ;;  %v32_v37 = vld [vmem:[%s1228_s1 + $0x78] sm:$0xff]  ;;  %v63_v38 = vld [vmem:[%s1228_s1 + $0x170] sm:$0xff]  ;;  %v693_v39 = vpack.c.bf16 %v80_v30, %v79_v29  ;;  %v98_v42 = vld [vmem:[%s1228_s1 + $0x288] sm:$0xff] }
  0x17   :  { %684 = vmatpush3.bf16.msra.mxu1 %v683_v4  ;;  %v169_v32 = vcombine.high %v161_v27, %v161_v27  ;;  %v168_v33 = vrot.slane %v154_v28, %v961_v13  ;;  %v64_v40 = vld [vmem:[%s1228_s1 + $0x178] sm:$0xff]  ;;  %v129_v44 = vld [vmem:[%s1228_s1 + $0x380] sm:$0xff]  ;;  %v130_v45 = vld [vmem:[%s1228_s1 + $0x388] sm:$0xff]  ;;  %v663_v46 = vpack.c.bf16 %v32_v37, %v31_v36  ;;  %v697_v48 = vpack.c.bf16 %v98_v42, %v97_v41 }
  0x18   :  { %686 = vmatprep.subr.bf16.mxu1 %v685_v9  ;;  %v695_v47 = vpack.c.bf16 %v64_v40, %v63_v38  ;;  %v81_v49 = vld [vmem:[%s1228_s1 + $0x200] sm:$0xff]  ;;  %v82_v50 = vld [vmem:[%s1228_s1 + $0x208] sm:$0xff]  ;;  %v729_v52 = vpack.c.bf16 %v130_v45, %v129_v44  ;;  %v99_v54 = vld [vmem:[%s1228_s1 + $0x290] sm:$0xff] }
  0x19   :  { %656 = vmatpush3.bf16.msra.mxu0 %v655_v16  ;;  %260 = vmatprep.mubr.f32.mxu0 %v169_v32  ;;  %v170_v43 = vcombine.high %v168_v33, %v168_v33  ;;  %v113_v51 = vld [vmem:[%s1228_s1 + $0x300] sm:$0xff]  ;;  %v114_v53 = vld [vmem:[%s1228_s1 + $0x308] sm:$0xff]  ;;  %v100_v55 = vld [vmem:[%s1228_s1 + $0x298] sm:$0xff]  ;;  %v699_v58 = vpack.c.bf16 %v82_v50, %v81_v49 }
  0x1a   :  { %658 = vmatprep.subr.bf16.mxu0 %v657_v19  ;;  %v131_v56 = vld [vmem:[%s1228_s1 + $0x390] sm:$0xff]  ;;  %v132_v57 = vld [vmem:[%s1228_s1 + $0x398] sm:$0xff]  ;;  %v731_v59 = vpack.c.bf16 %v114_v53, %v113_v51  ;;  %v701_v60 = vpack.c.bf16 %v100_v55, %v99_v54  ;;  %v101_v2 = vld [vmem:[%s1228_s1 + $0x2a0] sm:$0xff] }
  0x1b   :  { %688 = vmatpush3.bf16.msra.mxu1 %v687_v18  ;;  %330 = vmatprep.mubr.f32.mxu1 %v170_v43  ;;  %v83_v61 = vld [vmem:[%s1228_s1 + $0x210] sm:$0xff]  ;;  %v84_v62 = vld [vmem:[%s1228_s1 + $0x218] sm:$0xff]  ;;  %v733_v0 = vpack.c.bf16 %v132_v57, %v131_v56  ;;  %v102_v3 = vld [vmem:[%s1228_s1 + $0x2a8] sm:$0xff] }
  0x1c   :  { %690 = vmatprep.subr.bf16.mxu1 %v689_v23  ;;  %v115_v63 = vld [vmem:[%s1228_s1 + $0x310] sm:$0xff]  ;;  %v116_v1 = vld [vmem:[%s1228_s1 + $0x318] sm:$0xff]  ;;  %v133_v4 = vld [vmem:[%s1228_s1 + $0x3a0] sm:$0xff]  ;;  %v703_v6 = vpack.c.bf16 %v84_v62, %v83_v61  ;;  %v705_v8 = vpack.c.bf16 %v102_v3, %v101_v2 }
  0x1d   :  { %660 = vmatpush3.bf16.msra.mxu0 %v659_v31  ;;  %v134_v5 = vld [vmem:[%s1228_s1 + $0x3a8] sm:$0xff]  ;;  %v735_v7 = vpack.c.bf16 %v116_v1, %v115_v63  ;;  %v85_v9 = vld [vmem:[%s1228_s1 + $0x220] sm:$0xff]  ;;  %v103_v15 = vld [vmem:[%s1228_s1 + $0x2b0] sm:$0xff] }
  0x1e   :  { %662 = vmatprep.subr.bf16.mxu0 %v661_v35  ;;  %v86_v10 = vld [vmem:[%s1228_s1 + $0x228] sm:$0xff]  ;;  %v117_v11 = vld [vmem:[%s1228_s1 + $0x320] sm:$0xff]  ;;  %v737_v12 = vpack.c.bf16 %v134_v5, %v133_v4  ;;  %v104_v16 = vld [vmem:[%s1228_s1 + $0x2b8] sm:$0xff] }
  0x1f   :  { %692 = vmatpush3.bf16.msra.mxu1 %v691_v34  ;;  %v118_v14 = vld [vmem:[%s1228_s1 + $0x328] sm:$0xff]  ;;  %v135_v17 = vld [vmem:[%s1228_s1 + $0x3b0] sm:$0xff]  ;;  %v136_v18 = vld [vmem:[%s1228_s1 + $0x3b8] sm:$0xff]  ;;  %v707_v19 = vpack.c.bf16 %v86_v10, %v85_v9  ;;  %v709_v22 = vpack.c.bf16 %v104_v16, %v103_v15 }
  0x20   :  { %694 = vmatprep.subr.bf16.mxu1 %v693_v39  ;;  %v87_v20 = vld [vmem:[%s1228_s1 + $0x230] sm:$0xff]  ;;  %v739_v21 = vpack.c.bf16 %v118_v14, %v117_v11  ;;  %v88_v23 = vld [vmem:[%s1228_s1 + $0x238] sm:$0xff]  ;;  %v741_v26 = vpack.c.bf16 %v136_v18, %v135_v17  ;;  %v106_v28 = vld [vmem:[%s1228_s1 + $0x2c8] sm:$0xff] }
  0x21   :  { %664 = vmatpush3.bf16.msra.mxu0 %v663_v46  ;;  %v119_v24 = vld [vmem:[%s1228_s1 + $0x330] sm:$0xff]  ;;  %v120_v25 = vld [vmem:[%s1228_s1 + $0x338] sm:$0xff]  ;;  %v137_v29 = vld [vmem:[%s1228_s1 + $0x3c0] sm:$0xff] }
  0x22   :  { %698 = vmatprep.subr.bf16.mxu0 %v697_v48  ;;  %v138_v30 = vld [vmem:[%s1228_s1 + $0x3c8] sm:$0xff] }
  0x23   :  { %696 = vmatpush3.bf16.msra.mxu1 %v695_v47  ;;  %v16_v31 = vld [vmem:[%s1227_s0 + $0x8] sm:$0xff] }
  0x24   :  { %730 = vmatprep.subr.bf16.mxu1 %v729_v52  ;;  %261 = vmatmul.mubr.f32.vlgmr.msra.gmra.mrb[0].mxu0 %v161_v27  ;;  %v105_v27 = vld [vmem:[%s1228_s1 + $0x2c0] sm:$0xff] }
  0x25   :  { %700 = vmatpush3.bf16.msra.mxu0 %v699_v58 }
  0x26   :  { %331 = vmatmul.mubr.f32.vlgmr.msra.gmra.mrb[0].mxu1 %v168_v33  ;;  %702 = vmatprep.subr.bf16.mxu0 %v701_v60 }
  0x27   :  { %732 = vmatpush3.bf16.msra.mxu1 %v731_v59 }
  0x28   :  { %734 = vmatprep.subr.bf16.mxu1 %v733_v0 }
  0x29   :  { %704 = vmatpush3.bf16.msra.mxu0 %v703_v6 }
  0x2a   :  { %706 = vmatprep.subr.bf16.mxu0 %v705_v8 }
  0x2b   :  { %736 = vmatpush3.bf16.msra.mxu1 %v735_v7 }
  0x2c   :  { %738 = vmatprep.subr.bf16.mxu1 %v737_v12 }
  0x2d   :  { %8 = vsyncpa [#allocation3], 0  ;;  %708 = vmatpush3.bf16.msra.mxu0 %v707_v19  ;;  %v711_v32 = vpack.c.bf16 %v88_v23, %v87_v20  ;;  %v1122_v33 = vrot.slane %v16_v31, %v961_v13  ;;  %v171_v34 = vcombine.high %v16_v31, %v16_v31  ;;  %v743_v35 = vpack.c.bf16 %v120_v25, %v119_v24  ;;  %v89_v37 = vld [vmem:[%s1228_s1 + $0x240] sm:$0xff]  ;;  %v90_v38 = vld [vmem:[%s1228_s1 + $0x248] sm:$0xff] }
  0x2e   :  { %710 = vmatprep.subr.bf16.mxu0 %v709_v22  ;;  %v713_v36 = vpack.c.bf16 %v106_v28, %v105_v27  ;;  %v121_v39 = vld [vmem:[%s1228_s1 + $0x340] sm:$0xff]  ;;  %v745_v40 = vpack.c.bf16 %v138_v30, %v137_v29  ;;  %v122_v41 = vld [vmem:[%s1228_s1 + $0x348] sm:$0xff]  ;;  %v107_v42 = vld [vmem:[%s1228_s1 + $0x2d0] sm:$0xff]  ;;  %v715_v48 = vpack.c.bf16 %v90_v38, %v89_v37  ;;  %vm476_vm0 = vcmask 74752  }
  0x2f   :  { %740 = vmatpush3.bf16.msra.mxu1 %v739_v21  ;;  %v108_v43 = vld [vmem:[%s1228_s1 + $0x2d8] sm:$0xff]  ;;  %v186_v44 = vcombine.high %v1122_v33, %v1122_v33  ;;  %v185_v45 = vrot.slane %v171_v34, %v961_v13  ;;  %v139_v46 = vld [vmem:[%s1228_s1 + $0x3d0] sm:$0xff]  ;;  %v747_v50 = vpack.c.bf16 %v122_v41, %v121_v39  ;;  %v109_v56 = vld [vmem:[%s1228_s1 + $0x2e0] sm:$0xff] }
  0x30   :  { %742 = vmatprep.subr.bf16.mxu1 %v741_v26  ;;  %v140_v47 = vld [vmem:[%s1228_s1 + $0x3d8] sm:$0xff]  ;;  %v717_v51 = vpack.c.bf16 %v108_v43, %v107_v42  ;;  %v91_v13 = vld [vmem:[%s1228_s1 + $0x250] sm:$0xff]  ;;  %v110_v57 = vld [vmem:[%s1228_s1 + $0x2e8] sm:$0xff] }
  0x31   :  { %712 = vmatpush3.bf16.msra.mxu0 %v711_v32  ;;  %400 = vmatprep.mubr.f32.mxu0 %v186_v44  ;;  %v187_v49 = vcombine.high %v185_v45, %v185_v45  ;;  %v92_v52 = vld [vmem:[%s1228_s1 + $0x258] sm:$0xff]  ;;  %v123_v53 = vld [vmem:[%s1228_s1 + $0x350] sm:$0xff]  ;;  %v749_v54 = vpack.c.bf16 %v140_v47, %v139_v46  ;;  %v141_v58 = vld [vmem:[%s1228_s1 + $0x3e0] sm:$0xff]  ;;  %v721_v62 = vpack.c.bf16 %v110_v57, %v109_v56 }
  0x32   :  { %714 = vmatprep.subr.bf16.mxu0 %v713_v36  ;;  %v124_v55 = vld [vmem:[%s1228_s1 + $0x358] sm:$0xff]  ;;  %v142_v59 = vld [vmem:[%s1228_s1 + $0x3e8] sm:$0xff]  ;;  %v719_v60 = vpack.c.bf16 %v92_v52, %v91_v13  ;;  %v93_v63 = vld [vmem:[%s1228_s1 + $0x260] sm:$0xff] }
  0x33   :  { %744 = vmatpush3.bf16.msra.mxu1 %v743_v35  ;;  %470 = vmatprep.mubr.f32.mxu1 %v187_v49  ;;  %v751_v61 = vpack.c.bf16 %v124_v55, %v123_v53  ;;  %v94_v0 = vld [vmem:[%s1228_s1 + $0x268] sm:$0xff]  ;;  %v125_v1 = vld [vmem:[%s1228_s1 + $0x360] sm:$0xff]  ;;  %v753_v2 = vpack.c.bf16 %v142_v59, %v141_v58  ;;  %v111_v4 = vld [vmem:[%s1228_s1 + $0x2f0] sm:$0xff] }
  0x34   :  { %746 = vmatprep.subr.bf16.mxu1 %v745_v40  ;;  %v126_v3 = vld [vmem:[%s1228_s1 + $0x368] sm:$0xff]  ;;  %v112_v5 = vld [vmem:[%s1228_s1 + $0x2f8] sm:$0xff]  ;;  %v143_v6 = vld [vmem:[%s1228_s1 + $0x3f0] sm:$0xff]  ;;  %v723_v8 = vpack.c.bf16 %v94_v0, %v93_v63 }
  0x35   :  { %716 = vmatpush3.bf16.msra.mxu0 %v715_v48  ;;  %v144_v7 = vld [vmem:[%s1228_s1 + $0x3f8] sm:$0xff]  ;;  %v755_v9 = vpack.c.bf16 %v126_v3, %v125_v1  ;;  %v725_v10 = vpack.c.bf16 %v112_v5, %v111_v4  ;;  %v95_v11 = vld [vmem:[%s1228_s1 + $0x270] sm:$0xff]  ;;  %v492_v20 = vld [vmem:[%s1229_s2] ss:$0 sm:$0xff] }
  0x36   :  { %718 = vmatprep.subr.bf16.mxu0 %v717_v51  ;;  %v96_v12 = vld [vmem:[%s1228_s1 + $0x278] sm:$0xff]  ;;  %v757_v14 = vpack.c.bf16 %v144_v7, %v143_v6  ;;  %v127_v15 = vld [vmem:[%s1228_s1 + $0x370] sm:$0xff] }
  0x37   :  { %748 = vmatpush3.bf16.msra.mxu1 %v747_v50  ;;  %v128_v16 = vld [vmem:[%s1228_s1 + $0x378] sm:$0xff]  ;;  %v727_v17 = vpack.c.bf16 %v96_v12, %v95_v11  ;;  %s790_s1 = smov [#allocation2]  }
  0x38   :  { %750 = vmatprep.subr.bf16.mxu1 %v749_v54  ;;  %v759_v18 = vpack.c.bf16 %v128_v16, %v127_v15  ;;  %s484_s29 = sshll.u32 %s790_s1, 4  ;;  %s485_s29 = int_to_ptr.vmem [resolvable:$true] %s484_s29 }
  0x39   :  { %720 = vmatpush3.bf16.msra.mxu0 %v719_v60  ;;  %s765_s2 = scalar_lea.vmem %s485_s29, 32  ;;  %p770_p1 = scmp.lt.s32.totalorder %s485_s29, %s485_s29 }
  0x3a   :  { %722 = vmatprep.subr.bf16.mxu0 %v721_v62  ;;  %p766_p0 = scmp.ne.s32.totalorder %s485_s29, %s765_s2  ;;  %p771_p2 = scmp.lt.s32.totalorder %s765_s2, %s765_s2 }
  0x3b   :  { %752 = vmatpush3.bf16.msra.mxu1 %v751_v61 }
  0x3c   :  { %754 = vmatprep.subr.bf16.mxu1 %v753_v2  ;;  %p772_p3 = por %p771_p2, %p770_p1 }
  0x3d   :  { %724 = vmatpush3.bf16.msra.mxu0 %v723_v8 }
  0x3e   :  { %726 = vmatprep.subr.bf16.mxu0 %v725_v10  ;;  %p773_p4 = pnand %p772_p3, %p766_p0 }
  0x3f   :  { %756 = vmatpush3.bf16.msra.mxu1 %v755_v9 }
  0x40   :  { %758 = vmatprep.subr.bf16.mxu1 %v757_v14 }
  0x41   :  { %728 = vmatpush3.bf16.msra.mxu0 %v727_v17 }
  0x43   :  { %760 = vmatpush3.bf16.msra.mxu1 %v759_v18 }
  0x44   :  { %401 = vmatmul.mubr.f32.vlgmr.msra.gmra.mrb[2].mxu0 %v1122_v33 }
  0x46   :  { %471 = vmatmul.mubr.f32.vlgmr.msra.gmra.mrb[2].mxu1 %v185_v45 }
  0xf7   :  { %v525_v19 = vpop.f32.mrb[0].mxu0 }
  0xf8   :  { %v526_v21 = vpop.f32.mrb[1].mxu0 }
  0xf9   :  { %v560_v22 = vpop.f32.mrb[0].mxu1  ;;  %v527_v23 = vadd.f32 %v526_v21, %v525_v19 }
  0xfa   :  { %v561_v24 = vpop.f32.mrb[1].mxu1 }
  0xfb   :  { %v562_v25 = vadd.f32 %v561_v24, %v560_v22  ;;  %v263_v26 = vadd.f32 %v527_v23, %v492_v20 }
  0xfd   :  { %v333_v27 = vadd.f32 %v562_v25, %v263_v26 }
 0x117   :  { %v595_v28 = vpop.f32.mrb[2].mxu0 }
 0x118   :  { %v596_v29 = vpop.f32.mrb[3].mxu0 }
 0x119   :  { %v630_v30 = vpop.f32.mrb[2].mxu1  ;;  %v597_v31 = vadd.f32 %v596_v29, %v595_v28 }
 0x11a   :  { %v631_v32 = vpop.f32.mrb[3].mxu1 }
 0x11b   :  { %v632_v34 = vadd.f32 %v631_v32, %v630_v30  ;;  %v403_v33 = vadd.f32 %v597_v31, %v333_v27 }
 0x11d   :  { %v473_v35 = vadd.f32 %v632_v34, %v403_v33 }
 0x11f   :  { %477 = vst.msk [vmem:[#allocation2] sm:$0x3] %vm476_vm0, %v473_v35 }
 0x120   :  { %776 = shalt.err (!%p773_p4)
}
 0x121   :  { %s777_s4 = scalar_lea.hbm %s1230_s3, 32 }
 0x122   :  { %p778_p5 = scmp.ne.s32.totalorder %s1230_s3, %s777_s4  ;;  %p781_p6 = scmp.lt.u32.totalorder %s777_s4, %s1230_s3 }
 0x124   :  { %p783_p7 = pnand %p781_p6, %p778_p5 }
 0x126   :  { %786 = shalt.err (!%p783_p7)
}
 0x127   :  { %487 = dma.vmem_to_hbm [thread:$0]  %s485_s29, 32, %s1230_s3, [#allocation3]  }
 0x128   :  { %787 = dma.done.wait [#allocation3], 32  }
 0x129   :  { %788 = vsyncadd [#allocation3], 4294967264 }
 0x12a   :  { %491 = vsyncpa [#allocation3], 1 }

// kernel: model_forward.10
= control target key start
LH: loop header
LB: loop body
LE: loop exit
PB: predicated region body
PF: predicated region fallthrough
CT: control target
= control target key end

     0   :  { %s18844_s0 = inlined_call_operand.vmem [shape: bf16[2,25088], index: 0, kind: input, shape index: {}]   ;;  %s18845_s1 = inlined_call_operand.hbm [shape: bf16[25088,1024], index: 1, kind: input, shape index: {}]   ;;  %s18846_s2 = inlined_call_operand.hbm [shape: f32[1,1024], index: 2, kind: input, shape index: {}]   ;;  %s18847_s3 = inlined_call_operand.vmem [shape: f32[2,1024], index: 3, kind: output, shape index: {}]  }
   0x1   :  { %18853 = sst [smem:[#allocation10_spill]] %s18845_s1 }
   0x2   :  { %8 = vsyncpa [#allocation4], 0 }
   0x3   :  { %10 = vsyncpa [#allocation4 + $0x1], 0 }
   0x4   :  { %11 = vsyncpa [#allocation6], 0 }
   0x5   :  { %13 = vsyncpa [#allocation6 + $0x1], 0  ;;  %s16735_s12 = smov 0   ;;  %s16737_s13 = smov 0  }
   0x6   :  { %s16739_s14 = smov 0   ;;  %s16741_s15 = smov 0  }
   0x7   :  { %s16743_s16 = smov 0   ;;  %s16745_s17 = smov 0  }
   0x8   :  { %s16747_s18 = smov 0   ;;  %s16749_s19 = smov 0  }
   0x9   :  { %s16751_s20 = smov 0   ;;  %s16753_s21 = smov 0  }
   0xa   :  { %s16755_s22 = smov 0  }
   0xb LB: > { %s28_s23 = sadd.s32 1, %s16696_s20  ;;  %p73_p1 = scmp.ne.s32.totalorder %s16684_s17, %s16680_s16  ;;  %s16704_s22 = sphi %s16755_s22, %s19_s22   ;;  %s16700_s21 = sphi %s16753_s21, %s18881_s21   ;;  %s16696_s20 = sphi %s16751_s20, %s18880_s20   ;;  %s16692_s19 = sphi %s16749_s19, %s18879_s19   ;;  %s16688_s18 = sphi %s16747_s18, %s18878_s18   ;;  %s16684_s17 = sphi %s16745_s17, %s18877_s17   ;;  %s16680_s16 = sphi %s16743_s16, %s18876_s16   ;;  %s16676_s15 = sphi %s16741_s15, %s18875_s15   ;;  %s16672_s14 = sphi %s16739_s14, %s18874_s14   ;;  %s16668_s13 = sphi %s16737_s13, %s18873_s13   ;;  %s16664_s12 = sphi %s16735_s12, %s18872_s12  }
   0xc   : > { %p16792_p0 = scmp.ge.s32.totalorder %s28_s23, 4  ;;  %p18849_p2 = scmp.eq.s32.totalorder %s16704_s22, 0 }
   0xd   : > { %p18848_p4 = scmp.lt.s32.totalorder %s16704_s22, 8  ;;  %s163_s27 = sand.u32 1, %s16684_s17  }
   0xe   : > { %s18883_s23 = smov (%p16792_p0, %s28_s23), 0  ;;  %p75_p3 = por %p18849_p2, %p73_p1 }
   0xf   : > { %s14079_s28 = smul.u32 12544, %s163_s27  ;;  %s12302_s29 = sshll.u32 %s16700_s21, 2 }
  0x10   : > { %s13885_s30 = smul.u32 6272, %s16696_s20  ;;  %p16813_p5 = pnand %p18848_p4, %p75_p3 }
  0x11   : > { %s167_s6 = scalar_lea.vmem [#allocation3], %s14079_s28  ;;  %s18856_s1 = sld [smem:[#allocation10_spill]] }
  0x12   : > { %s174_s5 = sadd.s32 %s13885_s30, %s12302_s29  ;;  %s177_s7 = sshll.u32 %s167_s6, 4  ;;  %s16817_s7 = int_to_ptr.vmem [resolvable:$true] %s177_s7 }
  0x13   : > { %s12304_s8 = sshll.u32 %s174_s5, 6  ;;  %s16825_s24 = scalar_lea.sflag [#allocation4], %s163_s27 }
  0x14   : > { %p16552_p8 = pneg %p16813_p5 }
  0x17   : > { %s16822_s11 = scalar_lea.hbm %s18856_s1, %s12304_s8  ;;  %s16555_s30 = scalar_lea.hbm %s18856_s1, 1605632 }
  0x18   : > { %s16550_s26 = scalar_lea.hbm %s16822_s11, 200704  ;;  %p16556_p11 = scmp.lt.u32.totalorder %s16822_s11, %s18856_s1 }
  0x19   : > { %p16551_p7 = scmp.ne.s32.totalorder %s16822_s11, %s16550_s26  ;;  %p16557_p12 = scmp.lt.u32.totalorder %s16555_s30, %s16550_s26 }
  0x1a   : > { %p16559_p1 = scmp.lt.u32.totalorder %s16550_s26, %s16822_s11 }
  0x1b   : > { %p16553_p9 = pnand %p16552_p8, %p16551_p7  ;;  %p16558_p13 = por %p16557_p12, %p16556_p11 }
  0x1d   : > { %p16554_p10 = pneg %p16553_p9  ;;  %p16560_p3 = por %p16559_p1, %p16558_p13 }
  0x1f   : > { %p16561_p4 = pnand %p16560_p3, %p16554_p10 }
  0x21   : > { %16564 = shalt.err (!%p16561_p4)
}
  0x22   : > { %s16565_s27 = scalar_lea.vmem %s16817_s7, 200704  ;;  %s16706_s8 = smov [#allocation3]  }
  0x23   : > { %p16566_p7 = scmp.ne.s32.totalorder %s16817_s7, %s16565_s27  ;;  %s16570_s9 = sshll.u32 %s16706_s8, 4  ;;  %s16571_s9 = int_to_ptr.vmem [resolvable:$false] %s16570_s9 }
  0x24   : > { %s16572_s10 = scalar_lea.vmem %s16571_s9, 401408  ;;  %p16573_p6 = scmp.lt.s32.totalorder %s16817_s7, %s16571_s9 }
  0x25   : > { %p16568_p9 = pnand %p16566_p7, %p16552_p8  ;;  %p16574_p11 = scmp.lt.s32.totalorder %s16572_s10, %s16565_s27 }
  0x27   : > { %p16569_p2 = pneg %p16568_p9  ;;  %p16575_p12 = por %p16574_p11, %p16573_p6 }
  0x29   : > { %p16576_p13 = pnand %p16575_p12, %p16569_p2 }
  0x2b   : > { %16579 = shalt.err (!%p16576_p13)
}
  0x2c   : > { %s16707_s26 = smov 512   ;;  %s16708_s28 = smov 256  }
  0x2d   : > { %s16709_s29 = smov 16   ;;  %p204_p2 = scmp.lt.s32.totalorder %s16704_s22, 9 }
  0x2e   : > { %14088 = dma.hbm_to_vmem [thread:$0]  (!%p16813_p5), %s16822_s11, 200704, %s16817_s7, %s16825_s24, %s16707_s26, %s16708_s28, %s16709_s29  }
  0x2f   : > { %p18857_p4 = scmp.ge.s32.totalorder %s16704_s22, 1  ;;  %s12298_s5 = sadd.s32 4294967295, %s16704_s22  }
  0x30   : > { %s31_s6 = sadd.s32 1, %s16700_s21  ;;  %p79_p8 = scmp.ne.s32.totalorder %s16680_s16, %s16676_s15 }
  0x31   : > { %p16856_p6 = pnand %p18857_p4, %p204_p2  ;;  %s18885_s6 = smov (!%p16792_p0, %s31_s6), %s16700_s21 }
  0x32   : > { %p16867_p10 = scmp.eq.s32.totalorder %s12298_s5, 0  ;;  %p33_p5 = scmp.ge.s32.totalorder %s18885_s6, 2 }
  0x33   : > { %s92_s24 = sadd.s32 1, %s16672_s14  ;;  %p99_p3 = scmp.ne.s32.totalorder %s16672_s14, %s16668_s13 }
  0x34   : > { %p16874_p1 = por %p16867_p10, %p79_p8  ;;  %s18887_s6 = smov (%p33_p5, %s18885_s6), 0 }
  0x35   : > { %18861 = sst [smem:[#allocation9_spill]] %s18887_s6  ;;  %p18862_p0 = scmp.eq.s32.totalorder %s16704_s22, 0 }
  0x36   : > { %s18860_s7 = scalar_select %p16874_p1, 1, 0 }
  0x37   : > { %p16884_p7 = por %p99_p3, %p18862_p0  ;;  %p105_p9 = scmp.ne.s32.totalorder %s16668_s13, %s16664_s12 }
  0x38   : > { %s62_s25 = ssub.s32 %s16700_s21, %s18887_s6  ;;  %s187_s11 = sand.u32 1, %s16672_s14  }
  0x39   : > { %s18864_s27 = ssub.s32 %s16696_s20, %s18883_s23  ;;  %p90_p11 = scmp.eq.s32.totalorder %s62_s25, 0 }
  0x3a   : > { %s63_s8 = sor.u32 %s62_s25, %s18864_s27  ;;  %p16898_p13 = por %p105_p9, %p16867_p10 }
  0x3b   : > { %p64_p12 = scmp.eq.s32.totalorder %s63_s8, 0  ;;  %s18866_s26 = sadd.s32 1, %s16684_s17 }
  0x3c   : > { %s18865_s9 = scalar_select %p16898_p13, 1, 0 }
  0x3d   : > { %s16903_s10 = scalar_select %p90_p11, %s16672_s14, %s92_s24  }
  0x3e   : > { %s16908_s28 = scalar_select %p64_p12, %s16684_s17, %s18866_s26  }
  0x3f   : > { %s12305_s29 = sshll.u32 %s187_s11, 2  ;;  %s13886_s5 = sshll.u32 %s16700_s21, 6 }
  0x40   : > { %s16914_s6 = scalar_lea.hbm %s18846_s2, %s13886_s5  ;;  %s191_s4 = scalar_lea.vmem [#allocation5], %s12305_s29 }
  0x41   : > { %s199_s25 = sshll.u32 %s191_s4, 4  ;;  %p18867_p2 = scmp.lt.s32.totalorder %s16704_s22, 8  ;;  %s16916_s25 = int_to_ptr.vmem [resolvable:$true] %s199_s25 }
  0x42   : > { %s188_s27 = scalar_lea.sflag [#allocation6], %s187_s11  ;;  %s16580_s1 = scalar_lea.hbm %s16914_s6, 64 }
  0x43   : > { %p16922_p4 = pnand %p18867_p2, %p16884_p7  ;;  %p16581_p8 = scmp.ne.s32.totalorder %s16914_s6, %s16580_s1 }
  0x44   : > { %s16585_s15 = scalar_lea.hbm %s18846_s2, 128  ;;  %p16586_p0 = scmp.lt.u32.totalorder %s16914_s6, %s18846_s2 }
  0x45   : > { %p16582_p10 = pneg %p16922_p4  ;;  %p16587_p7 = scmp.lt.u32.totalorder %s16585_s15, %s16580_s1 }
  0x46   : > { %p16589_p11 = scmp.lt.u32.totalorder %s16580_s1, %s16914_s6 }
  0x47   : > { %p16583_p5 = pnand %p16582_p10, %p16581_p8  ;;  %p16588_p9 = por %p16587_p7, %p16586_p0 }
  0x49   : > { %p16584_p3 = pneg %p16583_p5  ;;  %p16590_p12 = por %p16589_p11, %p16588_p9 }
  0x4b   : > { %p16591_p2 = pnand %p16590_p12, %p16584_p3 }
  0x4d   : > { %16594 = shalt.err (!%p16591_p2)
}
  0x4e   : > { %s16595_s11 = scalar_lea.vmem %s16916_s25, 64  ;;  %s16710_s12 = smov [#allocation5]  }
  0x4f   : > { %p16596_p8 = scmp.ne.s32.totalorder %s16916_s25, %s16595_s11  ;;  %s16600_s4 = sshll.u32 %s16710_s12, 4  ;;  %s16601_s4 = int_to_ptr.vmem [resolvable:$false] %s16600_s4 }
  0x50   : > { %s16602_s8 = scalar_lea.vmem %s16601_s4, 128  ;;  %p16603_p1 = scmp.lt.s32.totalorder %s16916_s25, %s16601_s4 }
  0x51   : > { %p16598_p5 = pnand %p16596_p8, %p16582_p10  ;;  %p16604_p0 = scmp.lt.s32.totalorder %s16602_s8, %s16595_s11 }
  0x53   : > { %p16599_p13 = pneg %p16598_p5  ;;  %p16605_p7 = por %p16604_p0, %p16603_p1 }
  0x55   : > { %p16606_p9 = pnand %p16605_p7, %p16599_p13 }
  0x57   : > { %16609 = shalt.err (!%p16606_p9)
}
  0x58   : > { %14091 = dma.hbm_to_vmem [thread:$0]  (!%p16922_p4), %s16914_s6, 64, %s16916_s25, %s188_s27  }
  0x59   : > { %208 = sbr.rel (%p16856_p6) target bundleno = 1920 (0x780), region = 32  ;;  %s210_s1 = sand.u32 (!%p16856_p6), 1, %s16680_s16  }
  0x5a   : > { %s14080_s26 = smul.u32 (!%p16856_p6), 12544, %s210_s1  ;;  %s211_s15 = scalar_lea.sflag (!%p16856_p6), [#allocation4], %s210_s1 }
  0x5b   : > { %p18869_p10 = scmp.ne.s32.totalorder (!%p16856_p6), %s18860_s7, 0 }
  0x5c   : > { %s16954_s29 = scalar_lea.vmem (!%p16856_p6), [#allocation3], %s14080_s26 }
  0x60   : > { %16655 = dma.done.wait (%p18869_p10), %s211_s15, 200704  }
  0x61   : > { %16657 = vsyncadd (%p18869_p10), %s211_s15, 4294766592  ;;  %s219_s24 = sand.u32 1, %s16668_s13   ;;  %p18870_p1 = scmp.ne.s32.totalorder %s18865_s9, 0 }
  0x62   : > { %s12309_s5 = sshll.u32 %s219_s24, 2  ;;  %s220_s6 = scalar_lea.sflag [#allocation6], %s219_s24 }
  0x63   : > { %s223_s25 = scalar_lea.vmem [#allocation5], %s12309_s5 }
  0x64   : > { %16659 = dma.done.wait (%p18870_p1), %s220_s6, 64  }
  0x65   : > { %16661 = vsyncadd (%p18870_p1), %s220_s6, 4294967232  ;;  %s255_s30 = smul.u32 49, %s16688_s18  ;;  %s12310_s27 = sshll.u32 %s16692_s19, 2 }
  0x66   : > { %p264_p6 = scmp.lt.s32.totalorder %s12310_s27, 7  ;;  %p12312_p4 = scmp.ne.s32.totalorder %s16688_s18, 0 }
  0x67   : > { %p256_p13 = scmp.lt.s32.totalorder %s255_s30, 195  ;;  %v276_v0 = vlaneseq (!%p12312_p4)  ;;  %v16711_v1 = vmov (!%p12312_p4), 1983009808   ;;  %v274_v4 = vld [vmem:[%s223_s25] sm:$0xf] (!%p12312_p4) }
  0x68   : > { %s18889_s27 = smov (!%p264_p6, %s12310_s27), 7  ;;  %273 = sbr.rel (%p12312_p4) target bundleno = 119 (0x77), region = 44 }
  0x69   : > { %s18891_s30 = smov (!%p256_p13, %s255_s30), 195  ;;  %s12311_s7 = sshll.u32 %s18889_s27, 1  ;;  %v307_v2 = vunpack.c.l.s4 (!%p12312_p4), %v16711_v1  ;;  %v277_v3 = vshrl.u32 (!%p12312_p4), %v276_v0, 7 }
  0x6a   : > { %s16970_s4 = scalar_lea.vmem %s18844_s0, %s18891_s30  ;;  %s16975_s26 = scalar_lea.vmem %s18847_s3, %s12311_s7 }
  0x6b   : > { %v308_v5 = vunpack.c.0.s8 (!%p12312_p4), %v307_v2  ;;  %v278_v6 = vsub.s32 (!%p12312_p4), 0, %v277_v3  ;;  %v282_v7 = vsub.s32 (!%p12312_p4), 1, %v277_v3  ;;  %v286_v8 = vsub.s32 (!%p12312_p4), 2, %v277_v3 }
  0x6c   : > { %v290_v9 = vsub.s32 (!%p12312_p4), 3, %v277_v3 }
  0x6d   : > { %v311_v10 = vsub.s32 (!%p12312_p4), %v308_v5, %v277_v3  ;;  %v279_v11 = vrot.slane (!%p12312_p4), %v274_v4, %v278_v6  ;;  %v283_v12 = vrot.slane (!%p12312_p4), %v274_v4, %v282_v7  ;;  %v287_v13 = vrot.slane (!%p12312_p4), %v274_v4, %v286_v8 }
  0x6e   : > { %v291_v14 = vrot.slane (!%p12312_p4), %v274_v4, %v290_v9 }
  0x6f   : > { %v304_v15 = vcombine.low %v279_v11, %v283_v12 }
  0x70   : > { %v305_v16 = vcombine.low %v287_v13, %v291_v14 }
  0x71   : > { %v312_v17 = vrot.slane %v304_v15, %v311_v10 }
  0x72   : > { %v319_v18 = vrot.slane %v305_v16, %v311_v10 }
  0x74   : > { %v320_v19 = vcombine.low %v312_v17, %v319_v18 }
  0x76   : > { %322 = vst [vmem:[#allocation2] sm:$0xff] %v320_v19 }
  0x77 PF: > { %v14188_v20 = vld [vmem:[%s16954_s29 + $0x4] ss:$16 sps:$4 sm:$0xff]   ;;  %v14190_v21 = vld [vmem:[%s16954_s29 + $0xc] ss:$16 sps:$4 sm:$0xff]   ;;  %v14192_v22 = vld [vmem:[%s16954_s29] ss:$16 sps:$4 sm:$0xff]   ;;  %v1910_v58 = vlaneseq }
  0x78   : > { %10103 = vmatprep.subr.bf16.mxu0 %v14188_v20  ;;  %v14193_v23 = vld [vmem:[%s16954_s29 + $0x8] ss:$16 sps:$4 sm:$0xff]   ;;  %11128 = vmatprep.subr.bf16.mxu1 %v14190_v21  ;;  %v14194_v24 = vld [vmem:[%s16954_s29 + $0x24] ss:$16 sps:$4 sm:$0xff]   ;;  %v14196_v25 = vld [vmem:[%s16954_s29 + $0x2c] ss:$16 sps:$4 sm:$0xff]  }
  0x79   : > { %10104 = vmatpush1.bf16.msra.mxu0 %v14192_v22  ;;  %11129 = vmatpush1.bf16.msra.mxu1 %v14193_v23  ;;  %v14198_v26 = vld [vmem:[%s16954_s29 + $0x20] ss:$16 sps:$4 sm:$0xff]   ;;  %v14199_v27 = vld [vmem:[%s16954_s29 + $0x28] ss:$16 sps:$4 sm:$0xff]   ;;  %v14200_v28 = vld [vmem:[%s16954_s29 + $0x44] ss:$16 sps:$4 sm:$0xff]  }
  0x7a   : > { %10105 = vmatprep.subr.bf16.mxu0 %v14194_v24  ;;  %11130 = vmatprep.subr.bf16.mxu1 %v14196_v25  ;;  %v14202_v29 = vld [vmem:[%s16954_s29 + $0x4c] ss:$16 sps:$4 sm:$0xff]   ;;  %v14204_v30 = vld [vmem:[%s16954_s29 + $0x40] ss:$16 sps:$4 sm:$0xff]   ;;  %v14205_v31 = vld [vmem:[%s16954_s29 + $0x48] ss:$16 sps:$4 sm:$0xff]  }
  0x7b   : > { %v14206_v32 = vld [vmem:[%s16954_s29 + $0x64] ss:$16 sps:$4 sm:$0xff]   ;;  %v14208_v33 = vld [vmem:[%s16954_s29 + $0x6c] ss:$16 sps:$4 sm:$0xff]   ;;  %v14210_v34 = vld [vmem:[%s16954_s29 + $0x60] ss:$16 sps:$4 sm:$0xff]  }
  0x7c   : > { %v14211_v35 = vld [vmem:[%s16954_s29 + $0x68] ss:$16 sps:$4 sm:$0xff]   ;;  %v14212_v36 = vld [vmem:[%s16954_s29 + $0x84] ss:$16 sps:$4 sm:$0xff]   ;;  %v14214_v37 = vld [vmem:[%s16954_s29 + $0x8c] ss:$16 sps:$4 sm:$0xff]  }
  0x7d   : > { %10106 = vmatpush1.bf16.msra.mxu0 %v14198_v26  ;;  %11131 = vmatpush1.bf16.msra.mxu1 %v14199_v27  ;;  %v14216_v38 = vld [vmem:[%s16954_s29 + $0x80] ss:$16 sps:$4 sm:$0xff]   ;;  %v14217_v39 = vld [vmem:[%s16954_s29 + $0x88] ss:$16 sps:$4 sm:$0xff]   ;;  %v14218_v40 = vld [vmem:[%s16954_s29 + $0xa4] ss:$16 sps:$4 sm:$0xff]  }
  0x7e   : > { %10107 = vmatprep.subr.bf16.mxu0 %v14200_v28  ;;  %11132 = vmatprep.subr.bf16.mxu1 %v14202_v29  ;;  %v14220_v41 = vld [vmem:[%s16954_s29 + $0xac] ss:$16 sps:$4 sm:$0xff]   ;;  %v14222_v42 = vld [vmem:[%s16954_s29 + $0xa0] ss:$16 sps:$4 sm:$0xff]   ;;  %v14223_v43 = vld [vmem:[%s16954_s29 + $0xa8] ss:$16 sps:$4 sm:$0xff]  }
  0x7f   : > { %v14224_v44 = vld [vmem:[%s16954_s29 + $0xc4] ss:$16 sps:$4 sm:$0xff]   ;;  %v14226_v45 = vld [vmem:[%s16954_s29 + $0xcc] ss:$16 sps:$4 sm:$0xff]   ;;  %v14228_v46 = vld [vmem:[%s16954_s29 + $0xc0] ss:$16 sps:$4 sm:$0xff]  }
  0x80   : > { %v14229_v47 = vld [vmem:[%s16954_s29 + $0xc8] ss:$16 sps:$4 sm:$0xff]   ;;  %v14230_v48 = vld [vmem:[%s16954_s29 + $0xe4] ss:$16 sps:$4 sm:$0xff]   ;;  %v14232_v49 = vld [vmem:[%s16954_s29 + $0xec] ss:$16 sps:$4 sm:$0xff]  }
  0x81   : > { %10108 = vmatpush1.bf16.msra.mxu0 %v14204_v30  ;;  %11133 = vmatpush1.bf16.msra.mxu1 %v14205_v31  ;;  %v14234_v50 = vld [vmem:[%s16954_s29 + $0xe0] ss:$16 sps:$4 sm:$0xff]   ;;  %v14235_v51 = vld [vmem:[%s16954_s29 + $0xe8] ss:$16 sps:$4 sm:$0xff]   ;;  %v14236_v52 = vld [vmem:[%s16954_s29 + $0x104] ss:$16 sps:$4 sm:$0xff]  }
  0x82   : > { %10109 = vmatprep.subr.bf16.mxu0 %v14206_v32  ;;  %11134 = vmatprep.subr.bf16.mxu1 %v14208_v33  ;;  %v14238_v53 = vld [vmem:[%s16954_s29 + $0x10c] ss:$16 sps:$4 sm:$0xff]   ;;  %v14240_v54 = vld [vmem:[%s16954_s29 + $0x100] ss:$16 sps:$4 sm:$0xff]   ;;  %v14241_v55 = vld [vmem:[%s16954_s29 + $0x108] ss:$16 sps:$4 sm:$0xff]  }
  0x83   : > { %v16712_v56 = vmov 1966171168   ;;  %v14242_v59 = vld [vmem:[%s16954_s29 + $0x124] ss:$16 sps:$4 sm:$0xff]   ;;  %v14244_v60 = vld [vmem:[%s16954_s29 + $0x12c] ss:$16 sps:$4 sm:$0xff]  }
  0x84   : > { %v1908_v57 = vunpack.c.l.s4 %v16712_v56  ;;  %v14246_v61 = vld [vmem:[%s16954_s29 + $0x120] ss:$16 sps:$4 sm:$0xff]   ;;  %v17017_v63 = vshrl.u32 %v1910_v58, 7  ;;  %v14247_v0 = vld [vmem:[%s16954_s29 + $0x128] ss:$16 sps:$4 sm:$0xff]   ;;  %p13882_p3 = scmp.ne.s32.totalorder %s16688_s18, 3 }
  0x85   : > { %10110 = vmatpush1.bf16.msra.mxu0 %v14210_v34  ;;  %11135 = vmatpush1.bf16.msra.mxu1 %v14211_v35  ;;  %v14248_v1 = vld [vmem:[%s16954_s29 + $0x144] ss:$16 sps:$4 sm:$0xff]   ;;  %v14250_v2 = vld [vmem:[%s16954_s29 + $0x14c] ss:$16 sps:$4 sm:$0xff]   ;;  %v14252_v3 = vld [vmem:[%s16954_s29 + $0x140] ss:$16 sps:$4 sm:$0xff]  }
  0x86   : > { %10111 = vmatprep.subr.bf16.mxu0 %v14212_v36  ;;  %11136 = vmatprep.subr.bf16.mxu1 %v14214_v37  ;;  %v1909_v62 = vunpack.c.0.s8 %v1908_v57  ;;  %v14253_v4 = vld [vmem:[%s16954_s29 + $0x148] ss:$16 sps:$4 sm:$0xff]   ;;  %v14254_v6 = vld [vmem:[%s16954_s29 + $0x164] ss:$16 sps:$4 sm:$0xff]   ;;  %v14256_v7 = vld [vmem:[%s16954_s29 + $0x16c] ss:$16 sps:$4 sm:$0xff]  }
  0x87   : > { %v17030_v8 = vld [vmem:[%s16970_s4] sm:$0xff]  ;;  %v14258_v9 = vld [vmem:[%s16954_s29 + $0x160] ss:$16 sps:$4 sm:$0xff]   ;;  %v14260_v12 = vld [vmem:[%s16954_s29 + $0x184] ss:$16 sps:$4 sm:$0xff]  }
  0x88   : > { %v17025_v5 = vsub.s32 %v1909_v62, %v17017_v63  ;;  %v14259_v11 = vld [vmem:[%s16954_s29 + $0x168] ss:$16 sps:$4 sm:$0xff]   ;;  %v14262_v13 = vld [vmem:[%s16954_s29 + $0x18c] ss:$16 sps:$4 sm:$0xff]   ;;  %v14264_v15 = vld [vmem:[%s16954_s29 + $0x180] ss:$16 sps:$4 sm:$0xff]  }
  0x89   : > { %10112 = vmatpush1.bf16.msra.mxu0 %v14216_v38  ;;  %11137 = vmatpush1.bf16.msra.mxu1 %v14217_v39  ;;  %v14265_v17 = vld [vmem:[%s16954_s29 + $0x188] ss:$16 sps:$4 sm:$0xff]   ;;  %v14266_v18 = vld [vmem:[%s16954_s29 + $0x1a4] ss:$16 sps:$4 sm:$0xff]   ;;  %v14268_v19 = vld [vmem:[%s16954_s29 + $0x1ac] ss:$16 sps:$4 sm:$0xff]  }
  0x8a   : > { %10113 = vmatprep.subr.bf16.mxu0 %v14218_v40  ;;  %11138 = vmatprep.subr.bf16.mxu1 %v14220_v41  ;;  %v1913_v10 = vrot.slane %v17030_v8, %v17025_v5  ;;  %v14270_v20 = vld [vmem:[%s16954_s29 + $0x1a0] ss:$16 sps:$4 sm:$0xff]   ;;  %v14271_v21 = vld [vmem:[%s16954_s29 + $0x1a8] ss:$16 sps:$4 sm:$0xff]   ;;  %v14272_v22 = vld [vmem:[%s16954_s29 + $0x1c4] ss:$16 sps:$4 sm:$0xff]  }
  0x8b   : > { %v14274_v23 = vld [vmem:[%s16954_s29 + $0x1cc] ss:$16 sps:$4 sm:$0xff]   ;;  %v14276_v24 = vld [vmem:[%s16954_s29 + $0x1c0] ss:$16 sps:$4 sm:$0xff]   ;;  %v14277_v25 = vld [vmem:[%s16954_s29 + $0x1c8] ss:$16 sps:$4 sm:$0xff]  }
  0x8c   : > { %v1921_v14 = vcombine.high %v1913_v10, %v1913_v10  ;;  %v14278_v26 = vld [vmem:[%s16954_s29 + $0x1e4] ss:$16 sps:$4 sm:$0xff]   ;;  %v14280_v27 = vld [vmem:[%s16954_s29 + $0x1ec] ss:$16 sps:$4 sm:$0xff]   ;;  %v14282_v28 = vld [vmem:[%s16954_s29 + $0x1e0] ss:$16 sps:$4 sm:$0xff]   ;;  %v17057_v33 = vrot.slane %v1913_v10, %v17025_v5 }
  0x8d   : > { %10114 = vmatpush1.bf16.msra.mxu0 %v14222_v42  ;;  %11139 = vmatpush1.bf16.msra.mxu1 %v14223_v43  ;;  %v14283_v29 = vld [vmem:[%s16954_s29 + $0x1e8] ss:$16 sps:$4 sm:$0xff]   ;;  %v14286_v30 = vld [vmem:[%s16954_s29 + $0x204] ss:$16 sps:$4 sm:$0xff]   ;;  %v14289_v31 = vld [vmem:[%s16954_s29 + $0x20c] ss:$16 sps:$4 sm:$0xff]  }
  0x8e   : > { %10115 = vmatprep.subr.bf16.mxu0 %v14224_v44  ;;  %11140 = vmatprep.subr.bf16.mxu1 %v14226_v45  ;;  %v1943_v16 = vrot.slane %v1921_v14, %v17025_v5  ;;  %v14284_v32 = vld [vmem:[%s16954_s29 + $0x200] ss:$16 sps:$4 sm:$0xff]   ;;  %v14287_v34 = vld [vmem:[%s16954_s29 + $0x208] ss:$16 sps:$4 sm:$0xff]   ;;  %v14292_v35 = vld [vmem:[%s16954_s29 + $0x224] ss:$16 sps:$4 sm:$0xff]  }
  0x8f   : > { %v14295_v36 = vld [vmem:[%s16954_s29 + $0x22c] ss:$16 sps:$4 sm:$0xff]   ;;  %v14290_v38 = vld [vmem:[%s16954_s29 + $0x220] ss:$16 sps:$4 sm:$0xff]   ;;  %v14293_v39 = vld [vmem:[%s16954_s29 + $0x228] ss:$16 sps:$4 sm:$0xff]  }
  0x90   : > { %10135 = vmatprep.mubr.bf16.mxu0 %v1943_v16  ;;  %11160 = vmatprep.mubr.bf16.mxu1 %v1943_v16  ;;  %v1953_v37 = vcombine.high %v1943_v16, %v1943_v16  ;;  %v14298_v40 = vld [vmem:[%s16954_s29 + $0x244] ss:$16 sps:$4 sm:$0xff]   ;;  %v14301_v41 = vld [vmem:[%s16954_s29 + $0x24c] ss:$16 sps:$4 sm:$0xff]   ;;  %v14296_v42 = vld [vmem:[%s16954_s29 + $0x240] ss:$16 sps:$4 sm:$0xff]  }
  0x91   : > { %10116 = vmatpush1.bf16.msra.mxu0 %v14228_v46  ;;  %11141 = vmatpush1.bf16.msra.mxu1 %v14229_v47  ;;  %v14299_v43 = vld [vmem:[%s16954_s29 + $0x248] ss:$16 sps:$4 sm:$0xff]   ;;  %v14304_v44 = vld [vmem:[%s16954_s29 + $0x264] ss:$16 sps:$4 sm:$0xff]   ;;  %v14307_v45 = vld [vmem:[%s16954_s29 + $0x26c] ss:$16 sps:$4 sm:$0xff]  }
  0x92   : > { %10117 = vmatprep.subr.bf16.mxu0 %v14230_v48  ;;  %11142 = vmatprep.subr.bf16.mxu1 %v14232_v49  ;;  %v14302_v46 = vld [vmem:[%s16954_s29 + $0x260] ss:$16 sps:$4 sm:$0xff]   ;;  %v14305_v47 = vld [vmem:[%s16954_s29 + $0x268] ss:$16 sps:$4 sm:$0xff]   ;;  %v14310_v48 = vld [vmem:[%s16954_s29 + $0x284] ss:$16 sps:$4 sm:$0xff]  }
  0x93   : > { %v14313_v49 = vld [vmem:[%s16954_s29 + $0x28c] ss:$16 sps:$4 sm:$0xff]   ;;  %v14322_v56 = vld [vmem:[%s16954_s29 + $0x2c4] ss:$16 sps:$4 sm:$0xff]   ;;  %v14320_v58 = vld [vmem:[%s16954_s29 + $0x2c0] ss:$16 sps:$4 sm:$0xff]  }
  0x94   : > { %v14325_v57 = vld [vmem:[%s16954_s29 + $0x2cc] ss:$16 sps:$4 sm:$0xff]   ;;  %v14326_v62 = vld [vmem:[%s16954_s29 + $0x2e0] ss:$16 sps:$4 sm:$0xff]   ;;  %v14341_v10 = vld [vmem:[%s16954_s29 + $0x328] ss:$16 sps:$4 sm:$0xff]  }
  0x95   : > { %10118 = vmatpush1.bf16.msra.mxu0 %v14234_v50  ;;  %11143 = vmatpush1.bf16.msra.mxu1 %v14235_v51  ;;  %v14308_v50 = vld [vmem:[%s16954_s29 + $0x280] ss:$16 sps:$4 sm:$0xff]   ;;  %v14311_v51 = vld [vmem:[%s16954_s29 + $0x288] ss:$16 sps:$4 sm:$0xff]   ;;  %v14355_v16 = vld [vmem:[%s16954_s29 + $0x36c] ss:$16 sps:$4 sm:$0xff]  }
  0x96   : > { %10119 = vmatprep.subr.bf16.mxu0 %v14236_v52  ;;  %11144 = vmatprep.subr.bf16.mxu1 %v14238_v53  ;;  %v14316_v52 = vld [vmem:[%s16954_s29 + $0x2a4] ss:$16 sps:$4 sm:$0xff]   ;;  %v14319_v53 = vld [vmem:[%s16954_s29 + $0x2ac] ss:$16 sps:$4 sm:$0xff]   ;;  %v14347_v14 = vld [vmem:[%s16954_s29 + $0x348] ss:$16 sps:$4 sm:$0xff]  }
  0x99   : > { %10120 = vmatpush1.bf16.msra.mxu0 %v14240_v54  ;;  %11145 = vmatpush1.bf16.msra.mxu1 %v14241_v55  ;;  %v14314_v54 = vld [vmem:[%s16954_s29 + $0x2a0] ss:$16 sps:$4 sm:$0xff]   ;;  %v14317_v55 = vld [vmem:[%s16954_s29 + $0x2a8] ss:$16 sps:$4 sm:$0xff]  }
  0x9a   : > { %10121 = vmatprep.subr.bf16.mxu0 %v14242_v59  ;;  %11146 = vmatprep.subr.bf16.mxu1 %v14244_v60  ;;  %v14323_v59 = vld [vmem:[%s16954_s29 + $0x2c8] ss:$16 sps:$4 sm:$0xff]   ;;  %v14328_v60 = vld [vmem:[%s16954_s29 + $0x2e4] ss:$16 sps:$4 sm:$0xff]  }
  0x9d   : > { %10122 = vmatpush1.bf16.msra.mxu0 %v14246_v61  ;;  %11147 = vmatpush1.bf16.msra.mxu1 %v14247_v0  ;;  %v14331_v61 = vld [vmem:[%s16954_s29 + $0x2ec] ss:$16 sps:$4 sm:$0xff]   ;;  %v14329_v0 = vld [vmem:[%s16954_s29 + $0x2e8] ss:$16 sps:$4 sm:$0xff]  }
  0x9e   : > { %10123 = vmatprep.subr.bf16.mxu0 %v14248_v1  ;;  %11148 = vmatprep.subr.bf16.mxu1 %v14250_v2  ;;  %v14334_v1 = vld [vmem:[%s16954_s29 + $0x304] ss:$16 sps:$4 sm:$0xff]   ;;  %v14337_v2 = vld [vmem:[%s16954_s29 + $0x30c] ss:$16 sps:$4 sm:$0xff]  }
  0xa1   : > { %10124 = vmatpush1.bf16.msra.mxu0 %v14252_v3  ;;  %11149 = vmatpush1.bf16.msra.mxu1 %v14253_v4  ;;  %v14332_v3 = vld [vmem:[%s16954_s29 + $0x300] ss:$16 sps:$4 sm:$0xff]   ;;  %v14335_v4 = vld [vmem:[%s16954_s29 + $0x308] ss:$16 sps:$4 sm:$0xff]  }
  0xa2   : > { %10125 = vmatprep.subr.bf16.mxu0 %v14254_v6  ;;  %11150 = vmatprep.subr.bf16.mxu1 %v14256_v7  ;;  %v14340_v6 = vld [vmem:[%s16954_s29 + $0x324] ss:$16 sps:$4 sm:$0xff]   ;;  %v14343_v7 = vld [vmem:[%s16954_s29 + $0x32c] ss:$16 sps:$4 sm:$0xff]  }
  0xa5   : > { %10126 = vmatpush1.bf16.msra.mxu0 %v14258_v9  ;;  %11151 = vmatpush1.bf16.msra.mxu1 %v14259_v11  ;;  %v14338_v9 = vld [vmem:[%s16954_s29 + $0x320] ss:$16 sps:$4 sm:$0xff]   ;;  %v14346_v11 = vld [vmem:[%s16954_s29 + $0x344] ss:$16 sps:$4 sm:$0xff]  }
  0xa6   : > { %10127 = vmatprep.subr.bf16.mxu0 %v14260_v12  ;;  %11152 = vmatprep.subr.bf16.mxu1 %v14262_v13  ;;  %v14349_v12 = vld [vmem:[%s16954_s29 + $0x34c] ss:$16 sps:$4 sm:$0xff]   ;;  %v14344_v13 = vld [vmem:[%s16954_s29 + $0x340] ss:$16 sps:$4 sm:$0xff]  }
  0xa9   : > { %10128 = vmatpush1.bf16.msra.mxu0 %v14264_v15  ;;  %11153 = vmatpush1.bf16.msra.mxu1 %v14265_v17  ;;  %v14352_v15 = vld [vmem:[%s16954_s29 + $0x364] ss:$16 sps:$4 sm:$0xff]   ;;  %v14350_v17 = vld [vmem:[%s16954_s29 + $0x360] ss:$16 sps:$4 sm:$0xff]  }
  0xaa   : > { %10129 = vmatprep.subr.bf16.mxu0 %v14266_v18  ;;  %11154 = vmatprep.subr.bf16.mxu1 %v14268_v19  ;;  %v14353_v18 = vld [vmem:[%s16954_s29 + $0x368] ss:$16 sps:$4 sm:$0xff]   ;;  %v14358_v19 = vld [vmem:[%s16954_s29 + $0x384] ss:$16 sps:$4 sm:$0xff]  }
  0xad   : > { %10130 = vmatpush1.bf16.msra.mxu0 %v14270_v20  ;;  %11155 = vmatpush1.bf16.msra.mxu1 %v14271_v21  ;;  %v14361_v20 = vld [vmem:[%s16954_s29 + $0x38c] ss:$16 sps:$4 sm:$0xff]   ;;  %v14356_v21 = vld [vmem:[%s16954_s29 + $0x380] ss:$16 sps:$4 sm:$0xff]  }
  0xae   : > { %10131 = vmatprep.subr.bf16.mxu0 %v14272_v22  ;;  %11156 = vmatprep.subr.bf16.mxu1 %v14274_v23  ;;  %v14359_v22 = vld [vmem:[%s16954_s29 + $0x388] ss:$16 sps:$4 sm:$0xff]   ;;  %v14364_v23 = vld [vmem:[%s16954_s29 + $0x3a4] ss:$16 sps:$4 sm:$0xff]  }
  0xb1   : > { %10132 = vmatpush1.bf16.msra.mxu0 %v14276_v24  ;;  %11157 = vmatpush1.bf16.msra.mxu1 %v14277_v25  ;;  %v14367_v24 = vld [vmem:[%s16954_s29 + $0x3ac] ss:$16 sps:$4 sm:$0xff]   ;;  %v14362_v25 = vld [vmem:[%s16954_s29 + $0x3a0] ss:$16 sps:$4 sm:$0xff]  }
  0xb2   : > { %10133 = vmatprep.subr.bf16.mxu0 %v14278_v26  ;;  %11158 = vmatprep.subr.bf16.mxu1 %v14280_v27  ;;  %v14365_v26 = vld [vmem:[%s16954_s29 + $0x3a8] ss:$16 sps:$4 sm:$0xff]   ;;  %v14370_v27 = vld [vmem:[%s16954_s29 + $0x3c4] ss:$16 sps:$4 sm:$0xff]  }
  0xb5   : > { %10134 = vmatpush1.bf16.msra.mxu0 %v14282_v28  ;;  %11159 = vmatpush1.bf16.msra.mxu1 %v14283_v29  ;;  %v14373_v28 = vld [vmem:[%s16954_s29 + $0x3cc] ss:$16 sps:$4 sm:$0xff]   ;;  %v1906_v29 = vcombine.high %v17030_v8, %v17030_v8  ;;  %v14377_v8 = vld [vmem:[%s16954_s29 + $0x3e8] ss:$16 sps:$4 sm:$0xff]  }
  0xb6   : > { %10144 = vmatprep.subr.bf16.mxu0 %v14286_v30  ;;  %11169 = vmatprep.subr.bf16.mxu1 %v14289_v31  ;;  %v14368_v30 = vld [vmem:[%s16954_s29 + $0x3c0] ss:$16 sps:$4 sm:$0xff]   ;;  %v14371_v31 = vld [vmem:[%s16954_s29 + $0x3c8] ss:$16 sps:$4 sm:$0xff]  }
  0xb8   : > { %10136 = vmatmul.mubr.bf16.vlgmr.msra.gmra.mrb[0].mxu0 %v17057_v33  ;;  %11161 = vmatmul.mubr.bf16.vlgmr.msra.gmra.mrb[0].mxu1 %v17057_v33 }
  0xb9   : > { %10145 = vmatpush1.bf16.msra.mxu0 %v14284_v32  ;;  %11170 = vmatpush1.bf16.msra.mxu1 %v14287_v34  ;;  %v14376_v32 = vld [vmem:[%s16954_s29 + $0x3e4] ss:$16 sps:$4 sm:$0xff]   ;;  %v14379_v34 = vld [vmem:[%s16954_s29 + $0x3ec] ss:$16 sps:$4 sm:$0xff]  }
  0xba   : > { %10146 = vmatprep.subr.bf16.mxu0 %v14292_v35  ;;  %11171 = vmatprep.subr.bf16.mxu1 %v14295_v36  ;;  %v17123_v35 = vrot.slane %v1906_v29, %v17025_v5  ;;  %v14374_v36 = vld [vmem:[%s16954_s29 + $0x3e0] ss:$16 sps:$4 sm:$0xff]   ;;  %v14455_v29 = vld [vmem:[%s16954_s29 + $0x588] ss:$16 sps:$4 sm:$0xff]  }
  0xbb   : > { %10176 = vmatprep.mubr.bf16.mxu0 %v1953_v37  ;;  %11201 = vmatprep.mubr.bf16.mxu1 %v1953_v37  ;;  %v14382_v37 = vld [vmem:[%s16954_s29 + $0x404] ss:$16 sps:$4 sm:$0xff]  }
  0xbd   : > { %10147 = vmatpush1.bf16.msra.mxu0 %v14290_v38  ;;  %11172 = vmatpush1.bf16.msra.mxu1 %v14293_v39  ;;  %v14385_v38 = vld [vmem:[%s16954_s29 + $0x40c] ss:$16 sps:$4 sm:$0xff]   ;;  %v1922_v39 = vcombine.high %v17123_v35, %v17123_v35 }
  0xbe   : > { %10148 = vmatprep.subr.bf16.mxu0 %v14298_v40  ;;  %11173 = vmatprep.subr.bf16.mxu1 %v14301_v41  ;;  %v14380_v40 = vld [vmem:[%s16954_s29 + $0x400] ss:$16 sps:$4 sm:$0xff]   ;;  %v1951_v41 = vcombine.high %v17057_v33, %v17057_v33  ;;  %v14389_v33 = vld [vmem:[%s16954_s29 + $0x428] ss:$16 sps:$4 sm:$0xff]  }
  0xc1   : > { %10149 = vmatpush1.bf16.msra.mxu0 %v14296_v42  ;;  %11174 = vmatpush1.bf16.msra.mxu1 %v14299_v43  ;;  %v14383_v42 = vld [vmem:[%s16954_s29 + $0x408] ss:$16 sps:$4 sm:$0xff]   ;;  %v14388_v43 = vld [vmem:[%s16954_s29 + $0x424] ss:$16 sps:$4 sm:$0xff]  }
  0xc2   : > { %10150 = vmatprep.subr.bf16.mxu0 %v14304_v44  ;;  %11175 = vmatprep.subr.bf16.mxu1 %v14307_v45  ;;  %v14391_v44 = vld [vmem:[%s16954_s29 + $0x42c] ss:$16 sps:$4 sm:$0xff]   ;;  %v17138_v45 = vrot.slane %v1922_v39, %v17025_v5  ;;  %v14472_v39 = vld [vmem:[%s16954_s29 + $0x5e4] ss:$16 sps:$4 sm:$0xff]  }
  0xc5   : > { %10151 = vmatpush1.bf16.msra.mxu0 %v14302_v46  ;;  %11176 = vmatpush1.bf16.msra.mxu1 %v14305_v47  ;;  %v14386_v46 = vld [vmem:[%s16954_s29 + $0x420] ss:$16 sps:$4 sm:$0xff]   ;;  %v14394_v47 = vld [vmem:[%s16954_s29 + $0x444] ss:$16 sps:$4 sm:$0xff]  }
  0xc6   : > { %10152 = vmatprep.subr.bf16.mxu0 %v14310_v48  ;;  %11177 = vmatprep.subr.bf16.mxu1 %v14313_v49  ;;  %v14397_v48 = vld [vmem:[%s16954_s29 + $0x44c] ss:$16 sps:$4 sm:$0xff]   ;;  %v14392_v49 = vld [vmem:[%s16954_s29 + $0x440] ss:$16 sps:$4 sm:$0xff]  }
  0xc9   : > { %10153 = vmatpush1.bf16.msra.mxu0 %v14308_v50  ;;  %11178 = vmatpush1.bf16.msra.mxu1 %v14311_v51  ;;  %v14395_v50 = vld [vmem:[%s16954_s29 + $0x448] ss:$16 sps:$4 sm:$0xff]   ;;  %v14400_v51 = vld [vmem:[%s16954_s29 + $0x464] ss:$16 sps:$4 sm:$0xff]  }
  0xca   : > { %10154 = vmatprep.subr.bf16.mxu0 %v14316_v52  ;;  %11179 = vmatprep.subr.bf16.mxu1 %v14319_v53  ;;  %v14403_v52 = vld [vmem:[%s16954_s29 + $0x46c] ss:$16 sps:$4 sm:$0xff]   ;;  %v14398_v53 = vld [vmem:[%s16954_s29 + $0x460] ss:$16 sps:$4 sm:$0xff]  }
  0xcd   : > { %10155 = vmatpush1.bf16.msra.mxu0 %v14314_v54  ;;  %11180 = vmatpush1.bf16.msra.mxu1 %v14317_v55  ;;  %v14401_v54 = vld [vmem:[%s16954_s29 + $0x468] ss:$16 sps:$4 sm:$0xff]   ;;  %v14406_v55 = vld [vmem:[%s16954_s29 + $0x484] ss:$16 sps:$4 sm:$0xff]  }
  0xce   : > { %10156 = vmatprep.subr.bf16.mxu0 %v14322_v56  ;;  %11181 = vmatprep.subr.bf16.mxu1 %v14325_v57  ;;  %v14409_v56 = vld [vmem:[%s16954_s29 + $0x48c] ss:$16 sps:$4 sm:$0xff]   ;;  %v14404_v57 = vld [vmem:[%s16954_s29 + $0x480] ss:$16 sps:$4 sm:$0xff]  }
  0xd1   : > { %10157 = vmatpush1.bf16.msra.mxu0 %v14320_v58  ;;  %11182 = vmatpush1.bf16.msra.mxu1 %v14323_v59  ;;  %v14407_v58 = vld [vmem:[%s16954_s29 + $0x488] ss:$16 sps:$4 sm:$0xff]   ;;  %v14412_v59 = vld [vmem:[%s16954_s29 + $0x4a4] ss:$16 sps:$4 sm:$0xff]  }
  0xd2   : > { %10158 = vmatprep.subr.bf16.mxu0 %v14328_v60  ;;  %11183 = vmatprep.subr.bf16.mxu1 %v14331_v61  ;;  %v14415_v60 = vld [vmem:[%s16954_s29 + $0x4ac] ss:$16 sps:$4 sm:$0xff]   ;;  %v14410_v61 = vld [vmem:[%s16954_s29 + $0x4a0] ss:$16 sps:$4 sm:$0xff]  }
  0xd5   : > { %10159 = vmatpush1.bf16.msra.mxu0 %v14326_v62  ;;  %11184 = vmatpush1.bf16.msra.mxu1 %v14329_v0  ;;  %v14413_v62 = vld [vmem:[%s16954_s29 + $0x4a8] ss:$16 sps:$4 sm:$0xff]   ;;  %v14418_v0 = vld [vmem:[%s16954_s29 + $0x4c4] ss:$16 sps:$4 sm:$0xff]  }
  0xd6   : > { %10160 = vmatprep.subr.bf16.mxu0 %v14334_v1  ;;  %11185 = vmatprep.subr.bf16.mxu1 %v14337_v2  ;;  %v14421_v1 = vld [vmem:[%s16954_s29 + $0x4cc] ss:$16 sps:$4 sm:$0xff]   ;;  %v14416_v2 = vld [vmem:[%s16954_s29 + $0x4c0] ss:$16 sps:$4 sm:$0xff]  }
  0xd9   : > { %10161 = vmatpush1.bf16.msra.mxu0 %v14332_v3  ;;  %11186 = vmatpush1.bf16.msra.mxu1 %v14335_v4  ;;  %v14419_v3 = vld [vmem:[%s16954_s29 + $0x4c8] ss:$16 sps:$4 sm:$0xff]   ;;  %v14424_v4 = vld [vmem:[%s16954_s29 + $0x4e4] ss:$16 sps:$4 sm:$0xff]  }
  0xda   : > { %10162 = vmatprep.subr.bf16.mxu0 %v14340_v6  ;;  %11187 = vmatprep.subr.bf16.mxu1 %v14343_v7  ;;  %v14427_v6 = vld [vmem:[%s16954_s29 + $0x4ec] ss:$16 sps:$4 sm:$0xff]   ;;  %v14422_v7 = vld [vmem:[%s16954_s29 + $0x4e0] ss:$16 sps:$4 sm:$0xff]  }
  0xdd   : > { %10163 = vmatpush1.bf16.msra.mxu0 %v14338_v9  ;;  %11188 = vmatpush1.bf16.msra.mxu1 %v14341_v10  ;;  %v14425_v9 = vld [vmem:[%s16954_s29 + $0x4e8] ss:$16 sps:$4 sm:$0xff]   ;;  %v14430_v10 = vld [vmem:[%s16954_s29 + $0x504] ss:$16 sps:$4 sm:$0xff]  }
  0xde   : > { %10164 = vmatprep.subr.bf16.mxu0 %v14346_v11  ;;  %11189 = vmatprep.subr.bf16.mxu1 %v14349_v12  ;;  %v14433_v11 = vld [vmem:[%s16954_s29 + $0x50c] ss:$16 sps:$4 sm:$0xff]   ;;  %v14428_v12 = vld [vmem:[%s16954_s29 + $0x500] ss:$16 sps:$4 sm:$0xff]  }
  0xe1   : > { %10165 = vmatpush1.bf16.msra.mxu0 %v14344_v13  ;;  %11190 = vmatpush1.bf16.msra.mxu1 %v14347_v14  ;;  %v14431_v13 = vld [vmem:[%s16954_s29 + $0x508] ss:$16 sps:$4 sm:$0xff]   ;;  %v14436_v14 = vld [vmem:[%s16954_s29 + $0x524] ss:$16 sps:$4 sm:$0xff]  }
  0xe2   : > { %10166 = vmatprep.subr.bf16.mxu0 %v14352_v15  ;;  %11191 = vmatprep.subr.bf16.mxu1 %v14355_v16  ;;  %v14439_v15 = vld [vmem:[%s16954_s29 + $0x52c] ss:$16 sps:$4 sm:$0xff]   ;;  %v14434_v16 = vld [vmem:[%s16954_s29 + $0x520] ss:$16 sps:$4 sm:$0xff]  }
  0xe5   : > { %10167 = vmatpush1.bf16.msra.mxu0 %v14350_v17  ;;  %11192 = vmatpush1.bf16.msra.mxu1 %v14353_v18  ;;  %v14437_v17 = vld [vmem:[%s16954_s29 + $0x528] ss:$16 sps:$4 sm:$0xff]   ;;  %v14442_v18 = vld [vmem:[%s16954_s29 + $0x544] ss:$16 sps:$4 sm:$0xff]  }
  0xe6   : > { %10168 = vmatprep.subr.bf16.mxu0 %v14358_v19  ;;  %11193 = vmatprep.subr.bf16.mxu1 %v14361_v20  ;;  %v14445_v19 = vld [vmem:[%s16954_s29 + $0x54c] ss:$16 sps:$4 sm:$0xff]   ;;  %v14440_v20 = vld [vmem:[%s16954_s29 + $0x540] ss:$16 sps:$4 sm:$0xff]  }
  0xe9   : > { %10169 = vmatpush1.bf16.msra.mxu0 %v14356_v21  ;;  %11194 = vmatpush1.bf16.msra.mxu1 %v14359_v22  ;;  %v14443_v21 = vld [vmem:[%s16954_s29 + $0x548] ss:$16 sps:$4 sm:$0xff]   ;;  %v14448_v22 = vld [vmem:[%s16954_s29 + $0x564] ss:$16 sps:$4 sm:$0xff]  }
  0xea   : > { %10170 = vmatprep.subr.bf16.mxu0 %v14364_v23  ;;  %11195 = vmatprep.subr.bf16.mxu1 %v14367_v24  ;;  %v14451_v23 = vld [vmem:[%s16954_s29 + $0x56c] ss:$16 sps:$4 sm:$0xff]   ;;  %v14446_v24 = vld [vmem:[%s16954_s29 + $0x560] ss:$16 sps:$4 sm:$0xff]  }
  0xed   : > { %10171 = vmatpush1.bf16.msra.mxu0 %v14362_v25  ;;  %11196 = vmatpush1.bf16.msra.mxu1 %v14365_v26  ;;  %v14449_v25 = vld [vmem:[%s16954_s29 + $0x568] ss:$16 sps:$4 sm:$0xff]   ;;  %v14454_v26 = vld [vmem:[%s16954_s29 + $0x584] ss:$16 sps:$4 sm:$0xff]  }
  0xee   : > { %10172 = vmatprep.subr.bf16.mxu0 %v14370_v27  ;;  %11197 = vmatprep.subr.bf16.mxu1 %v14373_v28  ;;  %v14457_v27 = vld [vmem:[%s16954_s29 + $0x58c] ss:$16 sps:$4 sm:$0xff]   ;;  %v14452_v28 = vld [vmem:[%s16954_s29 + $0x580] ss:$16 sps:$4 sm:$0xff]  }
  0xf1   : > { %10173 = vmatpush1.bf16.msra.mxu0 %v14368_v30  ;;  %11198 = vmatpush1.bf16.msra.mxu1 %v14371_v31  ;;  %v14460_v30 = vld [vmem:[%s16954_s29 + $0x5a4] ss:$16 sps:$4 sm:$0xff]   ;;  %v14463_v31 = vld [vmem:[%s16954_s29 + $0x5ac] ss:$16 sps:$4 sm:$0xff]  }
  0xf2   : > { %10174 = vmatprep.subr.bf16.mxu0 %v14376_v32  ;;  %11199 = vmatprep.subr.bf16.mxu1 %v14379_v34  ;;  %v14458_v32 = vld [vmem:[%s16954_s29 + $0x5a0] ss:$16 sps:$4 sm:$0xff]   ;;  %v14461_v34 = vld [vmem:[%s16954_s29 + $0x5a8] ss:$16 sps:$4 sm:$0xff]  }
  0xf5   : > { %10175 = vmatpush1.bf16.msra.mxu0 %v14374_v36  ;;  %11200 = vmatpush1.bf16.msra.mxu1 %v14377_v8  ;;  %v14466_v36 = vld [vmem:[%s16954_s29 + $0x5c4] ss:$16 sps:$4 sm:$0xff]   ;;  %v14469_v8 = vld [vmem:[%s16954_s29 + $0x5cc] ss:$16 sps:$4 sm:$0xff]  }
  0xf6   : > { %10185 = vmatprep.subr.bf16.mxu0 %v14382_v37  ;;  %11210 = vmatprep.subr.bf16.mxu1 %v14385_v38  ;;  %v14464_v37 = vld [vmem:[%s16954_s29 + $0x5c0] ss:$16 sps:$4 sm:$0xff]   ;;  %v14467_v38 = vld [vmem:[%s16954_s29 + $0x5c8] ss:$16 sps:$4 sm:$0xff]  }
  0xf8   : > { %10177 = vmatmul.mubr.bf16.vlgmr.msra.gmra.mrb[0].mxu0 %v1951_v41  ;;  %11202 = vmatmul.mubr.bf16.vlgmr.msra.gmra.mrb[0].mxu1 %v1951_v41  ;;  %v14470_v41 = vld [vmem:[%s16954_s29 + $0x5e0] ss:$16 sps:$4 sm:$0xff]  }
  0xf9   : > { %10186 = vmatpush1.bf16.msra.mxu0 %v14380_v40  ;;  %11211 = vmatpush1.bf16.msra.mxu1 %v14383_v42  ;;  %v14475_v40 = vld [vmem:[%s16954_s29 + $0x5ec] ss:$16 sps:$4 sm:$0xff]   ;;  %v14473_v42 = vld [vmem:[%s16954_s29 + $0x5e8] ss:$16 sps:$4 sm:$0xff]  }
  0xfa   : > { %10187 = vmatprep.subr.bf16.mxu0 %v14388_v43  ;;  %11212 = vmatprep.subr.bf16.mxu1 %v14391_v44  ;;  %v14479_v43 = vld [vmem:[%s16954_s29 + $0x604] ss:$16 sps:$4 sm:$0xff]   ;;  %v14482_v44 = vld [vmem:[%s16954_s29 + $0x60c] ss:$16 sps:$4 sm:$0xff]  }
  0xfb   : > { %10217 = vmatprep.mubr.bf16.mxu0 %v17138_v45  ;;  %11242 = vmatprep.mubr.bf16.mxu1 %v17138_v45 }
  0xfd   : > { %10188 = vmatpush1.bf16.msra.mxu0 %v14386_v46  ;;  %11213 = vmatpush1.bf16.msra.mxu1 %v14389_v33  ;;  %v14477_v46 = vld [vmem:[%s16954_s29 + $0x600] ss:$16 sps:$4 sm:$0xff]   ;;  %v17205_v33 = vrot.slane %v17123_v35, %v17025_v5 }
  0xfe   : > { %10189 = vmatprep.subr.bf16.mxu0 %v14394_v47  ;;  %11214 = vmatprep.subr.bf16.mxu1 %v14397_v48  ;;  %v14480_v47 = vld [vmem:[%s16954_s29 + $0x608] ss:$16 sps:$4 sm:$0xff]   ;;  %v14485_v48 = vld [vmem:[%s16954_s29 + $0x624] ss:$16 sps:$4 sm:$0xff]   ;;  %v14483_v35 = vld [vmem:[%s16954_s29 + $0x620] ss:$16 sps:$4 sm:$0xff]  }
 0x101   : > { %10190 = vmatpush1.bf16.msra.mxu0 %v14392_v49  ;;  %11215 = vmatpush1.bf16.msra.mxu1 %v14395_v50  ;;  %v14488_v49 = vld [vmem:[%s16954_s29 + $0x62c] ss:$16 sps:$4 sm:$0xff]   ;;  %v1954_v50 = vcombine.high %v17138_v45, %v17138_v45  ;;  %v14489_v45 = vld [vmem:[%s16954_s29 + $0x640] ss:$16 sps:$4 sm:$0xff]  }
 0x102   : > { %10191 = vmatprep.subr.bf16.mxu0 %v14400_v51  ;;  %11216 = vmatprep.subr.bf16.mxu1 %v14403_v52  ;;  %v14486_v51 = vld [vmem:[%s16954_s29 + $0x628] ss:$16 sps:$4 sm:$0xff]   ;;  %v14491_v52 = vld [vmem:[%s16954_s29 + $0x644] ss:$16 sps:$4 sm:$0xff]  }
 0x105   : > { %10192 = vmatpush1.bf16.msra.mxu0 %v14398_v53  ;;  %11217 = vmatpush1.bf16.msra.mxu1 %v14401_v54  ;;  %v14494_v53 = vld [vmem:[%s16954_s29 + $0x64c] ss:$16 sps:$4 sm:$0xff]   ;;  %v14492_v54 = vld [vmem:[%s16954_s29 + $0x648] ss:$16 sps:$4 sm:$0xff]  }
 0x106   : > { %10193 = vmatprep.subr.bf16.mxu0 %v14406_v55  ;;  %11218 = vmatprep.subr.bf16.mxu1 %v14409_v56  ;;  %v14497_v55 = vld [vmem:[%s16954_s29 + $0x664] ss:$16 sps:$4 sm:$0xff]   ;;  %v14500_v56 = vld [vmem:[%s16954_s29 + $0x66c] ss:$16 sps:$4 sm:$0xff]  }
 0x109   : > { %10194 = vmatpush1.bf16.msra.mxu0 %v14404_v57  ;;  %11219 = vmatpush1.bf16.msra.mxu1 %v14407_v58  ;;  %v14495_v57 = vld [vmem:[%s16954_s29 + $0x660] ss:$16 sps:$4 sm:$0xff]   ;;  %v14498_v58 = vld [vmem:[%s16954_s29 + $0x668] ss:$16 sps:$4 sm:$0xff]  }
 0x10a   : > { %10195 = vmatprep.subr.bf16.mxu0 %v14412_v59  ;;  %11220 = vmatprep.subr.bf16.mxu1 %v14415_v60  ;;  %v14503_v59 = vld [vmem:[%s16954_s29 + $0x684] ss:$16 sps:$4 sm:$0xff]   ;;  %v14506_v60 = vld [vmem:[%s16954_s29 + $0x68c] ss:$16 sps:$4 sm:$0xff]  }
 0x10d   : > { %10196 = vmatpush1.bf16.msra.mxu0 %v14410_v61  ;;  %11221 = vmatpush1.bf16.msra.mxu1 %v14413_v62  ;;  %v14501_v61 = vld [vmem:[%s16954_s29 + $0x680] ss:$16 sps:$4 sm:$0xff]   ;;  %v14504_v62 = vld [vmem:[%s16954_s29 + $0x688] ss:$16 sps:$4 sm:$0xff]  }
 0x10e   : > { %10197 = vmatprep.subr.bf16.mxu0 %v14418_v0  ;;  %11222 = vmatprep.subr.bf16.mxu1 %v14421_v1  ;;  %v14509_v0 = vld [vmem:[%s16954_s29 + $0x6a4] ss:$16 sps:$4 sm:$0xff]   ;;  %v14512_v1 = vld [vmem:[%s16954_s29 + $0x6ac] ss:$16 sps:$4 sm:$0xff]  }
 0x111   : > { %10198 = vmatpush1.bf16.msra.mxu0 %v14416_v2  ;;  %11223 = vmatpush1.bf16.msra.mxu1 %v14419_v3  ;;  %v14507_v2 = vld [vmem:[%s16954_s29 + $0x6a0] ss:$16 sps:$4 sm:$0xff]   ;;  %v14510_v3 = vld [vmem:[%s16954_s29 + $0x6a8] ss:$16 sps:$4 sm:$0xff]  }
 0x112   : > { %10199 = vmatprep.subr.bf16.mxu0 %v14424_v4  ;;  %11224 = vmatprep.subr.bf16.mxu1 %v14427_v6  ;;  %v14515_v4 = vld [vmem:[%s16954_s29 + $0x6c4] ss:$16 sps:$4 sm:$0xff]   ;;  %v14518_v6 = vld [vmem:[%s16954_s29 + $0x6cc] ss:$16 sps:$4 sm:$0xff]  }
 0x115   : > { %10200 = vmatpush1.bf16.msra.mxu0 %v14422_v7  ;;  %11225 = vmatpush1.bf16.msra.mxu1 %v14425_v9  ;;  %v14513_v7 = vld [vmem:[%s16954_s29 + $0x6c0] ss:$16 sps:$4 sm:$0xff]   ;;  %v14516_v9 = vld [vmem:[%s16954_s29 + $0x6c8] ss:$16 sps:$4 sm:$0xff]  }
 0x116   : > { %10201 = vmatprep.subr.bf16.mxu0 %v14430_v10  ;;  %11226 = vmatprep.subr.bf16.mxu1 %v14433_v11  ;;  %v14521_v10 = vld [vmem:[%s16954_s29 + $0x6e4] ss:$16 sps:$4 sm:$0xff]   ;;  %v14524_v11 = vld [vmem:[%s16954_s29 + $0x6ec] ss:$16 sps:$4 sm:$0xff]  }
 0x119   : > { %10202 = vmatpush1.bf16.msra.mxu0 %v14428_v12  ;;  %11227 = vmatpush1.bf16.msra.mxu1 %v14431_v13  ;;  %v14519_v12 = vld [vmem:[%s16954_s29 + $0x6e0] ss:$16 sps:$4 sm:$0xff]   ;;  %v14522_v13 = vld [vmem:[%s16954_s29 + $0x6e8] ss:$16 sps:$4 sm:$0xff]  }
 0x11a   : > { %10203 = vmatprep.subr.bf16.mxu0 %v14436_v14  ;;  %11228 = vmatprep.subr.bf16.mxu1 %v14439_v15  ;;  %v14527_v14 = vld [vmem:[%s16954_s29 + $0x704] ss:$16 sps:$4 sm:$0xff]   ;;  %v14530_v15 = vld [vmem:[%s16954_s29 + $0x70c] ss:$16 sps:$4 sm:$0xff]  }
 0x11d   : > { %10204 = vmatpush1.bf16.msra.mxu0 %v14434_v16  ;;  %11229 = vmatpush1.bf16.msra.mxu1 %v14437_v17  ;;  %v14525_v16 = vld [vmem:[%s16954_s29 + $0x700] ss:$16 sps:$4 sm:$0xff]   ;;  %v14528_v17 = vld [vmem:[%s16954_s29 + $0x708] ss:$16 sps:$4 sm:$0xff]  }
 0x11e   : > { %10205 = vmatprep.subr.bf16.mxu0 %v14442_v18  ;;  %11230 = vmatprep.subr.bf16.mxu1 %v14445_v19  ;;  %v14533_v18 = vld [vmem:[%s16954_s29 + $0x724] ss:$16 sps:$4 sm:$0xff]   ;;  %v14536_v19 = vld [vmem:[%s16954_s29 + $0x72c] ss:$16 sps:$4 sm:$0xff]  }
 0x121   : > { %10206 = vmatpush1.bf16.msra.mxu0 %v14440_v20  ;;  %11231 = vmatpush1.bf16.msra.mxu1 %v14443_v21  ;;  %v14531_v20 = vld [vmem:[%s16954_s29 + $0x720] ss:$16 sps:$4 sm:$0xff]   ;;  %v14534_v21 = vld [vmem:[%s16954_s29 + $0x728] ss:$16 sps:$4 sm:$0xff]  }
 0x122   : > { %10207 = vmatprep.subr.bf16.mxu0 %v14448_v22  ;;  %11232 = vmatprep.subr.bf16.mxu1 %v14451_v23  ;;  %v14539_v22 = vld [vmem:[%s16954_s29 + $0x744] ss:$16 sps:$4 sm:$0xff]   ;;  %v14542_v23 = vld [vmem:[%s16954_s29 + $0x74c] ss:$16 sps:$4 sm:$0xff]  }
 0x125   : > { %10208 = vmatpush1.bf16.msra.mxu0 %v14446_v24  ;;  %11233 = vmatpush1.bf16.msra.mxu1 %v14449_v25  ;;  %v14537_v24 = vld [vmem:[%s16954_s29 + $0x740] ss:$16 sps:$4 sm:$0xff]   ;;  %v14540_v25 = vld [vmem:[%s16954_s29 + $0x748] ss:$16 sps:$4 sm:$0xff]  }
 0x126   : > { %10209 = vmatprep.subr.bf16.mxu0 %v14454_v26  ;;  %11234 = vmatprep.subr.bf16.mxu1 %v14457_v27  ;;  %v14545_v26 = vld [vmem:[%s16954_s29 + $0x764] ss:$16 sps:$4 sm:$0xff]   ;;  %v14548_v27 = vld [vmem:[%s16954_s29 + $0x76c] ss:$16 sps:$4 sm:$0xff]  }
 0x129   : > { %10210 = vmatpush1.bf16.msra.mxu0 %v14452_v28  ;;  %11235 = vmatpush1.bf16.msra.mxu1 %v14455_v29  ;;  %v14543_v28 = vld [vmem:[%s16954_s29 + $0x760] ss:$16 sps:$4 sm:$0xff]   ;;  %v14546_v29 = vld [vmem:[%s16954_s29 + $0x768] ss:$16 sps:$4 sm:$0xff]  }
 0x12a   : > { %10211 = vmatprep.subr.bf16.mxu0 %v14460_v30  ;;  %11236 = vmatprep.subr.bf16.mxu1 %v14463_v31  ;;  %v14551_v30 = vld [vmem:[%s16954_s29 + $0x784] ss:$16 sps:$4 sm:$0xff]   ;;  %v14554_v31 = vld [vmem:[%s16954_s29 + $0x78c] ss:$16 sps:$4 sm:$0xff]  }
 0x12d   : > { %10212 = vmatpush1.bf16.msra.mxu0 %v14458_v32  ;;  %11237 = vmatpush1.bf16.msra.mxu1 %v14461_v34  ;;  %v14549_v32 = vld [vmem:[%s16954_s29 + $0x780] ss:$16 sps:$4 sm:$0xff]   ;;  %v14552_v34 = vld [vmem:[%s16954_s29 + $0x788] ss:$16 sps:$4 sm:$0xff]  }
 0x12e   : > { %10213 = vmatprep.subr.bf16.mxu0 %v14466_v36  ;;  %11238 = vmatprep.subr.bf16.mxu1 %v14469_v8  ;;  %v14557_v36 = vld [vmem:[%s16954_s29 + $0x7a4] ss:$16 sps:$4 sm:$0xff]   ;;  %v14560_v8 = vld [vmem:[%s16954_s29 + $0x7ac] ss:$16 sps:$4 sm:$0xff]  }
 0x131   : > { %10214 = vmatpush1.bf16.msra.mxu0 %v14464_v37  ;;  %11239 = vmatpush1.bf16.msra.mxu1 %v14467_v38  ;;  %v14555_v37 = vld [vmem:[%s16954_s29 + $0x7a0] ss:$16 sps:$4 sm:$0xff]   ;;  %v14558_v38 = vld [vmem:[%s16954_s29 + $0x7a8] ss:$16 sps:$4 sm:$0xff]  }
 0x132   : > { %10215 = vmatprep.subr.bf16.mxu0 %v14472_v39  ;;  %11240 = vmatprep.subr.bf16.mxu1 %v14475_v40  ;;  %v14563_v39 = vld [vmem:[%s16954_s29 + $0x7c4] ss:$16 sps:$4 sm:$0xff]   ;;  %v14566_v40 = vld [vmem:[%s16954_s29 + $0x7cc] ss:$16 sps:$4 sm:$0xff]  }
 0x135   : > { %10216 = vmatpush1.bf16.msra.mxu0 %v14470_v41  ;;  %11241 = vmatpush1.bf16.msra.mxu1 %v14473_v42  ;;  %v17267_v41 = vld.sshfl [vmem:[%s16970_s4 + $0x8] sm:$0xff pattern:$0x75316420] }
 0x136   : > { %10226 = vmatprep.subr.bf16.mxu0 %v14479_v43  ;;  %11251 = vmatprep.subr.bf16.mxu1 %v14482_v44  ;;  %v14561_v42 = vld [vmem:[%s16954_s29 + $0x7c0] ss:$16 sps:$4 sm:$0xff]   ;;  %v14564_v43 = vld [vmem:[%s16954_s29 + $0x7c8] ss:$16 sps:$4 sm:$0xff]   ;;  %v14569_v44 = vld [vmem:[%s16954_s29 + $0x7e4] ss:$16 sps:$4 sm:$0xff]  }
 0x138   : > { %10218 = vmatmul.mubr.bf16.vlgmr.msra.gmra.mrb[0].mxu0 %v17205_v33  ;;  %11243 = vmatmul.mubr.bf16.vlgmr.msra.gmra.mrb[0].mxu1 %v17205_v33 }
 0x139   : > { %10227 = vmatpush1.bf16.msra.mxu0 %v14477_v46  ;;  %11252 = vmatpush1.bf16.msra.mxu1 %v14480_v47  ;;  %v14572_v46 = vld [vmem:[%s16954_s29 + $0x7ec] ss:$16 sps:$4 sm:$0xff]   ;;  %v14567_v47 = vld [vmem:[%s16954_s29 + $0x7e0] ss:$16 sps:$4 sm:$0xff]  }
 0x13a   : > { %10228 = vmatprep.subr.bf16.mxu0 %v14485_v48  ;;  %11253 = vmatprep.subr.bf16.mxu1 %v14488_v49  ;;  %v14570_v48 = vld [vmem:[%s16954_s29 + $0x7e8] ss:$16 sps:$4 sm:$0xff]   ;;  %v14575_v49 = vld [vmem:[%s16954_s29 + $0x804] ss:$16 sps:$4 sm:$0xff]  }
 0x13b   : > { %10258 = vmatprep.mubr.bf16.mxu0 %v1954_v50  ;;  %11283 = vmatprep.mubr.bf16.mxu1 %v1954_v50  ;;  %v14578_v50 = vld [vmem:[%s16954_s29 + $0x80c] ss:$16 sps:$4 sm:$0xff]  }
 0x13d   : > { %10229 = vmatpush1.bf16.msra.mxu0 %v14483_v35  ;;  %11254 = vmatpush1.bf16.msra.mxu1 %v14486_v51  ;;  %v1970_v35 = vcombine.high %v17267_v41, %v17267_v41  ;;  %v1952_v51 = vcombine.high %v17205_v33, %v17205_v33  ;;  %v14579_v33 = vld [vmem:[%s16954_s29 + $0x820] ss:$16 sps:$4 sm:$0xff]  }
 0x13e   : > { %10230 = vmatprep.subr.bf16.mxu0 %v14491_v52  ;;  %11255 = vmatprep.subr.bf16.mxu1 %v14494_v53  ;;  %v14573_v52 = vld [vmem:[%s16954_s29 + $0x800] ss:$16 sps:$4 sm:$0xff]   ;;  %v14576_v53 = vld [vmem:[%s16954_s29 + $0x808] ss:$16 sps:$4 sm:$0xff]  }
 0x141   : > { %10231 = vmatpush1.bf16.msra.mxu0 %v14489_v45  ;;  %11256 = vmatpush1.bf16.msra.mxu1 %v14492_v54  ;;  %v14581_v45 = vld [vmem:[%s16954_s29 + $0x824] ss:$16 sps:$4 sm:$0xff]   ;;  %v14584_v54 = vld [vmem:[%s16954_s29 + $0x82c] ss:$16 sps:$4 sm:$0xff]  }
 0x142   : > { %10232 = vmatprep.subr.bf16.mxu0 %v14497_v55  ;;  %11257 = vmatprep.subr.bf16.mxu1 %v14500_v56  ;;  %v17286_v55 = vrot.slane %v1970_v35, %v17025_v5  ;;  %v14582_v56 = vld [vmem:[%s16954_s29 + $0x828] ss:$16 sps:$4 sm:$0xff]   ;;  %v14665_v35 = vld [vmem:[%s16954_s29 + $0x9e4] ss:$16 sps:$4 sm:$0xff]  }
 0x145   : > { %10233 = vmatpush1.bf16.msra.mxu0 %v14495_v57  ;;  %11258 = vmatpush1.bf16.msra.mxu1 %v14498_v58  ;;  %v14587_v57 = vld [vmem:[%s16954_s29 + $0x844] ss:$16 sps:$4 sm:$0xff]   ;;  %v14590_v58 = vld [vmem:[%s16954_s29 + $0x84c] ss:$16 sps:$4 sm:$0xff]  }
 0x146   : > { %10234 = vmatprep.subr.bf16.mxu0 %v14503_v59  ;;  %11259 = vmatprep.subr.bf16.mxu1 %v14506_v60  ;;  %v14585_v59 = vld [vmem:[%s16954_s29 + $0x840] ss:$16 sps:$4 sm:$0xff]   ;;  %v14588_v60 = vld [vmem:[%s16954_s29 + $0x848] ss:$16 sps:$4 sm:$0xff]  }
 0x149   : > { %10235 = vmatpush1.bf16.msra.mxu0 %v14501_v61  ;;  %11260 = vmatpush1.bf16.msra.mxu1 %v14504_v62  ;;  %v14593_v61 = vld [vmem:[%s16954_s29 + $0x864] ss:$16 sps:$4 sm:$0xff]   ;;  %v14596_v62 = vld [vmem:[%s16954_s29 + $0x86c] ss:$16 sps:$4 sm:$0xff]  }
 0x14a   : > { %10236 = vmatprep.subr.bf16.mxu0 %v14509_v0  ;;  %11261 = vmatprep.subr.bf16.mxu1 %v14512_v1  ;;  %v14591_v0 = vld [vmem:[%s16954_s29 + $0x860] ss:$16 sps:$4 sm:$0xff]   ;;  %v14594_v1 = vld [vmem:[%s16954_s29 + $0x868] ss:$16 sps:$4 sm:$0xff]  }
 0x14d   : > { %10237 = vmatpush1.bf16.msra.mxu0 %v14507_v2  ;;  %11262 = vmatpush1.bf16.msra.mxu1 %v14510_v3  ;;  %v14599_v2 = vld [vmem:[%s16954_s29 + $0x884] ss:$16 sps:$4 sm:$0xff]   ;;  %v14602_v3 = vld [vmem:[%s16954_s29 + $0x88c] ss:$16 sps:$4 sm:$0xff]  }
 0x14e   : > { %10238 = vmatprep.subr.bf16.mxu0 %v14515_v4  ;;  %11263 = vmatprep.subr.bf16.mxu1 %v14518_v6  ;;  %v14597_v4 = vld [vmem:[%s16954_s29 + $0x880] ss:$16 sps:$4 sm:$0xff]   ;;  %v14600_v6 = vld [vmem:[%s16954_s29 + $0x888] ss:$16 sps:$4 sm:$0xff]  }
 0x151   : > { %10239 = vmatpush1.bf16.msra.mxu0 %v14513_v7  ;;  %11264 = vmatpush1.bf16.msra.mxu1 %v14516_v9  ;;  %v14605_v7 = vld [vmem:[%s16954_s29 + $0x8a4] ss:$16 sps:$4 sm:$0xff]   ;;  %v14608_v9 = vld [vmem:[%s16954_s29 + $0x8ac] ss:$16 sps:$4 sm:$0xff]  }
 0x152   : > { %10240 = vmatprep.subr.bf16.mxu0 %v14521_v10  ;;  %11265 = vmatprep.subr.bf16.mxu1 %v14524_v11  ;;  %v14603_v10 = vld [vmem:[%s16954_s29 + $0x8a0] ss:$16 sps:$4 sm:$0xff]   ;;  %v14606_v11 = vld [vmem:[%s16954_s29 + $0x8a8] ss:$16 sps:$4 sm:$0xff]  }
 0x155   : > { %10241 = vmatpush1.bf16.msra.mxu0 %v14519_v12  ;;  %11266 = vmatpush1.bf16.msra.mxu1 %v14522_v13  ;;  %v14611_v12 = vld [vmem:[%s16954_s29 + $0x8c4] ss:$16 sps:$4 sm:$0xff]   ;;  %v14614_v13 = vld [vmem:[%s16954_s29 + $0x8cc] ss:$16 sps:$4 sm:$0xff]  }
 0x156   : > { %10242 = vmatprep.subr.bf16.mxu0 %v14527_v14  ;;  %11267 = vmatprep.subr.bf16.mxu1 %v14530_v15  ;;  %v14609_v14 = vld [vmem:[%s16954_s29 + $0x8c0] ss:$16 sps:$4 sm:$0xff]   ;;  %v14612_v15 = vld [vmem:[%s16954_s29 + $0x8c8] ss:$16 sps:$4 sm:$0xff]  }
 0x159   : > { %10243 = vmatpush1.bf16.msra.mxu0 %v14525_v16  ;;  %11268 = vmatpush1.bf16.msra.mxu1 %v14528_v17  ;;  %v14617_v16 = vld [vmem:[%s16954_s29 + $0x8e4] ss:$16 sps:$4 sm:$0xff]   ;;  %v14620_v17 = vld [vmem:[%s16954_s29 + $0x8ec] ss:$16 sps:$4 sm:$0xff]  }
 0x15a   : > { %10244 = vmatprep.subr.bf16.mxu0 %v14533_v18  ;;  %11269 = vmatprep.subr.bf16.mxu1 %v14536_v19  ;;  %v14615_v18 = vld [vmem:[%s16954_s29 + $0x8e0] ss:$16 sps:$4 sm:$0xff]   ;;  %v14618_v19 = vld [vmem:[%s16954_s29 + $0x8e8] ss:$16 sps:$4 sm:$0xff]  }
 0x15d   : > { %10245 = vmatpush1.bf16.msra.mxu0 %v14531_v20  ;;  %11270 = vmatpush1.bf16.msra.mxu1 %v14534_v21  ;;  %v14623_v20 = vld [vmem:[%s16954_s29 + $0x904] ss:$16 sps:$4 sm:$0xff]   ;;  %v14626_v21 = vld [vmem:[%s16954_s29 + $0x90c] ss:$16 sps:$4 sm:$0xff]  }
 0x15e   : > { %10246 = vmatprep.subr.bf16.mxu0 %v14539_v22  ;;  %11271 = vmatprep.subr.bf16.mxu1 %v14542_v23  ;;  %v14621_v22 = vld [vmem:[%s16954_s29 + $0x900] ss:$16 sps:$4 sm:$0xff]   ;;  %v14624_v23 = vld [vmem:[%s16954_s29 + $0x908] ss:$16 sps:$4 sm:$0xff]  }
 0x161   : > { %10247 = vmatpush1.bf16.msra.mxu0 %v14537_v24  ;;  %11272 = vmatpush1.bf16.msra.mxu1 %v14540_v25  ;;  %v14629_v24 = vld [vmem:[%s16954_s29 + $0x924] ss:$16 sps:$4 sm:$0xff]   ;;  %v14632_v25 = vld [vmem:[%s16954_s29 + $0x92c] ss:$16 sps:$4 sm:$0xff]  }
 0x162   : > { %10248 = vmatprep.subr.bf16.mxu0 %v14545_v26  ;;  %11273 = vmatprep.subr.bf16.mxu1 %v14548_v27  ;;  %v14627_v26 = vld [vmem:[%s16954_s29 + $0x920] ss:$16 sps:$4 sm:$0xff]   ;;  %v14630_v27 = vld [vmem:[%s16954_s29 + $0x928] ss:$16 sps:$4 sm:$0xff]  }
 0x165   : > { %10249 = vmatpush1.bf16.msra.mxu0 %v14543_v28  ;;  %11274 = vmatpush1.bf16.msra.mxu1 %v14546_v29  ;;  %v14635_v28 = vld [vmem:[%s16954_s29 + $0x944] ss:$16 sps:$4 sm:$0xff]   ;;  %v14638_v29 = vld [vmem:[%s16954_s29 + $0x94c] ss:$16 sps:$4 sm:$0xff]  }
 0x166   : > { %10250 = vmatprep.subr.bf16.mxu0 %v14551_v30  ;;  %11275 = vmatprep.subr.bf16.mxu1 %v14554_v31  ;;  %v14633_v30 = vld [vmem:[%s16954_s29 + $0x940] ss:$16 sps:$4 sm:$0xff]   ;;  %v14636_v31 = vld [vmem:[%s16954_s29 + $0x948] ss:$16 sps:$4 sm:$0xff]  }
 0x169   : > { %10251 = vmatpush1.bf16.msra.mxu0 %v14549_v32  ;;  %11276 = vmatpush1.bf16.msra.mxu1 %v14552_v34  ;;  %v14641_v32 = vld [vmem:[%s16954_s29 + $0x964] ss:$16 sps:$4 sm:$0xff]   ;;  %v14644_v34 = vld [vmem:[%s16954_s29 + $0x96c] ss:$16 sps:$4 sm:$0xff]  }
 0x16a   : > { %10252 = vmatprep.subr.bf16.mxu0 %v14557_v36  ;;  %11277 = vmatprep.subr.bf16.mxu1 %v14560_v8  ;;  %v14639_v36 = vld [vmem:[%s16954_s29 + $0x960] ss:$16 sps:$4 sm:$0xff]   ;;  %v14642_v8 = vld [vmem:[%s16954_s29 + $0x968] ss:$16 sps:$4 sm:$0xff]  }
 0x16d   : > { %10253 = vmatpush1.bf16.msra.mxu0 %v14555_v37  ;;  %11278 = vmatpush1.bf16.msra.mxu1 %v14558_v38  ;;  %v14647_v37 = vld [vmem:[%s16954_s29 + $0x984] ss:$16 sps:$4 sm:$0xff]   ;;  %v14650_v38 = vld [vmem:[%s16954_s29 + $0x98c] ss:$16 sps:$4 sm:$0xff]  }
 0x16e   : > { %10254 = vmatprep.subr.bf16.mxu0 %v14563_v39  ;;  %11279 = vmatprep.subr.bf16.mxu1 %v14566_v40  ;;  %v14645_v39 = vld [vmem:[%s16954_s29 + $0x980] ss:$16 sps:$4 sm:$0xff]   ;;  %v14648_v40 = vld [vmem:[%s16954_s29 + $0x988] ss:$16 sps:$4 sm:$0xff]  }
 0x171   : > { %10255 = vmatpush1.bf16.msra.mxu0 %v14561_v42  ;;  %11280 = vmatpush1.bf16.msra.mxu1 %v14564_v43  ;;  %v14653_v42 = vld [vmem:[%s16954_s29 + $0x9a4] ss:$16 sps:$4 sm:$0xff]   ;;  %v14656_v43 = vld [vmem:[%s16954_s29 + $0x9ac] ss:$16 sps:$4 sm:$0xff]  }
 0x172   : > { %10256 = vmatprep.subr.bf16.mxu0 %v14569_v44  ;;  %11281 = vmatprep.subr.bf16.mxu1 %v14572_v46  ;;  %v14651_v44 = vld [vmem:[%s16954_s29 + $0x9a0] ss:$16 sps:$4 sm:$0xff]   ;;  %v14654_v46 = vld [vmem:[%s16954_s29 + $0x9a8] ss:$16 sps:$4 sm:$0xff]  }
 0x175   : > { %10257 = vmatpush1.bf16.msra.mxu0 %v14567_v47  ;;  %11282 = vmatpush1.bf16.msra.mxu1 %v14570_v48  ;;  %v14659_v47 = vld [vmem:[%s16954_s29 + $0x9c4] ss:$16 sps:$4 sm:$0xff]   ;;  %v14662_v48 = vld [vmem:[%s16954_s29 + $0x9cc] ss:$16 sps:$4 sm:$0xff]  }
 0x176   : > { %10267 = vmatprep.subr.bf16.mxu0 %v14575_v49  ;;  %11292 = vmatprep.subr.bf16.mxu1 %v14578_v50  ;;  %v14657_v49 = vld [vmem:[%s16954_s29 + $0x9c0] ss:$16 sps:$4 sm:$0xff]   ;;  %v14660_v50 = vld [vmem:[%s16954_s29 + $0x9c8] ss:$16 sps:$4 sm:$0xff]  }
 0x178   : > { %10259 = vmatmul.mubr.bf16.vlgmr.msra.gmra.mrb[0].mxu0 %v1952_v51  ;;  %11284 = vmatmul.mubr.bf16.vlgmr.msra.gmra.mrb[0].mxu1 %v1952_v51  ;;  %v14668_v51 = vld [vmem:[%s16954_s29 + $0x9ec] ss:$16 sps:$4 sm:$0xff]  }
 0x179   : > { %10268 = vmatpush1.bf16.msra.mxu0 %v14573_v52  ;;  %11293 = vmatpush1.bf16.msra.mxu1 %v14576_v53  ;;  %v14663_v52 = vld [vmem:[%s16954_s29 + $0x9e0] ss:$16 sps:$4 sm:$0xff]   ;;  %v14666_v53 = vld [vmem:[%s16954_s29 + $0x9e8] ss:$16 sps:$4 sm:$0xff]  }
 0x17a   : > { %10269 = vmatprep.subr.bf16.mxu0 %v14581_v45  ;;  %11294 = vmatprep.subr.bf16.mxu1 %v14584_v54  ;;  %v14671_v45 = vld [vmem:[%s16954_s29 + $0xa04] ss:$16 sps:$4 sm:$0xff]   ;;  %v14674_v54 = vld [vmem:[%s16954_s29 + $0xa0c] ss:$16 sps:$4 sm:$0xff]  }
 0x17b   : > { %10299 = vmatprep.mubr.bf16.mxu0 %v17286_v55  ;;  %11324 = vmatprep.mubr.bf16.mxu1 %v17286_v55 }
 0x17d   : > { %10270 = vmatpush1.bf16.msra.mxu0 %v14579_v33  ;;  %11295 = vmatpush1.bf16.msra.mxu1 %v14582_v56  ;;  %v17352_v33 = vrot.slane %v17267_v41, %v17025_v5  ;;  %v14669_v56 = vld [vmem:[%s16954_s29 + $0xa00] ss:$16 sps:$4 sm:$0xff]  }
 0x17e   : > { %10271 = vmatprep.subr.bf16.mxu0 %v14587_v57  ;;  %11296 = vmatprep.subr.bf16.mxu1 %v14590_v58  ;;  %v14672_v57 = vld [vmem:[%s16954_s29 + $0xa08] ss:$16 sps:$4 sm:$0xff]   ;;  %v14677_v58 = vld [vmem:[%s16954_s29 + $0xa24] ss:$16 sps:$4 sm:$0xff]   ;;  %v14675_v41 = vld [vmem:[%s16954_s29 + $0xa20] ss:$16 sps:$4 sm:$0xff]  }
 0x181   : > { %10272 = vmatpush1.bf16.msra.mxu0 %v14585_v59  ;;  %11297 = vmatpush1.bf16.msra.mxu1 %v14588_v60  ;;  %v14680_v59 = vld [vmem:[%s16954_s29 + $0xa2c] ss:$16 sps:$4 sm:$0xff]   ;;  %v2002_v60 = vcombine.high %v17286_v55, %v17286_v55  ;;  %v14681_v55 = vld [vmem:[%s16954_s29 + $0xa40] ss:$16 sps:$4 sm:$0xff]  }
 0x182   : > { %10273 = vmatprep.subr.bf16.mxu0 %v14593_v61  ;;  %11298 = vmatprep.subr.bf16.mxu1 %v14596_v62  ;;  %v14678_v61 = vld [vmem:[%s16954_s29 + $0xa28] ss:$16 sps:$4 sm:$0xff]   ;;  %v14683_v62 = vld [vmem:[%s16954_s29 + $0xa44] ss:$16 sps:$4 sm:$0xff]  }
 0x185   : > { %10274 = vmatpush1.bf16.msra.mxu0 %v14591_v0  ;;  %11299 = vmatpush1.bf16.msra.mxu1 %v14594_v1  ;;  %v14686_v0 = vld [vmem:[%s16954_s29 + $0xa4c] ss:$16 sps:$4 sm:$0xff]   ;;  %v14684_v1 = vld [vmem:[%s16954_s29 + $0xa48] ss:$16 sps:$4 sm:$0xff]  }
 0x186   : > { %10275 = vmatprep.subr.bf16.mxu0 %v14599_v2  ;;  %11300 = vmatprep.subr.bf16.mxu1 %v14602_v3  ;;  %v14689_v2 = vld [vmem:[%s16954_s29 + $0xa64] ss:$16 sps:$4 sm:$0xff]   ;;  %v14692_v3 = vld [vmem:[%s16954_s29 + $0xa6c] ss:$16 sps:$4 sm:$0xff]  }
 0x189   : > { %10276 = vmatpush1.bf16.msra.mxu0 %v14597_v4  ;;  %11301 = vmatpush1.bf16.msra.mxu1 %v14600_v6  ;;  %v14687_v4 = vld [vmem:[%s16954_s29 + $0xa60] ss:$16 sps:$4 sm:$0xff]   ;;  %v14690_v6 = vld [vmem:[%s16954_s29 + $0xa68] ss:$16 sps:$4 sm:$0xff]  }
 0x18a   : > { %10277 = vmatprep.subr.bf16.mxu0 %v14605_v7  ;;  %11302 = vmatprep.subr.bf16.mxu1 %v14608_v9  ;;  %v14695_v7 = vld [vmem:[%s16954_s29 + $0xa84] ss:$16 sps:$4 sm:$0xff]   ;;  %v14698_v9 = vld [vmem:[%s16954_s29 + $0xa8c] ss:$16 sps:$4 sm:$0xff]  }
 0x18d   : > { %10278 = vmatpush1.bf16.msra.mxu0 %v14603_v10  ;;  %11303 = vmatpush1.bf16.msra.mxu1 %v14606_v11  ;;  %v14693_v10 = vld [vmem:[%s16954_s29 + $0xa80] ss:$16 sps:$4 sm:$0xff]   ;;  %v14696_v11 = vld [vmem:[%s16954_s29 + $0xa88] ss:$16 sps:$4 sm:$0xff]  }
 0x18e   : > { %10279 = vmatprep.subr.bf16.mxu0 %v14611_v12  ;;  %11304 = vmatprep.subr.bf16.mxu1 %v14614_v13  ;;  %v14701_v12 = vld [vmem:[%s16954_s29 + $0xaa4] ss:$16 sps:$4 sm:$0xff]   ;;  %v14704_v13 = vld [vmem:[%s16954_s29 + $0xaac] ss:$16 sps:$4 sm:$0xff]  }
 0x191   : > { %10280 = vmatpush1.bf16.msra.mxu0 %v14609_v14  ;;  %11305 = vmatpush1.bf16.msra.mxu1 %v14612_v15  ;;  %v14699_v14 = vld [vmem:[%s16954_s29 + $0xaa0] ss:$16 sps:$4 sm:$0xff]   ;;  %v14702_v15 = vld [vmem:[%s16954_s29 + $0xaa8] ss:$16 sps:$4 sm:$0xff]  }
 0x192   : > { %10281 = vmatprep.subr.bf16.mxu0 %v14617_v16  ;;  %11306 = vmatprep.subr.bf16.mxu1 %v14620_v17  ;;  %v14707_v16 = vld [vmem:[%s16954_s29 + $0xac4] ss:$16 sps:$4 sm:$0xff]   ;;  %v14710_v17 = vld [vmem:[%s16954_s29 + $0xacc] ss:$16 sps:$4 sm:$0xff]  }
 0x195   : > { %10282 = vmatpush1.bf16.msra.mxu0 %v14615_v18  ;;  %11307 = vmatpush1.bf16.msra.mxu1 %v14618_v19  ;;  %v14705_v18 = vld [vmem:[%s16954_s29 + $0xac0] ss:$16 sps:$4 sm:$0xff]   ;;  %v14708_v19 = vld [vmem:[%s16954_s29 + $0xac8] ss:$16 sps:$4 sm:$0xff]  }
 0x196   : > { %10283 = vmatprep.subr.bf16.mxu0 %v14623_v20  ;;  %11308 = vmatprep.subr.bf16.mxu1 %v14626_v21  ;;  %v14713_v20 = vld [vmem:[%s16954_s29 + $0xae4] ss:$16 sps:$4 sm:$0xff]   ;;  %v14716_v21 = vld [vmem:[%s16954_s29 + $0xaec] ss:$16 sps:$4 sm:$0xff]  }
 0x199   : > { %10284 = vmatpush1.bf16.msra.mxu0 %v14621_v22  ;;  %11309 = vmatpush1.bf16.msra.mxu1 %v14624_v23  ;;  %v14711_v22 = vld [vmem:[%s16954_s29 + $0xae0] ss:$16 sps:$4 sm:$0xff]   ;;  %v14714_v23 = vld [vmem:[%s16954_s29 + $0xae8] ss:$16 sps:$4 sm:$0xff]  }
 0x19a   : > { %10285 = vmatprep.subr.bf16.mxu0 %v14629_v24  ;;  %11310 = vmatprep.subr.bf16.mxu1 %v14632_v25  ;;  %v14719_v24 = vld [vmem:[%s16954_s29 + $0xb04] ss:$16 sps:$4 sm:$0xff]   ;;  %v14722_v25 = vld [vmem:[%s16954_s29 + $0xb0c] ss:$16 sps:$4 sm:$0xff]  }
 0x19d   : > { %10286 = vmatpush1.bf16.msra.mxu0 %v14627_v26  ;;  %11311 = vmatpush1.bf16.msra.mxu1 %v14630_v27  ;;  %v14717_v26 = vld [vmem:[%s16954_s29 + $0xb00] ss:$16 sps:$4 sm:$0xff]   ;;  %v14720_v27 = vld [vmem:[%s16954_s29 + $0xb08] ss:$16 sps:$4 sm:$0xff]  }
 0x19e   : > { %10287 = vmatprep.subr.bf16.mxu0 %v14635_v28  ;;  %11312 = vmatprep.subr.bf16.mxu1 %v14638_v29  ;;  %v14725_v28 = vld [vmem:[%s16954_s29 + $0xb24] ss:$16 sps:$4 sm:$0xff]   ;;  %v14728_v29 = vld [vmem:[%s16954_s29 + $0xb2c] ss:$16 sps:$4 sm:$0xff]  }
 0x1a1   : > { %10288 = vmatpush1.bf16.msra.mxu0 %v14633_v30  ;;  %11313 = vmatpush1.bf16.msra.mxu1 %v14636_v31  ;;  %v14723_v30 = vld [vmem:[%s16954_s29 + $0xb20] ss:$16 sps:$4 sm:$0xff]   ;;  %v14726_v31 = vld [vmem:[%s16954_s29 + $0xb28] ss:$16 sps:$4 sm:$0xff]  }
 0x1a2   : > { %10289 = vmatprep.subr.bf16.mxu0 %v14641_v32  ;;  %11314 = vmatprep.subr.bf16.mxu1 %v14644_v34  ;;  %v14731_v32 = vld [vmem:[%s16954_s29 + $0xb44] ss:$16 sps:$4 sm:$0xff]   ;;  %v14734_v34 = vld [vmem:[%s16954_s29 + $0xb4c] ss:$16 sps:$4 sm:$0xff]  }
 0x1a5   : > { %10290 = vmatpush1.bf16.msra.mxu0 %v14639_v36  ;;  %11315 = vmatpush1.bf16.msra.mxu1 %v14642_v8  ;;  %v14729_v36 = vld [vmem:[%s16954_s29 + $0xb40] ss:$16 sps:$4 sm:$0xff]   ;;  %v14732_v8 = vld [vmem:[%s16954_s29 + $0xb48] ss:$16 sps:$4 sm:$0xff]  }
 0x1a6   : > { %10291 = vmatprep.subr.bf16.mxu0 %v14647_v37  ;;  %11316 = vmatprep.subr.bf16.mxu1 %v14650_v38  ;;  %v14737_v37 = vld [vmem:[%s16954_s29 + $0xb64] ss:$16 sps:$4 sm:$0xff]   ;;  %v14740_v38 = vld [vmem:[%s16954_s29 + $0xb6c] ss:$16 sps:$4 sm:$0xff]  }
 0x1a9   : > { %10292 = vmatpush1.bf16.msra.mxu0 %v14645_v39  ;;  %11317 = vmatpush1.bf16.msra.mxu1 %v14648_v40  ;;  %v14735_v39 = vld [vmem:[%s16954_s29 + $0xb60] ss:$16 sps:$4 sm:$0xff]   ;;  %v14738_v40 = vld [vmem:[%s16954_s29 + $0xb68] ss:$16 sps:$4 sm:$0xff]  }
 0x1aa   : > { %10293 = vmatprep.subr.bf16.mxu0 %v14653_v42  ;;  %11318 = vmatprep.subr.bf16.mxu1 %v14656_v43  ;;  %v14743_v42 = vld [vmem:[%s16954_s29 + $0xb84] ss:$16 sps:$4 sm:$0xff]   ;;  %v14746_v43 = vld [vmem:[%s16954_s29 + $0xb8c] ss:$16 sps:$4 sm:$0xff]  }
 0x1ad   : > { %10294 = vmatpush1.bf16.msra.mxu0 %v14651_v44  ;;  %11319 = vmatpush1.bf16.msra.mxu1 %v14654_v46  ;;  %v14741_v44 = vld [vmem:[%s16954_s29 + $0xb80] ss:$16 sps:$4 sm:$0xff]   ;;  %v14744_v46 = vld [vmem:[%s16954_s29 + $0xb88] ss:$16 sps:$4 sm:$0xff]  }
 0x1ae   : > { %10295 = vmatprep.subr.bf16.mxu0 %v14659_v47  ;;  %11320 = vmatprep.subr.bf16.mxu1 %v14662_v48  ;;  %v14749_v47 = vld [vmem:[%s16954_s29 + $0xba4] ss:$16 sps:$4 sm:$0xff]   ;;  %v14752_v48 = vld [vmem:[%s16954_s29 + $0xbac] ss:$16 sps:$4 sm:$0xff]  }
 0x1b1   : > { %10296 = vmatpush1.bf16.msra.mxu0 %v14657_v49  ;;  %11321 = vmatpush1.bf16.msra.mxu1 %v14660_v50  ;;  %v14747_v49 = vld [vmem:[%s16954_s29 + $0xba0] ss:$16 sps:$4 sm:$0xff]   ;;  %v14750_v50 = vld [vmem:[%s16954_s29 + $0xba8] ss:$16 sps:$4 sm:$0xff]  }
 0x1b2   : > { %10297 = vmatprep.subr.bf16.mxu0 %v14665_v35  ;;  %11322 = vmatprep.subr.bf16.mxu1 %v14668_v51  ;;  %v14755_v35 = vld [vmem:[%s16954_s29 + $0xbc4] ss:$16 sps:$4 sm:$0xff]   ;;  %v14758_v51 = vld [vmem:[%s16954_s29 + $0xbcc] ss:$16 sps:$4 sm:$0xff]  }
 0x1b5   : > { %10298 = vmatpush1.bf16.msra.mxu0 %v14663_v52  ;;  %11323 = vmatpush1.bf16.msra.mxu1 %v14666_v53  ;;  %v16546_v52 = vld [vmem:[%s16970_s4 + $0x8] sm:$0xff] }
 0x1b6   : > { %10308 = vmatprep.subr.bf16.mxu0 %v14671_v45  ;;  %11333 = vmatprep.subr.bf16.mxu1 %v14674_v54  ;;  %v1955_v53 = vcombine.high %v16546_v52, %v16546_v52  ;;  %v14753_v45 = vld [vmem:[%s16954_s29 + $0xbc0] ss:$16 sps:$4 sm:$0xff]   ;;  %v14756_v54 = vld [vmem:[%s16954_s29 + $0xbc8] ss:$16 sps:$4 sm:$0xff]  }
 0x1b7   : > { %v14837_v52 = vld [vmem:[%s16954_s29 + $0xd80] ss:$16 sps:$4 sm:$0xff]  }
 0x1b8   : > { %10300 = vmatmul.mubr.bf16.vlgmr.msra.gmra.mrb[0].mxu0 %v17352_v33  ;;  %11325 = vmatmul.mubr.bf16.vlgmr.msra.gmra.mrb[0].mxu1 %v17352_v33 }
 0x1b9   : > { %10309 = vmatpush1.bf16.msra.mxu0 %v14669_v56  ;;  %11334 = vmatpush1.bf16.msra.mxu1 %v14672_v57  ;;  %v14761_v56 = vld [vmem:[%s16954_s29 + $0xbe4] ss:$16 sps:$4 sm:$0xff]   ;;  %v14764_v57 = vld [vmem:[%s16954_s29 + $0xbec] ss:$16 sps:$4 sm:$0xff]  }
 0x1ba   : > { %10310 = vmatprep.subr.bf16.mxu0 %v14677_v58  ;;  %11335 = vmatprep.subr.bf16.mxu1 %v14680_v59  ;;  %v17420_v58 = vrot.slane %v1955_v53, %v17025_v5  ;;  %v14759_v59 = vld [vmem:[%s16954_s29 + $0xbe0] ss:$16 sps:$4 sm:$0xff]   ;;  %v14840_v53 = vld [vmem:[%s16954_s29 + $0xd88] ss:$16 sps:$4 sm:$0xff]  }
 0x1bb   : > { %10340 = vmatprep.mubr.bf16.mxu0 %v2002_v60  ;;  %11365 = vmatprep.mubr.bf16.mxu1 %v2002_v60  ;;  %v14762_v60 = vld [vmem:[%s16954_s29 + $0xbe8] ss:$16 sps:$4 sm:$0xff]  }
 0x1bd   : > { %10311 = vmatpush1.bf16.msra.mxu0 %v14675_v41  ;;  %11336 = vmatpush1.bf16.msra.mxu1 %v14678_v61  ;;  %v14767_v41 = vld [vmem:[%s16954_s29 + $0xc04] ss:$16 sps:$4 sm:$0xff]   ;;  %v14770_v61 = vld [vmem:[%s16954_s29 + $0xc0c] ss:$16 sps:$4 sm:$0xff]  }
 0x1be   : > { %10312 = vmatprep.subr.bf16.mxu0 %v14683_v62  ;;  %11337 = vmatprep.subr.bf16.mxu1 %v14686_v0  ;;  %v1971_v62 = vcombine.high %v17420_v58, %v17420_v58  ;;  %v2000_v0 = vcombine.high %v17352_v33, %v17352_v33  ;;  %v14771_v33 = vld [vmem:[%s16954_s29 + $0xc20] ss:$16 sps:$4 sm:$0xff]  }
 0x1c1   : > { %10313 = vmatpush1.bf16.msra.mxu0 %v14681_v55  ;;  %11338 = vmatpush1.bf16.msra.mxu1 %v14684_v1  ;;  %v14765_v55 = vld [vmem:[%s16954_s29 + $0xc00] ss:$16 sps:$4 sm:$0xff]   ;;  %v14768_v1 = vld [vmem:[%s16954_s29 + $0xc08] ss:$16 sps:$4 sm:$0xff]  }
 0x1c2   : > { %10314 = vmatprep.subr.bf16.mxu0 %v14689_v2  ;;  %11339 = vmatprep.subr.bf16.mxu1 %v14692_v3  ;;  %v14773_v2 = vld [vmem:[%s16954_s29 + $0xc24] ss:$16 sps:$4 sm:$0xff]   ;;  %v14776_v3 = vld [vmem:[%s16954_s29 + $0xc2c] ss:$16 sps:$4 sm:$0xff]  }
 0x1c5   : > { %10315 = vmatpush1.bf16.msra.mxu0 %v14687_v4  ;;  %11340 = vmatpush1.bf16.msra.mxu1 %v14690_v6  ;;  %v17435_v4 = vrot.slane %v1971_v62, %v17025_v5  ;;  %v14774_v6 = vld [vmem:[%s16954_s29 + $0xc28] ss:$16 sps:$4 sm:$0xff]   ;;  %v14857_v62 = vld [vmem:[%s16954_s29 + $0xde4] ss:$16 sps:$4 sm:$0xff]  }
 0x1c6   : > { %10316 = vmatprep.subr.bf16.mxu0 %v14695_v7  ;;  %11341 = vmatprep.subr.bf16.mxu1 %v14698_v9  ;;  %v14779_v7 = vld [vmem:[%s16954_s29 + $0xc44] ss:$16 sps:$4 sm:$0xff]   ;;  %v14782_v9 = vld [vmem:[%s16954_s29 + $0xc4c] ss:$16 sps:$4 sm:$0xff]  }
 0x1c9   : > { %10317 = vmatpush1.bf16.msra.mxu0 %v14693_v10  ;;  %11342 = vmatpush1.bf16.msra.mxu1 %v14696_v11  ;;  %v14777_v10 = vld [vmem:[%s16954_s29 + $0xc40] ss:$16 sps:$4 sm:$0xff]   ;;  %v14780_v11 = vld [vmem:[%s16954_s29 + $0xc48] ss:$16 sps:$4 sm:$0xff]  }
 0x1ca   : > { %10318 = vmatprep.subr.bf16.mxu0 %v14701_v12  ;;  %11343 = vmatprep.subr.bf16.mxu1 %v14704_v13  ;;  %v14785_v12 = vld [vmem:[%s16954_s29 + $0xc64] ss:$16 sps:$4 sm:$0xff]   ;;  %v14788_v13 = vld [vmem:[%s16954_s29 + $0xc6c] ss:$16 sps:$4 sm:$0xff]  }
 0x1cd   : > { %10319 = vmatpush1.bf16.msra.mxu0 %v14699_v14  ;;  %11344 = vmatpush1.bf16.msra.mxu1 %v14702_v15  ;;  %v14783_v14 = vld [vmem:[%s16954_s29 + $0xc60] ss:$16 sps:$4 sm:$0xff]   ;;  %v14786_v15 = vld [vmem:[%s16954_s29 + $0xc68] ss:$16 sps:$4 sm:$0xff]  }
 0x1ce   : > { %10320 = vmatprep.subr.bf16.mxu0 %v14707_v16  ;;  %11345 = vmatprep.subr.bf16.mxu1 %v14710_v17  ;;  %v14791_v16 = vld [vmem:[%s16954_s29 + $0xc84] ss:$16 sps:$4 sm:$0xff]   ;;  %v14794_v17 = vld [vmem:[%s16954_s29 + $0xc8c] ss:$16 sps:$4 sm:$0xff]  }
 0x1d1   : > { %10321 = vmatpush1.bf16.msra.mxu0 %v14705_v18  ;;  %11346 = vmatpush1.bf16.msra.mxu1 %v14708_v19  ;;  %v14789_v18 = vld [vmem:[%s16954_s29 + $0xc80] ss:$16 sps:$4 sm:$0xff]   ;;  %v14792_v19 = vld [vmem:[%s16954_s29 + $0xc88] ss:$16 sps:$4 sm:$0xff]  }
 0x1d2   : > { %10322 = vmatprep.subr.bf16.mxu0 %v14713_v20  ;;  %11347 = vmatprep.subr.bf16.mxu1 %v14716_v21  ;;  %v14797_v20 = vld [vmem:[%s16954_s29 + $0xca4] ss:$16 sps:$4 sm:$0xff]   ;;  %v14800_v21 = vld [vmem:[%s16954_s29 + $0xcac] ss:$16 sps:$4 sm:$0xff]  }
 0x1d5   : > { %10323 = vmatpush1.bf16.msra.mxu0 %v14711_v22  ;;  %11348 = vmatpush1.bf16.msra.mxu1 %v14714_v23  ;;  %v14795_v22 = vld [vmem:[%s16954_s29 + $0xca0] ss:$16 sps:$4 sm:$0xff]   ;;  %v14798_v23 = vld [vmem:[%s16954_s29 + $0xca8] ss:$16 sps:$4 sm:$0xff]  }
 0x1d6   : > { %10324 = vmatprep.subr.bf16.mxu0 %v14719_v24  ;;  %11349 = vmatprep.subr.bf16.mxu1 %v14722_v25  ;;  %v14803_v24 = vld [vmem:[%s16954_s29 + $0xcc4] ss:$16 sps:$4 sm:$0xff]   ;;  %v14806_v25 = vld [vmem:[%s16954_s29 + $0xccc] ss:$16 sps:$4 sm:$0xff]  }
 0x1d9   : > { %10325 = vmatpush1.bf16.msra.mxu0 %v14717_v26  ;;  %11350 = vmatpush1.bf16.msra.mxu1 %v14720_v27  ;;  %v14801_v26 = vld [vmem:[%s16954_s29 + $0xcc0] ss:$16 sps:$4 sm:$0xff]   ;;  %v14804_v27 = vld [vmem:[%s16954_s29 + $0xcc8] ss:$16 sps:$4 sm:$0xff]  }
 0x1da   : > { %10326 = vmatprep.subr.bf16.mxu0 %v14725_v28  ;;  %11351 = vmatprep.subr.bf16.mxu1 %v14728_v29  ;;  %v14809_v28 = vld [vmem:[%s16954_s29 + $0xce4] ss:$16 sps:$4 sm:$0xff]   ;;  %v14812_v29 = vld [vmem:[%s16954_s29 + $0xcec] ss:$16 sps:$4 sm:$0xff]  }
 0x1dd   : > { %10327 = vmatpush1.bf16.msra.mxu0 %v14723_v30  ;;  %11352 = vmatpush1.bf16.msra.mxu1 %v14726_v31  ;;  %v14807_v30 = vld [vmem:[%s16954_s29 + $0xce0] ss:$16 sps:$4 sm:$0xff]   ;;  %v14810_v31 = vld [vmem:[%s16954_s29 + $0xce8] ss:$16 sps:$4 sm:$0xff]  }
 0x1de   : > { %10328 = vmatprep.subr.bf16.mxu0 %v14731_v32  ;;  %11353 = vmatprep.subr.bf16.mxu1 %v14734_v34  ;;  %v14815_v32 = vld [vmem:[%s16954_s29 + $0xd04] ss:$16 sps:$4 sm:$0xff]   ;;  %v14818_v34 = vld [vmem:[%s16954_s29 + $0xd0c] ss:$16 sps:$4 sm:$0xff]  }
 0x1e1   : > { %10329 = vmatpush1.bf16.msra.mxu0 %v14729_v36  ;;  %11354 = vmatpush1.bf16.msra.mxu1 %v14732_v8  ;;  %v14813_v36 = vld [vmem:[%s16954_s29 + $0xd00] ss:$16 sps:$4 sm:$0xff]   ;;  %v14816_v8 = vld [vmem:[%s16954_s29 + $0xd08] ss:$16 sps:$4 sm:$0xff]  }
 0x1e2   : > { %10330 = vmatprep.subr.bf16.mxu0 %v14737_v37  ;;  %11355 = vmatprep.subr.bf16.mxu1 %v14740_v38  ;;  %v14821_v37 = vld [vmem:[%s16954_s29 + $0xd24] ss:$16 sps:$4 sm:$0xff]   ;;  %v14824_v38 = vld [vmem:[%s16954_s29 + $0xd2c] ss:$16 sps:$4 sm:$0xff]  }
 0x1e5   : > { %10331 = vmatpush1.bf16.msra.mxu0 %v14735_v39  ;;  %11356 = vmatpush1.bf16.msra.mxu1 %v14738_v40  ;;  %v14819_v39 = vld [vmem:[%s16954_s29 + $0xd20] ss:$16 sps:$4 sm:$0xff]   ;;  %v14822_v40 = vld [vmem:[%s16954_s29 + $0xd28] ss:$16 sps:$4 sm:$0xff]  }
 0x1e6   : > { %10332 = vmatprep.subr.bf16.mxu0 %v14743_v42  ;;  %11357 = vmatprep.subr.bf16.mxu1 %v14746_v43  ;;  %v14827_v42 = vld [vmem:[%s16954_s29 + $0xd44] ss:$16 sps:$4 sm:$0xff]   ;;  %v14830_v43 = vld [vmem:[%s16954_s29 + $0xd4c] ss:$16 sps:$4 sm:$0xff]  }
 0x1e9   : > { %10333 = vmatpush1.bf16.msra.mxu0 %v14741_v44  ;;  %11358 = vmatpush1.bf16.msra.mxu1 %v14744_v46  ;;  %v14825_v44 = vld [vmem:[%s16954_s29 + $0xd40] ss:$16 sps:$4 sm:$0xff]   ;;  %v14828_v46 = vld [vmem:[%s16954_s29 + $0xd48] ss:$16 sps:$4 sm:$0xff]  }
 0x1ea   : > { %10334 = vmatprep.subr.bf16.mxu0 %v14749_v47  ;;  %11359 = vmatprep.subr.bf16.mxu1 %v14752_v48  ;;  %v14833_v47 = vld [vmem:[%s16954_s29 + $0xd64] ss:$16 sps:$4 sm:$0xff]   ;;  %v14836_v48 = vld [vmem:[%s16954_s29 + $0xd6c] ss:$16 sps:$4 sm:$0xff]  }
 0x1ed   : > { %10335 = vmatpush1.bf16.msra.mxu0 %v14747_v49  ;;  %11360 = vmatpush1.bf16.msra.mxu1 %v14750_v50  ;;  %v14831_v49 = vld [vmem:[%s16954_s29 + $0xd60] ss:$16 sps:$4 sm:$0xff]   ;;  %v14834_v50 = vld [vmem:[%s16954_s29 + $0xd68] ss:$16 sps:$4 sm:$0xff]  }
 0x1ee   : > { %10336 = vmatprep.subr.bf16.mxu0 %v14755_v35  ;;  %11361 = vmatprep.subr.bf16.mxu1 %v14758_v51  ;;  %v14839_v35 = vld [vmem:[%s16954_s29 + $0xd84] ss:$16 sps:$4 sm:$0xff]   ;;  %v14842_v51 = vld [vmem:[%s16954_s29 + $0xd8c] ss:$16 sps:$4 sm:$0xff]  }
 0x1f1   : > { %10337 = vmatpush1.bf16.msra.mxu0 %v14753_v45  ;;  %11362 = vmatpush1.bf16.msra.mxu1 %v14756_v54  ;;  %v14845_v45 = vld [vmem:[%s16954_s29 + $0xda4] ss:$16 sps:$4 sm:$0xff]   ;;  %v14848_v54 = vld [vmem:[%s16954_s29 + $0xdac] ss:$16 sps:$4 sm:$0xff]  }
 0x1f2   : > { %10338 = vmatprep.subr.bf16.mxu0 %v14761_v56  ;;  %11363 = vmatprep.subr.bf16.mxu1 %v14764_v57  ;;  %v14843_v56 = vld [vmem:[%s16954_s29 + $0xda0] ss:$16 sps:$4 sm:$0xff]   ;;  %v14846_v57 = vld [vmem:[%s16954_s29 + $0xda8] ss:$16 sps:$4 sm:$0xff]  }
 0x1f5   : > { %10339 = vmatpush1.bf16.msra.mxu0 %v14759_v59  ;;  %11364 = vmatpush1.bf16.msra.mxu1 %v14762_v60  ;;  %v14851_v59 = vld [vmem:[%s16954_s29 + $0xdc4] ss:$16 sps:$4 sm:$0xff]   ;;  %v14854_v60 = vld [vmem:[%s16954_s29 + $0xdcc] ss:$16 sps:$4 sm:$0xff]  }
 0x1f6   : > { %10349 = vmatprep.subr.bf16.mxu0 %v14767_v41  ;;  %11374 = vmatprep.subr.bf16.mxu1 %v14770_v61  ;;  %v14849_v41 = vld [vmem:[%s16954_s29 + $0xdc0] ss:$16 sps:$4 sm:$0xff]   ;;  %v14852_v61 = vld [vmem:[%s16954_s29 + $0xdc8] ss:$16 sps:$4 sm:$0xff]  }
 0x1f8   : > { %10341 = vmatmul.mubr.bf16.vlgmr.msra.gmra.mrb[0].mxu0 %v2000_v0  ;;  %11366 = vmatmul.mubr.bf16.vlgmr.msra.gmra.mrb[0].mxu1 %v2000_v0  ;;  %v14860_v0 = vld [vmem:[%s16954_s29 + $0xdec] ss:$16 sps:$4 sm:$0xff]  }
 0x1f9   : > { %10350 = vmatpush1.bf16.msra.mxu0 %v14765_v55  ;;  %11375 = vmatpush1.bf16.msra.mxu1 %v14768_v1  ;;  %v14855_v55 = vld [vmem:[%s16954_s29 + $0xde0] ss:$16 sps:$4 sm:$0xff]   ;;  %v14858_v1 = vld [vmem:[%s16954_s29 + $0xde8] ss:$16 sps:$4 sm:$0xff]  }
 0x1fa   : > { %10351 = vmatprep.subr.bf16.mxu0 %v14773_v2  ;;  %11376 = vmatprep.subr.bf16.mxu1 %v14776_v3  ;;  %v14864_v2 = vld [vmem:[%s16954_s29 + $0xe04] ss:$16 sps:$4 sm:$0xff]   ;;  %v14867_v3 = vld [vmem:[%s16954_s29 + $0xe0c] ss:$16 sps:$4 sm:$0xff]  }
 0x1fb   : > { %10381 = vmatprep.mubr.bf16.mxu0 %v17435_v4  ;;  %11406 = vmatprep.mubr.bf16.mxu1 %v17435_v4 }
 0x1fd   : > { %10352 = vmatpush1.bf16.msra.mxu0 %v14771_v33  ;;  %11377 = vmatpush1.bf16.msra.mxu1 %v14774_v6  ;;  %v17501_v33 = vrot.slane %v17420_v58, %v17025_v5  ;;  %v14862_v6 = vld [vmem:[%s16954_s29 + $0xe00] ss:$16 sps:$4 sm:$0xff]  }
 0x1fe   : > { %10353 = vmatprep.subr.bf16.mxu0 %v14779_v7  ;;  %11378 = vmatprep.subr.bf16.mxu1 %v14782_v9  ;;  %v14865_v7 = vld [vmem:[%s16954_s29 + $0xe08] ss:$16 sps:$4 sm:$0xff]   ;;  %v14870_v9 = vld [vmem:[%s16954_s29 + $0xe24] ss:$16 sps:$4 sm:$0xff]   ;;  %v14868_v58 = vld [vmem:[%s16954_s29 + $0xe20] ss:$16 sps:$4 sm:$0xff]  }
 0x201   : > { %10354 = vmatpush1.bf16.msra.mxu0 %v14777_v10  ;;  %11379 = vmatpush1.bf16.msra.mxu1 %v14780_v11  ;;  %v14873_v10 = vld [vmem:[%s16954_s29 + $0xe2c] ss:$16 sps:$4 sm:$0xff]   ;;  %v2003_v11 = vcombine.high %v17435_v4, %v17435_v4  ;;  %v14874_v4 = vld [vmem:[%s16954_s29 + $0xe40] ss:$16 sps:$4 sm:$0xff]  }
 0x202   : > { %10355 = vmatprep.subr.bf16.mxu0 %v14785_v12  ;;  %11380 = vmatprep.subr.bf16.mxu1 %v14788_v13  ;;  %v14871_v12 = vld [vmem:[%s16954_s29 + $0xe28] ss:$16 sps:$4 sm:$0xff]   ;;  %v14876_v13 = vld [vmem:[%s16954_s29 + $0xe44] ss:$16 sps:$4 sm:$0xff]  }
 0x205   : > { %10356 = vmatpush1.bf16.msra.mxu0 %v14783_v14  ;;  %11381 = vmatpush1.bf16.msra.mxu1 %v14786_v15  ;;  %v14879_v14 = vld [vmem:[%s16954_s29 + $0xe4c] ss:$16 sps:$4 sm:$0xff]   ;;  %v14877_v15 = vld [vmem:[%s16954_s29 + $0xe48] ss:$16 sps:$4 sm:$0xff]  }
 0x206   : > { %10357 = vmatprep.subr.bf16.mxu0 %v14791_v16  ;;  %11382 = vmatprep.subr.bf16.mxu1 %v14794_v17  ;;  %v14882_v16 = vld [vmem:[%s16954_s29 + $0xe64] ss:$16 sps:$4 sm:$0xff]   ;;  %v14885_v17 = vld [vmem:[%s16954_s29 + $0xe6c] ss:$16 sps:$4 sm:$0xff]  }
 0x209   : > { %10358 = vmatpush1.bf16.msra.mxu0 %v14789_v18  ;;  %11383 = vmatpush1.bf16.msra.mxu1 %v14792_v19  ;;  %v14880_v18 = vld [vmem:[%s16954_s29 + $0xe60] ss:$16 sps:$4 sm:$0xff]   ;;  %v14883_v19 = vld [vmem:[%s16954_s29 + $0xe68] ss:$16 sps:$4 sm:$0xff]  }
 0x20a   : > { %10359 = vmatprep.subr.bf16.mxu0 %v14797_v20  ;;  %11384 = vmatprep.subr.bf16.mxu1 %v14800_v21  ;;  %v14888_v20 = vld [vmem:[%s16954_s29 + $0xe84] ss:$16 sps:$4 sm:$0xff]   ;;  %v14891_v21 = vld [vmem:[%s16954_s29 + $0xe8c] ss:$16 sps:$4 sm:$0xff]  }
 0x20d   : > { %10360 = vmatpush1.bf16.msra.mxu0 %v14795_v22  ;;  %11385 = vmatpush1.bf16.msra.mxu1 %v14798_v23  ;;  %v14886_v22 = vld [vmem:[%s16954_s29 + $0xe80] ss:$16 sps:$4 sm:$0xff]   ;;  %v14889_v23 = vld [vmem:[%s16954_s29 + $0xe88] ss:$16 sps:$4 sm:$0xff]  }
 0x20e   : > { %10361 = vmatprep.subr.bf16.mxu0 %v14803_v24  ;;  %11386 = vmatprep.subr.bf16.mxu1 %v14806_v25  ;;  %v14894_v24 = vld [vmem:[%s16954_s29 + $0xea4] ss:$16 sps:$4 sm:$0xff]   ;;  %v14897_v25 = vld [vmem:[%s16954_s29 + $0xeac] ss:$16 sps:$4 sm:$0xff]  }
 0x211   : > { %10362 = vmatpush1.bf16.msra.mxu0 %v14801_v26  ;;  %11387 = vmatpush1.bf16.msra.mxu1 %v14804_v27  ;;  %v14892_v26 = vld [vmem:[%s16954_s29 + $0xea0] ss:$16 sps:$4 sm:$0xff]   ;;  %v14895_v27 = vld [vmem:[%s16954_s29 + $0xea8] ss:$16 sps:$4 sm:$0xff]  }
 0x212   : > { %10363 = vmatprep.subr.bf16.mxu0 %v14809_v28  ;;  %11388 = vmatprep.subr.bf16.mxu1 %v14812_v29  ;;  %v14900_v28 = vld [vmem:[%s16954_s29 + $0xec4] ss:$16 sps:$4 sm:$0xff]   ;;  %v14903_v29 = vld [vmem:[%s16954_s29 + $0xecc] ss:$16 sps:$4 sm:$0xff]  }
 0x215   : > { %10364 = vmatpush1.bf16.msra.mxu0 %v14807_v30  ;;  %11389 = vmatpush1.bf16.msra.mxu1 %v14810_v31  ;;  %v14898_v30 = vld [vmem:[%s16954_s29 + $0xec0] ss:$16 sps:$4 sm:$0xff]   ;;  %v14901_v31 = vld [vmem:[%s16954_s29 + $0xec8] ss:$16 sps:$4 sm:$0xff]  }
 0x216   : > { %10365 = vmatprep.subr.bf16.mxu0 %v14815_v32  ;;  %11390 = vmatprep.subr.bf16.mxu1 %v14818_v34  ;;  %v14906_v32 = vld [vmem:[%s16954_s29 + $0xee4] ss:$16 sps:$4 sm:$0xff]   ;;  %v14909_v34 = vld [vmem:[%s16954_s29 + $0xeec] ss:$16 sps:$4 sm:$0xff]  }
 0x219   : > { %10366 = vmatpush1.bf16.msra.mxu0 %v14813_v36  ;;  %11391 = vmatpush1.bf16.msra.mxu1 %v14816_v8  ;;  %v14904_v36 = vld [vmem:[%s16954_s29 + $0xee0] ss:$16 sps:$4 sm:$0xff]   ;;  %v14907_v8 = vld [vmem:[%s16954_s29 + $0xee8] ss:$16 sps:$4 sm:$0xff]  }
 0x21a   : > { %10367 = vmatprep.subr.bf16.mxu0 %v14821_v37  ;;  %11392 = vmatprep.subr.bf16.mxu1 %v14824_v38  ;;  %v14912_v37 = vld [vmem:[%s16954_s29 + $0xf04] ss:$16 sps:$4 sm:$0xff]   ;;  %v14915_v38 = vld [vmem:[%s16954_s29 + $0xf0c] ss:$16 sps:$4 sm:$0xff]  }
 0x21d   : > { %10368 = vmatpush1.bf16.msra.mxu0 %v14819_v39  ;;  %11393 = vmatpush1.bf16.msra.mxu1 %v14822_v40  ;;  %v14910_v39 = vld [vmem:[%s16954_s29 + $0xf00] ss:$16 sps:$4 sm:$0xff]   ;;  %v14913_v40 = vld [vmem:[%s16954_s29 + $0xf08] ss:$16 sps:$4 sm:$0xff]  }
 0x21e   : > { %10369 = vmatprep.subr.bf16.mxu0 %v14827_v42  ;;  %11394 = vmatprep.subr.bf16.mxu1 %v14830_v43  ;;  %v14918_v42 = vld [vmem:[%s16954_s29 + $0xf24] ss:$16 sps:$4 sm:$0xff]   ;;  %v14921_v43 = vld [vmem:[%s16954_s29 + $0xf2c] ss:$16 sps:$4 sm:$0xff]  }
 0x221   : > { %10370 = vmatpush1.bf16.msra.mxu0 %v14825_v44  ;;  %11395 = vmatpush1.bf16.msra.mxu1 %v14828_v46  ;;  %v14916_v44 = vld [vmem:[%s16954_s29 + $0xf20] ss:$16 sps:$4 sm:$0xff]   ;;  %v14919_v46 = vld [vmem:[%s16954_s29 + $0xf28] ss:$16 sps:$4 sm:$0xff]  }
 0x222   : > { %10371 = vmatprep.subr.bf16.mxu0 %v14833_v47  ;;  %11396 = vmatprep.subr.bf16.mxu1 %v14836_v48  ;;  %v14924_v47 = vld [vmem:[%s16954_s29 + $0xf44] ss:$16 sps:$4 sm:$0xff]   ;;  %v14927_v48 = vld [vmem:[%s16954_s29 + $0xf4c] ss:$16 sps:$4 sm:$0xff]  }
 0x225   : > { %10372 = vmatpush1.bf16.msra.mxu0 %v14831_v49  ;;  %11397 = vmatpush1.bf16.msra.mxu1 %v14834_v50  ;;  %v14922_v49 = vld [vmem:[%s16954_s29 + $0xf40] ss:$16 sps:$4 sm:$0xff]   ;;  %v14925_v50 = vld [vmem:[%s16954_s29 + $0xf48] ss:$16 sps:$4 sm:$0xff]  }
 0x226   : > { %10373 = vmatprep.subr.bf16.mxu0 %v14839_v35  ;;  %11398 = vmatprep.subr.bf16.mxu1 %v14842_v51  ;;  %v14930_v35 = vld [vmem:[%s16954_s29 + $0xf64] ss:$16 sps:$4 sm:$0xff]   ;;  %v14933_v51 = vld [vmem:[%s16954_s29 + $0xf6c] ss:$16 sps:$4 sm:$0xff]  }
 0x229   : > { %10374 = vmatpush1.bf16.msra.mxu0 %v14837_v52  ;;  %11399 = vmatpush1.bf16.msra.mxu1 %v14840_v53  ;;  %v14928_v52 = vld [vmem:[%s16954_s29 + $0xf60] ss:$16 sps:$4 sm:$0xff]   ;;  %v14931_v53 = vld [vmem:[%s16954_s29 + $0xf68] ss:$16 sps:$4 sm:$0xff]  }
 0x22a   : > { %10375 = vmatprep.subr.bf16.mxu0 %v14845_v45  ;;  %11400 = vmatprep.subr.bf16.mxu1 %v14848_v54  ;;  %v14936_v45 = vld [vmem:[%s16954_s29 + $0xf84] ss:$16 sps:$4 sm:$0xff]   ;;  %v14939_v54 = vld [vmem:[%s16954_s29 + $0xf8c] ss:$16 sps:$4 sm:$0xff]  }
 0x22d   : > { %10376 = vmatpush1.bf16.msra.mxu0 %v14843_v56  ;;  %11401 = vmatpush1.bf16.msra.mxu1 %v14846_v57  ;;  %v14934_v56 = vld [vmem:[%s16954_s29 + $0xf80] ss:$16 sps:$4 sm:$0xff]   ;;  %v14937_v57 = vld [vmem:[%s16954_s29 + $0xf88] ss:$16 sps:$4 sm:$0xff]  }
 0x22e   : > { %10377 = vmatprep.subr.bf16.mxu0 %v14851_v59  ;;  %11402 = vmatprep.subr.bf16.mxu1 %v14854_v60  ;;  %v14942_v59 = vld [vmem:[%s16954_s29 + $0xfa4] ss:$16 sps:$4 sm:$0xff]   ;;  %v14945_v60 = vld [vmem:[%s16954_s29 + $0xfac] ss:$16 sps:$4 sm:$0xff]  }
 0x231   : > { %10378 = vmatpush1.bf16.msra.mxu0 %v14849_v41  ;;  %11403 = vmatpush1.bf16.msra.mxu1 %v14852_v61  ;;  %v14940_v41 = vld [vmem:[%s16954_s29 + $0xfa0] ss:$16 sps:$4 sm:$0xff]   ;;  %v14943_v61 = vld [vmem:[%s16954_s29 + $0xfa8] ss:$16 sps:$4 sm:$0xff]  }
 0x232   : > { %10379 = vmatprep.subr.bf16.mxu0 %v14857_v62  ;;  %11404 = vmatprep.subr.bf16.mxu1 %v14860_v0  ;;  %v14948_v62 = vld [vmem:[%s16954_s29 + $0xfc4] ss:$16 sps:$4 sm:$0xff]   ;;  %v14951_v0 = vld [vmem:[%s16954_s29 + $0xfcc] ss:$16 sps:$4 sm:$0xff]  }
 0x235   : > { %10380 = vmatpush1.bf16.msra.mxu0 %v14855_v55  ;;  %11405 = vmatpush1.bf16.msra.mxu1 %v14858_v1  ;;  %v17564_v55 = vld.sshfl [vmem:[%s16970_s4 + $0x10] sm:$0xff pattern:$0x75316420]  ;;  %v14946_v1 = vld [vmem:[%s16954_s29 + $0xfc0] ss:$16 sps:$4 sm:$0xff]  }
 0x236   : > { %10390 = vmatprep.subr.bf16.mxu0 %v14864_v2  ;;  %11415 = vmatprep.subr.bf16.mxu1 %v14867_v3  ;;  %v14949_v2 = vld [vmem:[%s16954_s29 + $0xfc8] ss:$16 sps:$4 sm:$0xff]   ;;  %v14954_v3 = vld [vmem:[%s16954_s29 + $0xfe4] ss:$16 sps:$4 sm:$0xff]  }
 0x238   : > { %10382 = vmatmul.mubr.bf16.vlgmr.msra.gmra.mrb[0].mxu0 %v17501_v33  ;;  %11407 = vmatmul.mubr.bf16.vlgmr.msra.gmra.mrb[0].mxu1 %v17501_v33 }
 0x239   : > { %10391 = vmatpush1.bf16.msra.mxu0 %v14862_v6  ;;  %11416 = vmatpush1.bf16.msra.mxu1 %v14865_v7  ;;  %v14957_v6 = vld [vmem:[%s16954_s29 + $0xfec] ss:$16 sps:$4 sm:$0xff]   ;;  %v14952_v7 = vld [vmem:[%s16954_s29 + $0xfe0] ss:$16 sps:$4 sm:$0xff]  }
 0x23a   : > { %10392 = vmatprep.subr.bf16.mxu0 %v14870_v9  ;;  %11417 = vmatprep.subr.bf16.mxu1 %v14873_v10  ;;  %v14955_v9 = vld [vmem:[%s16954_s29 + $0xfe8] ss:$16 sps:$4 sm:$0xff]   ;;  %v14960_v10 = vld [vmem:[%s16954_s29 + $0x1004] ss:$16 sps:$4 sm:$0xff]  }
 0x23b   : > { %10422 = vmatprep.mubr.bf16.mxu0 %v2003_v11  ;;  %11447 = vmatprep.mubr.bf16.mxu1 %v2003_v11  ;;  %v14963_v11 = vld [vmem:[%s16954_s29 + $0x100c] ss:$16 sps:$4 sm:$0xff]  }
 0x23d   : > { %10393 = vmatpush1.bf16.msra.mxu0 %v14868_v58  ;;  %11418 = vmatpush1.bf16.msra.mxu1 %v14871_v12  ;;  %v2019_v58 = vcombine.high %v17564_v55, %v17564_v55  ;;  %v2001_v12 = vcombine.high %v17501_v33, %v17501_v33  ;;  %v14964_v33 = vld [vmem:[%s16954_s29 + $0x1020] ss:$16 sps:$4 sm:$0xff]  }
 0x23e   : > { %10394 = vmatprep.subr.bf16.mxu0 %v14876_v13  ;;  %11419 = vmatprep.subr.bf16.mxu1 %v14879_v14  ;;  %v14958_v13 = vld [vmem:[%s16954_s29 + $0x1000] ss:$16 sps:$4 sm:$0xff]   ;;  %v14961_v14 = vld [vmem:[%s16954_s29 + $0x1008] ss:$16 sps:$4 sm:$0xff]  }
 0x241   : > { %10395 = vmatpush1.bf16.msra.mxu0 %v14874_v4  ;;  %11420 = vmatpush1.bf16.msra.mxu1 %v14877_v15  ;;  %v14966_v4 = vld [vmem:[%s16954_s29 + $0x1024] ss:$16 sps:$4 sm:$0xff]   ;;  %v14969_v15 = vld [vmem:[%s16954_s29 + $0x102c] ss:$16 sps:$4 sm:$0xff]  }
 0x242   : > { %10396 = vmatprep.subr.bf16.mxu0 %v14882_v16  ;;  %11421 = vmatprep.subr.bf16.mxu1 %v14885_v17  ;;  %v17583_v16 = vrot.slane %v2019_v58, %v17025_v5  ;;  %v14967_v17 = vld [vmem:[%s16954_s29 + $0x1028] ss:$16 sps:$4 sm:$0xff]   ;;  %v15050_v58 = vld [vmem:[%s16954_s29 + $0x11e4] ss:$16 sps:$4 sm:$0xff]  }
 0x245   : > { %10397 = vmatpush1.bf16.msra.mxu0 %v14880_v18  ;;  %11422 = vmatpush1.bf16.msra.mxu1 %v14883_v19  ;;  %v14972_v18 = vld [vmem:[%s16954_s29 + $0x1044] ss:$16 sps:$4 sm:$0xff]   ;;  %v14975_v19 = vld [vmem:[%s16954_s29 + $0x104c] ss:$16 sps:$4 sm:$0xff]  }
 0x246   : > { %10398 = vmatprep.subr.bf16.mxu0 %v14888_v20  ;;  %11423 = vmatprep.subr.bf16.mxu1 %v14891_v21  ;;  %v14970_v20 = vld [vmem:[%s16954_s29 + $0x1040] ss:$16 sps:$4 sm:$0xff]   ;;  %v14973_v21 = vld [vmem:[%s16954_s29 + $0x1048] ss:$16 sps:$4 sm:$0xff]  }
 0x249   : > { %10399 = vmatpush1.bf16.msra.mxu0 %v14886_v22  ;;  %11424 = vmatpush1.bf16.msra.mxu1 %v14889_v23  ;;  %v14978_v22 = vld [vmem:[%s16954_s29 + $0x1064] ss:$16 sps:$4 sm:$0xff]   ;;  %v14981_v23 = vld [vmem:[%s16954_s29 + $0x106c] ss:$16 sps:$4 sm:$0xff]  }
 0x24a   : > { %10400 = vmatprep.subr.bf16.mxu0 %v14894_v24  ;;  %11425 = vmatprep.subr.bf16.mxu1 %v14897_v25  ;;  %v14976_v24 = vld [vmem:[%s16954_s29 + $0x1060] ss:$16 sps:$4 sm:$0xff]   ;;  %v14979_v25 = vld [vmem:[%s16954_s29 + $0x1068] ss:$16 sps:$4 sm:$0xff]  }
 0x24d   : > { %10401 = vmatpush1.bf16.msra.mxu0 %v14892_v26  ;;  %11426 = vmatpush1.bf16.msra.mxu1 %v14895_v27  ;;  %v14984_v26 = vld [vmem:[%s16954_s29 + $0x1084] ss:$16 sps:$4 sm:$0xff]   ;;  %v14987_v27 = vld [vmem:[%s16954_s29 + $0x108c] ss:$16 sps:$4 sm:$0xff]  }
 0x24e   : > { %10402 = vmatprep.subr.bf16.mxu0 %v14900_v28  ;;  %11427 = vmatprep.subr.bf16.mxu1 %v14903_v29  ;;  %v14982_v28 = vld [vmem:[%s16954_s29 + $0x1080] ss:$16 sps:$4 sm:$0xff]   ;;  %v14985_v29 = vld [vmem:[%s16954_s29 + $0x1088] ss:$16 sps:$4 sm:$0xff]  }
 0x251   : > { %10403 = vmatpush1.bf16.msra.mxu0 %v14898_v30  ;;  %11428 = vmatpush1.bf16.msra.mxu1 %v14901_v31  ;;  %v14990_v30 = vld [vmem:[%s16954_s29 + $0x10a4] ss:$16 sps:$4 sm:$0xff]   ;;  %v14993_v31 = vld [vmem:[%s16954_s29 + $0x10ac] ss:$16 sps:$4 sm:$0xff]  }
 0x252   : > { %10404 = vmatprep.subr.bf16.mxu0 %v14906_v32  ;;  %11429 = vmatprep.subr.bf16.mxu1 %v14909_v34  ;;  %v14988_v32 = vld [vmem:[%s16954_s29 + $0x10a0] ss:$16 sps:$4 sm:$0xff]   ;;  %v14991_v34 = vld [vmem:[%s16954_s29 + $0x10a8] ss:$16 sps:$4 sm:$0xff]  }
 0x255   : > { %10405 = vmatpush1.bf16.msra.mxu0 %v14904_v36  ;;  %11430 = vmatpush1.bf16.msra.mxu1 %v14907_v8  ;;  %v14996_v36 = vld [vmem:[%s16954_s29 + $0x10c4] ss:$16 sps:$4 sm:$0xff]   ;;  %v14999_v8 = vld [vmem:[%s16954_s29 + $0x10cc] ss:$16 sps:$4 sm:$0xff]  }
 0x256   : > { %10406 = vmatprep.subr.bf16.mxu0 %v14912_v37  ;;  %11431 = vmatprep.subr.bf16.mxu1 %v14915_v38  ;;  %v14994_v37 = vld [vmem:[%s16954_s29 + $0x10c0] ss:$16 sps:$4 sm:$0xff]   ;;  %v14997_v38 = vld [vmem:[%s16954_s29 + $0x10c8] ss:$16 sps:$4 sm:$0xff]  }
 0x259   : > { %10407 = vmatpush1.bf16.msra.mxu0 %v14910_v39  ;;  %11432 = vmatpush1.bf16.msra.mxu1 %v14913_v40  ;;  %v15002_v39 = vld [vmem:[%s16954_s29 + $0x10e4] ss:$16 sps:$4 sm:$0xff]   ;;  %v15005_v40 = vld [vmem:[%s16954_s29 + $0x10ec] ss:$16 sps:$4 sm:$0xff]  }
 0x25a   : > { %10408 = vmatprep.subr.bf16.mxu0 %v14918_v42  ;;  %11433 = vmatprep.subr.bf16.mxu1 %v14921_v43  ;;  %v15000_v42 = vld [vmem:[%s16954_s29 + $0x10e0] ss:$16 sps:$4 sm:$0xff]   ;;  %v15003_v43 = vld [vmem:[%s16954_s29 + $0x10e8] ss:$16 sps:$4 sm:$0xff]  }
 0x25d   : > { %10409 = vmatpush1.bf16.msra.mxu0 %v14916_v44  ;;  %11434 = vmatpush1.bf16.msra.mxu1 %v14919_v46  ;;  %v15008_v44 = vld [vmem:[%s16954_s29 + $0x1104] ss:$16 sps:$4 sm:$0xff]   ;;  %v15011_v46 = vld [vmem:[%s16954_s29 + $0x110c] ss:$16 sps:$4 sm:$0xff]  }
 0x25e   : > { %10410 = vmatprep.subr.bf16.mxu0 %v14924_v47  ;;  %11435 = vmatprep.subr.bf16.mxu1 %v14927_v48  ;;  %v15006_v47 = vld [vmem:[%s16954_s29 + $0x1100] ss:$16 sps:$4 sm:$0xff]   ;;  %v15009_v48 = vld [vmem:[%s16954_s29 + $0x1108] ss:$16 sps:$4 sm:$0xff]  }
 0x261   : > { %10411 = vmatpush1.bf16.msra.mxu0 %v14922_v49  ;;  %11436 = vmatpush1.bf16.msra.mxu1 %v14925_v50  ;;  %v15014_v49 = vld [vmem:[%s16954_s29 + $0x1124] ss:$16 sps:$4 sm:$0xff]   ;;  %v15017_v50 = vld [vmem:[%s16954_s29 + $0x112c] ss:$16 sps:$4 sm:$0xff]  }
 0x262   : > { %10412 = vmatprep.subr.bf16.mxu0 %v14930_v35  ;;  %11437 = vmatprep.subr.bf16.mxu1 %v14933_v51  ;;  %v15012_v35 = vld [vmem:[%s16954_s29 + $0x1120] ss:$16 sps:$4 sm:$0xff]   ;;  %v15015_v51 = vld [vmem:[%s16954_s29 + $0x1128] ss:$16 sps:$4 sm:$0xff]  }
 0x265   : > { %10413 = vmatpush1.bf16.msra.mxu0 %v14928_v52  ;;  %11438 = vmatpush1.bf16.msra.mxu1 %v14931_v53  ;;  %v15020_v52 = vld [vmem:[%s16954_s29 + $0x1144] ss:$16 sps:$4 sm:$0xff]   ;;  %v15023_v53 = vld [vmem:[%s16954_s29 + $0x114c] ss:$16 sps:$4 sm:$0xff]  }
 0x266   : > { %10414 = vmatprep.subr.bf16.mxu0 %v14936_v45  ;;  %11439 = vmatprep.subr.bf16.mxu1 %v14939_v54  ;;  %v15018_v45 = vld [vmem:[%s16954_s29 + $0x1140] ss:$16 sps:$4 sm:$0xff]   ;;  %v15021_v54 = vld [vmem:[%s16954_s29 + $0x1148] ss:$16 sps:$4 sm:$0xff]  }
 0x269   : > { %10415 = vmatpush1.bf16.msra.mxu0 %v14934_v56  ;;  %11440 = vmatpush1.bf16.msra.mxu1 %v14937_v57  ;;  %v15026_v56 = vld [vmem:[%s16954_s29 + $0x1164] ss:$16 sps:$4 sm:$0xff]   ;;  %v15029_v57 = vld [vmem:[%s16954_s29 + $0x116c] ss:$16 sps:$4 sm:$0xff]  }
 0x26a   : > { %10416 = vmatprep.subr.bf16.mxu0 %v14942_v59  ;;  %11441 = vmatprep.subr.bf16.mxu1 %v14945_v60  ;;  %v15024_v59 = vld [vmem:[%s16954_s29 + $0x1160] ss:$16 sps:$4 sm:$0xff]   ;;  %v15027_v60 = vld [vmem:[%s16954_s29 + $0x1168] ss:$16 sps:$4 sm:$0xff]  }
 0x26d   : > { %10417 = vmatpush1.bf16.msra.mxu0 %v14940_v41  ;;  %11442 = vmatpush1.bf16.msra.mxu1 %v14943_v61  ;;  %v15032_v41 = vld [vmem:[%s16954_s29 + $0x1184] ss:$16 sps:$4 sm:$0xff]   ;;  %v15035_v61 = vld [vmem:[%s16954_s29 + $0x118c] ss:$16 sps:$4 sm:$0xff]  }
 0x26e   : > { %10418 = vmatprep.subr.bf16.mxu0 %v14948_v62  ;;  %11443 = vmatprep.subr.bf16.mxu1 %v14951_v0  ;;  %v15030_v62 = vld [vmem:[%s16954_s29 + $0x1180] ss:$16 sps:$4 sm:$0xff]   ;;  %v15033_v0 = vld [vmem:[%s16954_s29 + $0x1188] ss:$16 sps:$4 sm:$0xff]  }
 0x271   : > { %10419 = vmatpush1.bf16.msra.mxu0 %v14946_v1  ;;  %11444 = vmatpush1.bf16.msra.mxu1 %v14949_v2  ;;  %v15038_v1 = vld [vmem:[%s16954_s29 + $0x11a4] ss:$16 sps:$4 sm:$0xff]   ;;  %v15041_v2 = vld [vmem:[%s16954_s29 + $0x11ac] ss:$16 sps:$4 sm:$0xff]  }
 0x272   : > { %10420 = vmatprep.subr.bf16.mxu0 %v14954_v3  ;;  %11445 = vmatprep.subr.bf16.mxu1 %v14957_v6  ;;  %v15036_v3 = vld [vmem:[%s16954_s29 + $0x11a0] ss:$16 sps:$4 sm:$0xff]   ;;  %v15039_v6 = vld [vmem:[%s16954_s29 + $0x11a8] ss:$16 sps:$4 sm:$0xff]  }
 0x275   : > { %10421 = vmatpush1.bf16.msra.mxu0 %v14952_v7  ;;  %11446 = vmatpush1.bf16.msra.mxu1 %v14955_v9  ;;  %v15044_v7 = vld [vmem:[%s16954_s29 + $0x11c4] ss:$16 sps:$4 sm:$0xff]   ;;  %v15047_v9 = vld [vmem:[%s16954_s29 + $0x11cc] ss:$16 sps:$4 sm:$0xff]  }
 0x276   : > { %10431 = vmatprep.subr.bf16.mxu0 %v14960_v10  ;;  %11456 = vmatprep.subr.bf16.mxu1 %v14963_v11  ;;  %v15042_v10 = vld [vmem:[%s16954_s29 + $0x11c0] ss:$16 sps:$4 sm:$0xff]   ;;  %v15045_v11 = vld [vmem:[%s16954_s29 + $0x11c8] ss:$16 sps:$4 sm:$0xff]  }
 0x278   : > { %10423 = vmatmul.mubr.bf16.vlgmr.msra.gmra.mrb[0].mxu0 %v2001_v12  ;;  %11448 = vmatmul.mubr.bf16.vlgmr.msra.gmra.mrb[0].mxu1 %v2001_v12  ;;  %v15053_v12 = vld [vmem:[%s16954_s29 + $0x11ec] ss:$16 sps:$4 sm:$0xff]  }
 0x279   : > { %10432 = vmatpush1.bf16.msra.mxu0 %v14958_v13  ;;  %11457 = vmatpush1.bf16.msra.mxu1 %v14961_v14  ;;  %v15048_v13 = vld [vmem:[%s16954_s29 + $0x11e0] ss:$16 sps:$4 sm:$0xff]   ;;  %v15051_v14 = vld [vmem:[%s16954_s29 + $0x11e8] ss:$16 sps:$4 sm:$0xff]  }
 0x27a   : > { %10433 = vmatprep.subr.bf16.mxu0 %v14966_v4  ;;  %11458 = vmatprep.subr.bf16.mxu1 %v14969_v15  ;;  %v15056_v4 = vld [vmem:[%s16954_s29 + $0x1204] ss:$16 sps:$4 sm:$0xff]   ;;  %v15059_v15 = vld [vmem:[%s16954_s29 + $0x120c] ss:$16 sps:$4 sm:$0xff]  }
 0x27b   : > { %10463 = vmatprep.mubr.bf16.mxu0 %v17583_v16  ;;  %11488 = vmatprep.mubr.bf16.mxu1 %v17583_v16 }
 0x27d   : > { %10434 = vmatpush1.bf16.msra.mxu0 %v14964_v33  ;;  %11459 = vmatpush1.bf16.msra.mxu1 %v14967_v17  ;;  %v17649_v33 = vrot.slane %v17564_v55, %v17025_v5  ;;  %v15054_v17 = vld [vmem:[%s16954_s29 + $0x1200] ss:$16 sps:$4 sm:$0xff]  }
 0x27e   : > { %10435 = vmatprep.subr.bf16.mxu0 %v14972_v18  ;;  %11460 = vmatprep.subr.bf16.mxu1 %v14975_v19  ;;  %v15057_v18 = vld [vmem:[%s16954_s29 + $0x1208] ss:$16 sps:$4 sm:$0xff]   ;;  %v15062_v19 = vld [vmem:[%s16954_s29 + $0x1224] ss:$16 sps:$4 sm:$0xff]   ;;  %v15060_v55 = vld [vmem:[%s16954_s29 + $0x1220] ss:$16 sps:$4 sm:$0xff]  }
 0x281   : > { %10436 = vmatpush1.bf16.msra.mxu0 %v14970_v20  ;;  %11461 = vmatpush1.bf16.msra.mxu1 %v14973_v21  ;;  %v15065_v20 = vld [vmem:[%s16954_s29 + $0x122c] ss:$16 sps:$4 sm:$0xff]   ;;  %v2051_v21 = vcombine.high %v17583_v16, %v17583_v16  ;;  %v15066_v16 = vld [vmem:[%s16954_s29 + $0x1240] ss:$16 sps:$4 sm:$0xff]  }
 0x282   : > { %10437 = vmatprep.subr.bf16.mxu0 %v14978_v22  ;;  %11462 = vmatprep.subr.bf16.mxu1 %v14981_v23  ;;  %v15063_v22 = vld [vmem:[%s16954_s29 + $0x1228] ss:$16 sps:$4 sm:$0xff]   ;;  %v15068_v23 = vld [vmem:[%s16954_s29 + $0x1244] ss:$16 sps:$4 sm:$0xff]  }
 0x285   : > { %10438 = vmatpush1.bf16.msra.mxu0 %v14976_v24  ;;  %11463 = vmatpush1.bf16.msra.mxu1 %v14979_v25  ;;  %v15071_v24 = vld [vmem:[%s16954_s29 + $0x124c] ss:$16 sps:$4 sm:$0xff]   ;;  %v15069_v25 = vld [vmem:[%s16954_s29 + $0x1248] ss:$16 sps:$4 sm:$0xff]  }
 0x286   : > { %10439 = vmatprep.subr.bf16.mxu0 %v14984_v26  ;;  %11464 = vmatprep.subr.bf16.mxu1 %v14987_v27  ;;  %v15074_v26 = vld [vmem:[%s16954_s29 + $0x1264] ss:$16 sps:$4 sm:$0xff]   ;;  %v15077_v27 = vld [vmem:[%s16954_s29 + $0x126c] ss:$16 sps:$4 sm:$0xff]  }
 0x289   : > { %10440 = vmatpush1.bf16.msra.mxu0 %v14982_v28  ;;  %11465 = vmatpush1.bf16.msra.mxu1 %v14985_v29  ;;  %v15072_v28 = vld [vmem:[%s16954_s29 + $0x1260] ss:$16 sps:$4 sm:$0xff]   ;;  %v15075_v29 = vld [vmem:[%s16954_s29 + $0x1268] ss:$16 sps:$4 sm:$0xff]  }
 0x28a   : > { %10441 = vmatprep.subr.bf16.mxu0 %v14990_v30  ;;  %11466 = vmatprep.subr.bf16.mxu1 %v14993_v31  ;;  %v15080_v30 = vld [vmem:[%s16954_s29 + $0x1284] ss:$16 sps:$4 sm:$0xff]   ;;  %v15083_v31 = vld [vmem:[%s16954_s29 + $0x128c] ss:$16 sps:$4 sm:$0xff]  }
 0x28d   : > { %10442 = vmatpush1.bf16.msra.mxu0 %v14988_v32  ;;  %11467 = vmatpush1.bf16.msra.mxu1 %v14991_v34  ;;  %v15078_v32 = vld [vmem:[%s16954_s29 + $0x1280] ss:$16 sps:$4 sm:$0xff]   ;;  %v15081_v34 = vld [vmem:[%s16954_s29 + $0x1288] ss:$16 sps:$4 sm:$0xff]  }
 0x28e   : > { %10443 = vmatprep.subr.bf16.mxu0 %v14996_v36  ;;  %11468 = vmatprep.subr.bf16.mxu1 %v14999_v8  ;;  %v15086_v36 = vld [vmem:[%s16954_s29 + $0x12a4] ss:$16 sps:$4 sm:$0xff]   ;;  %v15089_v8 = vld [vmem:[%s16954_s29 + $0x12ac] ss:$16 sps:$4 sm:$0xff]  }
 0x291   : > { %10444 = vmatpush1.bf16.msra.mxu0 %v14994_v37  ;;  %11469 = vmatpush1.bf16.msra.mxu1 %v14997_v38  ;;  %v15084_v37 = vld [vmem:[%s16954_s29 + $0x12a0] ss:$16 sps:$4 sm:$0xff]   ;;  %v15087_v38 = vld [vmem:[%s16954_s29 + $0x12a8] ss:$16 sps:$4 sm:$0xff]  }
 0x292   : > { %10445 = vmatprep.subr.bf16.mxu0 %v15002_v39  ;;  %11470 = vmatprep.subr.bf16.mxu1 %v15005_v40  ;;  %v15092_v39 = vld [vmem:[%s16954_s29 + $0x12c4] ss:$16 sps:$4 sm:$0xff]   ;;  %v15095_v40 = vld [vmem:[%s16954_s29 + $0x12cc] ss:$16 sps:$4 sm:$0xff]  }
 0x295   : > { %10446 = vmatpush1.bf16.msra.mxu0 %v15000_v42  ;;  %11471 = vmatpush1.bf16.msra.mxu1 %v15003_v43  ;;  %v15090_v42 = vld [vmem:[%s16954_s29 + $0x12c0] ss:$16 sps:$4 sm:$0xff]   ;;  %v15093_v43 = vld [vmem:[%s16954_s29 + $0x12c8] ss:$16 sps:$4 sm:$0xff]  }
 0x296   : > { %10447 = vmatprep.subr.bf16.mxu0 %v15008_v44  ;;  %11472 = vmatprep.subr.bf16.mxu1 %v15011_v46  ;;  %v15098_v44 = vld [vmem:[%s16954_s29 + $0x12e4] ss:$16 sps:$4 sm:$0xff]   ;;  %v15101_v46 = vld [vmem:[%s16954_s29 + $0x12ec] ss:$16 sps:$4 sm:$0xff]  }
 0x299   : > { %10448 = vmatpush1.bf16.msra.mxu0 %v15006_v47  ;;  %11473 = vmatpush1.bf16.msra.mxu1 %v15009_v48  ;;  %v15096_v47 = vld [vmem:[%s16954_s29 + $0x12e0] ss:$16 sps:$4 sm:$0xff]   ;;  %v15099_v48 = vld [vmem:[%s16954_s29 + $0x12e8] ss:$16 sps:$4 sm:$0xff]  }
 0x29a   : > { %10449 = vmatprep.subr.bf16.mxu0 %v15014_v49  ;;  %11474 = vmatprep.subr.bf16.mxu1 %v15017_v50  ;;  %v15104_v49 = vld [vmem:[%s16954_s29 + $0x1304] ss:$16 sps:$4 sm:$0xff]   ;;  %v15107_v50 = vld [vmem:[%s16954_s29 + $0x130c] ss:$16 sps:$4 sm:$0xff]  }
 0x29d   : > { %10450 = vmatpush1.bf16.msra.mxu0 %v15012_v35  ;;  %11475 = vmatpush1.bf16.msra.mxu1 %v15015_v51  ;;  %v15102_v35 = vld [vmem:[%s16954_s29 + $0x1300] ss:$16 sps:$4 sm:$0xff]   ;;  %v15105_v51 = vld [vmem:[%s16954_s29 + $0x1308] ss:$16 sps:$4 sm:$0xff]  }
 0x29e   : > { %10451 = vmatprep.subr.bf16.mxu0 %v15020_v52  ;;  %11476 = vmatprep.subr.bf16.mxu1 %v15023_v53  ;;  %v15110_v52 = vld [vmem:[%s16954_s29 + $0x1324] ss:$16 sps:$4 sm:$0xff]   ;;  %v15113_v53 = vld [vmem:[%s16954_s29 + $0x132c] ss:$16 sps:$4 sm:$0xff]  }
 0x2a1   : > { %10452 = vmatpush1.bf16.msra.mxu0 %v15018_v45  ;;  %11477 = vmatpush1.bf16.msra.mxu1 %v15021_v54  ;;  %v15108_v45 = vld [vmem:[%s16954_s29 + $0x1320] ss:$16 sps:$4 sm:$0xff]   ;;  %v15111_v54 = vld [vmem:[%s16954_s29 + $0x1328] ss:$16 sps:$4 sm:$0xff]  }
 0x2a2   : > { %10453 = vmatprep.subr.bf16.mxu0 %v15026_v56  ;;  %11478 = vmatprep.subr.bf16.mxu1 %v15029_v57  ;;  %v15116_v56 = vld [vmem:[%s16954_s29 + $0x1344] ss:$16 sps:$4 sm:$0xff]   ;;  %v15119_v57 = vld [vmem:[%s16954_s29 + $0x134c] ss:$16 sps:$4 sm:$0xff]  }
 0x2a5   : > { %10454 = vmatpush1.bf16.msra.mxu0 %v15024_v59  ;;  %11479 = vmatpush1.bf16.msra.mxu1 %v15027_v60  ;;  %v15114_v59 = vld [vmem:[%s16954_s29 + $0x1340] ss:$16 sps:$4 sm:$0xff]   ;;  %v15117_v60 = vld [vmem:[%s16954_s29 + $0x1348] ss:$16 sps:$4 sm:$0xff]  }
 0x2a6   : > { %10455 = vmatprep.subr.bf16.mxu0 %v15032_v41  ;;  %11480 = vmatprep.subr.bf16.mxu1 %v15035_v61  ;;  %v15122_v41 = vld [vmem:[%s16954_s29 + $0x1364] ss:$16 sps:$4 sm:$0xff]   ;;  %v15125_v61 = vld [vmem:[%s16954_s29 + $0x136c] ss:$16 sps:$4 sm:$0xff]  }
 0x2a9   : > { %10456 = vmatpush1.bf16.msra.mxu0 %v15030_v62  ;;  %11481 = vmatpush1.bf16.msra.mxu1 %v15033_v0  ;;  %v15120_v62 = vld [vmem:[%s16954_s29 + $0x1360] ss:$16 sps:$4 sm:$0xff]   ;;  %v15123_v0 = vld [vmem:[%s16954_s29 + $0x1368] ss:$16 sps:$4 sm:$0xff]  }
 0x2aa   : > { %10457 = vmatprep.subr.bf16.mxu0 %v15038_v1  ;;  %11482 = vmatprep.subr.bf16.mxu1 %v15041_v2  ;;  %v15128_v1 = vld [vmem:[%s16954_s29 + $0x1384] ss:$16 sps:$4 sm:$0xff]   ;;  %v15131_v2 = vld [vmem:[%s16954_s29 + $0x138c] ss:$16 sps:$4 sm:$0xff]  }
 0x2ad   : > { %10458 = vmatpush1.bf16.msra.mxu0 %v15036_v3  ;;  %11483 = vmatpush1.bf16.msra.mxu1 %v15039_v6  ;;  %v15126_v3 = vld [vmem:[%s16954_s29 + $0x1380] ss:$16 sps:$4 sm:$0xff]   ;;  %v15129_v6 = vld [vmem:[%s16954_s29 + $0x1388] ss:$16 sps:$4 sm:$0xff]  }
 0x2ae   : > { %10459 = vmatprep.subr.bf16.mxu0 %v15044_v7  ;;  %11484 = vmatprep.subr.bf16.mxu1 %v15047_v9  ;;  %v15134_v7 = vld [vmem:[%s16954_s29 + $0x13a4] ss:$16 sps:$4 sm:$0xff]   ;;  %v15137_v9 = vld [vmem:[%s16954_s29 + $0x13ac] ss:$16 sps:$4 sm:$0xff]  }
 0x2b1   : > { %10460 = vmatpush1.bf16.msra.mxu0 %v15042_v10  ;;  %11485 = vmatpush1.bf16.msra.mxu1 %v15045_v11  ;;  %v15132_v10 = vld [vmem:[%s16954_s29 + $0x13a0] ss:$16 sps:$4 sm:$0xff]   ;;  %v15135_v11 = vld [vmem:[%s16954_s29 + $0x13a8] ss:$16 sps:$4 sm:$0xff]  }
 0x2b2   : > { %10461 = vmatprep.subr.bf16.mxu0 %v15050_v58  ;;  %11486 = vmatprep.subr.bf16.mxu1 %v15053_v12  ;;  %v15140_v58 = vld [vmem:[%s16954_s29 + $0x13c4] ss:$16 sps:$4 sm:$0xff]   ;;  %v15143_v12 = vld [vmem:[%s16954_s29 + $0x13cc] ss:$16 sps:$4 sm:$0xff]  }
 0x2b5   : > { %10462 = vmatpush1.bf16.msra.mxu0 %v15048_v13  ;;  %11487 = vmatpush1.bf16.msra.mxu1 %v15051_v14  ;;  %v16547_v13 = vld [vmem:[%s16970_s4 + $0x10] sm:$0xff] }
 0x2b6   : > { %10472 = vmatprep.subr.bf16.mxu0 %v15056_v4  ;;  %11497 = vmatprep.subr.bf16.mxu1 %v15059_v15  ;;  %v2004_v14 = vcombine.high %v16547_v13, %v16547_v13  ;;  %v15138_v4 = vld [vmem:[%s16954_s29 + $0x13c0] ss:$16 sps:$4 sm:$0xff]   ;;  %v15141_v15 = vld [vmem:[%s16954_s29 + $0x13c8] ss:$16 sps:$4 sm:$0xff]  }
 0x2b7   : > { %v15222_v13 = vld [vmem:[%s16954_s29 + $0x1580] ss:$16 sps:$4 sm:$0xff]  }
 0x2b8   : > { %10464 = vmatmul.mubr.bf16.vlgmr.msra.gmra.mrb[0].mxu0 %v17649_v33  ;;  %11489 = vmatmul.mubr.bf16.vlgmr.msra.gmra.mrb[0].mxu1 %v17649_v33 }
 0x2b9   : > { %10473 = vmatpush1.bf16.msra.mxu0 %v15054_v17  ;;  %11498 = vmatpush1.bf16.msra.mxu1 %v15057_v18  ;;  %v15146_v17 = vld [vmem:[%s16954_s29 + $0x13e4] ss:$16 sps:$4 sm:$0xff]   ;;  %v15149_v18 = vld [vmem:[%s16954_s29 + $0x13ec] ss:$16 sps:$4 sm:$0xff]  }
 0x2ba   : > { %10474 = vmatprep.subr.bf16.mxu0 %v15062_v19  ;;  %11499 = vmatprep.subr.bf16.mxu1 %v15065_v20  ;;  %v17717_v19 = vrot.slane %v2004_v14, %v17025_v5  ;;  %v15144_v20 = vld [vmem:[%s16954_s29 + $0x13e0] ss:$16 sps:$4 sm:$0xff]   ;;  %v15225_v14 = vld [vmem:[%s16954_s29 + $0x1588] ss:$16 sps:$4 sm:$0xff]  }
 0x2bb   : > { %10504 = vmatprep.mubr.bf16.mxu0 %v2051_v21  ;;  %11529 = vmatprep.mubr.bf16.mxu1 %v2051_v21  ;;  %v15147_v21 = vld [vmem:[%s16954_s29 + $0x13e8] ss:$16 sps:$4 sm:$0xff]  }
 0x2bd   : > { %10475 = vmatpush1.bf16.msra.mxu0 %v15060_v55  ;;  %11500 = vmatpush1.bf16.msra.mxu1 %v15063_v22  ;;  %v15152_v55 = vld [vmem:[%s16954_s29 + $0x1404] ss:$16 sps:$4 sm:$0xff]   ;;  %v15155_v22 = vld [vmem:[%s16954_s29 + $0x140c] ss:$16 sps:$4 sm:$0xff]  }
 0x2be   : > { %10476 = vmatprep.subr.bf16.mxu0 %v15068_v23  ;;  %11501 = vmatprep.subr.bf16.mxu1 %v15071_v24  ;;  %v2020_v23 = vcombine.high %v17717_v19, %v17717_v19  ;;  %v2049_v24 = vcombine.high %v17649_v33, %v17649_v33  ;;  %v15156_v33 = vld [vmem:[%s16954_s29 + $0x1420] ss:$16 sps:$4 sm:$0xff]  }
 0x2c1   : > { %10477 = vmatpush1.bf16.msra.mxu0 %v15066_v16  ;;  %11502 = vmatpush1.bf16.msra.mxu1 %v15069_v25  ;;  %v15150_v16 = vld [vmem:[%s16954_s29 + $0x1400] ss:$16 sps:$4 sm:$0xff]   ;;  %v15153_v25 = vld [vmem:[%s16954_s29 + $0x1408] ss:$16 sps:$4 sm:$0xff]  }
 0x2c2   : > { %10478 = vmatprep.subr.bf16.mxu0 %v15074_v26  ;;  %11503 = vmatprep.subr.bf16.mxu1 %v15077_v27  ;;  %v15158_v26 = vld [vmem:[%s16954_s29 + $0x1424] ss:$16 sps:$4 sm:$0xff]   ;;  %v15161_v27 = vld [vmem:[%s16954_s29 + $0x142c] ss:$16 sps:$4 sm:$0xff]  }
 0x2c5   : > { %10479 = vmatpush1.bf16.msra.mxu0 %v15072_v28  ;;  %11504 = vmatpush1.bf16.msra.mxu1 %v15075_v29  ;;  %v17732_v28 = vrot.slane %v2020_v23, %v17025_v5  ;;  %v15159_v29 = vld [vmem:[%s16954_s29 + $0x1428] ss:$16 sps:$4 sm:$0xff]   ;;  %v15242_v23 = vld [vmem:[%s16954_s29 + $0x15e4] ss:$16 sps:$4 sm:$0xff]  }
 0x2c6   : > { %10480 = vmatprep.subr.bf16.mxu0 %v15080_v30  ;;  %11505 = vmatprep.subr.bf16.mxu1 %v15083_v31  ;;  %v15164_v30 = vld [vmem:[%s16954_s29 + $0x1444] ss:$16 sps:$4 sm:$0xff]   ;;  %v15167_v31 = vld [vmem:[%s16954_s29 + $0x144c] ss:$16 sps:$4 sm:$0xff]  }
 0x2c9   : > { %10481 = vmatpush1.bf16.msra.mxu0 %v15078_v32  ;;  %11506 = vmatpush1.bf16.msra.mxu1 %v15081_v34  ;;  %v15162_v32 = vld [vmem:[%s16954_s29 + $0x1440] ss:$16 sps:$4 sm:$0xff]   ;;  %v15165_v34 = vld [vmem:[%s16954_s29 + $0x1448] ss:$16 sps:$4 sm:$0xff]  }
 0x2ca   : > { %10482 = vmatprep.subr.bf16.mxu0 %v15086_v36  ;;  %11507 = vmatprep.subr.bf16.mxu1 %v15089_v8  ;;  %v15170_v36 = vld [vmem:[%s16954_s29 + $0x1464] ss:$16 sps:$4 sm:$0xff]   ;;  %v15173_v8 = vld [vmem:[%s16954_s29 + $0x146c] ss:$16 sps:$4 sm:$0xff]  }
 0x2cd   : > { %10483 = vmatpush1.bf16.msra.mxu0 %v15084_v37  ;;  %11508 = vmatpush1.bf16.msra.mxu1 %v15087_v38  ;;  %v15168_v37 = vld [vmem:[%s16954_s29 + $0x1460] ss:$16 sps:$4 sm:$0xff]   ;;  %v15171_v38 = vld [vmem:[%s16954_s29 + $0x1468] ss:$16 sps:$4 sm:$0xff]  }
 0x2ce   : > { %10484 = vmatprep.subr.bf16.mxu0 %v15092_v39  ;;  %11509 = vmatprep.subr.bf16.mxu1 %v15095_v40  ;;  %v15176_v39 = vld [vmem:[%s16954_s29 + $0x1484] ss:$16 sps:$4 sm:$0xff]   ;;  %v15179_v40 = vld [vmem:[%s16954_s29 + $0x148c] ss:$16 sps:$4 sm:$0xff]  }
 0x2d1   : > { %10485 = vmatpush1.bf16.msra.mxu0 %v15090_v42  ;;  %11510 = vmatpush1.bf16.msra.mxu1 %v15093_v43  ;;  %v15174_v42 = vld [vmem:[%s16954_s29 + $0x1480] ss:$16 sps:$4 sm:$0xff]   ;;  %v15177_v43 = vld [vmem:[%s16954_s29 + $0x1488] ss:$16 sps:$4 sm:$0xff]  }
 0x2d2   : > { %10486 = vmatprep.subr.bf16.mxu0 %v15098_v44  ;;  %11511 = vmatprep.subr.bf16.mxu1 %v15101_v46  ;;  %v15182_v44 = vld [vmem:[%s16954_s29 + $0x14a4] ss:$16 sps:$4 sm:$0xff]   ;;  %v15185_v46 = vld [vmem:[%s16954_s29 + $0x14ac] ss:$16 sps:$4 sm:$0xff]  }
 0x2d5   : > { %10487 = vmatpush1.bf16.msra.mxu0 %v15096_v47  ;;  %11512 = vmatpush1.bf16.msra.mxu1 %v15099_v48  ;;  %v15180_v47 = vld [vmem:[%s16954_s29 + $0x14a0] ss:$16 sps:$4 sm:$0xff]   ;;  %v15183_v48 = vld [vmem:[%s16954_s29 + $0x14a8] ss:$16 sps:$4 sm:$0xff]  }
 0x2d6   : > { %10488 = vmatprep.subr.bf16.mxu0 %v15104_v49  ;;  %11513 = vmatprep.subr.bf16.mxu1 %v15107_v50  ;;  %v15188_v49 = vld [vmem:[%s16954_s29 + $0x14c4] ss:$16 sps:$4 sm:$0xff]   ;;  %v15191_v50 = vld [vmem:[%s16954_s29 + $0x14cc] ss:$16 sps:$4 sm:$0xff]  }
 0x2d9   : > { %10489 = vmatpush1.bf16.msra.mxu0 %v15102_v35  ;;  %11514 = vmatpush1.bf16.msra.mxu1 %v15105_v51  ;;  %v15186_v35 = vld [vmem:[%s16954_s29 + $0x14c0] ss:$16 sps:$4 sm:$0xff]   ;;  %v15189_v51 = vld [vmem:[%s16954_s29 + $0x14c8] ss:$16 sps:$4 sm:$0xff]  }
 0x2da   : > { %10490 = vmatprep.subr.bf16.mxu0 %v15110_v52  ;;  %11515 = vmatprep.subr.bf16.mxu1 %v15113_v53  ;;  %v15194_v52 = vld [vmem:[%s16954_s29 + $0x14e4] ss:$16 sps:$4 sm:$0xff]   ;;  %v15197_v53 = vld [vmem:[%s16954_s29 + $0x14ec] ss:$16 sps:$4 sm:$0xff]  }
 0x2dd   : > { %10491 = vmatpush1.bf16.msra.mxu0 %v15108_v45  ;;  %11516 = vmatpush1.bf16.msra.mxu1 %v15111_v54  ;;  %v15192_v45 = vld [vmem:[%s16954_s29 + $0x14e0] ss:$16 sps:$4 sm:$0xff]   ;;  %v15195_v54 = vld [vmem:[%s16954_s29 + $0x14e8] ss:$16 sps:$4 sm:$0xff]  }
 0x2de   : > { %10492 = vmatprep.subr.bf16.mxu0 %v15116_v56  ;;  %11517 = vmatprep.subr.bf16.mxu1 %v15119_v57  ;;  %v15200_v56 = vld [vmem:[%s16954_s29 + $0x1504] ss:$16 sps:$4 sm:$0xff]   ;;  %v15203_v57 = vld [vmem:[%s16954_s29 + $0x150c] ss:$16 sps:$4 sm:$0xff]  }
 0x2e1   : > { %10493 = vmatpush1.bf16.msra.mxu0 %v15114_v59  ;;  %11518 = vmatpush1.bf16.msra.mxu1 %v15117_v60  ;;  %v15198_v59 = vld [vmem:[%s16954_s29 + $0x1500] ss:$16 sps:$4 sm:$0xff]   ;;  %v15201_v60 = vld [vmem:[%s16954_s29 + $0x1508] ss:$16 sps:$4 sm:$0xff]  }
 0x2e2   : > { %10494 = vmatprep.subr.bf16.mxu0 %v15122_v41  ;;  %11519 = vmatprep.subr.bf16.mxu1 %v15125_v61  ;;  %v15206_v41 = vld [vmem:[%s16954_s29 + $0x1524] ss:$16 sps:$4 sm:$0xff]   ;;  %v15209_v61 = vld [vmem:[%s16954_s29 + $0x152c] ss:$16 sps:$4 sm:$0xff]  }
 0x2e5   : > { %10495 = vmatpush1.bf16.msra.mxu0 %v15120_v62  ;;  %11520 = vmatpush1.bf16.msra.mxu1 %v15123_v0  ;;  %v15204_v62 = vld [vmem:[%s16954_s29 + $0x1520] ss:$16 sps:$4 sm:$0xff]   ;;  %v15207_v0 = vld [vmem:[%s16954_s29 + $0x1528] ss:$16 sps:$4 sm:$0xff]  }
 0x2e6   : > { %10496 = vmatprep.subr.bf16.mxu0 %v15128_v1  ;;  %11521 = vmatprep.subr.bf16.mxu1 %v15131_v2  ;;  %v15212_v1 = vld [vmem:[%s16954_s29 + $0x1544] ss:$16 sps:$4 sm:$0xff]   ;;  %v15215_v2 = vld [vmem:[%s16954_s29 + $0x154c] ss:$16 sps:$4 sm:$0xff]  }
 0x2e9   : > { %10497 = vmatpush1.bf16.msra.mxu0 %v15126_v3  ;;  %11522 = vmatpush1.bf16.msra.mxu1 %v15129_v6  ;;  %v15210_v3 = vld [vmem:[%s16954_s29 + $0x1540] ss:$16 sps:$4 sm:$0xff]   ;;  %v15213_v6 = vld [vmem:[%s16954_s29 + $0x1548] ss:$16 sps:$4 sm:$0xff]  }
 0x2ea   : > { %10498 = vmatprep.subr.bf16.mxu0 %v15134_v7  ;;  %11523 = vmatprep.subr.bf16.mxu1 %v15137_v9  ;;  %v15218_v7 = vld [vmem:[%s16954_s29 + $0x1564] ss:$16 sps:$4 sm:$0xff]   ;;  %v15221_v9 = vld [vmem:[%s16954_s29 + $0x156c] ss:$16 sps:$4 sm:$0xff]  }
 0x2ed   : > { %10499 = vmatpush1.bf16.msra.mxu0 %v15132_v10  ;;  %11524 = vmatpush1.bf16.msra.mxu1 %v15135_v11  ;;  %v15216_v10 = vld [vmem:[%s16954_s29 + $0x1560] ss:$16 sps:$4 sm:$0xff]   ;;  %v15219_v11 = vld [vmem:[%s16954_s29 + $0x1568] ss:$16 sps:$4 sm:$0xff]  }
 0x2ee   : > { %10500 = vmatprep.subr.bf16.mxu0 %v15140_v58  ;;  %11525 = vmatprep.subr.bf16.mxu1 %v15143_v12  ;;  %v15224_v58 = vld [vmem:[%s16954_s29 + $0x1584] ss:$16 sps:$4 sm:$0xff]   ;;  %v15227_v12 = vld [vmem:[%s16954_s29 + $0x158c] ss:$16 sps:$4 sm:$0xff]  }
 0x2f1   : > { %10501 = vmatpush1.bf16.msra.mxu0 %v15138_v4  ;;  %11526 = vmatpush1.bf16.msra.mxu1 %v15141_v15  ;;  %v15230_v4 = vld [vmem:[%s16954_s29 + $0x15a4] ss:$16 sps:$4 sm:$0xff]   ;;  %v15233_v15 = vld [vmem:[%s16954_s29 + $0x15ac] ss:$16 sps:$4 sm:$0xff]  }
 0x2f2   : > { %10502 = vmatprep.subr.bf16.mxu0 %v15146_v17  ;;  %11527 = vmatprep.subr.bf16.mxu1 %v15149_v18  ;;  %v15228_v17 = vld [vmem:[%s16954_s29 + $0x15a0] ss:$16 sps:$4 sm:$0xff]   ;;  %v15231_v18 = vld [vmem:[%s16954_s29 + $0x15a8] ss:$16 sps:$4 sm:$0xff]  }
 0x2f5   : > { %10503 = vmatpush1.bf16.msra.mxu0 %v15144_v20  ;;  %11528 = vmatpush1.bf16.msra.mxu1 %v15147_v21  ;;  %v15236_v20 = vld [vmem:[%s16954_s29 + $0x15c4] ss:$16 sps:$4 sm:$0xff]   ;;  %v15239_v21 = vld [vmem:[%s16954_s29 + $0x15cc] ss:$16 sps:$4 sm:$0xff]  }
 0x2f6   : > { %10513 = vmatprep.subr.bf16.mxu0 %v15152_v55  ;;  %11538 = vmatprep.subr.bf16.mxu1 %v15155_v22  ;;  %v15234_v55 = vld [vmem:[%s16954_s29 + $0x15c0] ss:$16 sps:$4 sm:$0xff]   ;;  %v15237_v22 = vld [vmem:[%s16954_s29 + $0x15c8] ss:$16 sps:$4 sm:$0xff]  }
 0x2f8   : > { %10505 = vmatmul.mubr.bf16.vlgmr.msra.gmra.mrb[0].mxu0 %v2049_v24  ;;  %11530 = vmatmul.mubr.bf16.vlgmr.msra.gmra.mrb[0].mxu1 %v2049_v24  ;;  %v15245_v24 = vld [vmem:[%s16954_s29 + $0x15ec] ss:$16 sps:$4 sm:$0xff]  }
 0x2f9   : > { %10514 = vmatpush1.bf16.msra.mxu0 %v15150_v16  ;;  %11539 = vmatpush1.bf16.msra.mxu1 %v15153_v25  ;;  %v15240_v16 = vld [vmem:[%s16954_s29 + $0x15e0] ss:$16 sps:$4 sm:$0xff]   ;;  %v15243_v25 = vld [vmem:[%s16954_s29 + $0x15e8] ss:$16 sps:$4 sm:$0xff]  }
 0x2fa   : > { %10515 = vmatprep.subr.bf16.mxu0 %v15158_v26  ;;  %11540 = vmatprep.subr.bf16.mxu1 %v15161_v27  ;;  %v15249_v26 = vld [vmem:[%s16954_s29 + $0x1604] ss:$16 sps:$4 sm:$0xff]   ;;  %v15252_v27 = vld [vmem:[%s16954_s29 + $0x160c] ss:$16 sps:$4 sm:$0xff]  }
 0x2fb   : > { %10545 = vmatprep.mubr.bf16.mxu0 %v17732_v28  ;;  %11570 = vmatprep.mubr.bf16.mxu1 %v17732_v28 }
 0x2fd   : > { %10516 = vmatpush1.bf16.msra.mxu0 %v15156_v33  ;;  %11541 = vmatpush1.bf16.msra.mxu1 %v15159_v29  ;;  %v17798_v33 = vrot.slane %v17717_v19, %v17025_v5  ;;  %v15247_v29 = vld [vmem:[%s16954_s29 + $0x1600] ss:$16 sps:$4 sm:$0xff]  }
 0x2fe   : > { %10517 = vmatprep.subr.bf16.mxu0 %v15164_v30  ;;  %11542 = vmatprep.subr.bf16.mxu1 %v15167_v31  ;;  %v15250_v30 = vld [vmem:[%s16954_s29 + $0x1608] ss:$16 sps:$4 sm:$0xff]   ;;  %v15255_v31 = vld [vmem:[%s16954_s29 + $0x1624] ss:$16 sps:$4 sm:$0xff]   ;;  %v15253_v19 = vld [vmem:[%s16954_s29 + $0x1620] ss:$16 sps:$4 sm:$0xff]  }
 0x301   : > { %10518 = vmatpush1.bf16.msra.mxu0 %v15162_v32  ;;  %11543 = vmatpush1.bf16.msra.mxu1 %v15165_v34  ;;  %v15258_v32 = vld [vmem:[%s16954_s29 + $0x162c] ss:$16 sps:$4 sm:$0xff]   ;;  %v2052_v34 = vcombine.high %v17732_v28, %v17732_v28  ;;  %v15259_v28 = vld [vmem:[%s16954_s29 + $0x1640] ss:$16 sps:$4 sm:$0xff]  }
 0x302   : > { %10519 = vmatprep.subr.bf16.mxu0 %v15170_v36  ;;  %11544 = vmatprep.subr.bf16.mxu1 %v15173_v8  ;;  %v15256_v36 = vld [vmem:[%s16954_s29 + $0x1628] ss:$16 sps:$4 sm:$0xff]   ;;  %v15261_v8 = vld [vmem:[%s16954_s29 + $0x1644] ss:$16 sps:$4 sm:$0xff]  }
 0x305   : > { %10520 = vmatpush1.bf16.msra.mxu0 %v15168_v37  ;;  %11545 = vmatpush1.bf16.msra.mxu1 %v15171_v38  ;;  %v15264_v37 = vld [vmem:[%s16954_s29 + $0x164c] ss:$16 sps:$4 sm:$0xff]   ;;  %v15262_v38 = vld [vmem:[%s16954_s29 + $0x1648] ss:$16 sps:$4 sm:$0xff]  }
 0x306   : > { %10521 = vmatprep.subr.bf16.mxu0 %v15176_v39  ;;  %11546 = vmatprep.subr.bf16.mxu1 %v15179_v40  ;;  %v15267_v39 = vld [vmem:[%s16954_s29 + $0x1664] ss:$16 sps:$4 sm:$0xff]   ;;  %v15270_v40 = vld [vmem:[%s16954_s29 + $0x166c] ss:$16 sps:$4 sm:$0xff]  }
 0x309   : > { %10522 = vmatpush1.bf16.msra.mxu0 %v15174_v42  ;;  %11547 = vmatpush1.bf16.msra.mxu1 %v15177_v43  ;;  %v15265_v42 = vld [vmem:[%s16954_s29 + $0x1660] ss:$16 sps:$4 sm:$0xff]   ;;  %v15268_v43 = vld [vmem:[%s16954_s29 + $0x1668] ss:$16 sps:$4 sm:$0xff]  }
 0x30a   : > { %10523 = vmatprep.subr.bf16.mxu0 %v15182_v44  ;;  %11548 = vmatprep.subr.bf16.mxu1 %v15185_v46  ;;  %v15273_v44 = vld [vmem:[%s16954_s29 + $0x1684] ss:$16 sps:$4 sm:$0xff]   ;;  %v15276_v46 = vld [vmem:[%s16954_s29 + $0x168c] ss:$16 sps:$4 sm:$0xff]  }
 0x30d   : > { %10524 = vmatpush1.bf16.msra.mxu0 %v15180_v47  ;;  %11549 = vmatpush1.bf16.msra.mxu1 %v15183_v48  ;;  %v15271_v47 = vld [vmem:[%s16954_s29 + $0x1680] ss:$16 sps:$4 sm:$0xff]   ;;  %v15274_v48 = vld [vmem:[%s16954_s29 + $0x1688] ss:$16 sps:$4 sm:$0xff]  }
 0x30e   : > { %10525 = vmatprep.subr.bf16.mxu0 %v15188_v49  ;;  %11550 = vmatprep.subr.bf16.mxu1 %v15191_v50  ;;  %v15279_v49 = vld [vmem:[%s16954_s29 + $0x16a4] ss:$16 sps:$4 sm:$0xff]   ;;  %v15282_v50 = vld [vmem:[%s16954_s29 + $0x16ac] ss:$16 sps:$4 sm:$0xff]  }
 0x311   : > { %10526 = vmatpush1.bf16.msra.mxu0 %v15186_v35  ;;  %11551 = vmatpush1.bf16.msra.mxu1 %v15189_v51  ;;  %v15277_v35 = vld [vmem:[%s16954_s29 + $0x16a0] ss:$16 sps:$4 sm:$0xff]   ;;  %v15280_v51 = vld [vmem:[%s16954_s29 + $0x16a8] ss:$16 sps:$4 sm:$0xff]  }
 0x312   : > { %10527 = vmatprep.subr.bf16.mxu0 %v15194_v52  ;;  %11552 = vmatprep.subr.bf16.mxu1 %v15197_v53  ;;  %v15285_v52 = vld [vmem:[%s16954_s29 + $0x16c4] ss:$16 sps:$4 sm:$0xff]   ;;  %v15288_v53 = vld [vmem:[%s16954_s29 + $0x16cc] ss:$16 sps:$4 sm:$0xff]  }
 0x315   : > { %10528 = vmatpush1.bf16.msra.mxu0 %v15192_v45  ;;  %11553 = vmatpush1.bf16.msra.mxu1 %v15195_v54  ;;  %v15283_v45 = vld [vmem:[%s16954_s29 + $0x16c0] ss:$16 sps:$4 sm:$0xff]   ;;  %v15286_v54 = vld [vmem:[%s16954_s29 + $0x16c8] ss:$16 sps:$4 sm:$0xff]  }
 0x316   : > { %10529 = vmatprep.subr.bf16.mxu0 %v15200_v56  ;;  %11554 = vmatprep.subr.bf16.mxu1 %v15203_v57  ;;  %v15291_v56 = vld [vmem:[%s16954_s29 + $0x16e4] ss:$16 sps:$4 sm:$0xff]   ;;  %v15294_v57 = vld [vmem:[%s16954_s29 + $0x16ec] ss:$16 sps:$4 sm:$0xff]  }
 0x319   : > { %10530 = vmatpush1.bf16.msra.mxu0 %v15198_v59  ;;  %11555 = vmatpush1.bf16.msra.mxu1 %v15201_v60  ;;  %v15289_v59 = vld [vmem:[%s16954_s29 + $0x16e0] ss:$16 sps:$4 sm:$0xff]   ;;  %v15292_v60 = vld [vmem:[%s16954_s29 + $0x16e8] ss:$16 sps:$4 sm:$0xff]  }
 0x31a   : > { %10531 = vmatprep.subr.bf16.mxu0 %v15206_v41  ;;  %11556 = vmatprep.subr.bf16.mxu1 %v15209_v61  ;;  %v15297_v41 = vld [vmem:[%s16954_s29 + $0x1704] ss:$16 sps:$4 sm:$0xff]   ;;  %v15300_v61 = vld [vmem:[%s16954_s29 + $0x170c] ss:$16 sps:$4 sm:$0xff]  }
 0x31d   : > { %10532 = vmatpush1.bf16.msra.mxu0 %v15204_v62  ;;  %11557 = vmatpush1.bf16.msra.mxu1 %v15207_v0  ;;  %v15295_v62 = vld [vmem:[%s16954_s29 + $0x1700] ss:$16 sps:$4 sm:$0xff]   ;;  %v15298_v0 = vld [vmem:[%s16954_s29 + $0x1708] ss:$16 sps:$4 sm:$0xff]  }
 0x31e   : > { %10533 = vmatprep.subr.bf16.mxu0 %v15212_v1  ;;  %11558 = vmatprep.subr.bf16.mxu1 %v15215_v2  ;;  %v15303_v1 = vld [vmem:[%s16954_s29 + $0x1724] ss:$16 sps:$4 sm:$0xff]   ;;  %v15306_v2 = vld [vmem:[%s16954_s29 + $0x172c] ss:$16 sps:$4 sm:$0xff]  }
 0x321   : > { %10534 = vmatpush1.bf16.msra.mxu0 %v15210_v3  ;;  %11559 = vmatpush1.bf16.msra.mxu1 %v15213_v6  ;;  %v15301_v3 = vld [vmem:[%s16954_s29 + $0x1720] ss:$16 sps:$4 sm:$0xff]   ;;  %v15304_v6 = vld [vmem:[%s16954_s29 + $0x1728] ss:$16 sps:$4 sm:$0xff]  }
 0x322   : > { %10535 = vmatprep.subr.bf16.mxu0 %v15218_v7  ;;  %11560 = vmatprep.subr.bf16.mxu1 %v15221_v9  ;;  %v15309_v7 = vld [vmem:[%s16954_s29 + $0x1744] ss:$16 sps:$4 sm:$0xff]   ;;  %v15312_v9 = vld [vmem:[%s16954_s29 + $0x174c] ss:$16 sps:$4 sm:$0xff]  }
 0x325   : > { %10536 = vmatpush1.bf16.msra.mxu0 %v15216_v10  ;;  %11561 = vmatpush1.bf16.msra.mxu1 %v15219_v11  ;;  %v15307_v10 = vld [vmem:[%s16954_s29 + $0x1740] ss:$16 sps:$4 sm:$0xff]   ;;  %v15310_v11 = vld [vmem:[%s16954_s29 + $0x1748] ss:$16 sps:$4 sm:$0xff]  }
 0x326   : > { %10537 = vmatprep.subr.bf16.mxu0 %v15224_v58  ;;  %11562 = vmatprep.subr.bf16.mxu1 %v15227_v12  ;;  %v15315_v58 = vld [vmem:[%s16954_s29 + $0x1764] ss:$16 sps:$4 sm:$0xff]   ;;  %v15318_v12 = vld [vmem:[%s16954_s29 + $0x176c] ss:$16 sps:$4 sm:$0xff]  }
 0x329   : > { %10538 = vmatpush1.bf16.msra.mxu0 %v15222_v13  ;;  %11563 = vmatpush1.bf16.msra.mxu1 %v15225_v14  ;;  %v15313_v13 = vld [vmem:[%s16954_s29 + $0x1760] ss:$16 sps:$4 sm:$0xff]   ;;  %v15316_v14 = vld [vmem:[%s16954_s29 + $0x1768] ss:$16 sps:$4 sm:$0xff]  }
 0x32a   : > { %10539 = vmatprep.subr.bf16.mxu0 %v15230_v4  ;;  %11564 = vmatprep.subr.bf16.mxu1 %v15233_v15  ;;  %v15321_v4 = vld [vmem:[%s16954_s29 + $0x1784] ss:$16 sps:$4 sm:$0xff]   ;;  %v15324_v15 = vld [vmem:[%s16954_s29 + $0x178c] ss:$16 sps:$4 sm:$0xff]  }
 0x32d   : > { %10540 = vmatpush1.bf16.msra.mxu0 %v15228_v17  ;;  %11565 = vmatpush1.bf16.msra.mxu1 %v15231_v18  ;;  %v15319_v17 = vld [vmem:[%s16954_s29 + $0x1780] ss:$16 sps:$4 sm:$0xff]   ;;  %v15322_v18 = vld [vmem:[%s16954_s29 + $0x1788] ss:$16 sps:$4 sm:$0xff]  }
 0x32e   : > { %10541 = vmatprep.subr.bf16.mxu0 %v15236_v20  ;;  %11566 = vmatprep.subr.bf16.mxu1 %v15239_v21  ;;  %v15327_v20 = vld [vmem:[%s16954_s29 + $0x17a4] ss:$16 sps:$4 sm:$0xff]   ;;  %v15330_v21 = vld [vmem:[%s16954_s29 + $0x17ac] ss:$16 sps:$4 sm:$0xff]  }
 0x331   : > { %10542 = vmatpush1.bf16.msra.mxu0 %v15234_v55  ;;  %11567 = vmatpush1.bf16.msra.mxu1 %v15237_v22  ;;  %v15325_v55 = vld [vmem:[%s16954_s29 + $0x17a0] ss:$16 sps:$4 sm:$0xff]   ;;  %v15328_v22 = vld [vmem:[%s16954_s29 + $0x17a8] ss:$16 sps:$4 sm:$0xff]  }
 0x332   : > { %10543 = vmatprep.subr.bf16.mxu0 %v15242_v23  ;;  %11568 = vmatprep.subr.bf16.mxu1 %v15245_v24  ;;  %v15333_v23 = vld [vmem:[%s16954_s29 + $0x17c4] ss:$16 sps:$4 sm:$0xff]   ;;  %v15336_v24 = vld [vmem:[%s16954_s29 + $0x17cc] ss:$16 sps:$4 sm:$0xff]  }
 0x335   : > { %10544 = vmatpush1.bf16.msra.mxu0 %v15240_v16  ;;  %11569 = vmatpush1.bf16.msra.mxu1 %v15243_v25  ;;  %v17861_v16 = vld [vmem:[%s16970_s4 + $0x18] sm:$0xff] }
 0x336   : > { %10554 = vmatprep.subr.bf16.mxu0 %v15249_v26  ;;  %11579 = vmatprep.subr.bf16.mxu1 %v15252_v27  ;;  %v15331_v25 = vld [vmem:[%s16954_s29 + $0x17c0] ss:$16 sps:$4 sm:$0xff]   ;;  %v15334_v26 = vld [vmem:[%s16954_s29 + $0x17c8] ss:$16 sps:$4 sm:$0xff]   ;;  %v15339_v27 = vld [vmem:[%s16954_s29 + $0x17e4] ss:$16 sps:$4 sm:$0xff]  }
 0x338   : > { %10546 = vmatmul.mubr.bf16.vlgmr.msra.gmra.mrb[0].mxu0 %v17798_v33  ;;  %11571 = vmatmul.mubr.bf16.vlgmr.msra.gmra.mrb[0].mxu1 %v17798_v33 }
 0x339   : > { %10555 = vmatpush1.bf16.msra.mxu0 %v15247_v29  ;;  %11580 = vmatpush1.bf16.msra.mxu1 %v15250_v30  ;;  %v15342_v29 = vld [vmem:[%s16954_s29 + $0x17ec] ss:$16 sps:$4 sm:$0xff]   ;;  %v17869_v30 = vrot.slane %v17861_v16, %v17025_v5 }
 0x33a   : > { %10556 = vmatprep.subr.bf16.mxu0 %v15255_v31  ;;  %11581 = vmatprep.subr.bf16.mxu1 %v15258_v32  ;;  %v15337_v31 = vld [vmem:[%s16954_s29 + $0x17e0] ss:$16 sps:$4 sm:$0xff]   ;;  %v15340_v32 = vld [vmem:[%s16954_s29 + $0x17e8] ss:$16 sps:$4 sm:$0xff]  }
 0x33b   : > { %10586 = vmatprep.mubr.bf16.mxu0 %v2052_v34  ;;  %11611 = vmatprep.mubr.bf16.mxu1 %v2052_v34  ;;  %v15345_v34 = vld [vmem:[%s16954_s29 + $0x1804] ss:$16 sps:$4 sm:$0xff]  }
 0x33d   : > { %10557 = vmatpush1.bf16.msra.mxu0 %v15253_v19  ;;  %11582 = vmatpush1.bf16.msra.mxu1 %v15256_v36  ;;  %v15348_v19 = vld [vmem:[%s16954_s29 + $0x180c] ss:$16 sps:$4 sm:$0xff]   ;;  %v2068_v36 = vcombine.high %v17869_v30, %v17869_v30 }
 0x33e   : > { %10558 = vmatprep.subr.bf16.mxu0 %v15261_v8  ;;  %11583 = vmatprep.subr.bf16.mxu1 %v15264_v37  ;;  %v2050_v8 = vcombine.high %v17798_v33, %v17798_v33  ;;  %v15343_v37 = vld [vmem:[%s16954_s29 + $0x1800] ss:$16 sps:$4 sm:$0xff]  }
 0x33f   : > { %v15349_v33 = vld [vmem:[%s16954_s29 + $0x1820] ss:$16 sps:$4 sm:$0xff]  }
 0x341   : > { %10559 = vmatpush1.bf16.msra.mxu0 %v15259_v28  ;;  %11584 = vmatpush1.bf16.msra.mxu1 %v15262_v38  ;;  %v15346_v28 = vld [vmem:[%s16954_s29 + $0x1808] ss:$16 sps:$4 sm:$0xff]   ;;  %v15351_v38 = vld [vmem:[%s16954_s29 + $0x1824] ss:$16 sps:$4 sm:$0xff]  }
 0x342   : > { %10560 = vmatprep.subr.bf16.mxu0 %v15267_v39  ;;  %11585 = vmatprep.subr.bf16.mxu1 %v15270_v40  ;;  %v15354_v39 = vld [vmem:[%s16954_s29 + $0x182c] ss:$16 sps:$4 sm:$0xff]   ;;  %v17884_v40 = vrot.slane %v2068_v36, %v17025_v5  ;;  %v15430_v36 = vld [vmem:[%s16954_s29 + $0x19c8] ss:$16 sps:$4 sm:$0xff]  }
 0x345   : > { %10561 = vmatpush1.bf16.msra.mxu0 %v15265_v42  ;;  %11586 = vmatpush1.bf16.msra.mxu1 %v15268_v43  ;;  %v15352_v42 = vld [vmem:[%s16954_s29 + $0x1828] ss:$16 sps:$4 sm:$0xff]   ;;  %v15357_v43 = vld [vmem:[%s16954_s29 + $0x1844] ss:$16 sps:$4 sm:$0xff]  }
 0x346   : > { %10562 = vmatprep.subr.bf16.mxu0 %v15273_v44  ;;  %11587 = vmatprep.subr.bf16.mxu1 %v15276_v46  ;;  %v15360_v44 = vld [vmem:[%s16954_s29 + $0x184c] ss:$16 sps:$4 sm:$0xff]   ;;  %v15355_v46 = vld [vmem:[%s16954_s29 + $0x1840] ss:$16 sps:$4 sm:$0xff]  }
 0x349   : > { %10563 = vmatpush1.bf16.msra.mxu0 %v15271_v47  ;;  %11588 = vmatpush1.bf16.msra.mxu1 %v15274_v48  ;;  %v15358_v47 = vld [vmem:[%s16954_s29 + $0x1848] ss:$16 sps:$4 sm:$0xff]   ;;  %v15363_v48 = vld [vmem:[%s16954_s29 + $0x1864] ss:$16 sps:$4 sm:$0xff]  }
 0x34a   : > { %10564 = vmatprep.subr.bf16.mxu0 %v15279_v49  ;;  %11589 = vmatprep.subr.bf16.mxu1 %v15282_v50  ;;  %v15366_v49 = vld [vmem:[%s16954_s29 + $0x186c] ss:$16 sps:$4 sm:$0xff]   ;;  %v15361_v50 = vld [vmem:[%s16954_s29 + $0x1860] ss:$16 sps:$4 sm:$0xff]  }
 0x34d   : > { %10565 = vmatpush1.bf16.msra.mxu0 %v15277_v35  ;;  %11590 = vmatpush1.bf16.msra.mxu1 %v15280_v51  ;;  %v15364_v35 = vld [vmem:[%s16954_s29 + $0x1868] ss:$16 sps:$4 sm:$0xff]   ;;  %v15369_v51 = vld [vmem:[%s16954_s29 + $0x1884] ss:$16 sps:$4 sm:$0xff]  }
 0x34e   : > { %10566 = vmatprep.subr.bf16.mxu0 %v15285_v52  ;;  %11591 = vmatprep.subr.bf16.mxu1 %v15288_v53  ;;  %v15372_v52 = vld [vmem:[%s16954_s29 + $0x188c] ss:$16 sps:$4 sm:$0xff]   ;;  %v15367_v53 = vld [vmem:[%s16954_s29 + $0x1880] ss:$16 sps:$4 sm:$0xff]  }
 0x351   : > { %10567 = vmatpush1.bf16.msra.mxu0 %v15283_v45  ;;  %11592 = vmatpush1.bf16.msra.mxu1 %v15286_v54  ;;  %v15370_v45 = vld [vmem:[%s16954_s29 + $0x1888] ss:$16 sps:$4 sm:$0xff]   ;;  %v15375_v54 = vld [vmem:[%s16954_s29 + $0x18a4] ss:$16 sps:$4 sm:$0xff]  }
 0x352   : > { %10568 = vmatprep.subr.bf16.mxu0 %v15291_v56  ;;  %11593 = vmatprep.subr.bf16.mxu1 %v15294_v57  ;;  %v15378_v56 = vld [vmem:[%s16954_s29 + $0x18ac] ss:$16 sps:$4 sm:$0xff]   ;;  %v15373_v57 = vld [vmem:[%s16954_s29 + $0x18a0] ss:$16 sps:$4 sm:$0xff]  }
 0x355   : > { %10569 = vmatpush1.bf16.msra.mxu0 %v15289_v59  ;;  %11594 = vmatpush1.bf16.msra.mxu1 %v15292_v60  ;;  %v15376_v59 = vld [vmem:[%s16954_s29 + $0x18a8] ss:$16 sps:$4 sm:$0xff]   ;;  %v15381_v60 = vld [vmem:[%s16954_s29 + $0x18c4] ss:$16 sps:$4 sm:$0xff]  }
 0x356   : > { %10570 = vmatprep.subr.bf16.mxu0 %v15297_v41  ;;  %11595 = vmatprep.subr.bf16.mxu1 %v15300_v61  ;;  %v15384_v41 = vld [vmem:[%s16954_s29 + $0x18cc] ss:$16 sps:$4 sm:$0xff]   ;;  %v15379_v61 = vld [vmem:[%s16954_s29 + $0x18c0] ss:$16 sps:$4 sm:$0xff]  }
 0x359   : > { %10571 = vmatpush1.bf16.msra.mxu0 %v15295_v62  ;;  %11596 = vmatpush1.bf16.msra.mxu1 %v15298_v0  ;;  %v15382_v62 = vld [vmem:[%s16954_s29 + $0x18c8] ss:$16 sps:$4 sm:$0xff]   ;;  %v15387_v0 = vld [vmem:[%s16954_s29 + $0x18e4] ss:$16 sps:$4 sm:$0xff]  }
 0x35a   : > { %10572 = vmatprep.subr.bf16.mxu0 %v15303_v1  ;;  %11597 = vmatprep.subr.bf16.mxu1 %v15306_v2  ;;  %v15390_v1 = vld [vmem:[%s16954_s29 + $0x18ec] ss:$16 sps:$4 sm:$0xff]   ;;  %v15385_v2 = vld [vmem:[%s16954_s29 + $0x18e0] ss:$16 sps:$4 sm:$0xff]  }
 0x35d   : > { %10573 = vmatpush1.bf16.msra.mxu0 %v15301_v3  ;;  %11598 = vmatpush1.bf16.msra.mxu1 %v15304_v6  ;;  %v15388_v3 = vld [vmem:[%s16954_s29 + $0x18e8] ss:$16 sps:$4 sm:$0xff]   ;;  %v15393_v6 = vld [vmem:[%s16954_s29 + $0x1904] ss:$16 sps:$4 sm:$0xff]  }
 0x35e   : > { %10574 = vmatprep.subr.bf16.mxu0 %v15309_v7  ;;  %11599 = vmatprep.subr.bf16.mxu1 %v15312_v9  ;;  %v15396_v7 = vld [vmem:[%s16954_s29 + $0x190c] ss:$16 sps:$4 sm:$0xff]   ;;  %v15391_v9 = vld [vmem:[%s16954_s29 + $0x1900] ss:$16 sps:$4 sm:$0xff]  }
 0x361   : > { %10575 = vmatpush1.bf16.msra.mxu0 %v15307_v10  ;;  %11600 = vmatpush1.bf16.msra.mxu1 %v15310_v11  ;;  %v15394_v10 = vld [vmem:[%s16954_s29 + $0x1908] ss:$16 sps:$4 sm:$0xff]   ;;  %v15399_v11 = vld [vmem:[%s16954_s29 + $0x1924] ss:$16 sps:$4 sm:$0xff]  }
 0x362   : > { %10576 = vmatprep.subr.bf16.mxu0 %v15315_v58  ;;  %11601 = vmatprep.subr.bf16.mxu1 %v15318_v12  ;;  %v15402_v58 = vld [vmem:[%s16954_s29 + $0x192c] ss:$16 sps:$4 sm:$0xff]   ;;  %v15397_v12 = vld [vmem:[%s16954_s29 + $0x1920] ss:$16 sps:$4 sm:$0xff]  }
 0x365   : > { %10577 = vmatpush1.bf16.msra.mxu0 %v15313_v13  ;;  %11602 = vmatpush1.bf16.msra.mxu1 %v15316_v14  ;;  %v15400_v13 = vld [vmem:[%s16954_s29 + $0x1928] ss:$16 sps:$4 sm:$0xff]   ;;  %v15405_v14 = vld [vmem:[%s16954_s29 + $0x1944] ss:$16 sps:$4 sm:$0xff]  }
 0x366   : > { %10578 = vmatprep.subr.bf16.mxu0 %v15321_v4  ;;  %11603 = vmatprep.subr.bf16.mxu1 %v15324_v15  ;;  %v15408_v4 = vld [vmem:[%s16954_s29 + $0x194c] ss:$16 sps:$4 sm:$0xff]   ;;  %v15403_v15 = vld [vmem:[%s16954_s29 + $0x1940] ss:$16 sps:$4 sm:$0xff]  }
 0x369   : > { %10579 = vmatpush1.bf16.msra.mxu0 %v15319_v17  ;;  %11604 = vmatpush1.bf16.msra.mxu1 %v15322_v18  ;;  %v15406_v17 = vld [vmem:[%s16954_s29 + $0x1948] ss:$16 sps:$4 sm:$0xff]   ;;  %v15411_v18 = vld [vmem:[%s16954_s29 + $0x1964] ss:$16 sps:$4 sm:$0xff]  }
 0x36a   : > { %10580 = vmatprep.subr.bf16.mxu0 %v15327_v20  ;;  %11605 = vmatprep.subr.bf16.mxu1 %v15330_v21  ;;  %v15414_v20 = vld [vmem:[%s16954_s29 + $0x196c] ss:$16 sps:$4 sm:$0xff]   ;;  %v15409_v21 = vld [vmem:[%s16954_s29 + $0x1960] ss:$16 sps:$4 sm:$0xff]  }
 0x36d   : > { %10581 = vmatpush1.bf16.msra.mxu0 %v15325_v55  ;;  %11606 = vmatpush1.bf16.msra.mxu1 %v15328_v22  ;;  %v15412_v55 = vld [vmem:[%s16954_s29 + $0x1968] ss:$16 sps:$4 sm:$0xff]   ;;  %v15417_v22 = vld [vmem:[%s16954_s29 + $0x1984] ss:$16 sps:$4 sm:$0xff]  }
 0x36e   : > { %10582 = vmatprep.subr.bf16.mxu0 %v15333_v23  ;;  %11607 = vmatprep.subr.bf16.mxu1 %v15336_v24  ;;  %v15420_v23 = vld [vmem:[%s16954_s29 + $0x198c] ss:$16 sps:$4 sm:$0xff]   ;;  %v15415_v24 = vld [vmem:[%s16954_s29 + $0x1980] ss:$16 sps:$4 sm:$0xff]  }
 0x371   : > { %10583 = vmatpush1.bf16.msra.mxu0 %v15331_v25  ;;  %11608 = vmatpush1.bf16.msra.mxu1 %v15334_v26  ;;  %v15418_v25 = vld [vmem:[%s16954_s29 + $0x1988] ss:$16 sps:$4 sm:$0xff]   ;;  %v15423_v26 = vld [vmem:[%s16954_s29 + $0x19a4] ss:$16 sps:$4 sm:$0xff]  }
 0x372   : > { %10584 = vmatprep.subr.bf16.mxu0 %v15339_v27  ;;  %11609 = vmatprep.subr.bf16.mxu1 %v15342_v29  ;;  %v15426_v27 = vld [vmem:[%s16954_s29 + $0x19ac] ss:$16 sps:$4 sm:$0xff]   ;;  %v15421_v29 = vld [vmem:[%s16954_s29 + $0x19a0] ss:$16 sps:$4 sm:$0xff]  }
 0x375   : > { %10585 = vmatpush1.bf16.msra.mxu0 %v15337_v31  ;;  %11610 = vmatpush1.bf16.msra.mxu1 %v15340_v32  ;;  %v15424_v31 = vld [vmem:[%s16954_s29 + $0x19a8] ss:$16 sps:$4 sm:$0xff]   ;;  %v15429_v32 = vld [vmem:[%s16954_s29 + $0x19c4] ss:$16 sps:$4 sm:$0xff]  }
 0x376   : > { %10595 = vmatprep.subr.bf16.mxu0 %v15345_v34  ;;  %11620 = vmatprep.subr.bf16.mxu1 %v15348_v19  ;;  %v15432_v34 = vld [vmem:[%s16954_s29 + $0x19cc] ss:$16 sps:$4 sm:$0xff]   ;;  %v15427_v19 = vld [vmem:[%s16954_s29 + $0x19c0] ss:$16 sps:$4 sm:$0xff]  }
 0x378   : > { %10587 = vmatmul.mubr.bf16.vlgmr.msra.gmra.mrb[0].mxu0 %v2050_v8  ;;  %11612 = vmatmul.mubr.bf16.vlgmr.msra.gmra.mrb[0].mxu1 %v2050_v8  ;;  %v15435_v8 = vld [vmem:[%s16954_s29 + $0x19e4] ss:$16 sps:$4 sm:$0xff]  }
 0x379   : > { %10596 = vmatpush1.bf16.msra.mxu0 %v15343_v37  ;;  %11621 = vmatpush1.bf16.msra.mxu1 %v15346_v28  ;;  %v15438_v37 = vld [vmem:[%s16954_s29 + $0x19ec] ss:$16 sps:$4 sm:$0xff]   ;;  %v15433_v28 = vld [vmem:[%s16954_s29 + $0x19e0] ss:$16 sps:$4 sm:$0xff]  }
 0x37a   : > { %10597 = vmatprep.subr.bf16.mxu0 %v15351_v38  ;;  %11622 = vmatprep.subr.bf16.mxu1 %v15354_v39  ;;  %v15436_v38 = vld [vmem:[%s16954_s29 + $0x19e8] ss:$16 sps:$4 sm:$0xff]   ;;  %v15441_v39 = vld [vmem:[%s16954_s29 + $0x1a04] ss:$16 sps:$4 sm:$0xff]  }
 0x37b   : > { %10627 = vmatprep.mubr.bf16.mxu0 %v17884_v40  ;;  %11652 = vmatprep.mubr.bf16.mxu1 %v17884_v40 }
 0x37d   : > { %10598 = vmatpush1.bf16.msra.mxu0 %v15349_v33  ;;  %11623 = vmatpush1.bf16.msra.mxu1 %v15352_v42  ;;  %v15444_v33 = vld [vmem:[%s16954_s29 + $0x1a0c] ss:$16 sps:$4 sm:$0xff]   ;;  %v17950_v42 = vrot.slane %v17869_v30, %v17025_v5  ;;  %v15445_v30 = vld [vmem:[%s16954_s29 + $0x1a20] ss:$16 sps:$4 sm:$0xff]  }
 0x37e   : > { %10599 = vmatprep.subr.bf16.mxu0 %v15357_v43  ;;  %11624 = vmatprep.subr.bf16.mxu1 %v15360_v44  ;;  %v15439_v43 = vld [vmem:[%s16954_s29 + $0x1a00] ss:$16 sps:$4 sm:$0xff]   ;;  %v15442_v44 = vld [vmem:[%s16954_s29 + $0x1a08] ss:$16 sps:$4 sm:$0xff]  }
 0x381   : > { %10600 = vmatpush1.bf16.msra.mxu0 %v15355_v46  ;;  %11625 = vmatpush1.bf16.msra.mxu1 %v15358_v47  ;;  %v15447_v46 = vld [vmem:[%s16954_s29 + $0x1a24] ss:$16 sps:$4 sm:$0xff]   ;;  %v15450_v47 = vld [vmem:[%s16954_s29 + $0x1a2c] ss:$16 sps:$4 sm:$0xff]  }
 0x382   : > { %10601 = vmatprep.subr.bf16.mxu0 %v15363_v48  ;;  %11626 = vmatprep.subr.bf16.mxu1 %v15366_v49  ;;  %v2100_v48 = vcombine.high %v17884_v40, %v17884_v40  ;;  %v15448_v49 = vld [vmem:[%s16954_s29 + $0x1a28] ss:$16 sps:$4 sm:$0xff]   ;;  %v15451_v40 = vld [vmem:[%s16954_s29 + $0x1a40] ss:$16 sps:$4 sm:$0xff]  }
 0x385   : > { %10602 = vmatpush1.bf16.msra.mxu0 %v15361_v50  ;;  %11627 = vmatpush1.bf16.msra.mxu1 %v15364_v35  ;;  %v15453_v50 = vld [vmem:[%s16954_s29 + $0x1a44] ss:$16 sps:$4 sm:$0xff]   ;;  %v15456_v35 = vld [vmem:[%s16954_s29 + $0x1a4c] ss:$16 sps:$4 sm:$0xff]  }
 0x386   : > { %10603 = vmatprep.subr.bf16.mxu0 %v15369_v51  ;;  %11628 = vmatprep.subr.bf16.mxu1 %v15372_v52  ;;  %v15454_v51 = vld [vmem:[%s16954_s29 + $0x1a48] ss:$16 sps:$4 sm:$0xff]   ;;  %v15459_v52 = vld [vmem:[%s16954_s29 + $0x1a64] ss:$16 sps:$4 sm:$0xff]  }
 0x389   : > { %10604 = vmatpush1.bf16.msra.mxu0 %v15367_v53  ;;  %11629 = vmatpush1.bf16.msra.mxu1 %v15370_v45  ;;  %v15462_v53 = vld [vmem:[%s16954_s29 + $0x1a6c] ss:$16 sps:$4 sm:$0xff]   ;;  %v15457_v45 = vld [vmem:[%s16954_s29 + $0x1a60] ss:$16 sps:$4 sm:$0xff]  }
 0x38a   : > { %10605 = vmatprep.subr.bf16.mxu0 %v15375_v54  ;;  %11630 = vmatprep.subr.bf16.mxu1 %v15378_v56  ;;  %v15460_v54 = vld [vmem:[%s16954_s29 + $0x1a68] ss:$16 sps:$4 sm:$0xff]   ;;  %v15465_v56 = vld [vmem:[%s16954_s29 + $0x1a84] ss:$16 sps:$4 sm:$0xff]  }
 0x38d   : > { %10606 = vmatpush1.bf16.msra.mxu0 %v15373_v57  ;;  %11631 = vmatpush1.bf16.msra.mxu1 %v15376_v59  ;;  %v15468_v57 = vld [vmem:[%s16954_s29 + $0x1a8c] ss:$16 sps:$4 sm:$0xff]   ;;  %v15463_v59 = vld [vmem:[%s16954_s29 + $0x1a80] ss:$16 sps:$4 sm:$0xff]  }
 0x38e   : > { %10607 = vmatprep.subr.bf16.mxu0 %v15381_v60  ;;  %11632 = vmatprep.subr.bf16.mxu1 %v15384_v41  ;;  %v15466_v60 = vld [vmem:[%s16954_s29 + $0x1a88] ss:$16 sps:$4 sm:$0xff]   ;;  %v15471_v41 = vld [vmem:[%s16954_s29 + $0x1aa4] ss:$16 sps:$4 sm:$0xff]  }
 0x391   : > { %10608 = vmatpush1.bf16.msra.mxu0 %v15379_v61  ;;  %11633 = vmatpush1.bf16.msra.mxu1 %v15382_v62  ;;  %v15474_v61 = vld [vmem:[%s16954_s29 + $0x1aac] ss:$16 sps:$4 sm:$0xff]   ;;  %v15469_v62 = vld [vmem:[%s16954_s29 + $0x1aa0] ss:$16 sps:$4 sm:$0xff]  }
 0x392   : > { %10609 = vmatprep.subr.bf16.mxu0 %v15387_v0  ;;  %11634 = vmatprep.subr.bf16.mxu1 %v15390_v1  ;;  %v15472_v0 = vld [vmem:[%s16954_s29 + $0x1aa8] ss:$16 sps:$4 sm:$0xff]   ;;  %v15477_v1 = vld [vmem:[%s16954_s29 + $0x1ac4] ss:$16 sps:$4 sm:$0xff]  }
 0x395   : > { %10610 = vmatpush1.bf16.msra.mxu0 %v15385_v2  ;;  %11635 = vmatpush1.bf16.msra.mxu1 %v15388_v3  ;;  %v15480_v2 = vld [vmem:[%s16954_s29 + $0x1acc] ss:$16 sps:$4 sm:$0xff]   ;;  %v15475_v3 = vld [vmem:[%s16954_s29 + $0x1ac0] ss:$16 sps:$4 sm:$0xff]  }
 0x396   : > { %10611 = vmatprep.subr.bf16.mxu0 %v15393_v6  ;;  %11636 = vmatprep.subr.bf16.mxu1 %v15396_v7  ;;  %v15478_v6 = vld [vmem:[%s16954_s29 + $0x1ac8] ss:$16 sps:$4 sm:$0xff]   ;;  %v15483_v7 = vld [vmem:[%s16954_s29 + $0x1ae4] ss:$16 sps:$4 sm:$0xff]  }
 0x399   : > { %10612 = vmatpush1.bf16.msra.mxu0 %v15391_v9  ;;  %11637 = vmatpush1.bf16.msra.mxu1 %v15394_v10  ;;  %v15486_v9 = vld [vmem:[%s16954_s29 + $0x1aec] ss:$16 sps:$4 sm:$0xff]   ;;  %v15481_v10 = vld [vmem:[%s16954_s29 + $0x1ae0] ss:$16 sps:$4 sm:$0xff]  }
 0x39a   : > { %10613 = vmatprep.subr.bf16.mxu0 %v15399_v11  ;;  %11638 = vmatprep.subr.bf16.mxu1 %v15402_v58  ;;  %v15484_v11 = vld [vmem:[%s16954_s29 + $0x1ae8] ss:$16 sps:$4 sm:$0xff]   ;;  %v15489_v58 = vld [vmem:[%s16954_s29 + $0x1b04] ss:$16 sps:$4 sm:$0xff]  }
 0x39d   : > { %10614 = vmatpush1.bf16.msra.mxu0 %v15397_v12  ;;  %11639 = vmatpush1.bf16.msra.mxu1 %v15400_v13  ;;  %v15492_v12 = vld [vmem:[%s16954_s29 + $0x1b0c] ss:$16 sps:$4 sm:$0xff]   ;;  %v15487_v13 = vld [vmem:[%s16954_s29 + $0x1b00] ss:$16 sps:$4 sm:$0xff]  }
 0x39e   : > { %10615 = vmatprep.subr.bf16.mxu0 %v15405_v14  ;;  %11640 = vmatprep.subr.bf16.mxu1 %v15408_v4  ;;  %v15490_v14 = vld [vmem:[%s16954_s29 + $0x1b08] ss:$16 sps:$4 sm:$0xff]   ;;  %v15495_v4 = vld [vmem:[%s16954_s29 + $0x1b24] ss:$16 sps:$4 sm:$0xff]  }
 0x3a1   : > { %10616 = vmatpush1.bf16.msra.mxu0 %v15403_v15  ;;  %11641 = vmatpush1.bf16.msra.mxu1 %v15406_v17  ;;  %v15498_v15 = vld [vmem:[%s16954_s29 + $0x1b2c] ss:$16 sps:$4 sm:$0xff]   ;;  %v15493_v17 = vld [vmem:[%s16954_s29 + $0x1b20] ss:$16 sps:$4 sm:$0xff]  }
 0x3a2   : > { %10617 = vmatprep.subr.bf16.mxu0 %v15411_v18  ;;  %11642 = vmatprep.subr.bf16.mxu1 %v15414_v20  ;;  %v15496_v18 = vld [vmem:[%s16954_s29 + $0x1b28] ss:$16 sps:$4 sm:$0xff]   ;;  %v15501_v20 = vld [vmem:[%s16954_s29 + $0x1b44] ss:$16 sps:$4 sm:$0xff]  }
 0x3a5   : > { %10618 = vmatpush1.bf16.msra.mxu0 %v15409_v21  ;;  %11643 = vmatpush1.bf16.msra.mxu1 %v15412_v55  ;;  %v15504_v21 = vld [vmem:[%s16954_s29 + $0x1b4c] ss:$16 sps:$4 sm:$0xff]   ;;  %v15499_v55 = vld [vmem:[%s16954_s29 + $0x1b40] ss:$16 sps:$4 sm:$0xff]  }
 0x3a6   : > { %10619 = vmatprep.subr.bf16.mxu0 %v15417_v22  ;;  %11644 = vmatprep.subr.bf16.mxu1 %v15420_v23  ;;  %v15502_v22 = vld [vmem:[%s16954_s29 + $0x1b48] ss:$16 sps:$4 sm:$0xff]   ;;  %v15507_v23 = vld [vmem:[%s16954_s29 + $0x1b64] ss:$16 sps:$4 sm:$0xff]  }
 0x3a9   : > { %10620 = vmatpush1.bf16.msra.mxu0 %v15415_v24  ;;  %11645 = vmatpush1.bf16.msra.mxu1 %v15418_v25  ;;  %v15510_v24 = vld [vmem:[%s16954_s29 + $0x1b6c] ss:$16 sps:$4 sm:$0xff]   ;;  %v15505_v25 = vld [vmem:[%s16954_s29 + $0x1b60] ss:$16 sps:$4 sm:$0xff]  }
 0x3aa   : > { %10621 = vmatprep.subr.bf16.mxu0 %v15423_v26  ;;  %11646 = vmatprep.subr.bf16.mxu1 %v15426_v27  ;;  %v15508_v26 = vld [vmem:[%s16954_s29 + $0x1b68] ss:$16 sps:$4 sm:$0xff]   ;;  %v15513_v27 = vld [vmem:[%s16954_s29 + $0x1b84] ss:$16 sps:$4 sm:$0xff]  }
 0x3ad   : > { %10622 = vmatpush1.bf16.msra.mxu0 %v15421_v29  ;;  %11647 = vmatpush1.bf16.msra.mxu1 %v15424_v31  ;;  %v15516_v29 = vld [vmem:[%s16954_s29 + $0x1b8c] ss:$16 sps:$4 sm:$0xff]   ;;  %v15511_v31 = vld [vmem:[%s16954_s29 + $0x1b80] ss:$16 sps:$4 sm:$0xff]  }
 0x3ae   : > { %10623 = vmatprep.subr.bf16.mxu0 %v15429_v32  ;;  %11648 = vmatprep.subr.bf16.mxu1 %v15432_v34  ;;  %v15514_v32 = vld [vmem:[%s16954_s29 + $0x1b88] ss:$16 sps:$4 sm:$0xff]   ;;  %v15519_v34 = vld [vmem:[%s16954_s29 + $0x1ba4] ss:$16 sps:$4 sm:$0xff]  }
 0x3b1   : > { %10624 = vmatpush1.bf16.msra.mxu0 %v15427_v19  ;;  %11649 = vmatpush1.bf16.msra.mxu1 %v15430_v36  ;;  %v15522_v19 = vld [vmem:[%s16954_s29 + $0x1bac] ss:$16 sps:$4 sm:$0xff]   ;;  %v15517_v36 = vld [vmem:[%s16954_s29 + $0x1ba0] ss:$16 sps:$4 sm:$0xff]  }
 0x3b2   : > { %10625 = vmatprep.subr.bf16.mxu0 %v15435_v8  ;;  %11650 = vmatprep.subr.bf16.mxu1 %v15438_v37  ;;  %v15520_v8 = vld [vmem:[%s16954_s29 + $0x1ba8] ss:$16 sps:$4 sm:$0xff]   ;;  %v15525_v37 = vld [vmem:[%s16954_s29 + $0x1bc4] ss:$16 sps:$4 sm:$0xff]  }
 0x3b5   : > { %10626 = vmatpush1.bf16.msra.mxu0 %v15433_v28  ;;  %11651 = vmatpush1.bf16.msra.mxu1 %v15436_v38  ;;  %v15528_v28 = vld [vmem:[%s16954_s29 + $0x1bcc] ss:$16 sps:$4 sm:$0xff]   ;;  %v2053_v38 = vcombine.high %v17861_v16, %v17861_v16  ;;  %v15529_v16 = vld [vmem:[%s16954_s29 + $0x1be0] ss:$16 sps:$4 sm:$0xff]  }
 0x3b6   : > { %10636 = vmatprep.subr.bf16.mxu0 %v15441_v39  ;;  %11661 = vmatprep.subr.bf16.mxu1 %v15444_v33  ;;  %v15523_v39 = vld [vmem:[%s16954_s29 + $0x1bc0] ss:$16 sps:$4 sm:$0xff]   ;;  %v15526_v33 = vld [vmem:[%s16954_s29 + $0x1bc8] ss:$16 sps:$4 sm:$0xff]  }
 0x3b8   : > { %10628 = vmatmul.mubr.bf16.vlgmr.msra.gmra.mrb[0].mxu0 %v17950_v42  ;;  %11653 = vmatmul.mubr.bf16.vlgmr.msra.gmra.mrb[0].mxu1 %v17950_v42 }
 0x3b9   : > { %10637 = vmatpush1.bf16.msra.mxu0 %v15439_v43  ;;  %11662 = vmatpush1.bf16.msra.mxu1 %v15442_v44  ;;  %v15531_v43 = vld [vmem:[%s16954_s29 + $0x1be4] ss:$16 sps:$4 sm:$0xff]   ;;  %v15534_v44 = vld [vmem:[%s16954_s29 + $0x1bec] ss:$16 sps:$4 sm:$0xff]  }
 0x3ba   : > { %10638 = vmatprep.subr.bf16.mxu0 %v15447_v46  ;;  %11663 = vmatprep.subr.bf16.mxu1 %v15450_v47  ;;  %v18019_v46 = vrot.slane %v2053_v38, %v17025_v5  ;;  %v15532_v47 = vld [vmem:[%s16954_s29 + $0x1be8] ss:$16 sps:$4 sm:$0xff]  }
 0x3bb   : > { %10668 = vmatprep.mubr.bf16.mxu0 %v2100_v48  ;;  %11693 = vmatprep.mubr.bf16.mxu1 %v2100_v48  ;;  %v15537_v48 = vld [vmem:[%s16954_s29 + $0x1c04] ss:$16 sps:$4 sm:$0xff]   ;;  %v15610_v38 = vld [vmem:[%s16954_s29 + $0x1d88] ss:$16 sps:$4 sm:$0xff]  }
 0x3bd   : > { %10639 = vmatpush1.bf16.msra.mxu0 %v15445_v30  ;;  %11664 = vmatpush1.bf16.msra.mxu1 %v15448_v49  ;;  %v15540_v30 = vld [vmem:[%s16954_s29 + $0x1c0c] ss:$16 sps:$4 sm:$0xff]   ;;  %v2069_v49 = vcombine.high %v18019_v46, %v18019_v46 }
 0x3be   : > { %10640 = vmatprep.subr.bf16.mxu0 %v15453_v50  ;;  %11665 = vmatprep.subr.bf16.mxu1 %v15456_v35  ;;  %v2098_v50 = vcombine.high %v17950_v42, %v17950_v42  ;;  %v15535_v35 = vld [vmem:[%s16954_s29 + $0x1c00] ss:$16 sps:$4 sm:$0xff]  }
 0x3bf   : > { %v15541_v42 = vld [vmem:[%s16954_s29 + $0x1c20] ss:$16 sps:$4 sm:$0xff]  }
 0x3c1   : > { %10641 = vmatpush1.bf16.msra.mxu0 %v15451_v40  ;;  %11666 = vmatpush1.bf16.msra.mxu1 %v15454_v51  ;;  %v15538_v40 = vld [vmem:[%s16954_s29 + $0x1c08] ss:$16 sps:$4 sm:$0xff]   ;;  %v15543_v51 = vld [vmem:[%s16954_s29 + $0x1c24] ss:$16 sps:$4 sm:$0xff]  }
 0x3c2   : > { %10642 = vmatprep.subr.bf16.mxu0 %v15459_v52  ;;  %11667 = vmatprep.subr.bf16.mxu1 %v15462_v53  ;;  %v15546_v52 = vld [vmem:[%s16954_s29 + $0x1c2c] ss:$16 sps:$4 sm:$0xff]   ;;  %v18034_v53 = vrot.slane %v2069_v49, %v17025_v5  ;;  %v15627_v49 = vld [vmem:[%s16954_s29 + $0x1de4] ss:$16 sps:$4 sm:$0xff]  }
 0x3c5   : > { %10643 = vmatpush1.bf16.msra.mxu0 %v15457_v45  ;;  %11668 = vmatpush1.bf16.msra.mxu1 %v15460_v54  ;;  %v15544_v45 = vld [vmem:[%s16954_s29 + $0x1c28] ss:$16 sps:$4 sm:$0xff]   ;;  %v15549_v54 = vld [vmem:[%s16954_s29 + $0x1c44] ss:$16 sps:$4 sm:$0xff]  }
 0x3c6   : > { %10644 = vmatprep.subr.bf16.mxu0 %v15465_v56  ;;  %11669 = vmatprep.subr.bf16.mxu1 %v15468_v57  ;;  %v15552_v56 = vld [vmem:[%s16954_s29 + $0x1c4c] ss:$16 sps:$4 sm:$0xff]   ;;  %v15547_v57 = vld [vmem:[%s16954_s29 + $0x1c40] ss:$16 sps:$4 sm:$0xff]  }
 0x3c9   : > { %10645 = vmatpush1.bf16.msra.mxu0 %v15463_v59  ;;  %11670 = vmatpush1.bf16.msra.mxu1 %v15466_v60  ;;  %v15550_v59 = vld [vmem:[%s16954_s29 + $0x1c48] ss:$16 sps:$4 sm:$0xff]   ;;  %v15555_v60 = vld [vmem:[%s16954_s29 + $0x1c64] ss:$16 sps:$4 sm:$0xff]  }
 0x3ca   : > { %10646 = vmatprep.subr.bf16.mxu0 %v15471_v41  ;;  %11671 = vmatprep.subr.bf16.mxu1 %v15474_v61  ;;  %v15558_v41 = vld [vmem:[%s16954_s29 + $0x1c6c] ss:$16 sps:$4 sm:$0xff]   ;;  %v15553_v61 = vld [vmem:[%s16954_s29 + $0x1c60] ss:$16 sps:$4 sm:$0xff]  }
 0x3cd   : > { %10647 = vmatpush1.bf16.msra.mxu0 %v15469_v62  ;;  %11672 = vmatpush1.bf16.msra.mxu1 %v15472_v0  ;;  %v15556_v62 = vld [vmem:[%s16954_s29 + $0x1c68] ss:$16 sps:$4 sm:$0xff]   ;;  %v15561_v0 = vld [vmem:[%s16954_s29 + $0x1c84] ss:$16 sps:$4 sm:$0xff]  }
 0x3ce   : > { %10648 = vmatprep.subr.bf16.mxu0 %v15477_v1  ;;  %11673 = vmatprep.subr.bf16.mxu1 %v15480_v2  ;;  %v15564_v1 = vld [vmem:[%s16954_s29 + $0x1c8c] ss:$16 sps:$4 sm:$0xff]   ;;  %v15559_v2 = vld [vmem:[%s16954_s29 + $0x1c80] ss:$16 sps:$4 sm:$0xff]  }
 0x3d1   : > { %10649 = vmatpush1.bf16.msra.mxu0 %v15475_v3  ;;  %11674 = vmatpush1.bf16.msra.mxu1 %v15478_v6  ;;  %v15562_v3 = vld [vmem:[%s16954_s29 + $0x1c88] ss:$16 sps:$4 sm:$0xff]   ;;  %v15567_v6 = vld [vmem:[%s16954_s29 + $0x1ca4] ss:$16 sps:$4 sm:$0xff]  }
 0x3d2   : > { %10650 = vmatprep.subr.bf16.mxu0 %v15483_v7  ;;  %11675 = vmatprep.subr.bf16.mxu1 %v15486_v9  ;;  %v15570_v7 = vld [vmem:[%s16954_s29 + $0x1cac] ss:$16 sps:$4 sm:$0xff]   ;;  %v15565_v9 = vld [vmem:[%s16954_s29 + $0x1ca0] ss:$16 sps:$4 sm:$0xff]  }
 0x3d5   : > { %10651 = vmatpush1.bf16.msra.mxu0 %v15481_v10  ;;  %11676 = vmatpush1.bf16.msra.mxu1 %v15484_v11  ;;  %v15568_v10 = vld [vmem:[%s16954_s29 + $0x1ca8] ss:$16 sps:$4 sm:$0xff]   ;;  %v15573_v11 = vld [vmem:[%s16954_s29 + $0x1cc4] ss:$16 sps:$4 sm:$0xff]  }
 0x3d6   : > { %10652 = vmatprep.subr.bf16.mxu0 %v15489_v58  ;;  %11677 = vmatprep.subr.bf16.mxu1 %v15492_v12  ;;  %v15576_v58 = vld [vmem:[%s16954_s29 + $0x1ccc] ss:$16 sps:$4 sm:$0xff]   ;;  %v15571_v12 = vld [vmem:[%s16954_s29 + $0x1cc0] ss:$16 sps:$4 sm:$0xff]  }
 0x3d9   : > { %10653 = vmatpush1.bf16.msra.mxu0 %v15487_v13  ;;  %11678 = vmatpush1.bf16.msra.mxu1 %v15490_v14  ;;  %v15574_v13 = vld [vmem:[%s16954_s29 + $0x1cc8] ss:$16 sps:$4 sm:$0xff]   ;;  %v15579_v14 = vld [vmem:[%s16954_s29 + $0x1ce4] ss:$16 sps:$4 sm:$0xff]  }
 0x3da   : > { %10654 = vmatprep.subr.bf16.mxu0 %v15495_v4  ;;  %11679 = vmatprep.subr.bf16.mxu1 %v15498_v15  ;;  %v15582_v4 = vld [vmem:[%s16954_s29 + $0x1cec] ss:$16 sps:$4 sm:$0xff]   ;;  %v15577_v15 = vld [vmem:[%s16954_s29 + $0x1ce0] ss:$16 sps:$4 sm:$0xff]  }
 0x3dd   : > { %10655 = vmatpush1.bf16.msra.mxu0 %v15493_v17  ;;  %11680 = vmatpush1.bf16.msra.mxu1 %v15496_v18  ;;  %v15580_v17 = vld [vmem:[%s16954_s29 + $0x1ce8] ss:$16 sps:$4 sm:$0xff]   ;;  %v15585_v18 = vld [vmem:[%s16954_s29 + $0x1d04] ss:$16 sps:$4 sm:$0xff]  }
 0x3de   : > { %10656 = vmatprep.subr.bf16.mxu0 %v15501_v20  ;;  %11681 = vmatprep.subr.bf16.mxu1 %v15504_v21  ;;  %v15588_v20 = vld [vmem:[%s16954_s29 + $0x1d0c] ss:$16 sps:$4 sm:$0xff]   ;;  %v15583_v21 = vld [vmem:[%s16954_s29 + $0x1d00] ss:$16 sps:$4 sm:$0xff]  }
 0x3e1   : > { %10657 = vmatpush1.bf16.msra.mxu0 %v15499_v55  ;;  %11682 = vmatpush1.bf16.msra.mxu1 %v15502_v22  ;;  %v15586_v55 = vld [vmem:[%s16954_s29 + $0x1d08] ss:$16 sps:$4 sm:$0xff]   ;;  %v15591_v22 = vld [vmem:[%s16954_s29 + $0x1d24] ss:$16 sps:$4 sm:$0xff]  }
 0x3e2   : > { %10658 = vmatprep.subr.bf16.mxu0 %v15507_v23  ;;  %11683 = vmatprep.subr.bf16.mxu1 %v15510_v24  ;;  %v15594_v23 = vld [vmem:[%s16954_s29 + $0x1d2c] ss:$16 sps:$4 sm:$0xff]   ;;  %v15589_v24 = vld [vmem:[%s16954_s29 + $0x1d20] ss:$16 sps:$4 sm:$0xff]  }
 0x3e5   : > { %10659 = vmatpush1.bf16.msra.mxu0 %v15505_v25  ;;  %11684 = vmatpush1.bf16.msra.mxu1 %v15508_v26  ;;  %v15592_v25 = vld [vmem:[%s16954_s29 + $0x1d28] ss:$16 sps:$4 sm:$0xff]   ;;  %v15597_v26 = vld [vmem:[%s16954_s29 + $0x1d44] ss:$16 sps:$4 sm:$0xff]  }
 0x3e6   : > { %10660 = vmatprep.subr.bf16.mxu0 %v15513_v27  ;;  %11685 = vmatprep.subr.bf16.mxu1 %v15516_v29  ;;  %v15600_v27 = vld [vmem:[%s16954_s29 + $0x1d4c] ss:$16 sps:$4 sm:$0xff]   ;;  %v15595_v29 = vld [vmem:[%s16954_s29 + $0x1d40] ss:$16 sps:$4 sm:$0xff]  }
 0x3e9   : > { %10661 = vmatpush1.bf16.msra.mxu0 %v15511_v31  ;;  %11686 = vmatpush1.bf16.msra.mxu1 %v15514_v32  ;;  %v15598_v31 = vld [vmem:[%s16954_s29 + $0x1d48] ss:$16 sps:$4 sm:$0xff]   ;;  %v15603_v32 = vld [vmem:[%s16954_s29 + $0x1d64] ss:$16 sps:$4 sm:$0xff]  }
 0x3ea   : > { %10662 = vmatprep.subr.bf16.mxu0 %v15519_v34  ;;  %11687 = vmatprep.subr.bf16.mxu1 %v15522_v19  ;;  %v15606_v34 = vld [vmem:[%s16954_s29 + $0x1d6c] ss:$16 sps:$4 sm:$0xff]   ;;  %v15601_v19 = vld [vmem:[%s16954_s29 + $0x1d60] ss:$16 sps:$4 sm:$0xff]  }
 0x3ed   : > { %10663 = vmatpush1.bf16.msra.mxu0 %v15517_v36  ;;  %11688 = vmatpush1.bf16.msra.mxu1 %v15520_v8  ;;  %v15604_v36 = vld [vmem:[%s16954_s29 + $0x1d68] ss:$16 sps:$4 sm:$0xff]   ;;  %v15609_v8 = vld [vmem:[%s16954_s29 + $0x1d84] ss:$16 sps:$4 sm:$0xff]  }
 0x3ee   : > { %10664 = vmatprep.subr.bf16.mxu0 %v15525_v37  ;;  %11689 = vmatprep.subr.bf16.mxu1 %v15528_v28  ;;  %v15612_v37 = vld [vmem:[%s16954_s29 + $0x1d8c] ss:$16 sps:$4 sm:$0xff]   ;;  %v15607_v28 = vld [vmem:[%s16954_s29 + $0x1d80] ss:$16 sps:$4 sm:$0xff]  }
 0x3f1   : > { %10665 = vmatpush1.bf16.msra.mxu0 %v15523_v39  ;;  %11690 = vmatpush1.bf16.msra.mxu1 %v15526_v33  ;;  %v15615_v39 = vld [vmem:[%s16954_s29 + $0x1da4] ss:$16 sps:$4 sm:$0xff]   ;;  %v15618_v33 = vld [vmem:[%s16954_s29 + $0x1dac] ss:$16 sps:$4 sm:$0xff]  }
 0x3f2   : > { %10666 = vmatprep.subr.bf16.mxu0 %v15531_v43  ;;  %11691 = vmatprep.subr.bf16.mxu1 %v15534_v44  ;;  %v15613_v43 = vld [vmem:[%s16954_s29 + $0x1da0] ss:$16 sps:$4 sm:$0xff]   ;;  %v15616_v44 = vld [vmem:[%s16954_s29 + $0x1da8] ss:$16 sps:$4 sm:$0xff]  }
 0x3f5   : > { %10667 = vmatpush1.bf16.msra.mxu0 %v15529_v16  ;;  %11692 = vmatpush1.bf16.msra.mxu1 %v15532_v47  ;;  %v15621_v16 = vld [vmem:[%s16954_s29 + $0x1dc4] ss:$16 sps:$4 sm:$0xff]   ;;  %v15624_v47 = vld [vmem:[%s16954_s29 + $0x1dcc] ss:$16 sps:$4 sm:$0xff]  }
 0x3f6   : > { %10677 = vmatprep.subr.bf16.mxu0 %v15537_v48  ;;  %11702 = vmatprep.subr.bf16.mxu1 %v15540_v30  ;;  %v15619_v48 = vld [vmem:[%s16954_s29 + $0x1dc0] ss:$16 sps:$4 sm:$0xff]   ;;  %v15622_v30 = vld [vmem:[%s16954_s29 + $0x1dc8] ss:$16 sps:$4 sm:$0xff]  }
 0x3f8   : > { %10669 = vmatmul.mubr.bf16.vlgmr.msra.gmra.mrb[0].mxu0 %v2098_v50  ;;  %11694 = vmatmul.mubr.bf16.vlgmr.msra.gmra.mrb[0].mxu1 %v2098_v50  ;;  %v15630_v50 = vld [vmem:[%s16954_s29 + $0x1dec] ss:$16 sps:$4 sm:$0xff]  }
 0x3f9   : > { %10678 = vmatpush1.bf16.msra.mxu0 %v15535_v35  ;;  %11703 = vmatpush1.bf16.msra.mxu1 %v15538_v40  ;;  %v15625_v35 = vld [vmem:[%s16954_s29 + $0x1de0] ss:$16 sps:$4 sm:$0xff]   ;;  %v15628_v40 = vld [vmem:[%s16954_s29 + $0x1de8] ss:$16 sps:$4 sm:$0xff]  }
 0x3fa   : > { %10679 = vmatprep.subr.bf16.mxu0 %v15543_v51  ;;  %11704 = vmatprep.subr.bf16.mxu1 %v15546_v52  ;;  %v15634_v51 = vld [vmem:[%s16954_s29 + $0x1e04] ss:$16 sps:$4 sm:$0xff]   ;;  %v15637_v52 = vld [vmem:[%s16954_s29 + $0x1e0c] ss:$16 sps:$4 sm:$0xff]  }
 0x3fb   : > { %10709 = vmatprep.mubr.bf16.mxu0 %v18034_v53  ;;  %11734 = vmatprep.mubr.bf16.mxu1 %v18034_v53 }
 0x3fd   : > { %10680 = vmatpush1.bf16.msra.mxu0 %v15541_v42  ;;  %11705 = vmatpush1.bf16.msra.mxu1 %v15544_v45  ;;  %v18100_v42 = vrot.slane %v18019_v46, %v17025_v5  ;;  %v15632_v45 = vld [vmem:[%s16954_s29 + $0x1e00] ss:$16 sps:$4 sm:$0xff]  }
 0x3fe   : > { %10681 = vmatprep.subr.bf16.mxu0 %v15549_v54  ;;  %11706 = vmatprep.subr.bf16.mxu1 %v15552_v56  ;;  %v15635_v54 = vld [vmem:[%s16954_s29 + $0x1e08] ss:$16 sps:$4 sm:$0xff]   ;;  %v15640_v56 = vld [vmem:[%s16954_s29 + $0x1e24] ss:$16 sps:$4 sm:$0xff]   ;;  %v15638_v46 = vld [vmem:[%s16954_s29 + $0x1e20] ss:$16 sps:$4 sm:$0xff]  }
 0x401   : > { %10682 = vmatpush1.bf16.msra.mxu0 %v15547_v57  ;;  %11707 = vmatpush1.bf16.msra.mxu1 %v15550_v59  ;;  %v15643_v57 = vld [vmem:[%s16954_s29 + $0x1e2c] ss:$16 sps:$4 sm:$0xff]   ;;  %v2101_v59 = vcombine.high %v18034_v53, %v18034_v53  ;;  %v15644_v53 = vld [vmem:[%s16954_s29 + $0x1e40] ss:$16 sps:$4 sm:$0xff]  }
 0x402   : > { %10683 = vmatprep.subr.bf16.mxu0 %v15555_v60  ;;  %11708 = vmatprep.subr.bf16.mxu1 %v15558_v41  ;;  %v15641_v60 = vld [vmem:[%s16954_s29 + $0x1e28] ss:$16 sps:$4 sm:$0xff]   ;;  %v15646_v41 = vld [vmem:[%s16954_s29 + $0x1e44] ss:$16 sps:$4 sm:$0xff]  }
 0x405   : > { %10684 = vmatpush1.bf16.msra.mxu0 %v15553_v61  ;;  %11709 = vmatpush1.bf16.msra.mxu1 %v15556_v62  ;;  %v15649_v61 = vld [vmem:[%s16954_s29 + $0x1e4c] ss:$16 sps:$4 sm:$0xff]   ;;  %v15647_v62 = vld [vmem:[%s16954_s29 + $0x1e48] ss:$16 sps:$4 sm:$0xff]  }
 0x406   : > { %10685 = vmatprep.subr.bf16.mxu0 %v15561_v0  ;;  %11710 = vmatprep.subr.bf16.mxu1 %v15564_v1  ;;  %v15652_v0 = vld [vmem:[%s16954_s29 + $0x1e64] ss:$16 sps:$4 sm:$0xff]   ;;  %v15655_v1 = vld [vmem:[%s16954_s29 + $0x1e6c] ss:$16 sps:$4 sm:$0xff]  }
 0x409   : > { %10686 = vmatpush1.bf16.msra.mxu0 %v15559_v2  ;;  %11711 = vmatpush1.bf16.msra.mxu1 %v15562_v3  ;;  %v15650_v2 = vld [vmem:[%s16954_s29 + $0x1e60] ss:$16 sps:$4 sm:$0xff]   ;;  %v15653_v3 = vld [vmem:[%s16954_s29 + $0x1e68] ss:$16 sps:$4 sm:$0xff]  }
 0x40a   : > { %10687 = vmatprep.subr.bf16.mxu0 %v15567_v6  ;;  %11712 = vmatprep.subr.bf16.mxu1 %v15570_v7  ;;  %v15658_v6 = vld [vmem:[%s16954_s29 + $0x1e84] ss:$16 sps:$4 sm:$0xff]   ;;  %v15661_v7 = vld [vmem:[%s16954_s29 + $0x1e8c] ss:$16 sps:$4 sm:$0xff]  }
 0x40d   : > { %10688 = vmatpush1.bf16.msra.mxu0 %v15565_v9  ;;  %11713 = vmatpush1.bf16.msra.mxu1 %v15568_v10  ;;  %v15656_v9 = vld [vmem:[%s16954_s29 + $0x1e80] ss:$16 sps:$4 sm:$0xff]   ;;  %v15659_v10 = vld [vmem:[%s16954_s29 + $0x1e88] ss:$16 sps:$4 sm:$0xff]  }
 0x40e   : > { %10689 = vmatprep.subr.bf16.mxu0 %v15573_v11  ;;  %11714 = vmatprep.subr.bf16.mxu1 %v15576_v58  ;;  %v15664_v11 = vld [vmem:[%s16954_s29 + $0x1ea4] ss:$16 sps:$4 sm:$0xff]   ;;  %v15667_v58 = vld [vmem:[%s16954_s29 + $0x1eac] ss:$16 sps:$4 sm:$0xff]  }
 0x411   : > { %10690 = vmatpush1.bf16.msra.mxu0 %v15571_v12  ;;  %11715 = vmatpush1.bf16.msra.mxu1 %v15574_v13  ;;  %v15662_v12 = vld [vmem:[%s16954_s29 + $0x1ea0] ss:$16 sps:$4 sm:$0xff]   ;;  %v15665_v13 = vld [vmem:[%s16954_s29 + $0x1ea8] ss:$16 sps:$4 sm:$0xff]  }
 0x412   : > { %10691 = vmatprep.subr.bf16.mxu0 %v15579_v14  ;;  %11716 = vmatprep.subr.bf16.mxu1 %v15582_v4  ;;  %v15670_v14 = vld [vmem:[%s16954_s29 + $0x1ec4] ss:$16 sps:$4 sm:$0xff]   ;;  %v15673_v4 = vld [vmem:[%s16954_s29 + $0x1ecc] ss:$16 sps:$4 sm:$0xff]  }
 0x415   : > { %10692 = vmatpush1.bf16.msra.mxu0 %v15577_v15  ;;  %11717 = vmatpush1.bf16.msra.mxu1 %v15580_v17  ;;  %v15668_v15 = vld [vmem:[%s16954_s29 + $0x1ec0] ss:$16 sps:$4 sm:$0xff]   ;;  %v15671_v17 = vld [vmem:[%s16954_s29 + $0x1ec8] ss:$16 sps:$4 sm:$0xff]  }
 0x416   : > { %10693 = vmatprep.subr.bf16.mxu0 %v15585_v18  ;;  %11718 = vmatprep.subr.bf16.mxu1 %v15588_v20  ;;  %v15676_v18 = vld [vmem:[%s16954_s29 + $0x1ee4] ss:$16 sps:$4 sm:$0xff]   ;;  %v15679_v20 = vld [vmem:[%s16954_s29 + $0x1eec] ss:$16 sps:$4 sm:$0xff]  }
 0x419   : > { %10694 = vmatpush1.bf16.msra.mxu0 %v15583_v21  ;;  %11719 = vmatpush1.bf16.msra.mxu1 %v15586_v55  ;;  %v15674_v21 = vld [vmem:[%s16954_s29 + $0x1ee0] ss:$16 sps:$4 sm:$0xff]   ;;  %v15677_v55 = vld [vmem:[%s16954_s29 + $0x1ee8] ss:$16 sps:$4 sm:$0xff]  }
 0x41a   : > { %10695 = vmatprep.subr.bf16.mxu0 %v15591_v22  ;;  %11720 = vmatprep.subr.bf16.mxu1 %v15594_v23  ;;  %v15682_v22 = vld [vmem:[%s16954_s29 + $0x1f04] ss:$16 sps:$4 sm:$0xff]   ;;  %v15685_v23 = vld [vmem:[%s16954_s29 + $0x1f0c] ss:$16 sps:$4 sm:$0xff]  }
 0x41d   : > { %10696 = vmatpush1.bf16.msra.mxu0 %v15589_v24  ;;  %11721 = vmatpush1.bf16.msra.mxu1 %v15592_v25  ;;  %v15680_v24 = vld [vmem:[%s16954_s29 + $0x1f00] ss:$16 sps:$4 sm:$0xff]   ;;  %v15683_v25 = vld [vmem:[%s16954_s29 + $0x1f08] ss:$16 sps:$4 sm:$0xff]  }
 0x41e   : > { %10697 = vmatprep.subr.bf16.mxu0 %v15597_v26  ;;  %11722 = vmatprep.subr.bf16.mxu1 %v15600_v27  ;;  %v15688_v26 = vld [vmem:[%s16954_s29 + $0x1f24] ss:$16 sps:$4 sm:$0xff]   ;;  %v15691_v27 = vld [vmem:[%s16954_s29 + $0x1f2c] ss:$16 sps:$4 sm:$0xff]  }
 0x421   : > { %10698 = vmatpush1.bf16.msra.mxu0 %v15595_v29  ;;  %11723 = vmatpush1.bf16.msra.mxu1 %v15598_v31  ;;  %v15686_v29 = vld [vmem:[%s16954_s29 + $0x1f20] ss:$16 sps:$4 sm:$0xff]   ;;  %v15689_v31 = vld [vmem:[%s16954_s29 + $0x1f28] ss:$16 sps:$4 sm:$0xff]  }
 0x422   : > { %10699 = vmatprep.subr.bf16.mxu0 %v15603_v32  ;;  %11724 = vmatprep.subr.bf16.mxu1 %v15606_v34  ;;  %v15694_v32 = vld [vmem:[%s16954_s29 + $0x1f44] ss:$16 sps:$4 sm:$0xff]   ;;  %v15697_v34 = vld [vmem:[%s16954_s29 + $0x1f4c] ss:$16 sps:$4 sm:$0xff]  }
 0x425   : > { %10700 = vmatpush1.bf16.msra.mxu0 %v15601_v19  ;;  %11725 = vmatpush1.bf16.msra.mxu1 %v15604_v36  ;;  %v15692_v19 = vld [vmem:[%s16954_s29 + $0x1f40] ss:$16 sps:$4 sm:$0xff]   ;;  %v15695_v36 = vld [vmem:[%s16954_s29 + $0x1f48] ss:$16 sps:$4 sm:$0xff]  }
 0x426   : > { %10701 = vmatprep.subr.bf16.mxu0 %v15609_v8  ;;  %11726 = vmatprep.subr.bf16.mxu1 %v15612_v37  ;;  %v15700_v8 = vld [vmem:[%s16954_s29 + $0x1f64] ss:$16 sps:$4 sm:$0xff]   ;;  %v15703_v37 = vld [vmem:[%s16954_s29 + $0x1f6c] ss:$16 sps:$4 sm:$0xff]  }
 0x429   : > { %10702 = vmatpush1.bf16.msra.mxu0 %v15607_v28  ;;  %11727 = vmatpush1.bf16.msra.mxu1 %v15610_v38  ;;  %v15698_v28 = vld [vmem:[%s16954_s29 + $0x1f60] ss:$16 sps:$4 sm:$0xff]   ;;  %v15701_v38 = vld [vmem:[%s16954_s29 + $0x1f68] ss:$16 sps:$4 sm:$0xff]  }
 0x42a   : > { %10703 = vmatprep.subr.bf16.mxu0 %v15615_v39  ;;  %11728 = vmatprep.subr.bf16.mxu1 %v15618_v33  ;;  %v15706_v39 = vld [vmem:[%s16954_s29 + $0x1f84] ss:$16 sps:$4 sm:$0xff]   ;;  %v15709_v33 = vld [vmem:[%s16954_s29 + $0x1f8c] ss:$16 sps:$4 sm:$0xff]  }
 0x42d   : > { %10704 = vmatpush1.bf16.msra.mxu0 %v15613_v43  ;;  %11729 = vmatpush1.bf16.msra.mxu1 %v15616_v44  ;;  %v15704_v43 = vld [vmem:[%s16954_s29 + $0x1f80] ss:$16 sps:$4 sm:$0xff]   ;;  %v15707_v44 = vld [vmem:[%s16954_s29 + $0x1f88] ss:$16 sps:$4 sm:$0xff]  }
 0x42e   : > { %10705 = vmatprep.subr.bf16.mxu0 %v15621_v16  ;;  %11730 = vmatprep.subr.bf16.mxu1 %v15624_v47  ;;  %v15712_v16 = vld [vmem:[%s16954_s29 + $0x1fa4] ss:$16 sps:$4 sm:$0xff]   ;;  %v15715_v47 = vld [vmem:[%s16954_s29 + $0x1fac] ss:$16 sps:$4 sm:$0xff]  }
 0x431   : > { %10706 = vmatpush1.bf16.msra.mxu0 %v15619_v48  ;;  %11731 = vmatpush1.bf16.msra.mxu1 %v15622_v30  ;;  %v15710_v48 = vld [vmem:[%s16954_s29 + $0x1fa0] ss:$16 sps:$4 sm:$0xff]   ;;  %v15713_v30 = vld [vmem:[%s16954_s29 + $0x1fa8] ss:$16 sps:$4 sm:$0xff]  }
 0x432   : > { %10707 = vmatprep.subr.bf16.mxu0 %v15627_v49  ;;  %11732 = vmatprep.subr.bf16.mxu1 %v15630_v50  ;;  %v15718_v49 = vld [vmem:[%s16954_s29 + $0x1fc4] ss:$16 sps:$4 sm:$0xff]   ;;  %v15721_v50 = vld [vmem:[%s16954_s29 + $0x1fcc] ss:$16 sps:$4 sm:$0xff]  }
 0x435   : > { %10708 = vmatpush1.bf16.msra.mxu0 %v15625_v35  ;;  %11733 = vmatpush1.bf16.msra.mxu1 %v15628_v40  ;;  %v18163_v35 = vld [vmem:[%s16970_s4 + $0x20] sm:$0xff]  ;;  %v15716_v40 = vld [vmem:[%s16954_s29 + $0x1fc0] ss:$16 sps:$4 sm:$0xff]  }
 0x436   : > { %10718 = vmatprep.subr.bf16.mxu0 %v15634_v51  ;;  %11743 = vmatprep.subr.bf16.mxu1 %v15637_v52  ;;  %v15719_v51 = vld [vmem:[%s16954_s29 + $0x1fc8] ss:$16 sps:$4 sm:$0xff]   ;;  %v15724_v52 = vld [vmem:[%s16954_s29 + $0x1fe4] ss:$16 sps:$4 sm:$0xff]  }
 0x438   : > { %10710 = vmatmul.mubr.bf16.vlgmr.msra.gmra.mrb[0].mxu0 %v18100_v42  ;;  %11735 = vmatmul.mubr.bf16.vlgmr.msra.gmra.mrb[0].mxu1 %v18100_v42 }
 0x439   : > { %10719 = vmatpush1.bf16.msra.mxu0 %v15632_v45  ;;  %11744 = vmatpush1.bf16.msra.mxu1 %v15635_v54  ;;  %v15727_v45 = vld [vmem:[%s16954_s29 + $0x1fec] ss:$16 sps:$4 sm:$0xff]   ;;  %v18171_v54 = vrot.slane %v18163_v35, %v17025_v5 }
 0x43a   : > { %10720 = vmatprep.subr.bf16.mxu0 %v15640_v56  ;;  %11745 = vmatprep.subr.bf16.mxu1 %v15643_v57  ;;  %v15722_v56 = vld [vmem:[%s16954_s29 + $0x1fe0] ss:$16 sps:$4 sm:$0xff]   ;;  %v15725_v57 = vld [vmem:[%s16954_s29 + $0x1fe8] ss:$16 sps:$4 sm:$0xff]  }
 0x43b   : > { %10750 = vmatprep.mubr.bf16.mxu0 %v2101_v59  ;;  %11775 = vmatprep.mubr.bf16.mxu1 %v2101_v59  ;;  %v15730_v59 = vld [vmem:[%s16954_s29 + $0x2004] ss:$16 sps:$4 sm:$0xff]  }
 0x43d   : > { %10721 = vmatpush1.bf16.msra.mxu0 %v15638_v46  ;;  %11746 = vmatpush1.bf16.msra.mxu1 %v15641_v60  ;;  %v15733_v46 = vld [vmem:[%s16954_s29 + $0x200c] ss:$16 sps:$4 sm:$0xff]   ;;  %v2117_v60 = vcombine.high %v18171_v54, %v18171_v54 }
 0x43e   : > { %10722 = vmatprep.subr.bf16.mxu0 %v15646_v41  ;;  %11747 = vmatprep.subr.bf16.mxu1 %v15649_v61  ;;  %v2099_v41 = vcombine.high %v18100_v42, %v18100_v42  ;;  %v15728_v61 = vld [vmem:[%s16954_s29 + $0x2000] ss:$16 sps:$4 sm:$0xff]  }
 0x43f   : > { %v15734_v42 = vld [vmem:[%s16954_s29 + $0x2020] ss:$16 sps:$4 sm:$0xff]  }
 0x441   : > { %10723 = vmatpush1.bf16.msra.mxu0 %v15644_v53  ;;  %11748 = vmatpush1.bf16.msra.mxu1 %v15647_v62  ;;  %v15731_v53 = vld [vmem:[%s16954_s29 + $0x2008] ss:$16 sps:$4 sm:$0xff]   ;;  %v15736_v62 = vld [vmem:[%s16954_s29 + $0x2024] ss:$16 sps:$4 sm:$0xff]  }
 0x442   : > { %10724 = vmatprep.subr.bf16.mxu0 %v15652_v0  ;;  %11749 = vmatprep.subr.bf16.mxu1 %v15655_v1  ;;  %v15739_v0 = vld [vmem:[%s16954_s29 + $0x202c] ss:$16 sps:$4 sm:$0xff]   ;;  %v18186_v1 = vrot.slane %v2117_v60, %v17025_v5  ;;  %v15815_v60 = vld [vmem:[%s16954_s29 + $0x21c8] ss:$16 sps:$4 sm:$0xff]  }
 0x445   : > { %10725 = vmatpush1.bf16.msra.mxu0 %v15650_v2  ;;  %11750 = vmatpush1.bf16.msra.mxu1 %v15653_v3  ;;  %v15737_v2 = vld [vmem:[%s16954_s29 + $0x2028] ss:$16 sps:$4 sm:$0xff]   ;;  %v15742_v3 = vld [vmem:[%s16954_s29 + $0x2044] ss:$16 sps:$4 sm:$0xff]  }
 0x446   : > { %10726 = vmatprep.subr.bf16.mxu0 %v15658_v6  ;;  %11751 = vmatprep.subr.bf16.mxu1 %v15661_v7  ;;  %v15745_v6 = vld [vmem:[%s16954_s29 + $0x204c] ss:$16 sps:$4 sm:$0xff]   ;;  %v15740_v7 = vld [vmem:[%s16954_s29 + $0x2040] ss:$16 sps:$4 sm:$0xff]  }
 0x449   : > { %10727 = vmatpush1.bf16.msra.mxu0 %v15656_v9  ;;  %11752 = vmatpush1.bf16.msra.mxu1 %v15659_v10  ;;  %v15743_v9 = vld [vmem:[%s16954_s29 + $0x2048] ss:$16 sps:$4 sm:$0xff]   ;;  %v15748_v10 = vld [vmem:[%s16954_s29 + $0x2064] ss:$16 sps:$4 sm:$0xff]  }
 0x44a   : > { %10728 = vmatprep.subr.bf16.mxu0 %v15664_v11  ;;  %11753 = vmatprep.subr.bf16.mxu1 %v15667_v58  ;;  %v15751_v11 = vld [vmem:[%s16954_s29 + $0x206c] ss:$16 sps:$4 sm:$0xff]   ;;  %v15746_v58 = vld [vmem:[%s16954_s29 + $0x2060] ss:$16 sps:$4 sm:$0xff]  }
 0x44d   : > { %10729 = vmatpush1.bf16.msra.mxu0 %v15662_v12  ;;  %11754 = vmatpush1.bf16.msra.mxu1 %v15665_v13  ;;  %v15749_v12 = vld [vmem:[%s16954_s29 + $0x2068] ss:$16 sps:$4 sm:$0xff]   ;;  %v15754_v13 = vld [vmem:[%s16954_s29 + $0x2084] ss:$16 sps:$4 sm:$0xff]  }
 0x44e   : > { %10730 = vmatprep.subr.bf16.mxu0 %v15670_v14  ;;  %11755 = vmatprep.subr.bf16.mxu1 %v15673_v4  ;;  %v15757_v14 = vld [vmem:[%s16954_s29 + $0x208c] ss:$16 sps:$4 sm:$0xff]   ;;  %v15752_v4 = vld [vmem:[%s16954_s29 + $0x2080] ss:$16 sps:$4 sm:$0xff]  }
 0x451   : > { %10731 = vmatpush1.bf16.msra.mxu0 %v15668_v15  ;;  %11756 = vmatpush1.bf16.msra.mxu1 %v15671_v17  ;;  %v15755_v15 = vld [vmem:[%s16954_s29 + $0x2088] ss:$16 sps:$4 sm:$0xff]   ;;  %v15760_v17 = vld [vmem:[%s16954_s29 + $0x20a4] ss:$16 sps:$4 sm:$0xff]  }
 0x452   : > { %10732 = vmatprep.subr.bf16.mxu0 %v15676_v18  ;;  %11757 = vmatprep.subr.bf16.mxu1 %v15679_v20  ;;  %v15763_v18 = vld [vmem:[%s16954_s29 + $0x20ac] ss:$16 sps:$4 sm:$0xff]   ;;  %v15758_v20 = vld [vmem:[%s16954_s29 + $0x20a0] ss:$16 sps:$4 sm:$0xff]  }
 0x455   : > { %10733 = vmatpush1.bf16.msra.mxu0 %v15674_v21  ;;  %11758 = vmatpush1.bf16.msra.mxu1 %v15677_v55  ;;  %v15761_v21 = vld [vmem:[%s16954_s29 + $0x20a8] ss:$16 sps:$4 sm:$0xff]   ;;  %v15766_v55 = vld [vmem:[%s16954_s29 + $0x20c4] ss:$16 sps:$4 sm:$0xff]  }
 0x456   : > { %10734 = vmatprep.subr.bf16.mxu0 %v15682_v22  ;;  %11759 = vmatprep.subr.bf16.mxu1 %v15685_v23  ;;  %v15769_v22 = vld [vmem:[%s16954_s29 + $0x20cc] ss:$16 sps:$4 sm:$0xff]   ;;  %v15764_v23 = vld [vmem:[%s16954_s29 + $0x20c0] ss:$16 sps:$4 sm:$0xff]  }
 0x459   : > { %10735 = vmatpush1.bf16.msra.mxu0 %v15680_v24  ;;  %11760 = vmatpush1.bf16.msra.mxu1 %v15683_v25  ;;  %v15767_v24 = vld [vmem:[%s16954_s29 + $0x20c8] ss:$16 sps:$4 sm:$0xff]   ;;  %v15772_v25 = vld [vmem:[%s16954_s29 + $0x20e4] ss:$16 sps:$4 sm:$0xff]  }
 0x45a   : > { %10736 = vmatprep.subr.bf16.mxu0 %v15688_v26  ;;  %11761 = vmatprep.subr.bf16.mxu1 %v15691_v27  ;;  %v15775_v26 = vld [vmem:[%s16954_s29 + $0x20ec] ss:$16 sps:$4 sm:$0xff]   ;;  %v15770_v27 = vld [vmem:[%s16954_s29 + $0x20e0] ss:$16 sps:$4 sm:$0xff]  }
 0x45d   : > { %10737 = vmatpush1.bf16.msra.mxu0 %v15686_v29  ;;  %11762 = vmatpush1.bf16.msra.mxu1 %v15689_v31  ;;  %v15773_v29 = vld [vmem:[%s16954_s29 + $0x20e8] ss:$16 sps:$4 sm:$0xff]   ;;  %v15778_v31 = vld [vmem:[%s16954_s29 + $0x2104] ss:$16 sps:$4 sm:$0xff]  }
 0x45e   : > { %10738 = vmatprep.subr.bf16.mxu0 %v15694_v32  ;;  %11763 = vmatprep.subr.bf16.mxu1 %v15697_v34  ;;  %v15781_v32 = vld [vmem:[%s16954_s29 + $0x210c] ss:$16 sps:$4 sm:$0xff]   ;;  %v15776_v34 = vld [vmem:[%s16954_s29 + $0x2100] ss:$16 sps:$4 sm:$0xff]  }
 0x461   : > { %10739 = vmatpush1.bf16.msra.mxu0 %v15692_v19  ;;  %11764 = vmatpush1.bf16.msra.mxu1 %v15695_v36  ;;  %v15779_v19 = vld [vmem:[%s16954_s29 + $0x2108] ss:$16 sps:$4 sm:$0xff]   ;;  %v15784_v36 = vld [vmem:[%s16954_s29 + $0x2124] ss:$16 sps:$4 sm:$0xff]  }
 0x462   : > { %10740 = vmatprep.subr.bf16.mxu0 %v15700_v8  ;;  %11765 = vmatprep.subr.bf16.mxu1 %v15703_v37  ;;  %v15787_v8 = vld [vmem:[%s16954_s29 + $0x212c] ss:$16 sps:$4 sm:$0xff]   ;;  %v15782_v37 = vld [vmem:[%s16954_s29 + $0x2120] ss:$16 sps:$4 sm:$0xff]  }
 0x465   : > { %10741 = vmatpush1.bf16.msra.mxu0 %v15698_v28  ;;  %11766 = vmatpush1.bf16.msra.mxu1 %v15701_v38  ;;  %v15785_v28 = vld [vmem:[%s16954_s29 + $0x2128] ss:$16 sps:$4 sm:$0xff]   ;;  %v15790_v38 = vld [vmem:[%s16954_s29 + $0x2144] ss:$16 sps:$4 sm:$0xff]  }
 0x466   : > { %10742 = vmatprep.subr.bf16.mxu0 %v15706_v39  ;;  %11767 = vmatprep.subr.bf16.mxu1 %v15709_v33  ;;  %v15793_v39 = vld [vmem:[%s16954_s29 + $0x214c] ss:$16 sps:$4 sm:$0xff]   ;;  %v15788_v33 = vld [vmem:[%s16954_s29 + $0x2140] ss:$16 sps:$4 sm:$0xff]  }
 0x469   : > { %10743 = vmatpush1.bf16.msra.mxu0 %v15704_v43  ;;  %11768 = vmatpush1.bf16.msra.mxu1 %v15707_v44  ;;  %v15791_v43 = vld [vmem:[%s16954_s29 + $0x2148] ss:$16 sps:$4 sm:$0xff]   ;;  %v15796_v44 = vld [vmem:[%s16954_s29 + $0x2164] ss:$16 sps:$4 sm:$0xff]  }
 0x46a   : > { %10744 = vmatprep.subr.bf16.mxu0 %v15712_v16  ;;  %11769 = vmatprep.subr.bf16.mxu1 %v15715_v47  ;;  %v15799_v16 = vld [vmem:[%s16954_s29 + $0x216c] ss:$16 sps:$4 sm:$0xff]   ;;  %v15794_v47 = vld [vmem:[%s16954_s29 + $0x2160] ss:$16 sps:$4 sm:$0xff]  }
 0x46d   : > { %10745 = vmatpush1.bf16.msra.mxu0 %v15710_v48  ;;  %11770 = vmatpush1.bf16.msra.mxu1 %v15713_v30  ;;  %v15797_v48 = vld [vmem:[%s16954_s29 + $0x2168] ss:$16 sps:$4 sm:$0xff]   ;;  %v15802_v30 = vld [vmem:[%s16954_s29 + $0x2184] ss:$16 sps:$4 sm:$0xff]  }
 0x46e   : > { %10746 = vmatprep.subr.bf16.mxu0 %v15718_v49  ;;  %11771 = vmatprep.subr.bf16.mxu1 %v15721_v50  ;;  %v15805_v49 = vld [vmem:[%s16954_s29 + $0x218c] ss:$16 sps:$4 sm:$0xff]   ;;  %v15800_v50 = vld [vmem:[%s16954_s29 + $0x2180] ss:$16 sps:$4 sm:$0xff]  }
 0x471   : > { %10747 = vmatpush1.bf16.msra.mxu0 %v15716_v40  ;;  %11772 = vmatpush1.bf16.msra.mxu1 %v15719_v51  ;;  %v15803_v40 = vld [vmem:[%s16954_s29 + $0x2188] ss:$16 sps:$4 sm:$0xff]   ;;  %v15808_v51 = vld [vmem:[%s16954_s29 + $0x21a4] ss:$16 sps:$4 sm:$0xff]  }
 0x472   : > { %10748 = vmatprep.subr.bf16.mxu0 %v15724_v52  ;;  %11773 = vmatprep.subr.bf16.mxu1 %v15727_v45  ;;  %v15811_v52 = vld [vmem:[%s16954_s29 + $0x21ac] ss:$16 sps:$4 sm:$0xff]   ;;  %v15806_v45 = vld [vmem:[%s16954_s29 + $0x21a0] ss:$16 sps:$4 sm:$0xff]  }
 0x475   : > { %10749 = vmatpush1.bf16.msra.mxu0 %v15722_v56  ;;  %11774 = vmatpush1.bf16.msra.mxu1 %v15725_v57  ;;  %v15809_v56 = vld [vmem:[%s16954_s29 + $0x21a8] ss:$16 sps:$4 sm:$0xff]   ;;  %v15814_v57 = vld [vmem:[%s16954_s29 + $0x21c4] ss:$16 sps:$4 sm:$0xff]  }
 0x476   : > { %10759 = vmatprep.subr.bf16.mxu0 %v15730_v59  ;;  %11784 = vmatprep.subr.bf16.mxu1 %v15733_v46  ;;  %v15817_v59 = vld [vmem:[%s16954_s29 + $0x21cc] ss:$16 sps:$4 sm:$0xff]   ;;  %v15812_v46 = vld [vmem:[%s16954_s29 + $0x21c0] ss:$16 sps:$4 sm:$0xff]  }
 0x478   : > { %10751 = vmatmul.mubr.bf16.vlgmr.msra.gmra.mrb[0].mxu0 %v2099_v41  ;;  %11776 = vmatmul.mubr.bf16.vlgmr.msra.gmra.mrb[0].mxu1 %v2099_v41  ;;  %v15820_v41 = vld [vmem:[%s16954_s29 + $0x21e4] ss:$16 sps:$4 sm:$0xff]  }
 0x479   : > { %10760 = vmatpush1.bf16.msra.mxu0 %v15728_v61  ;;  %11785 = vmatpush1.bf16.msra.mxu1 %v15731_v53  ;;  %v15823_v61 = vld [vmem:[%s16954_s29 + $0x21ec] ss:$16 sps:$4 sm:$0xff]   ;;  %v15818_v53 = vld [vmem:[%s16954_s29 + $0x21e0] ss:$16 sps:$4 sm:$0xff]  }
 0x47a   : > { %10761 = vmatprep.subr.bf16.mxu0 %v15736_v62  ;;  %11786 = vmatprep.subr.bf16.mxu1 %v15739_v0  ;;  %v15821_v62 = vld [vmem:[%s16954_s29 + $0x21e8] ss:$16 sps:$4 sm:$0xff]   ;;  %v15826_v0 = vld [vmem:[%s16954_s29 + $0x2204] ss:$16 sps:$4 sm:$0xff]  }
 0x47b   : > { %10791 = vmatprep.mubr.bf16.mxu0 %v18186_v1  ;;  %11816 = vmatprep.mubr.bf16.mxu1 %v18186_v1 }
 0x47d   : > { %10762 = vmatpush1.bf16.msra.mxu0 %v15734_v42  ;;  %11787 = vmatpush1.bf16.msra.mxu1 %v15737_v2  ;;  %v15829_v42 = vld [vmem:[%s16954_s29 + $0x220c] ss:$16 sps:$4 sm:$0xff]   ;;  %v18252_v2 = vrot.slane %v18171_v54, %v17025_v5  ;;  %v15830_v54 = vld [vmem:[%s16954_s29 + $0x2220] ss:$16 sps:$4 sm:$0xff]  }
 0x47e   : > { %10763 = vmatprep.subr.bf16.mxu0 %v15742_v3  ;;  %11788 = vmatprep.subr.bf16.mxu1 %v15745_v6  ;;  %v15824_v3 = vld [vmem:[%s16954_s29 + $0x2200] ss:$16 sps:$4 sm:$0xff]   ;;  %v15827_v6 = vld [vmem:[%s16954_s29 + $0x2208] ss:$16 sps:$4 sm:$0xff]  }
 0x481   : > { %10764 = vmatpush1.bf16.msra.mxu0 %v15740_v7  ;;  %11789 = vmatpush1.bf16.msra.mxu1 %v15743_v9  ;;  %v15832_v7 = vld [vmem:[%s16954_s29 + $0x2224] ss:$16 sps:$4 sm:$0xff]   ;;  %v15835_v9 = vld [vmem:[%s16954_s29 + $0x222c] ss:$16 sps:$4 sm:$0xff]  }
 0x482   : > { %10765 = vmatprep.subr.bf16.mxu0 %v15748_v10  ;;  %11790 = vmatprep.subr.bf16.mxu1 %v15751_v11  ;;  %v2149_v10 = vcombine.high %v18186_v1, %v18186_v1  ;;  %v15833_v11 = vld [vmem:[%s16954_s29 + $0x2228] ss:$16 sps:$4 sm:$0xff]   ;;  %v15836_v1 = vld [vmem:[%s16954_s29 + $0x2240] ss:$16 sps:$4 sm:$0xff]  }
 0x485   : > { %10766 = vmatpush1.bf16.msra.mxu0 %v15746_v58  ;;  %11791 = vmatpush1.bf16.msra.mxu1 %v15749_v12  ;;  %v15838_v58 = vld [vmem:[%s16954_s29 + $0x2244] ss:$16 sps:$4 sm:$0xff]   ;;  %v15841_v12 = vld [vmem:[%s16954_s29 + $0x224c] ss:$16 sps:$4 sm:$0xff]  }
 0x486   : > { %10767 = vmatprep.subr.bf16.mxu0 %v15754_v13  ;;  %11792 = vmatprep.subr.bf16.mxu1 %v15757_v14  ;;  %v15839_v13 = vld [vmem:[%s16954_s29 + $0x2248] ss:$16 sps:$4 sm:$0xff]   ;;  %v15844_v14 = vld [vmem:[%s16954_s29 + $0x2264] ss:$16 sps:$4 sm:$0xff]  }
 0x489   : > { %10768 = vmatpush1.bf16.msra.mxu0 %v15752_v4  ;;  %11793 = vmatpush1.bf16.msra.mxu1 %v15755_v15  ;;  %v15847_v4 = vld [vmem:[%s16954_s29 + $0x226c] ss:$16 sps:$4 sm:$0xff]   ;;  %v15842_v15 = vld [vmem:[%s16954_s29 + $0x2260] ss:$16 sps:$4 sm:$0xff]  }
 0x48a   : > { %10769 = vmatprep.subr.bf16.mxu0 %v15760_v17  ;;  %11794 = vmatprep.subr.bf16.mxu1 %v15763_v18  ;;  %v15845_v17 = vld [vmem:[%s16954_s29 + $0x2268] ss:$16 sps:$4 sm:$0xff]   ;;  %v15850_v18 = vld [vmem:[%s16954_s29 + $0x2284] ss:$16 sps:$4 sm:$0xff]  }
 0x48d   : > { %10770 = vmatpush1.bf16.msra.mxu0 %v15758_v20  ;;  %11795 = vmatpush1.bf16.msra.mxu1 %v15761_v21  ;;  %v15853_v20 = vld [vmem:[%s16954_s29 + $0x228c] ss:$16 sps:$4 sm:$0xff]   ;;  %v15848_v21 = vld [vmem:[%s16954_s29 + $0x2280] ss:$16 sps:$4 sm:$0xff]  }
 0x48e   : > { %10771 = vmatprep.subr.bf16.mxu0 %v15766_v55  ;;  %11796 = vmatprep.subr.bf16.mxu1 %v15769_v22  ;;  %v15851_v55 = vld [vmem:[%s16954_s29 + $0x2288] ss:$16 sps:$4 sm:$0xff]   ;;  %v15856_v22 = vld [vmem:[%s16954_s29 + $0x22a4] ss:$16 sps:$4 sm:$0xff]  }
 0x491   : > { %10772 = vmatpush1.bf16.msra.mxu0 %v15764_v23  ;;  %11797 = vmatpush1.bf16.msra.mxu1 %v15767_v24  ;;  %v15859_v23 = vld [vmem:[%s16954_s29 + $0x22ac] ss:$16 sps:$4 sm:$0xff]   ;;  %v15854_v24 = vld [vmem:[%s16954_s29 + $0x22a0] ss:$16 sps:$4 sm:$0xff]  }
 0x492   : > { %10773 = vmatprep.subr.bf16.mxu0 %v15772_v25  ;;  %11798 = vmatprep.subr.bf16.mxu1 %v15775_v26  ;;  %v15857_v25 = vld [vmem:[%s16954_s29 + $0x22a8] ss:$16 sps:$4 sm:$0xff]   ;;  %v15862_v26 = vld [vmem:[%s16954_s29 + $0x22c4] ss:$16 sps:$4 sm:$0xff]  }
 0x495   : > { %10774 = vmatpush1.bf16.msra.mxu0 %v15770_v27  ;;  %11799 = vmatpush1.bf16.msra.mxu1 %v15773_v29  ;;  %v15865_v27 = vld [vmem:[%s16954_s29 + $0x22cc] ss:$16 sps:$4 sm:$0xff]   ;;  %v15860_v29 = vld [vmem:[%s16954_s29 + $0x22c0] ss:$16 sps:$4 sm:$0xff]  }
 0x496   : > { %10775 = vmatprep.subr.bf16.mxu0 %v15778_v31  ;;  %11800 = vmatprep.subr.bf16.mxu1 %v15781_v32  ;;  %v15863_v31 = vld [vmem:[%s16954_s29 + $0x22c8] ss:$16 sps:$4 sm:$0xff]   ;;  %v15868_v32 = vld [vmem:[%s16954_s29 + $0x22e4] ss:$16 sps:$4 sm:$0xff]  }
 0x499   : > { %10776 = vmatpush1.bf16.msra.mxu0 %v15776_v34  ;;  %11801 = vmatpush1.bf16.msra.mxu1 %v15779_v19  ;;  %v15871_v34 = vld [vmem:[%s16954_s29 + $0x22ec] ss:$16 sps:$4 sm:$0xff]   ;;  %v15866_v19 = vld [vmem:[%s16954_s29 + $0x22e0] ss:$16 sps:$4 sm:$0xff]  }
 0x49a   : > { %10777 = vmatprep.subr.bf16.mxu0 %v15784_v36  ;;  %11802 = vmatprep.subr.bf16.mxu1 %v15787_v8  ;;  %v15869_v36 = vld [vmem:[%s16954_s29 + $0x22e8] ss:$16 sps:$4 sm:$0xff]   ;;  %v15874_v8 = vld [vmem:[%s16954_s29 + $0x2304] ss:$16 sps:$4 sm:$0xff]  }
 0x49d   : > { %10778 = vmatpush1.bf16.msra.mxu0 %v15782_v37  ;;  %11803 = vmatpush1.bf16.msra.mxu1 %v15785_v28  ;;  %v15877_v37 = vld [vmem:[%s16954_s29 + $0x230c] ss:$16 sps:$4 sm:$0xff]   ;;  %v15872_v28 = vld [vmem:[%s16954_s29 + $0x2300] ss:$16 sps:$4 sm:$0xff]  }
 0x49e   : > { %10779 = vmatprep.subr.bf16.mxu0 %v15790_v38  ;;  %11804 = vmatprep.subr.bf16.mxu1 %v15793_v39  ;;  %v15875_v38 = vld [vmem:[%s16954_s29 + $0x2308] ss:$16 sps:$4 sm:$0xff]   ;;  %v15880_v39 = vld [vmem:[%s16954_s29 + $0x2324] ss:$16 sps:$4 sm:$0xff]  }
 0x4a1   : > { %10780 = vmatpush1.bf16.msra.mxu0 %v15788_v33  ;;  %11805 = vmatpush1.bf16.msra.mxu1 %v15791_v43  ;;  %v15883_v33 = vld [vmem:[%s16954_s29 + $0x232c] ss:$16 sps:$4 sm:$0xff]   ;;  %v15878_v43 = vld [vmem:[%s16954_s29 + $0x2320] ss:$16 sps:$4 sm:$0xff]  }
 0x4a2   : > { %10781 = vmatprep.subr.bf16.mxu0 %v15796_v44  ;;  %11806 = vmatprep.subr.bf16.mxu1 %v15799_v16  ;;  %v15881_v44 = vld [vmem:[%s16954_s29 + $0x2328] ss:$16 sps:$4 sm:$0xff]   ;;  %v15886_v16 = vld [vmem:[%s16954_s29 + $0x2344] ss:$16 sps:$4 sm:$0xff]  }
 0x4a5   : > { %10782 = vmatpush1.bf16.msra.mxu0 %v15794_v47  ;;  %11807 = vmatpush1.bf16.msra.mxu1 %v15797_v48  ;;  %v15889_v47 = vld [vmem:[%s16954_s29 + $0x234c] ss:$16 sps:$4 sm:$0xff]   ;;  %v15884_v48 = vld [vmem:[%s16954_s29 + $0x2340] ss:$16 sps:$4 sm:$0xff]  }
 0x4a6   : > { %10783 = vmatprep.subr.bf16.mxu0 %v15802_v30  ;;  %11808 = vmatprep.subr.bf16.mxu1 %v15805_v49  ;;  %v15887_v30 = vld [vmem:[%s16954_s29 + $0x2348] ss:$16 sps:$4 sm:$0xff]   ;;  %v15892_v49 = vld [vmem:[%s16954_s29 + $0x2364] ss:$16 sps:$4 sm:$0xff]  }
 0x4a9   : > { %10784 = vmatpush1.bf16.msra.mxu0 %v15800_v50  ;;  %11809 = vmatpush1.bf16.msra.mxu1 %v15803_v40  ;;  %v15895_v50 = vld [vmem:[%s16954_s29 + $0x236c] ss:$16 sps:$4 sm:$0xff]   ;;  %v15890_v40 = vld [vmem:[%s16954_s29 + $0x2360] ss:$16 sps:$4 sm:$0xff]  }
 0x4aa   : > { %10785 = vmatprep.subr.bf16.mxu0 %v15808_v51  ;;  %11810 = vmatprep.subr.bf16.mxu1 %v15811_v52  ;;  %v15893_v51 = vld [vmem:[%s16954_s29 + $0x2368] ss:$16 sps:$4 sm:$0xff]   ;;  %v15898_v52 = vld [vmem:[%s16954_s29 + $0x2384] ss:$16 sps:$4 sm:$0xff]  }
 0x4ad   : > { %10786 = vmatpush1.bf16.msra.mxu0 %v15806_v45  ;;  %11811 = vmatpush1.bf16.msra.mxu1 %v15809_v56  ;;  %v15901_v45 = vld [vmem:[%s16954_s29 + $0x238c] ss:$16 sps:$4 sm:$0xff]   ;;  %v15896_v56 = vld [vmem:[%s16954_s29 + $0x2380] ss:$16 sps:$4 sm:$0xff]  }
 0x4ae   : > { %10787 = vmatprep.subr.bf16.mxu0 %v15814_v57  ;;  %11812 = vmatprep.subr.bf16.mxu1 %v15817_v59  ;;  %v15899_v57 = vld [vmem:[%s16954_s29 + $0x2388] ss:$16 sps:$4 sm:$0xff]   ;;  %v15904_v59 = vld [vmem:[%s16954_s29 + $0x23a4] ss:$16 sps:$4 sm:$0xff]  }
 0x4b1   : > { %10788 = vmatpush1.bf16.msra.mxu0 %v15812_v46  ;;  %11813 = vmatpush1.bf16.msra.mxu1 %v15815_v60  ;;  %v15907_v46 = vld [vmem:[%s16954_s29 + $0x23ac] ss:$16 sps:$4 sm:$0xff]   ;;  %v15902_v60 = vld [vmem:[%s16954_s29 + $0x23a0] ss:$16 sps:$4 sm:$0xff]  }
 0x4b2   : > { %10789 = vmatprep.subr.bf16.mxu0 %v15820_v41  ;;  %11814 = vmatprep.subr.bf16.mxu1 %v15823_v61  ;;  %v15905_v41 = vld [vmem:[%s16954_s29 + $0x23a8] ss:$16 sps:$4 sm:$0xff]   ;;  %v15910_v61 = vld [vmem:[%s16954_s29 + $0x23c4] ss:$16 sps:$4 sm:$0xff]  }
 0x4b5   : > { %10790 = vmatpush1.bf16.msra.mxu0 %v15818_v53  ;;  %11815 = vmatpush1.bf16.msra.mxu1 %v15821_v62  ;;  %v15913_v53 = vld [vmem:[%s16954_s29 + $0x23cc] ss:$16 sps:$4 sm:$0xff]   ;;  %v2102_v62 = vcombine.high %v18163_v35, %v18163_v35  ;;  %v15914_v35 = vld [vmem:[%s16954_s29 + $0x23e0] ss:$16 sps:$4 sm:$0xff]  }
 0x4b6   : > { %10800 = vmatprep.subr.bf16.mxu0 %v15826_v0  ;;  %11825 = vmatprep.subr.bf16.mxu1 %v15829_v42  ;;  %v15908_v0 = vld [vmem:[%s16954_s29 + $0x23c0] ss:$16 sps:$4 sm:$0xff]   ;;  %v15911_v42 = vld [vmem:[%s16954_s29 + $0x23c8] ss:$16 sps:$4 sm:$0xff]  }
 0x4b8   : > { %10792 = vmatmul.mubr.bf16.vlgmr.msra.gmra.mrb[0].mxu0 %v18252_v2  ;;  %11817 = vmatmul.mubr.bf16.vlgmr.msra.gmra.mrb[0].mxu1 %v18252_v2 }
 0x4b9   : > { %10801 = vmatpush1.bf16.msra.mxu0 %v15824_v3  ;;  %11826 = vmatpush1.bf16.msra.mxu1 %v15827_v6  ;;  %v15916_v3 = vld [vmem:[%s16954_s29 + $0x23e4] ss:$16 sps:$4 sm:$0xff]   ;;  %v15919_v6 = vld [vmem:[%s16954_s29 + $0x23ec] ss:$16 sps:$4 sm:$0xff]  }
 0x4ba   : > { %10802 = vmatprep.subr.bf16.mxu0 %v15832_v7  ;;  %11827 = vmatprep.subr.bf16.mxu1 %v15835_v9  ;;  %v18321_v7 = vrot.slane %v2102_v62, %v17025_v5  ;;  %v15917_v9 = vld [vmem:[%s16954_s29 + $0x23e8] ss:$16 sps:$4 sm:$0xff]  }
 0x4bb   : > { %10832 = vmatprep.mubr.bf16.mxu0 %v2149_v10  ;;  %11857 = vmatprep.mubr.bf16.mxu1 %v2149_v10  ;;  %v15922_v10 = vld [vmem:[%s16954_s29 + $0x2404] ss:$16 sps:$4 sm:$0xff]   ;;  %v15995_v62 = vld [vmem:[%s16954_s29 + $0x2588] ss:$16 sps:$4 sm:$0xff]  }
 0x4bd   : > { %10803 = vmatpush1.bf16.msra.mxu0 %v15830_v54  ;;  %11828 = vmatpush1.bf16.msra.mxu1 %v15833_v11  ;;  %v15925_v54 = vld [vmem:[%s16954_s29 + $0x240c] ss:$16 sps:$4 sm:$0xff]   ;;  %v2118_v11 = vcombine.high %v18321_v7, %v18321_v7 }
 0x4be   : > { %10804 = vmatprep.subr.bf16.mxu0 %v15838_v58  ;;  %11829 = vmatprep.subr.bf16.mxu1 %v15841_v12  ;;  %v2147_v58 = vcombine.high %v18252_v2, %v18252_v2  ;;  %v15920_v12 = vld [vmem:[%s16954_s29 + $0x2400] ss:$16 sps:$4 sm:$0xff]  }
 0x4bf   : > { %v15926_v2 = vld [vmem:[%s16954_s29 + $0x2420] ss:$16 sps:$4 sm:$0xff]  }
 0x4c1   : > { %10805 = vmatpush1.bf16.msra.mxu0 %v15836_v1  ;;  %11830 = vmatpush1.bf16.msra.mxu1 %v15839_v13  ;;  %v15923_v1 = vld [vmem:[%s16954_s29 + $0x2408] ss:$16 sps:$4 sm:$0xff]   ;;  %v15928_v13 = vld [vmem:[%s16954_s29 + $0x2424] ss:$16 sps:$4 sm:$0xff]  }
 0x4c2   : > { %10806 = vmatprep.subr.bf16.mxu0 %v15844_v14  ;;  %11831 = vmatprep.subr.bf16.mxu1 %v15847_v4  ;;  %v15931_v14 = vld [vmem:[%s16954_s29 + $0x242c] ss:$16 sps:$4 sm:$0xff]   ;;  %v18336_v4 = vrot.slane %v2118_v11, %v17025_v5  ;;  %v16012_v11 = vld [vmem:[%s16954_s29 + $0x25e4] ss:$16 sps:$4 sm:$0xff]  }
 0x4c5   : > { %10807 = vmatpush1.bf16.msra.mxu0 %v15842_v15  ;;  %11832 = vmatpush1.bf16.msra.mxu1 %v15845_v17  ;;  %v15929_v15 = vld [vmem:[%s16954_s29 + $0x2428] ss:$16 sps:$4 sm:$0xff]   ;;  %v15934_v17 = vld [vmem:[%s16954_s29 + $0x2444] ss:$16 sps:$4 sm:$0xff]  }
 0x4c6   : > { %10808 = vmatprep.subr.bf16.mxu0 %v15850_v18  ;;  %11833 = vmatprep.subr.bf16.mxu1 %v15853_v20  ;;  %v15937_v18 = vld [vmem:[%s16954_s29 + $0x244c] ss:$16 sps:$4 sm:$0xff]   ;;  %v15932_v20 = vld [vmem:[%s16954_s29 + $0x2440] ss:$16 sps:$4 sm:$0xff]  }
 0x4c9   : > { %10809 = vmatpush1.bf16.msra.mxu0 %v15848_v21  ;;  %11834 = vmatpush1.bf16.msra.mxu1 %v15851_v55  ;;  %v15935_v21 = vld [vmem:[%s16954_s29 + $0x2448] ss:$16 sps:$4 sm:$0xff]   ;;  %v15940_v55 = vld [vmem:[%s16954_s29 + $0x2464] ss:$16 sps:$4 sm:$0xff]  }
 0x4ca   : > { %10810 = vmatprep.subr.bf16.mxu0 %v15856_v22  ;;  %11835 = vmatprep.subr.bf16.mxu1 %v15859_v23  ;;  %v15943_v22 = vld [vmem:[%s16954_s29 + $0x246c] ss:$16 sps:$4 sm:$0xff]   ;;  %v15938_v23 = vld [vmem:[%s16954_s29 + $0x2460] ss:$16 sps:$4 sm:$0xff]  }
 0x4cd   : > { %10811 = vmatpush1.bf16.msra.mxu0 %v15854_v24  ;;  %11836 = vmatpush1.bf16.msra.mxu1 %v15857_v25  ;;  %v15941_v24 = vld [vmem:[%s16954_s29 + $0x2468] ss:$16 sps:$4 sm:$0xff]   ;;  %v15946_v25 = vld [vmem:[%s16954_s29 + $0x2484] ss:$16 sps:$4 sm:$0xff]  }
 0x4ce   : > { %10812 = vmatprep.subr.bf16.mxu0 %v15862_v26  ;;  %11837 = vmatprep.subr.bf16.mxu1 %v15865_v27  ;;  %v15949_v26 = vld [vmem:[%s16954_s29 + $0x248c] ss:$16 sps:$4 sm:$0xff]   ;;  %v15944_v27 = vld [vmem:[%s16954_s29 + $0x2480] ss:$16 sps:$4 sm:$0xff]  }
 0x4d1   : > { %10813 = vmatpush1.bf16.msra.mxu0 %v15860_v29  ;;  %11838 = vmatpush1.bf16.msra.mxu1 %v15863_v31  ;;  %v15947_v29 = vld [vmem:[%s16954_s29 + $0x2488] ss:$16 sps:$4 sm:$0xff]   ;;  %v15952_v31 = vld [vmem:[%s16954_s29 + $0x24a4] ss:$16 sps:$4 sm:$0xff]  }
 0x4d2   : > { %10814 = vmatprep.subr.bf16.mxu0 %v15868_v32  ;;  %11839 = vmatprep.subr.bf16.mxu1 %v15871_v34  ;;  %v15955_v32 = vld [vmem:[%s16954_s29 + $0x24ac] ss:$16 sps:$4 sm:$0xff]   ;;  %v15950_v34 = vld [vmem:[%s16954_s29 + $0x24a0] ss:$16 sps:$4 sm:$0xff]  }
 0x4d5   : > { %10815 = vmatpush1.bf16.msra.mxu0 %v15866_v19  ;;  %11840 = vmatpush1.bf16.msra.mxu1 %v15869_v36  ;;  %v15953_v19 = vld [vmem:[%s16954_s29 + $0x24a8] ss:$16 sps:$4 sm:$0xff]   ;;  %v15958_v36 = vld [vmem:[%s16954_s29 + $0x24c4] ss:$16 sps:$4 sm:$0xff]  }
 0x4d6   : > { %10816 = vmatprep.subr.bf16.mxu0 %v15874_v8  ;;  %11841 = vmatprep.subr.bf16.mxu1 %v15877_v37  ;;  %v15961_v8 = vld [vmem:[%s16954_s29 + $0x24cc] ss:$16 sps:$4 sm:$0xff]   ;;  %v15956_v37 = vld [vmem:[%s16954_s29 + $0x24c0] ss:$16 sps:$4 sm:$0xff]  }
 0x4d9   : > { %10817 = vmatpush1.bf16.msra.mxu0 %v15872_v28  ;;  %11842 = vmatpush1.bf16.msra.mxu1 %v15875_v38  ;;  %v15959_v28 = vld [vmem:[%s16954_s29 + $0x24c8] ss:$16 sps:$4 sm:$0xff]   ;;  %v15964_v38 = vld [vmem:[%s16954_s29 + $0x24e4] ss:$16 sps:$4 sm:$0xff]  }
 0x4da   : > { %10818 = vmatprep.subr.bf16.mxu0 %v15880_v39  ;;  %11843 = vmatprep.subr.bf16.mxu1 %v15883_v33  ;;  %v15967_v39 = vld [vmem:[%s16954_s29 + $0x24ec] ss:$16 sps:$4 sm:$0xff]   ;;  %v15962_v33 = vld [vmem:[%s16954_s29 + $0x24e0] ss:$16 sps:$4 sm:$0xff]  }
 0x4dd   : > { %10819 = vmatpush1.bf16.msra.mxu0 %v15878_v43  ;;  %11844 = vmatpush1.bf16.msra.mxu1 %v15881_v44  ;;  %v15965_v43 = vld [vmem:[%s16954_s29 + $0x24e8] ss:$16 sps:$4 sm:$0xff]   ;;  %v15970_v44 = vld [vmem:[%s16954_s29 + $0x2504] ss:$16 sps:$4 sm:$0xff]  }
 0x4de   : > { %10820 = vmatprep.subr.bf16.mxu0 %v15886_v16  ;;  %11845 = vmatprep.subr.bf16.mxu1 %v15889_v47  ;;  %v15973_v16 = vld [vmem:[%s16954_s29 + $0x250c] ss:$16 sps:$4 sm:$0xff]   ;;  %v15968_v47 = vld [vmem:[%s16954_s29 + $0x2500] ss:$16 sps:$4 sm:$0xff]  }
 0x4e1   : > { %10821 = vmatpush1.bf16.msra.mxu0 %v15884_v48  ;;  %11846 = vmatpush1.bf16.msra.mxu1 %v15887_v30  ;;  %v15971_v48 = vld [vmem:[%s16954_s29 + $0x2508] ss:$16 sps:$4 sm:$0xff]   ;;  %v15976_v30 = vld [vmem:[%s16954_s29 + $0x2524] ss:$16 sps:$4 sm:$0xff]  }
 0x4e2   : > { %10822 = vmatprep.subr.bf16.mxu0 %v15892_v49  ;;  %11847 = vmatprep.subr.bf16.mxu1 %v15895_v50  ;;  %v15979_v49 = vld [vmem:[%s16954_s29 + $0x252c] ss:$16 sps:$4 sm:$0xff]   ;;  %v15974_v50 = vld [vmem:[%s16954_s29 + $0x2520] ss:$16 sps:$4 sm:$0xff]  }
 0x4e5   : > { %10823 = vmatpush1.bf16.msra.mxu0 %v15890_v40  ;;  %11848 = vmatpush1.bf16.msra.mxu1 %v15893_v51  ;;  %v15977_v40 = vld [vmem:[%s16954_s29 + $0x2528] ss:$16 sps:$4 sm:$0xff]   ;;  %v15982_v51 = vld [vmem:[%s16954_s29 + $0x2544] ss:$16 sps:$4 sm:$0xff]  }
 0x4e6   : > { %10824 = vmatprep.subr.bf16.mxu0 %v15898_v52  ;;  %11849 = vmatprep.subr.bf16.mxu1 %v15901_v45  ;;  %v15985_v52 = vld [vmem:[%s16954_s29 + $0x254c] ss:$16 sps:$4 sm:$0xff]   ;;  %v15980_v45 = vld [vmem:[%s16954_s29 + $0x2540] ss:$16 sps:$4 sm:$0xff]  }
 0x4e9   : > { %10825 = vmatpush1.bf16.msra.mxu0 %v15896_v56  ;;  %11850 = vmatpush1.bf16.msra.mxu1 %v15899_v57  ;;  %v15983_v56 = vld [vmem:[%s16954_s29 + $0x2548] ss:$16 sps:$4 sm:$0xff]   ;;  %v15988_v57 = vld [vmem:[%s16954_s29 + $0x2564] ss:$16 sps:$4 sm:$0xff]  }
 0x4ea   : > { %10826 = vmatprep.subr.bf16.mxu0 %v15904_v59  ;;  %11851 = vmatprep.subr.bf16.mxu1 %v15907_v46  ;;  %v15991_v59 = vld [vmem:[%s16954_s29 + $0x256c] ss:$16 sps:$4 sm:$0xff]   ;;  %v15986_v46 = vld [vmem:[%s16954_s29 + $0x2560] ss:$16 sps:$4 sm:$0xff]  }
 0x4ed   : > { %10827 = vmatpush1.bf16.msra.mxu0 %v15902_v60  ;;  %11852 = vmatpush1.bf16.msra.mxu1 %v15905_v41  ;;  %v15989_v60 = vld [vmem:[%s16954_s29 + $0x2568] ss:$16 sps:$4 sm:$0xff]   ;;  %v15994_v41 = vld [vmem:[%s16954_s29 + $0x2584] ss:$16 sps:$4 sm:$0xff]  }
 0x4ee   : > { %10828 = vmatprep.subr.bf16.mxu0 %v15910_v61  ;;  %11853 = vmatprep.subr.bf16.mxu1 %v15913_v53  ;;  %v15997_v61 = vld [vmem:[%s16954_s29 + $0x258c] ss:$16 sps:$4 sm:$0xff]   ;;  %v15992_v53 = vld [vmem:[%s16954_s29 + $0x2580] ss:$16 sps:$4 sm:$0xff]  }
 0x4f1   : > { %10829 = vmatpush1.bf16.msra.mxu0 %v15908_v0  ;;  %11854 = vmatpush1.bf16.msra.mxu1 %v15911_v42  ;;  %v16000_v0 = vld [vmem:[%s16954_s29 + $0x25a4] ss:$16 sps:$4 sm:$0xff]   ;;  %v16003_v42 = vld [vmem:[%s16954_s29 + $0x25ac] ss:$16 sps:$4 sm:$0xff]  }
 0x4f2   : > { %10830 = vmatprep.subr.bf16.mxu0 %v15916_v3  ;;  %11855 = vmatprep.subr.bf16.mxu1 %v15919_v6  ;;  %v15998_v3 = vld [vmem:[%s16954_s29 + $0x25a0] ss:$16 sps:$4 sm:$0xff]   ;;  %v16001_v6 = vld [vmem:[%s16954_s29 + $0x25a8] ss:$16 sps:$4 sm:$0xff]  }
 0x4f5   : > { %10831 = vmatpush1.bf16.msra.mxu0 %v15914_v35  ;;  %11856 = vmatpush1.bf16.msra.mxu1 %v15917_v9  ;;  %v16006_v35 = vld [vmem:[%s16954_s29 + $0x25c4] ss:$16 sps:$4 sm:$0xff]   ;;  %v16009_v9 = vld [vmem:[%s16954_s29 + $0x25cc] ss:$16 sps:$4 sm:$0xff]  }
 0x4f6   : > { %10841 = vmatprep.subr.bf16.mxu0 %v15922_v10  ;;  %11866 = vmatprep.subr.bf16.mxu1 %v15925_v54  ;;  %v16004_v10 = vld [vmem:[%s16954_s29 + $0x25c0] ss:$16 sps:$4 sm:$0xff]   ;;  %v16007_v54 = vld [vmem:[%s16954_s29 + $0x25c8] ss:$16 sps:$4 sm:$0xff]  }
 0x4f8   : > { %10833 = vmatmul.mubr.bf16.vlgmr.msra.gmra.mrb[0].mxu0 %v2147_v58  ;;  %11858 = vmatmul.mubr.bf16.vlgmr.msra.gmra.mrb[0].mxu1 %v2147_v58  ;;  %v16015_v58 = vld [vmem:[%s16954_s29 + $0x25ec] ss:$16 sps:$4 sm:$0xff]  }
 0x4f9   : > { %10842 = vmatpush1.bf16.msra.mxu0 %v15920_v12  ;;  %11867 = vmatpush1.bf16.msra.mxu1 %v15923_v1  ;;  %v16010_v12 = vld [vmem:[%s16954_s29 + $0x25e0] ss:$16 sps:$4 sm:$0xff]   ;;  %v16013_v1 = vld [vmem:[%s16954_s29 + $0x25e8] ss:$16 sps:$4 sm:$0xff]  }
 0x4fa   : > { %10843 = vmatprep.subr.bf16.mxu0 %v15928_v13  ;;  %11868 = vmatprep.subr.bf16.mxu1 %v15931_v14  ;;  %v16019_v13 = vld [vmem:[%s16954_s29 + $0x2604] ss:$16 sps:$4 sm:$0xff]   ;;  %v16022_v14 = vld [vmem:[%s16954_s29 + $0x260c] ss:$16 sps:$4 sm:$0xff]  }
 0x4fb   : > { %10873 = vmatprep.mubr.bf16.mxu0 %v18336_v4  ;;  %11898 = vmatprep.mubr.bf16.mxu1 %v18336_v4 }
 0x4fd   : > { %10844 = vmatpush1.bf16.msra.mxu0 %v15926_v2  ;;  %11869 = vmatpush1.bf16.msra.mxu1 %v15929_v15  ;;  %v18402_v2 = vrot.slane %v18321_v7, %v17025_v5  ;;  %v16017_v15 = vld [vmem:[%s16954_s29 + $0x2600] ss:$16 sps:$4 sm:$0xff]  }
 0x4fe   : > { %10845 = vmatprep.subr.bf16.mxu0 %v15934_v17  ;;  %11870 = vmatprep.subr.bf16.mxu1 %v15937_v18  ;;  %v16020_v17 = vld [vmem:[%s16954_s29 + $0x2608] ss:$16 sps:$4 sm:$0xff]   ;;  %v16025_v18 = vld [vmem:[%s16954_s29 + $0x2624] ss:$16 sps:$4 sm:$0xff]   ;;  %v16023_v7 = vld [vmem:[%s16954_s29 + $0x2620] ss:$16 sps:$4 sm:$0xff]  }
 0x501   : > { %10846 = vmatpush1.bf16.msra.mxu0 %v15932_v20  ;;  %11871 = vmatpush1.bf16.msra.mxu1 %v15935_v21  ;;  %v16028_v20 = vld [vmem:[%s16954_s29 + $0x262c] ss:$16 sps:$4 sm:$0xff]   ;;  %v2150_v21 = vcombine.high %v18336_v4, %v18336_v4  ;;  %v16029_v4 = vld [vmem:[%s16954_s29 + $0x2640] ss:$16 sps:$4 sm:$0xff]  }
 0x502   : > { %10847 = vmatprep.subr.bf16.mxu0 %v15940_v55  ;;  %11872 = vmatprep.subr.bf16.mxu1 %v15943_v22  ;;  %v16026_v55 = vld [vmem:[%s16954_s29 + $0x2628] ss:$16 sps:$4 sm:$0xff]   ;;  %v16031_v22 = vld [vmem:[%s16954_s29 + $0x2644] ss:$16 sps:$4 sm:$0xff]  }
 0x505   : > { %10848 = vmatpush1.bf16.msra.mxu0 %v15938_v23  ;;  %11873 = vmatpush1.bf16.msra.mxu1 %v15941_v24  ;;  %v16034_v23 = vld [vmem:[%s16954_s29 + $0x264c] ss:$16 sps:$4 sm:$0xff]   ;;  %v16032_v24 = vld [vmem:[%s16954_s29 + $0x2648] ss:$16 sps:$4 sm:$0xff]  }
 0x506   : > { %10849 = vmatprep.subr.bf16.mxu0 %v15946_v25  ;;  %11874 = vmatprep.subr.bf16.mxu1 %v15949_v26  ;;  %v16037_v25 = vld [vmem:[%s16954_s29 + $0x2664] ss:$16 sps:$4 sm:$0xff]   ;;  %v16040_v26 = vld [vmem:[%s16954_s29 + $0x266c] ss:$16 sps:$4 sm:$0xff]  }
 0x509   : > { %10850 = vmatpush1.bf16.msra.mxu0 %v15944_v27  ;;  %11875 = vmatpush1.bf16.msra.mxu1 %v15947_v29  ;;  %v16035_v27 = vld [vmem:[%s16954_s29 + $0x2660] ss:$16 sps:$4 sm:$0xff]   ;;  %v16038_v29 = vld [vmem:[%s16954_s29 + $0x2668] ss:$16 sps:$4 sm:$0xff]  }
 0x50a   : > { %10851 = vmatprep.subr.bf16.mxu0 %v15952_v31  ;;  %11876 = vmatprep.subr.bf16.mxu1 %v15955_v32  ;;  %v16043_v31 = vld [vmem:[%s16954_s29 + $0x2684] ss:$16 sps:$4 sm:$0xff]   ;;  %v16046_v32 = vld [vmem:[%s16954_s29 + $0x268c] ss:$16 sps:$4 sm:$0xff]  }
 0x50d   : > { %10852 = vmatpush1.bf16.msra.mxu0 %v15950_v34  ;;  %11877 = vmatpush1.bf16.msra.mxu1 %v15953_v19  ;;  %v16041_v34 = vld [vmem:[%s16954_s29 + $0x2680] ss:$16 sps:$4 sm:$0xff]   ;;  %v16044_v19 = vld [vmem:[%s16954_s29 + $0x2688] ss:$16 sps:$4 sm:$0xff]  }
 0x50e   : > { %10853 = vmatprep.subr.bf16.mxu0 %v15958_v36  ;;  %11878 = vmatprep.subr.bf16.mxu1 %v15961_v8  ;;  %v16049_v36 = vld [vmem:[%s16954_s29 + $0x26a4] ss:$16 sps:$4 sm:$0xff]   ;;  %v16052_v8 = vld [vmem:[%s16954_s29 + $0x26ac] ss:$16 sps:$4 sm:$0xff]  }
 0x511   : > { %10854 = vmatpush1.bf16.msra.mxu0 %v15956_v37  ;;  %11879 = vmatpush1.bf16.msra.mxu1 %v15959_v28  ;;  %v16047_v37 = vld [vmem:[%s16954_s29 + $0x26a0] ss:$16 sps:$4 sm:$0xff]   ;;  %v16050_v28 = vld [vmem:[%s16954_s29 + $0x26a8] ss:$16 sps:$4 sm:$0xff]  }
 0x512   : > { %10855 = vmatprep.subr.bf16.mxu0 %v15964_v38  ;;  %11880 = vmatprep.subr.bf16.mxu1 %v15967_v39  ;;  %v16055_v38 = vld [vmem:[%s16954_s29 + $0x26c4] ss:$16 sps:$4 sm:$0xff]   ;;  %v16058_v39 = vld [vmem:[%s16954_s29 + $0x26cc] ss:$16 sps:$4 sm:$0xff]  }
 0x515   : > { %10856 = vmatpush1.bf16.msra.mxu0 %v15962_v33  ;;  %11881 = vmatpush1.bf16.msra.mxu1 %v15965_v43  ;;  %v16053_v33 = vld [vmem:[%s16954_s29 + $0x26c0] ss:$16 sps:$4 sm:$0xff]   ;;  %v16056_v43 = vld [vmem:[%s16954_s29 + $0x26c8] ss:$16 sps:$4 sm:$0xff]  }
 0x516   : > { %10857 = vmatprep.subr.bf16.mxu0 %v15970_v44  ;;  %11882 = vmatprep.subr.bf16.mxu1 %v15973_v16  ;;  %v16061_v44 = vld [vmem:[%s16954_s29 + $0x26e4] ss:$16 sps:$4 sm:$0xff]   ;;  %v16064_v16 = vld [vmem:[%s16954_s29 + $0x26ec] ss:$16 sps:$4 sm:$0xff]  }
 0x519   : > { %10858 = vmatpush1.bf16.msra.mxu0 %v15968_v47  ;;  %11883 = vmatpush1.bf16.msra.mxu1 %v15971_v48  ;;  %v16059_v47 = vld [vmem:[%s16954_s29 + $0x26e0] ss:$16 sps:$4 sm:$0xff]   ;;  %v16062_v48 = vld [vmem:[%s16954_s29 + $0x26e8] ss:$16 sps:$4 sm:$0xff]  }
 0x51a   : > { %10859 = vmatprep.subr.bf16.mxu0 %v15976_v30  ;;  %11884 = vmatprep.subr.bf16.mxu1 %v15979_v49  ;;  %v16067_v30 = vld [vmem:[%s16954_s29 + $0x2704] ss:$16 sps:$4 sm:$0xff]   ;;  %v16070_v49 = vld [vmem:[%s16954_s29 + $0x270c] ss:$16 sps:$4 sm:$0xff]  }
 0x51d   : > { %10860 = vmatpush1.bf16.msra.mxu0 %v15974_v50  ;;  %11885 = vmatpush1.bf16.msra.mxu1 %v15977_v40  ;;  %v16065_v50 = vld [vmem:[%s16954_s29 + $0x2700] ss:$16 sps:$4 sm:$0xff]   ;;  %v16068_v40 = vld [vmem:[%s16954_s29 + $0x2708] ss:$16 sps:$4 sm:$0xff]  }
 0x51e   : > { %10861 = vmatprep.subr.bf16.mxu0 %v15982_v51  ;;  %11886 = vmatprep.subr.bf16.mxu1 %v15985_v52  ;;  %v16073_v51 = vld [vmem:[%s16954_s29 + $0x2724] ss:$16 sps:$4 sm:$0xff]   ;;  %v16076_v52 = vld [vmem:[%s16954_s29 + $0x272c] ss:$16 sps:$4 sm:$0xff]  }
 0x521   : > { %10862 = vmatpush1.bf16.msra.mxu0 %v15980_v45  ;;  %11887 = vmatpush1.bf16.msra.mxu1 %v15983_v56  ;;  %v16071_v45 = vld [vmem:[%s16954_s29 + $0x2720] ss:$16 sps:$4 sm:$0xff]   ;;  %v16074_v56 = vld [vmem:[%s16954_s29 + $0x2728] ss:$16 sps:$4 sm:$0xff]  }
 0x522   : > { %10863 = vmatprep.subr.bf16.mxu0 %v15988_v57  ;;  %11888 = vmatprep.subr.bf16.mxu1 %v15991_v59  ;;  %v16079_v57 = vld [vmem:[%s16954_s29 + $0x2744] ss:$16 sps:$4 sm:$0xff]   ;;  %v16082_v59 = vld [vmem:[%s16954_s29 + $0x274c] ss:$16 sps:$4 sm:$0xff]  }
 0x525   : > { %10864 = vmatpush1.bf16.msra.mxu0 %v15986_v46  ;;  %11889 = vmatpush1.bf16.msra.mxu1 %v15989_v60  ;;  %v16077_v46 = vld [vmem:[%s16954_s29 + $0x2740] ss:$16 sps:$4 sm:$0xff]   ;;  %v16080_v60 = vld [vmem:[%s16954_s29 + $0x2748] ss:$16 sps:$4 sm:$0xff]  }
 0x526   : > { %10865 = vmatprep.subr.bf16.mxu0 %v15994_v41  ;;  %11890 = vmatprep.subr.bf16.mxu1 %v15997_v61  ;;  %v16085_v41 = vld [vmem:[%s16954_s29 + $0x2764] ss:$16 sps:$4 sm:$0xff]   ;;  %v16088_v61 = vld [vmem:[%s16954_s29 + $0x276c] ss:$16 sps:$4 sm:$0xff]  }
 0x529   : > { %10866 = vmatpush1.bf16.msra.mxu0 %v15992_v53  ;;  %11891 = vmatpush1.bf16.msra.mxu1 %v15995_v62  ;;  %v16083_v53 = vld [vmem:[%s16954_s29 + $0x2760] ss:$16 sps:$4 sm:$0xff]   ;;  %v16086_v62 = vld [vmem:[%s16954_s29 + $0x2768] ss:$16 sps:$4 sm:$0xff]  }
 0x52a   : > { %10867 = vmatprep.subr.bf16.mxu0 %v16000_v0  ;;  %11892 = vmatprep.subr.bf16.mxu1 %v16003_v42  ;;  %v16091_v0 = vld [vmem:[%s16954_s29 + $0x2784] ss:$16 sps:$4 sm:$0xff]   ;;  %v16094_v42 = vld [vmem:[%s16954_s29 + $0x278c] ss:$16 sps:$4 sm:$0xff]  }
 0x52d   : > { %10868 = vmatpush1.bf16.msra.mxu0 %v15998_v3  ;;  %11893 = vmatpush1.bf16.msra.mxu1 %v16001_v6  ;;  %v16089_v3 = vld [vmem:[%s16954_s29 + $0x2780] ss:$16 sps:$4 sm:$0xff]   ;;  %v16092_v6 = vld [vmem:[%s16954_s29 + $0x2788] ss:$16 sps:$4 sm:$0xff]  }
 0x52e   : > { %10869 = vmatprep.subr.bf16.mxu0 %v16006_v35  ;;  %11894 = vmatprep.subr.bf16.mxu1 %v16009_v9  ;;  %v16097_v35 = vld [vmem:[%s16954_s29 + $0x27a4] ss:$16 sps:$4 sm:$0xff]   ;;  %v16100_v9 = vld [vmem:[%s16954_s29 + $0x27ac] ss:$16 sps:$4 sm:$0xff]  }
 0x531   : > { %10870 = vmatpush1.bf16.msra.mxu0 %v16004_v10  ;;  %11895 = vmatpush1.bf16.msra.mxu1 %v16007_v54  ;;  %v16095_v10 = vld [vmem:[%s16954_s29 + $0x27a0] ss:$16 sps:$4 sm:$0xff]   ;;  %v16098_v54 = vld [vmem:[%s16954_s29 + $0x27a8] ss:$16 sps:$4 sm:$0xff]  }
 0x532   : > { %10871 = vmatprep.subr.bf16.mxu0 %v16012_v11  ;;  %11896 = vmatprep.subr.bf16.mxu1 %v16015_v58  ;;  %v16103_v11 = vld [vmem:[%s16954_s29 + $0x27c4] ss:$16 sps:$4 sm:$0xff]   ;;  %v16106_v58 = vld [vmem:[%s16954_s29 + $0x27cc] ss:$16 sps:$4 sm:$0xff]  }
 0x535   : > { %10872 = vmatpush1.bf16.msra.mxu0 %v16010_v12  ;;  %11897 = vmatpush1.bf16.msra.mxu1 %v16013_v1  ;;  %v18465_v12 = vld [vmem:[%s16970_s4 + $0x28] sm:$0xff] }
 0x536   : > { %10882 = vmatprep.subr.bf16.mxu0 %v16019_v13  ;;  %11907 = vmatprep.subr.bf16.mxu1 %v16022_v14  ;;  %v16101_v1 = vld [vmem:[%s16954_s29 + $0x27c0] ss:$16 sps:$4 sm:$0xff]   ;;  %v16104_v13 = vld [vmem:[%s16954_s29 + $0x27c8] ss:$16 sps:$4 sm:$0xff]   ;;  %v16109_v14 = vld [vmem:[%s16954_s29 + $0x27e4] ss:$16 sps:$4 sm:$0xff]  }
 0x538   : > { %10874 = vmatmul.mubr.bf16.vlgmr.msra.gmra.mrb[0].mxu0 %v18402_v2  ;;  %11899 = vmatmul.mubr.bf16.vlgmr.msra.gmra.mrb[0].mxu1 %v18402_v2 }
 0x539   : > { %10883 = vmatpush1.bf16.msra.mxu0 %v16017_v15  ;;  %11908 = vmatpush1.bf16.msra.mxu1 %v16020_v17  ;;  %v16112_v15 = vld [vmem:[%s16954_s29 + $0x27ec] ss:$16 sps:$4 sm:$0xff]   ;;  %v18473_v17 = vrot.slane %v18465_v12, %v17025_v5 }
 0x53a   : > { %10884 = vmatprep.subr.bf16.mxu0 %v16025_v18  ;;  %11909 = vmatprep.subr.bf16.mxu1 %v16028_v20  ;;  %v16107_v18 = vld [vmem:[%s16954_s29 + $0x27e0] ss:$16 sps:$4 sm:$0xff]   ;;  %v16110_v20 = vld [vmem:[%s16954_s29 + $0x27e8] ss:$16 sps:$4 sm:$0xff]  }
 0x53b   : > { %10914 = vmatprep.mubr.bf16.mxu0 %v2150_v21  ;;  %11939 = vmatprep.mubr.bf16.mxu1 %v2150_v21  ;;  %v16115_v21 = vld [vmem:[%s16954_s29 + $0x2804] ss:$16 sps:$4 sm:$0xff]  }
 0x53d   : > { %10885 = vmatpush1.bf16.msra.mxu0 %v16023_v7  ;;  %11910 = vmatpush1.bf16.msra.mxu1 %v16026_v55  ;;  %v16118_v7 = vld [vmem:[%s16954_s29 + $0x280c] ss:$16 sps:$4 sm:$0xff]   ;;  %v2166_v55 = vcombine.high %v18473_v17, %v18473_v17 }
 0x53e   : > { %10886 = vmatprep.subr.bf16.mxu0 %v16031_v22  ;;  %11911 = vmatprep.subr.bf16.mxu1 %v16034_v23  ;;  %v2148_v22 = vcombine.high %v18402_v2, %v18402_v2  ;;  %v16113_v23 = vld [vmem:[%s16954_s29 + $0x2800] ss:$16 sps:$4 sm:$0xff]  }
 0x53f   : > { %v16119_v2 = vld [vmem:[%s16954_s29 + $0x2820] ss:$16 sps:$4 sm:$0xff]  }
 0x541   : > { %10887 = vmatpush1.bf16.msra.mxu0 %v16029_v4  ;;  %11912 = vmatpush1.bf16.msra.mxu1 %v16032_v24  ;;  %v16116_v4 = vld [vmem:[%s16954_s29 + $0x2808] ss:$16 sps:$4 sm:$0xff]   ;;  %v16121_v24 = vld [vmem:[%s16954_s29 + $0x2824] ss:$16 sps:$4 sm:$0xff]  }
 0x542   : > { %10888 = vmatprep.subr.bf16.mxu0 %v16037_v25  ;;  %11913 = vmatprep.subr.bf16.mxu1 %v16040_v26  ;;  %v16124_v25 = vld [vmem:[%s16954_s29 + $0x282c] ss:$16 sps:$4 sm:$0xff]   ;;  %v18488_v26 = vrot.slane %v2166_v55, %v17025_v5  ;;  %v16200_v55 = vld [vmem:[%s16954_s29 + $0x29c8] ss:$16 sps:$4 sm:$0xff]  }
 0x545   : > { %10889 = vmatpush1.bf16.msra.mxu0 %v16035_v27  ;;  %11914 = vmatpush1.bf16.msra.mxu1 %v16038_v29  ;;  %v16122_v27 = vld [vmem:[%s16954_s29 + $0x2828] ss:$16 sps:$4 sm:$0xff]   ;;  %v16127_v29 = vld [vmem:[%s16954_s29 + $0x2844] ss:$16 sps:$4 sm:$0xff]  }
 0x546   : > { %10890 = vmatprep.subr.bf16.mxu0 %v16043_v31  ;;  %11915 = vmatprep.subr.bf16.mxu1 %v16046_v32  ;;  %v16130_v31 = vld [vmem:[%s16954_s29 + $0x284c] ss:$16 sps:$4 sm:$0xff]   ;;  %v16125_v32 = vld [vmem:[%s16954_s29 + $0x2840] ss:$16 sps:$4 sm:$0xff]  }
 0x549   : > { %10891 = vmatpush1.bf16.msra.mxu0 %v16041_v34  ;;  %11916 = vmatpush1.bf16.msra.mxu1 %v16044_v19  ;;  %v16128_v34 = vld [vmem:[%s16954_s29 + $0x2848] ss:$16 sps:$4 sm:$0xff]   ;;  %v16133_v19 = vld [vmem:[%s16954_s29 + $0x2864] ss:$16 sps:$4 sm:$0xff]  }
 0x54a   : > { %10892 = vmatprep.subr.bf16.mxu0 %v16049_v36  ;;  %11917 = vmatprep.subr.bf16.mxu1 %v16052_v8  ;;  %v16136_v36 = vld [vmem:[%s16954_s29 + $0x286c] ss:$16 sps:$4 sm:$0xff]   ;;  %v16131_v8 = vld [vmem:[%s16954_s29 + $0x2860] ss:$16 sps:$4 sm:$0xff]  }
 0x54d   : > { %10893 = vmatpush1.bf16.msra.mxu0 %v16047_v37  ;;  %11918 = vmatpush1.bf16.msra.mxu1 %v16050_v28  ;;  %v16134_v37 = vld [vmem:[%s16954_s29 + $0x2868] ss:$16 sps:$4 sm:$0xff]   ;;  %v16139_v28 = vld [vmem:[%s16954_s29 + $0x2884] ss:$16 sps:$4 sm:$0xff]  }
 0x54e   : > { %10894 = vmatprep.subr.bf16.mxu0 %v16055_v38  ;;  %11919 = vmatprep.subr.bf16.mxu1 %v16058_v39  ;;  %v16142_v38 = vld [vmem:[%s16954_s29 + $0x288c] ss:$16 sps:$4 sm:$0xff]   ;;  %v16137_v39 = vld [vmem:[%s16954_s29 + $0x2880] ss:$16 sps:$4 sm:$0xff]  }
 0x551   : > { %10895 = vmatpush1.bf16.msra.mxu0 %v16053_v33  ;;  %11920 = vmatpush1.bf16.msra.mxu1 %v16056_v43  ;;  %v16140_v33 = vld [vmem:[%s16954_s29 + $0x2888] ss:$16 sps:$4 sm:$0xff]   ;;  %v16145_v43 = vld [vmem:[%s16954_s29 + $0x28a4] ss:$16 sps:$4 sm:$0xff]  }
 0x552   : > { %10896 = vmatprep.subr.bf16.mxu0 %v16061_v44  ;;  %11921 = vmatprep.subr.bf16.mxu1 %v16064_v16  ;;  %v16148_v44 = vld [vmem:[%s16954_s29 + $0x28ac] ss:$16 sps:$4 sm:$0xff]   ;;  %v16143_v16 = vld [vmem:[%s16954_s29 + $0x28a0] ss:$16 sps:$4 sm:$0xff]  }
 0x555   : > { %10897 = vmatpush1.bf16.msra.mxu0 %v16059_v47  ;;  %11922 = vmatpush1.bf16.msra.mxu1 %v16062_v48  ;;  %v16146_v47 = vld [vmem:[%s16954_s29 + $0x28a8] ss:$16 sps:$4 sm:$0xff]   ;;  %v16151_v48 = vld [vmem:[%s16954_s29 + $0x28c4] ss:$16 sps:$4 sm:$0xff]  }
 0x556   : > { %10898 = vmatprep.subr.bf16.mxu0 %v16067_v30  ;;  %11923 = vmatprep.subr.bf16.mxu1 %v16070_v49  ;;  %v16154_v30 = vld [vmem:[%s16954_s29 + $0x28cc] ss:$16 sps:$4 sm:$0xff]   ;;  %v16149_v49 = vld [vmem:[%s16954_s29 + $0x28c0] ss:$16 sps:$4 sm:$0xff]  }
 0x559   : > { %10899 = vmatpush1.bf16.msra.mxu0 %v16065_v50  ;;  %11924 = vmatpush1.bf16.msra.mxu1 %v16068_v40  ;;  %v16152_v50 = vld [vmem:[%s16954_s29 + $0x28c8] ss:$16 sps:$4 sm:$0xff]   ;;  %v16157_v40 = vld [vmem:[%s16954_s29 + $0x28e4] ss:$16 sps:$4 sm:$0xff]  }
 0x55a   : > { %10900 = vmatprep.subr.bf16.mxu0 %v16073_v51  ;;  %11925 = vmatprep.subr.bf16.mxu1 %v16076_v52  ;;  %v16160_v51 = vld [vmem:[%s16954_s29 + $0x28ec] ss:$16 sps:$4 sm:$0xff]   ;;  %v16155_v52 = vld [vmem:[%s16954_s29 + $0x28e0] ss:$16 sps:$4 sm:$0xff]  }
 0x55d   : > { %10901 = vmatpush1.bf16.msra.mxu0 %v16071_v45  ;;  %11926 = vmatpush1.bf16.msra.mxu1 %v16074_v56  ;;  %v16158_v45 = vld [vmem:[%s16954_s29 + $0x28e8] ss:$16 sps:$4 sm:$0xff]   ;;  %v16163_v56 = vld [vmem:[%s16954_s29 + $0x2904] ss:$16 sps:$4 sm:$0xff]  }
 0x55e   : > { %10902 = vmatprep.subr.bf16.mxu0 %v16079_v57  ;;  %11927 = vmatprep.subr.bf16.mxu1 %v16082_v59  ;;  %v16166_v57 = vld [vmem:[%s16954_s29 + $0x290c] ss:$16 sps:$4 sm:$0xff]   ;;  %v16161_v59 = vld [vmem:[%s16954_s29 + $0x2900] ss:$16 sps:$4 sm:$0xff]  }
 0x561   : > { %10903 = vmatpush1.bf16.msra.mxu0 %v16077_v46  ;;  %11928 = vmatpush1.bf16.msra.mxu1 %v16080_v60  ;;  %v16164_v46 = vld [vmem:[%s16954_s29 + $0x2908] ss:$16 sps:$4 sm:$0xff]   ;;  %v16169_v60 = vld [vmem:[%s16954_s29 + $0x2924] ss:$16 sps:$4 sm:$0xff]  }
 0x562   : > { %10904 = vmatprep.subr.bf16.mxu0 %v16085_v41  ;;  %11929 = vmatprep.subr.bf16.mxu1 %v16088_v61  ;;  %v16172_v41 = vld [vmem:[%s16954_s29 + $0x292c] ss:$16 sps:$4 sm:$0xff]   ;;  %v16167_v61 = vld [vmem:[%s16954_s29 + $0x2920] ss:$16 sps:$4 sm:$0xff]  }
 0x565   : > { %10905 = vmatpush1.bf16.msra.mxu0 %v16083_v53  ;;  %11930 = vmatpush1.bf16.msra.mxu1 %v16086_v62  ;;  %v16170_v53 = vld [vmem:[%s16954_s29 + $0x2928] ss:$16 sps:$4 sm:$0xff]   ;;  %v16175_v62 = vld [vmem:[%s16954_s29 + $0x2944] ss:$16 sps:$4 sm:$0xff]  }
 0x566   : > { %10906 = vmatprep.subr.bf16.mxu0 %v16091_v0  ;;  %11931 = vmatprep.subr.bf16.mxu1 %v16094_v42  ;;  %v16178_v0 = vld [vmem:[%s16954_s29 + $0x294c] ss:$16 sps:$4 sm:$0xff]   ;;  %v16173_v42 = vld [vmem:[%s16954_s29 + $0x2940] ss:$16 sps:$4 sm:$0xff]  }
 0x569   : > { %10907 = vmatpush1.bf16.msra.mxu0 %v16089_v3  ;;  %11932 = vmatpush1.bf16.msra.mxu1 %v16092_v6  ;;  %v16176_v3 = vld [vmem:[%s16954_s29 + $0x2948] ss:$16 sps:$4 sm:$0xff]   ;;  %v16181_v6 = vld [vmem:[%s16954_s29 + $0x2964] ss:$16 sps:$4 sm:$0xff]  }
 0x56a   : > { %10908 = vmatprep.subr.bf16.mxu0 %v16097_v35  ;;  %11933 = vmatprep.subr.bf16.mxu1 %v16100_v9  ;;  %v16184_v35 = vld [vmem:[%s16954_s29 + $0x296c] ss:$16 sps:$4 sm:$0xff]   ;;  %v16179_v9 = vld [vmem:[%s16954_s29 + $0x2960] ss:$16 sps:$4 sm:$0xff]  }
 0x56d   : > { %10909 = vmatpush1.bf16.msra.mxu0 %v16095_v10  ;;  %11934 = vmatpush1.bf16.msra.mxu1 %v16098_v54  ;;  %v16182_v10 = vld [vmem:[%s16954_s29 + $0x2968] ss:$16 sps:$4 sm:$0xff]   ;;  %v16187_v54 = vld [vmem:[%s16954_s29 + $0x2984] ss:$16 sps:$4 sm:$0xff]  }
 0x56e   : > { %10910 = vmatprep.subr.bf16.mxu0 %v16103_v11  ;;  %11935 = vmatprep.subr.bf16.mxu1 %v16106_v58  ;;  %v16190_v11 = vld [vmem:[%s16954_s29 + $0x298c] ss:$16 sps:$4 sm:$0xff]   ;;  %v16185_v58 = vld [vmem:[%s16954_s29 + $0x2980] ss:$16 sps:$4 sm:$0xff]  }
 0x571   : > { %10911 = vmatpush1.bf16.msra.mxu0 %v16101_v1  ;;  %11936 = vmatpush1.bf16.msra.mxu1 %v16104_v13  ;;  %v16188_v1 = vld [vmem:[%s16954_s29 + $0x2988] ss:$16 sps:$4 sm:$0xff]   ;;  %v16193_v13 = vld [vmem:[%s16954_s29 + $0x29a4] ss:$16 sps:$4 sm:$0xff]  }
 0x572   : > { %10912 = vmatprep.subr.bf16.mxu0 %v16109_v14  ;;  %11937 = vmatprep.subr.bf16.mxu1 %v16112_v15  ;;  %v16196_v14 = vld [vmem:[%s16954_s29 + $0x29ac] ss:$16 sps:$4 sm:$0xff]   ;;  %v16191_v15 = vld [vmem:[%s16954_s29 + $0x29a0] ss:$16 sps:$4 sm:$0xff]  }
 0x575   : > { %10913 = vmatpush1.bf16.msra.mxu0 %v16107_v18  ;;  %11938 = vmatpush1.bf16.msra.mxu1 %v16110_v20  ;;  %v16194_v18 = vld [vmem:[%s16954_s29 + $0x29a8] ss:$16 sps:$4 sm:$0xff]   ;;  %v16199_v20 = vld [vmem:[%s16954_s29 + $0x29c4] ss:$16 sps:$4 sm:$0xff]  }
 0x576   : > { %10923 = vmatprep.subr.bf16.mxu0 %v16115_v21  ;;  %11948 = vmatprep.subr.bf16.mxu1 %v16118_v7  ;;  %v16202_v21 = vld [vmem:[%s16954_s29 + $0x29cc] ss:$16 sps:$4 sm:$0xff]   ;;  %v16197_v7 = vld [vmem:[%s16954_s29 + $0x29c0] ss:$16 sps:$4 sm:$0xff]  }
 0x578   : > { %10915 = vmatmul.mubr.bf16.vlgmr.msra.gmra.mrb[0].mxu0 %v2148_v22  ;;  %11940 = vmatmul.mubr.bf16.vlgmr.msra.gmra.mrb[0].mxu1 %v2148_v22  ;;  %v16205_v22 = vld [vmem:[%s16954_s29 + $0x29e4] ss:$16 sps:$4 sm:$0xff]  }
 0x579   : > { %10924 = vmatpush1.bf16.msra.mxu0 %v16113_v23  ;;  %11949 = vmatpush1.bf16.msra.mxu1 %v16116_v4  ;;  %v16208_v23 = vld [vmem:[%s16954_s29 + $0x29ec] ss:$16 sps:$4 sm:$0xff]   ;;  %v16203_v4 = vld [vmem:[%s16954_s29 + $0x29e0] ss:$16 sps:$4 sm:$0xff]  }
 0x57a   : > { %10925 = vmatprep.subr.bf16.mxu0 %v16121_v24  ;;  %11950 = vmatprep.subr.bf16.mxu1 %v16124_v25  ;;  %v16206_v24 = vld [vmem:[%s16954_s29 + $0x29e8] ss:$16 sps:$4 sm:$0xff]   ;;  %v16211_v25 = vld [vmem:[%s16954_s29 + $0x2a04] ss:$16 sps:$4 sm:$0xff]  }
 0x57b   : > { %10955 = vmatprep.mubr.bf16.mxu0 %v18488_v26  ;;  %11980 = vmatprep.mubr.bf16.mxu1 %v18488_v26 }
 0x57d   : > { %10926 = vmatpush1.bf16.msra.mxu0 %v16119_v2  ;;  %11951 = vmatpush1.bf16.msra.mxu1 %v16122_v27  ;;  %v16214_v2 = vld [vmem:[%s16954_s29 + $0x2a0c] ss:$16 sps:$4 sm:$0xff]   ;;  %v18554_v27 = vrot.slane %v18473_v17, %v17025_v5  ;;  %v16215_v17 = vld [vmem:[%s16954_s29 + $0x2a20] ss:$16 sps:$4 sm:$0xff]  }
 0x57e   : > { %10927 = vmatprep.subr.bf16.mxu0 %v16127_v29  ;;  %11952 = vmatprep.subr.bf16.mxu1 %v16130_v31  ;;  %v16209_v29 = vld [vmem:[%s16954_s29 + $0x2a00] ss:$16 sps:$4 sm:$0xff]   ;;  %v16212_v31 = vld [vmem:[%s16954_s29 + $0x2a08] ss:$16 sps:$4 sm:$0xff]  }
 0x581   : > { %10928 = vmatpush1.bf16.msra.mxu0 %v16125_v32  ;;  %11953 = vmatpush1.bf16.msra.mxu1 %v16128_v34  ;;  %v16217_v32 = vld [vmem:[%s16954_s29 + $0x2a24] ss:$16 sps:$4 sm:$0xff]   ;;  %v16220_v34 = vld [vmem:[%s16954_s29 + $0x2a2c] ss:$16 sps:$4 sm:$0xff]  }
 0x582   : > { %10929 = vmatprep.subr.bf16.mxu0 %v16133_v19  ;;  %11954 = vmatprep.subr.bf16.mxu1 %v16136_v36  ;;  %v2198_v19 = vcombine.high %v18488_v26, %v18488_v26  ;;  %v16218_v36 = vld [vmem:[%s16954_s29 + $0x2a28] ss:$16 sps:$4 sm:$0xff]   ;;  %v16221_v26 = vld [vmem:[%s16954_s29 + $0x2a40] ss:$16 sps:$4 sm:$0xff]  }
 0x585   : > { %10930 = vmatpush1.bf16.msra.mxu0 %v16131_v8  ;;  %11955 = vmatpush1.bf16.msra.mxu1 %v16134_v37  ;;  %v16223_v8 = vld [vmem:[%s16954_s29 + $0x2a44] ss:$16 sps:$4 sm:$0xff]   ;;  %v16226_v37 = vld [vmem:[%s16954_s29 + $0x2a4c] ss:$16 sps:$4 sm:$0xff]  }
 0x586   : > { %10931 = vmatprep.subr.bf16.mxu0 %v16139_v28  ;;  %11956 = vmatprep.subr.bf16.mxu1 %v16142_v38  ;;  %v16224_v28 = vld [vmem:[%s16954_s29 + $0x2a48] ss:$16 sps:$4 sm:$0xff]   ;;  %v16229_v38 = vld [vmem:[%s16954_s29 + $0x2a64] ss:$16 sps:$4 sm:$0xff]  }
 0x589   : > { %10932 = vmatpush1.bf16.msra.mxu0 %v16137_v39  ;;  %11957 = vmatpush1.bf16.msra.mxu1 %v16140_v33  ;;  %v16232_v39 = vld [vmem:[%s16954_s29 + $0x2a6c] ss:$16 sps:$4 sm:$0xff]   ;;  %v16227_v33 = vld [vmem:[%s16954_s29 + $0x2a60] ss:$16 sps:$4 sm:$0xff]  }
 0x58a   : > { %10933 = vmatprep.subr.bf16.mxu0 %v16145_v43  ;;  %11958 = vmatprep.subr.bf16.mxu1 %v16148_v44  ;;  %v16230_v43 = vld [vmem:[%s16954_s29 + $0x2a68] ss:$16 sps:$4 sm:$0xff]   ;;  %v16235_v44 = vld [vmem:[%s16954_s29 + $0x2a84] ss:$16 sps:$4 sm:$0xff]  }
 0x58d   : > { %10934 = vmatpush1.bf16.msra.mxu0 %v16143_v16  ;;  %11959 = vmatpush1.bf16.msra.mxu1 %v16146_v47  ;;  %v16238_v16 = vld [vmem:[%s16954_s29 + $0x2a8c] ss:$16 sps:$4 sm:$0xff]   ;;  %v16233_v47 = vld [vmem:[%s16954_s29 + $0x2a80] ss:$16 sps:$4 sm:$0xff]  }
 0x58e   : > { %10935 = vmatprep.subr.bf16.mxu0 %v16151_v48  ;;  %11960 = vmatprep.subr.bf16.mxu1 %v16154_v30  ;;  %v16236_v48 = vld [vmem:[%s16954_s29 + $0x2a88] ss:$16 sps:$4 sm:$0xff]   ;;  %v16241_v30 = vld [vmem:[%s16954_s29 + $0x2aa4] ss:$16 sps:$4 sm:$0xff]  }
 0x591   : > { %10936 = vmatpush1.bf16.msra.mxu0 %v16149_v49  ;;  %11961 = vmatpush1.bf16.msra.mxu1 %v16152_v50  ;;  %v16244_v49 = vld [vmem:[%s16954_s29 + $0x2aac] ss:$16 sps:$4 sm:$0xff]   ;;  %v16239_v50 = vld [vmem:[%s16954_s29 + $0x2aa0] ss:$16 sps:$4 sm:$0xff]  }
 0x592   : > { %10937 = vmatprep.subr.bf16.mxu0 %v16157_v40  ;;  %11962 = vmatprep.subr.bf16.mxu1 %v16160_v51  ;;  %v16242_v40 = vld [vmem:[%s16954_s29 + $0x2aa8] ss:$16 sps:$4 sm:$0xff]   ;;  %v16247_v51 = vld [vmem:[%s16954_s29 + $0x2ac4] ss:$16 sps:$4 sm:$0xff]  }
 0x595   : > { %10938 = vmatpush1.bf16.msra.mxu0 %v16155_v52  ;;  %11963 = vmatpush1.bf16.msra.mxu1 %v16158_v45  ;;  %v16250_v52 = vld [vmem:[%s16954_s29 + $0x2acc] ss:$16 sps:$4 sm:$0xff]   ;;  %v16245_v45 = vld [vmem:[%s16954_s29 + $0x2ac0] ss:$16 sps:$4 sm:$0xff]  }
 0x596   : > { %10939 = vmatprep.subr.bf16.mxu0 %v16163_v56  ;;  %11964 = vmatprep.subr.bf16.mxu1 %v16166_v57  ;;  %v16248_v56 = vld [vmem:[%s16954_s29 + $0x2ac8] ss:$16 sps:$4 sm:$0xff]   ;;  %v16253_v57 = vld [vmem:[%s16954_s29 + $0x2ae4] ss:$16 sps:$4 sm:$0xff]  }
 0x599   : > { %10940 = vmatpush1.bf16.msra.mxu0 %v16161_v59  ;;  %11965 = vmatpush1.bf16.msra.mxu1 %v16164_v46  ;;  %v16256_v59 = vld [vmem:[%s16954_s29 + $0x2aec] ss:$16 sps:$4 sm:$0xff]   ;;  %v16251_v46 = vld [vmem:[%s16954_s29 + $0x2ae0] ss:$16 sps:$4 sm:$0xff]  }
 0x59a   : > { %10941 = vmatprep.subr.bf16.mxu0 %v16169_v60  ;;  %11966 = vmatprep.subr.bf16.mxu1 %v16172_v41  ;;  %v16254_v60 = vld [vmem:[%s16954_s29 + $0x2ae8] ss:$16 sps:$4 sm:$0xff]   ;;  %v16259_v41 = vld [vmem:[%s16954_s29 + $0x2b04] ss:$16 sps:$4 sm:$0xff]  }
 0x59d   : > { %10942 = vmatpush1.bf16.msra.mxu0 %v16167_v61  ;;  %11967 = vmatpush1.bf16.msra.mxu1 %v16170_v53  ;;  %v16262_v61 = vld [vmem:[%s16954_s29 + $0x2b0c] ss:$16 sps:$4 sm:$0xff]   ;;  %v16257_v53 = vld [vmem:[%s16954_s29 + $0x2b00] ss:$16 sps:$4 sm:$0xff]  }
 0x59e   : > { %10943 = vmatprep.subr.bf16.mxu0 %v16175_v62  ;;  %11968 = vmatprep.subr.bf16.mxu1 %v16178_v0  ;;  %v16260_v62 = vld [vmem:[%s16954_s29 + $0x2b08] ss:$16 sps:$4 sm:$0xff]   ;;  %v16265_v0 = vld [vmem:[%s16954_s29 + $0x2b24] ss:$16 sps:$4 sm:$0xff]  }
 0x5a1   : > { %10944 = vmatpush1.bf16.msra.mxu0 %v16173_v42  ;;  %11969 = vmatpush1.bf16.msra.mxu1 %v16176_v3  ;;  %v16268_v42 = vld [vmem:[%s16954_s29 + $0x2b2c] ss:$16 sps:$4 sm:$0xff]   ;;  %v16263_v3 = vld [vmem:[%s16954_s29 + $0x2b20] ss:$16 sps:$4 sm:$0xff]  }
 0x5a2   : > { %10945 = vmatprep.subr.bf16.mxu0 %v16181_v6  ;;  %11970 = vmatprep.subr.bf16.mxu1 %v16184_v35  ;;  %v16266_v6 = vld [vmem:[%s16954_s29 + $0x2b28] ss:$16 sps:$4 sm:$0xff]   ;;  %v16271_v35 = vld [vmem:[%s16954_s29 + $0x2b44] ss:$16 sps:$4 sm:$0xff]  }
 0x5a5   : > { %10946 = vmatpush1.bf16.msra.mxu0 %v16179_v9  ;;  %11971 = vmatpush1.bf16.msra.mxu1 %v16182_v10  ;;  %v16274_v9 = vld [vmem:[%s16954_s29 + $0x2b4c] ss:$16 sps:$4 sm:$0xff]   ;;  %v16269_v10 = vld [vmem:[%s16954_s29 + $0x2b40] ss:$16 sps:$4 sm:$0xff]  }
 0x5a6   : > { %10947 = vmatprep.subr.bf16.mxu0 %v16187_v54  ;;  %11972 = vmatprep.subr.bf16.mxu1 %v16190_v11  ;;  %v16272_v54 = vld [vmem:[%s16954_s29 + $0x2b48] ss:$16 sps:$4 sm:$0xff]   ;;  %v16277_v11 = vld [vmem:[%s16954_s29 + $0x2b64] ss:$16 sps:$4 sm:$0xff]  }
 0x5a9   : > { %10948 = vmatpush1.bf16.msra.mxu0 %v16185_v58  ;;  %11973 = vmatpush1.bf16.msra.mxu1 %v16188_v1  ;;  %v16280_v58 = vld [vmem:[%s16954_s29 + $0x2b6c] ss:$16 sps:$4 sm:$0xff]   ;;  %v16275_v1 = vld [vmem:[%s16954_s29 + $0x2b60] ss:$16 sps:$4 sm:$0xff]  }
 0x5aa   : > { %10949 = vmatprep.subr.bf16.mxu0 %v16193_v13  ;;  %11974 = vmatprep.subr.bf16.mxu1 %v16196_v14  ;;  %v16278_v13 = vld [vmem:[%s16954_s29 + $0x2b68] ss:$16 sps:$4 sm:$0xff]   ;;  %v16283_v14 = vld [vmem:[%s16954_s29 + $0x2b84] ss:$16 sps:$4 sm:$0xff]  }
 0x5ad   : > { %10950 = vmatpush1.bf16.msra.mxu0 %v16191_v15  ;;  %11975 = vmatpush1.bf16.msra.mxu1 %v16194_v18  ;;  %v16286_v15 = vld [vmem:[%s16954_s29 + $0x2b8c] ss:$16 sps:$4 sm:$0xff]   ;;  %v16281_v18 = vld [vmem:[%s16954_s29 + $0x2b80] ss:$16 sps:$4 sm:$0xff]  }
 0x5ae   : > { %10951 = vmatprep.subr.bf16.mxu0 %v16199_v20  ;;  %11976 = vmatprep.subr.bf16.mxu1 %v16202_v21  ;;  %v16284_v20 = vld [vmem:[%s16954_s29 + $0x2b88] ss:$16 sps:$4 sm:$0xff]   ;;  %v16289_v21 = vld [vmem:[%s16954_s29 + $0x2ba4] ss:$16 sps:$4 sm:$0xff]  }
 0x5b1   : > { %10952 = vmatpush1.bf16.msra.mxu0 %v16197_v7  ;;  %11977 = vmatpush1.bf16.msra.mxu1 %v16200_v55  ;;  %v16292_v7 = vld [vmem:[%s16954_s29 + $0x2bac] ss:$16 sps:$4 sm:$0xff]   ;;  %v16287_v55 = vld [vmem:[%s16954_s29 + $0x2ba0] ss:$16 sps:$4 sm:$0xff]  }
 0x5b2   : > { %10953 = vmatprep.subr.bf16.mxu0 %v16205_v22  ;;  %11978 = vmatprep.subr.bf16.mxu1 %v16208_v23  ;;  %v16290_v22 = vld [vmem:[%s16954_s29 + $0x2ba8] ss:$16 sps:$4 sm:$0xff]   ;;  %v16295_v23 = vld [vmem:[%s16954_s29 + $0x2bc4] ss:$16 sps:$4 sm:$0xff]  }
 0x5b5   : > { %10954 = vmatpush1.bf16.msra.mxu0 %v16203_v4  ;;  %11979 = vmatpush1.bf16.msra.mxu1 %v16206_v24  ;;  %v16298_v4 = vld [vmem:[%s16954_s29 + $0x2bcc] ss:$16 sps:$4 sm:$0xff]   ;;  %v2151_v24 = vcombine.high %v18465_v12, %v18465_v12  ;;  %v16299_v12 = vld [vmem:[%s16954_s29 + $0x2be0] ss:$16 sps:$4 sm:$0xff]  }
 0x5b6   : > { %10964 = vmatprep.subr.bf16.mxu0 %v16211_v25  ;;  %11989 = vmatprep.subr.bf16.mxu1 %v16214_v2  ;;  %v16293_v25 = vld [vmem:[%s16954_s29 + $0x2bc0] ss:$16 sps:$4 sm:$0xff]   ;;  %v16296_v2 = vld [vmem:[%s16954_s29 + $0x2bc8] ss:$16 sps:$4 sm:$0xff]  }
 0x5b8   : > { %10956 = vmatmul.mubr.bf16.vlgmr.msra.gmra.mrb[0].mxu0 %v18554_v27  ;;  %11981 = vmatmul.mubr.bf16.vlgmr.msra.gmra.mrb[0].mxu1 %v18554_v27 }
 0x5b9   : > { %10965 = vmatpush1.bf16.msra.mxu0 %v16209_v29  ;;  %11990 = vmatpush1.bf16.msra.mxu1 %v16212_v31  ;;  %v16301_v29 = vld [vmem:[%s16954_s29 + $0x2be4] ss:$16 sps:$4 sm:$0xff]   ;;  %v16304_v31 = vld [vmem:[%s16954_s29 + $0x2bec] ss:$16 sps:$4 sm:$0xff]  }
 0x5ba   : > { %10966 = vmatprep.subr.bf16.mxu0 %v16217_v32  ;;  %11991 = vmatprep.subr.bf16.mxu1 %v16220_v34  ;;  %v18623_v32 = vrot.slane %v2151_v24, %v17025_v5  ;;  %v16302_v34 = vld [vmem:[%s16954_s29 + $0x2be8] ss:$16 sps:$4 sm:$0xff]  }
 0x5bb   : > { %10996 = vmatprep.mubr.bf16.mxu0 %v2198_v19  ;;  %12021 = vmatprep.mubr.bf16.mxu1 %v2198_v19  ;;  %v16307_v19 = vld [vmem:[%s16954_s29 + $0x2c04] ss:$16 sps:$4 sm:$0xff]   ;;  %v16380_v24 = vld [vmem:[%s16954_s29 + $0x2d88] ss:$16 sps:$4 sm:$0xff]  }
 0x5bd   : > { %10967 = vmatpush1.bf16.msra.mxu0 %v16215_v17  ;;  %11992 = vmatpush1.bf16.msra.mxu1 %v16218_v36  ;;  %v16310_v17 = vld [vmem:[%s16954_s29 + $0x2c0c] ss:$16 sps:$4 sm:$0xff]   ;;  %v2167_v36 = vcombine.high %v18623_v32, %v18623_v32 }
 0x5be   : > { %10968 = vmatprep.subr.bf16.mxu0 %v16223_v8  ;;  %11993 = vmatprep.subr.bf16.mxu1 %v16226_v37  ;;  %v2196_v8 = vcombine.high %v18554_v27, %v18554_v27  ;;  %v16305_v37 = vld [vmem:[%s16954_s29 + $0x2c00] ss:$16 sps:$4 sm:$0xff]  }
 0x5bf   : > { %v16311_v27 = vld [vmem:[%s16954_s29 + $0x2c20] ss:$16 sps:$4 sm:$0xff]  }
 0x5c1   : > { %10969 = vmatpush1.bf16.msra.mxu0 %v16221_v26  ;;  %11994 = vmatpush1.bf16.msra.mxu1 %v16224_v28  ;;  %v16308_v26 = vld [vmem:[%s16954_s29 + $0x2c08] ss:$16 sps:$4 sm:$0xff]   ;;  %v16313_v28 = vld [vmem:[%s16954_s29 + $0x2c24] ss:$16 sps:$4 sm:$0xff]  }
 0x5c2   : > { %10970 = vmatprep.subr.bf16.mxu0 %v16229_v38  ;;  %11995 = vmatprep.subr.bf16.mxu1 %v16232_v39  ;;  %v16316_v38 = vld [vmem:[%s16954_s29 + $0x2c2c] ss:$16 sps:$4 sm:$0xff]   ;;  %v18638_v39 = vrot.slane %v2167_v36, %v17025_v5  ;;  %v16397_v36 = vld [vmem:[%s16954_s29 + $0x2de4] ss:$16 sps:$4 sm:$0xff]  }
 0x5c5   : > { %10971 = vmatpush1.bf16.msra.mxu0 %v16227_v33  ;;  %11996 = vmatpush1.bf16.msra.mxu1 %v16230_v43  ;;  %v16314_v33 = vld [vmem:[%s16954_s29 + $0x2c28] ss:$16 sps:$4 sm:$0xff]   ;;  %v16319_v43 = vld [vmem:[%s16954_s29 + $0x2c44] ss:$16 sps:$4 sm:$0xff]  }
 0x5c6   : > { %10972 = vmatprep.subr.bf16.mxu0 %v16235_v44  ;;  %11997 = vmatprep.subr.bf16.mxu1 %v16238_v16  ;;  %v16322_v44 = vld [vmem:[%s16954_s29 + $0x2c4c] ss:$16 sps:$4 sm:$0xff]   ;;  %v16317_v16 = vld [vmem:[%s16954_s29 + $0x2c40] ss:$16 sps:$4 sm:$0xff]  }
 0x5c9   : > { %10973 = vmatpush1.bf16.msra.mxu0 %v16233_v47  ;;  %11998 = vmatpush1.bf16.msra.mxu1 %v16236_v48  ;;  %v16320_v47 = vld [vmem:[%s16954_s29 + $0x2c48] ss:$16 sps:$4 sm:$0xff]   ;;  %v16325_v48 = vld [vmem:[%s16954_s29 + $0x2c64] ss:$16 sps:$4 sm:$0xff]  }
 0x5ca   : > { %10974 = vmatprep.subr.bf16.mxu0 %v16241_v30  ;;  %11999 = vmatprep.subr.bf16.mxu1 %v16244_v49  ;;  %v16328_v30 = vld [vmem:[%s16954_s29 + $0x2c6c] ss:$16 sps:$4 sm:$0xff]   ;;  %v16323_v49 = vld [vmem:[%s16954_s29 + $0x2c60] ss:$16 sps:$4 sm:$0xff]  }
 0x5cd   : > { %10975 = vmatpush1.bf16.msra.mxu0 %v16239_v50  ;;  %12000 = vmatpush1.bf16.msra.mxu1 %v16242_v40  ;;  %v16326_v50 = vld [vmem:[%s16954_s29 + $0x2c68] ss:$16 sps:$4 sm:$0xff]   ;;  %v16331_v40 = vld [vmem:[%s16954_s29 + $0x2c84] ss:$16 sps:$4 sm:$0xff]  }
 0x5ce   : > { %10976 = vmatprep.subr.bf16.mxu0 %v16247_v51  ;;  %12001 = vmatprep.subr.bf16.mxu1 %v16250_v52  ;;  %v16334_v51 = vld [vmem:[%s16954_s29 + $0x2c8c] ss:$16 sps:$4 sm:$0xff]   ;;  %v16329_v52 = vld [vmem:[%s16954_s29 + $0x2c80] ss:$16 sps:$4 sm:$0xff]  }
 0x5d1   : > { %10977 = vmatpush1.bf16.msra.mxu0 %v16245_v45  ;;  %12002 = vmatpush1.bf16.msra.mxu1 %v16248_v56  ;;  %v16332_v45 = vld [vmem:[%s16954_s29 + $0x2c88] ss:$16 sps:$4 sm:$0xff]   ;;  %v16337_v56 = vld [vmem:[%s16954_s29 + $0x2ca4] ss:$16 sps:$4 sm:$0xff]  }
 0x5d2   : > { %10978 = vmatprep.subr.bf16.mxu0 %v16253_v57  ;;  %12003 = vmatprep.subr.bf16.mxu1 %v16256_v59  ;;  %v16340_v57 = vld [vmem:[%s16954_s29 + $0x2cac] ss:$16 sps:$4 sm:$0xff]   ;;  %v16335_v59 = vld [vmem:[%s16954_s29 + $0x2ca0] ss:$16 sps:$4 sm:$0xff]  }
 0x5d5   : > { %10979 = vmatpush1.bf16.msra.mxu0 %v16251_v46  ;;  %12004 = vmatpush1.bf16.msra.mxu1 %v16254_v60  ;;  %v16338_v46 = vld [vmem:[%s16954_s29 + $0x2ca8] ss:$16 sps:$4 sm:$0xff]   ;;  %v16343_v60 = vld [vmem:[%s16954_s29 + $0x2cc4] ss:$16 sps:$4 sm:$0xff]  }
 0x5d6   : > { %10980 = vmatprep.subr.bf16.mxu0 %v16259_v41  ;;  %12005 = vmatprep.subr.bf16.mxu1 %v16262_v61  ;;  %v16346_v41 = vld [vmem:[%s16954_s29 + $0x2ccc] ss:$16 sps:$4 sm:$0xff]   ;;  %v16341_v61 = vld [vmem:[%s16954_s29 + $0x2cc0] ss:$16 sps:$4 sm:$0xff]  }
 0x5d9   : > { %10981 = vmatpush1.bf16.msra.mxu0 %v16257_v53  ;;  %12006 = vmatpush1.bf16.msra.mxu1 %v16260_v62  ;;  %v16344_v53 = vld [vmem:[%s16954_s29 + $0x2cc8] ss:$16 sps:$4 sm:$0xff]   ;;  %v16349_v62 = vld [vmem:[%s16954_s29 + $0x2ce4] ss:$16 sps:$4 sm:$0xff]  }
 0x5da   : > { %10982 = vmatprep.subr.bf16.mxu0 %v16265_v0  ;;  %12007 = vmatprep.subr.bf16.mxu1 %v16268_v42  ;;  %v16352_v0 = vld [vmem:[%s16954_s29 + $0x2cec] ss:$16 sps:$4 sm:$0xff]   ;;  %v16347_v42 = vld [vmem:[%s16954_s29 + $0x2ce0] ss:$16 sps:$4 sm:$0xff]  }
 0x5dd   : > { %10983 = vmatpush1.bf16.msra.mxu0 %v16263_v3  ;;  %12008 = vmatpush1.bf16.msra.mxu1 %v16266_v6  ;;  %v16350_v3 = vld [vmem:[%s16954_s29 + $0x2ce8] ss:$16 sps:$4 sm:$0xff]   ;;  %v16355_v6 = vld [vmem:[%s16954_s29 + $0x2d04] ss:$16 sps:$4 sm:$0xff]  }
 0x5de   : > { %10984 = vmatprep.subr.bf16.mxu0 %v16271_v35  ;;  %12009 = vmatprep.subr.bf16.mxu1 %v16274_v9  ;;  %v16358_v35 = vld [vmem:[%s16954_s29 + $0x2d0c] ss:$16 sps:$4 sm:$0xff]   ;;  %v16353_v9 = vld [vmem:[%s16954_s29 + $0x2d00] ss:$16 sps:$4 sm:$0xff]  }
 0x5e1   : > { %10985 = vmatpush1.bf16.msra.mxu0 %v16269_v10  ;;  %12010 = vmatpush1.bf16.msra.mxu1 %v16272_v54  ;;  %v16356_v10 = vld [vmem:[%s16954_s29 + $0x2d08] ss:$16 sps:$4 sm:$0xff]   ;;  %v16361_v54 = vld [vmem:[%s16954_s29 + $0x2d24] ss:$16 sps:$4 sm:$0xff]  }
 0x5e2   : > { %10986 = vmatprep.subr.bf16.mxu0 %v16277_v11  ;;  %12011 = vmatprep.subr.bf16.mxu1 %v16280_v58  ;;  %v16364_v11 = vld [vmem:[%s16954_s29 + $0x2d2c] ss:$16 sps:$4 sm:$0xff]   ;;  %v16359_v58 = vld [vmem:[%s16954_s29 + $0x2d20] ss:$16 sps:$4 sm:$0xff]  }
 0x5e5   : > { %10987 = vmatpush1.bf16.msra.mxu0 %v16275_v1  ;;  %12012 = vmatpush1.bf16.msra.mxu1 %v16278_v13  ;;  %v16362_v1 = vld [vmem:[%s16954_s29 + $0x2d28] ss:$16 sps:$4 sm:$0xff]   ;;  %v16367_v13 = vld [vmem:[%s16954_s29 + $0x2d44] ss:$16 sps:$4 sm:$0xff]  }
 0x5e6   : > { %10988 = vmatprep.subr.bf16.mxu0 %v16283_v14  ;;  %12013 = vmatprep.subr.bf16.mxu1 %v16286_v15  ;;  %v16370_v14 = vld [vmem:[%s16954_s29 + $0x2d4c] ss:$16 sps:$4 sm:$0xff]   ;;  %v16365_v15 = vld [vmem:[%s16954_s29 + $0x2d40] ss:$16 sps:$4 sm:$0xff]  }
 0x5e9   : > { %10989 = vmatpush1.bf16.msra.mxu0 %v16281_v18  ;;  %12014 = vmatpush1.bf16.msra.mxu1 %v16284_v20  ;;  %v16368_v18 = vld [vmem:[%s16954_s29 + $0x2d48] ss:$16 sps:$4 sm:$0xff]   ;;  %v16373_v20 = vld [vmem:[%s16954_s29 + $0x2d64] ss:$16 sps:$4 sm:$0xff]  }
 0x5ea   : > { %10990 = vmatprep.subr.bf16.mxu0 %v16289_v21  ;;  %12015 = vmatprep.subr.bf16.mxu1 %v16292_v7  ;;  %v16376_v21 = vld [vmem:[%s16954_s29 + $0x2d6c] ss:$16 sps:$4 sm:$0xff]   ;;  %v16371_v7 = vld [vmem:[%s16954_s29 + $0x2d60] ss:$16 sps:$4 sm:$0xff]  }
 0x5ed   : > { %10991 = vmatpush1.bf16.msra.mxu0 %v16287_v55  ;;  %12016 = vmatpush1.bf16.msra.mxu1 %v16290_v22  ;;  %v16374_v55 = vld [vmem:[%s16954_s29 + $0x2d68] ss:$16 sps:$4 sm:$0xff]   ;;  %v16379_v22 = vld [vmem:[%s16954_s29 + $0x2d84] ss:$16 sps:$4 sm:$0xff]  }
 0x5ee   : > { %10992 = vmatprep.subr.bf16.mxu0 %v16295_v23  ;;  %12017 = vmatprep.subr.bf16.mxu1 %v16298_v4  ;;  %v16382_v23 = vld [vmem:[%s16954_s29 + $0x2d8c] ss:$16 sps:$4 sm:$0xff]   ;;  %v16377_v4 = vld [vmem:[%s16954_s29 + $0x2d80] ss:$16 sps:$4 sm:$0xff]  }
 0x5f1   : > { %10993 = vmatpush1.bf16.msra.mxu0 %v16293_v25  ;;  %12018 = vmatpush1.bf16.msra.mxu1 %v16296_v2  ;;  %v16385_v25 = vld [vmem:[%s16954_s29 + $0x2da4] ss:$16 sps:$4 sm:$0xff]   ;;  %v16388_v2 = vld [vmem:[%s16954_s29 + $0x2dac] ss:$16 sps:$4 sm:$0xff]  }
 0x5f2   : > { %10994 = vmatprep.subr.bf16.mxu0 %v16301_v29  ;;  %12019 = vmatprep.subr.bf16.mxu1 %v16304_v31  ;;  %v16383_v29 = vld [vmem:[%s16954_s29 + $0x2da0] ss:$16 sps:$4 sm:$0xff]   ;;  %v16386_v31 = vld [vmem:[%s16954_s29 + $0x2da8] ss:$16 sps:$4 sm:$0xff]  }
 0x5f5   : > { %10995 = vmatpush1.bf16.msra.mxu0 %v16299_v12  ;;  %12020 = vmatpush1.bf16.msra.mxu1 %v16302_v34  ;;  %v16391_v12 = vld [vmem:[%s16954_s29 + $0x2dc4] ss:$16 sps:$4 sm:$0xff]   ;;  %v16394_v34 = vld [vmem:[%s16954_s29 + $0x2dcc] ss:$16 sps:$4 sm:$0xff]  }
 0x5f6   : > { %11005 = vmatprep.subr.bf16.mxu0 %v16307_v19  ;;  %12030 = vmatprep.subr.bf16.mxu1 %v16310_v17  ;;  %v16389_v19 = vld [vmem:[%s16954_s29 + $0x2dc0] ss:$16 sps:$4 sm:$0xff]   ;;  %v16392_v17 = vld [vmem:[%s16954_s29 + $0x2dc8] ss:$16 sps:$4 sm:$0xff]  }
 0x5f8   : > { %10997 = vmatmul.mubr.bf16.vlgmr.msra.gmra.mrb[0].mxu0 %v2196_v8  ;;  %12022 = vmatmul.mubr.bf16.vlgmr.msra.gmra.mrb[0].mxu1 %v2196_v8  ;;  %v16400_v8 = vld [vmem:[%s16954_s29 + $0x2dec] ss:$16 sps:$4 sm:$0xff]  }
 0x5f9   : > { %11006 = vmatpush1.bf16.msra.mxu0 %v16305_v37  ;;  %12031 = vmatpush1.bf16.msra.mxu1 %v16308_v26  ;;  %v16395_v37 = vld [vmem:[%s16954_s29 + $0x2de0] ss:$16 sps:$4 sm:$0xff]   ;;  %v16398_v26 = vld [vmem:[%s16954_s29 + $0x2de8] ss:$16 sps:$4 sm:$0xff]  }
 0x5fa   : > { %11007 = vmatprep.subr.bf16.mxu0 %v16313_v28  ;;  %12032 = vmatprep.subr.bf16.mxu1 %v16316_v38  ;;  %v16404_v28 = vld [vmem:[%s16954_s29 + $0x2e04] ss:$16 sps:$4 sm:$0xff]   ;;  %v16407_v38 = vld [vmem:[%s16954_s29 + $0x2e0c] ss:$16 sps:$4 sm:$0xff]  }
 0x5fb   : > { %11037 = vmatprep.mubr.bf16.mxu0 %v18638_v39  ;;  %12062 = vmatprep.mubr.bf16.mxu1 %v18638_v39 }
 0x5fd   : > { %11008 = vmatpush1.bf16.msra.mxu0 %v16311_v27  ;;  %12033 = vmatpush1.bf16.msra.mxu1 %v16314_v33  ;;  %v18704_v27 = vrot.slane %v18623_v32, %v17025_v5  ;;  %v16402_v33 = vld [vmem:[%s16954_s29 + $0x2e00] ss:$16 sps:$4 sm:$0xff]  }
 0x5fe   : > { %11009 = vmatprep.subr.bf16.mxu0 %v16319_v43  ;;  %12034 = vmatprep.subr.bf16.mxu1 %v16322_v44  ;;  %v16405_v43 = vld [vmem:[%s16954_s29 + $0x2e08] ss:$16 sps:$4 sm:$0xff]   ;;  %v16410_v44 = vld [vmem:[%s16954_s29 + $0x2e24] ss:$16 sps:$4 sm:$0xff]   ;;  %v16408_v32 = vld [vmem:[%s16954_s29 + $0x2e20] ss:$16 sps:$4 sm:$0xff]  }
 0x601   : > { %11010 = vmatpush1.bf16.msra.mxu0 %v16317_v16  ;;  %12035 = vmatpush1.bf16.msra.mxu1 %v16320_v47  ;;  %v16413_v16 = vld [vmem:[%s16954_s29 + $0x2e2c] ss:$16 sps:$4 sm:$0xff]   ;;  %v2199_v47 = vcombine.high %v18638_v39, %v18638_v39  ;;  %v16414_v39 = vld [vmem:[%s16954_s29 + $0x2e40] ss:$16 sps:$4 sm:$0xff]  }
 0x602   : > { %11011 = vmatprep.subr.bf16.mxu0 %v16325_v48  ;;  %12036 = vmatprep.subr.bf16.mxu1 %v16328_v30  ;;  %v16411_v48 = vld [vmem:[%s16954_s29 + $0x2e28] ss:$16 sps:$4 sm:$0xff]   ;;  %v16416_v30 = vld [vmem:[%s16954_s29 + $0x2e44] ss:$16 sps:$4 sm:$0xff]  }
 0x605   : > { %11012 = vmatpush1.bf16.msra.mxu0 %v16323_v49  ;;  %12037 = vmatpush1.bf16.msra.mxu1 %v16326_v50  ;;  %v16419_v49 = vld [vmem:[%s16954_s29 + $0x2e4c] ss:$16 sps:$4 sm:$0xff]   ;;  %v16417_v50 = vld [vmem:[%s16954_s29 + $0x2e48] ss:$16 sps:$4 sm:$0xff]  }
 0x606   : > { %11013 = vmatprep.subr.bf16.mxu0 %v16331_v40  ;;  %12038 = vmatprep.subr.bf16.mxu1 %v16334_v51  ;;  %v16422_v40 = vld [vmem:[%s16954_s29 + $0x2e64] ss:$16 sps:$4 sm:$0xff]   ;;  %v16425_v51 = vld [vmem:[%s16954_s29 + $0x2e6c] ss:$16 sps:$4 sm:$0xff]  }
 0x609   : > { %11014 = vmatpush1.bf16.msra.mxu0 %v16329_v52  ;;  %12039 = vmatpush1.bf16.msra.mxu1 %v16332_v45  ;;  %v16420_v52 = vld [vmem:[%s16954_s29 + $0x2e60] ss:$16 sps:$4 sm:$0xff]   ;;  %v16423_v45 = vld [vmem:[%s16954_s29 + $0x2e68] ss:$16 sps:$4 sm:$0xff]  }
 0x60a   : > { %11015 = vmatprep.subr.bf16.mxu0 %v16337_v56  ;;  %12040 = vmatprep.subr.bf16.mxu1 %v16340_v57  ;;  %v16428_v56 = vld [vmem:[%s16954_s29 + $0x2e84] ss:$16 sps:$4 sm:$0xff]   ;;  %v16431_v57 = vld [vmem:[%s16954_s29 + $0x2e8c] ss:$16 sps:$4 sm:$0xff]  }
 0x60d   : > { %11016 = vmatpush1.bf16.msra.mxu0 %v16335_v59  ;;  %12041 = vmatpush1.bf16.msra.mxu1 %v16338_v46  ;;  %v16426_v59 = vld [vmem:[%s16954_s29 + $0x2e80] ss:$16 sps:$4 sm:$0xff]   ;;  %v16429_v46 = vld [vmem:[%s16954_s29 + $0x2e88] ss:$16 sps:$4 sm:$0xff]  }
 0x60e   : > { %11017 = vmatprep.subr.bf16.mxu0 %v16343_v60  ;;  %12042 = vmatprep.subr.bf16.mxu1 %v16346_v41  ;;  %v16434_v60 = vld [vmem:[%s16954_s29 + $0x2ea4] ss:$16 sps:$4 sm:$0xff]   ;;  %v16437_v41 = vld [vmem:[%s16954_s29 + $0x2eac] ss:$16 sps:$4 sm:$0xff]  }
 0x611   : > { %11018 = vmatpush1.bf16.msra.mxu0 %v16341_v61  ;;  %12043 = vmatpush1.bf16.msra.mxu1 %v16344_v53  ;;  %v16432_v61 = vld [vmem:[%s16954_s29 + $0x2ea0] ss:$16 sps:$4 sm:$0xff]   ;;  %v16435_v53 = vld [vmem:[%s16954_s29 + $0x2ea8] ss:$16 sps:$4 sm:$0xff]  }
 0x612   : > { %11019 = vmatprep.subr.bf16.mxu0 %v16349_v62  ;;  %12044 = vmatprep.subr.bf16.mxu1 %v16352_v0  ;;  %v16440_v62 = vld [vmem:[%s16954_s29 + $0x2ec4] ss:$16 sps:$4 sm:$0xff]   ;;  %v16443_v0 = vld [vmem:[%s16954_s29 + $0x2ecc] ss:$16 sps:$4 sm:$0xff]  }
 0x615   : > { %11020 = vmatpush1.bf16.msra.mxu0 %v16347_v42  ;;  %12045 = vmatpush1.bf16.msra.mxu1 %v16350_v3  ;;  %v16438_v42 = vld [vmem:[%s16954_s29 + $0x2ec0] ss:$16 sps:$4 sm:$0xff]   ;;  %v16441_v3 = vld [vmem:[%s16954_s29 + $0x2ec8] ss:$16 sps:$4 sm:$0xff]  }
 0x616   : > { %11021 = vmatprep.subr.bf16.mxu0 %v16355_v6  ;;  %12046 = vmatprep.subr.bf16.mxu1 %v16358_v35  ;;  %v16446_v6 = vld [vmem:[%s16954_s29 + $0x2ee4] ss:$16 sps:$4 sm:$0xff]   ;;  %v16449_v35 = vld [vmem:[%s16954_s29 + $0x2eec] ss:$16 sps:$4 sm:$0xff]  }
 0x619   : > { %11022 = vmatpush1.bf16.msra.mxu0 %v16353_v9  ;;  %12047 = vmatpush1.bf16.msra.mxu1 %v16356_v10  ;;  %v16444_v9 = vld [vmem:[%s16954_s29 + $0x2ee0] ss:$16 sps:$4 sm:$0xff]   ;;  %v16447_v10 = vld [vmem:[%s16954_s29 + $0x2ee8] ss:$16 sps:$4 sm:$0xff]  }
 0x61a   : > { %11023 = vmatprep.subr.bf16.mxu0 %v16361_v54  ;;  %12048 = vmatprep.subr.bf16.mxu1 %v16364_v11  ;;  %v16452_v54 = vld [vmem:[%s16954_s29 + $0x2f04] ss:$16 sps:$4 sm:$0xff]   ;;  %v16455_v11 = vld [vmem:[%s16954_s29 + $0x2f0c] ss:$16 sps:$4 sm:$0xff]  }
 0x61d   : > { %11024 = vmatpush1.bf16.msra.mxu0 %v16359_v58  ;;  %12049 = vmatpush1.bf16.msra.mxu1 %v16362_v1  ;;  %v16450_v58 = vld [vmem:[%s16954_s29 + $0x2f00] ss:$16 sps:$4 sm:$0xff]   ;;  %v16453_v1 = vld [vmem:[%s16954_s29 + $0x2f08] ss:$16 sps:$4 sm:$0xff]  }
 0x61e   : > { %11025 = vmatprep.subr.bf16.mxu0 %v16367_v13  ;;  %12050 = vmatprep.subr.bf16.mxu1 %v16370_v14  ;;  %v16458_v13 = vld [vmem:[%s16954_s29 + $0x2f24] ss:$16 sps:$4 sm:$0xff]   ;;  %v16461_v14 = vld [vmem:[%s16954_s29 + $0x2f2c] ss:$16 sps:$4 sm:$0xff]  }
 0x621   : > { %11026 = vmatpush1.bf16.msra.mxu0 %v16365_v15  ;;  %12051 = vmatpush1.bf16.msra.mxu1 %v16368_v18  ;;  %v16456_v15 = vld [vmem:[%s16954_s29 + $0x2f20] ss:$16 sps:$4 sm:$0xff]   ;;  %v16459_v18 = vld [vmem:[%s16954_s29 + $0x2f28] ss:$16 sps:$4 sm:$0xff]  }
 0x622   : > { %11027 = vmatprep.subr.bf16.mxu0 %v16373_v20  ;;  %12052 = vmatprep.subr.bf16.mxu1 %v16376_v21  ;;  %v16464_v20 = vld [vmem:[%s16954_s29 + $0x2f44] ss:$16 sps:$4 sm:$0xff]   ;;  %v16467_v21 = vld [vmem:[%s16954_s29 + $0x2f4c] ss:$16 sps:$4 sm:$0xff]  }
 0x625   : > { %11028 = vmatpush1.bf16.msra.mxu0 %v16371_v7  ;;  %12053 = vmatpush1.bf16.msra.mxu1 %v16374_v55  ;;  %v16462_v7 = vld [vmem:[%s16954_s29 + $0x2f40] ss:$16 sps:$4 sm:$0xff]   ;;  %v16465_v55 = vld [vmem:[%s16954_s29 + $0x2f48] ss:$16 sps:$4 sm:$0xff]  }
 0x626   : > { %11029 = vmatprep.subr.bf16.mxu0 %v16379_v22  ;;  %12054 = vmatprep.subr.bf16.mxu1 %v16382_v23  ;;  %v16470_v22 = vld [vmem:[%s16954_s29 + $0x2f64] ss:$16 sps:$4 sm:$0xff]   ;;  %v16473_v23 = vld [vmem:[%s16954_s29 + $0x2f6c] ss:$16 sps:$4 sm:$0xff]  }
 0x629   : > { %11030 = vmatpush1.bf16.msra.mxu0 %v16377_v4  ;;  %12055 = vmatpush1.bf16.msra.mxu1 %v16380_v24  ;;  %v16468_v4 = vld [vmem:[%s16954_s29 + $0x2f60] ss:$16 sps:$4 sm:$0xff]   ;;  %v16471_v24 = vld [vmem:[%s16954_s29 + $0x2f68] ss:$16 sps:$4 sm:$0xff]  }
 0x62a   : > { %11031 = vmatprep.subr.bf16.mxu0 %v16385_v25  ;;  %12056 = vmatprep.subr.bf16.mxu1 %v16388_v2  ;;  %v16476_v25 = vld [vmem:[%s16954_s29 + $0x2f84] ss:$16 sps:$4 sm:$0xff]   ;;  %v16479_v2 = vld [vmem:[%s16954_s29 + $0x2f8c] ss:$16 sps:$4 sm:$0xff]  }
 0x62d   : > { %11032 = vmatpush1.bf16.msra.mxu0 %v16383_v29  ;;  %12057 = vmatpush1.bf16.msra.mxu1 %v16386_v31  ;;  %v16474_v29 = vld [vmem:[%s16954_s29 + $0x2f80] ss:$16 sps:$4 sm:$0xff]   ;;  %v16477_v31 = vld [vmem:[%s16954_s29 + $0x2f88] ss:$16 sps:$4 sm:$0xff]  }
 0x62e   : > { %11033 = vmatprep.subr.bf16.mxu0 %v16391_v12  ;;  %12058 = vmatprep.subr.bf16.mxu1 %v16394_v34  ;;  %v16482_v12 = vld [vmem:[%s16954_s29 + $0x2fa4] ss:$16 sps:$4 sm:$0xff]   ;;  %v16485_v34 = vld [vmem:[%s16954_s29 + $0x2fac] ss:$16 sps:$4 sm:$0xff]  }
 0x631   : > { %11034 = vmatpush1.bf16.msra.mxu0 %v16389_v19  ;;  %12059 = vmatpush1.bf16.msra.mxu1 %v16392_v17  ;;  %v16480_v19 = vld [vmem:[%s16954_s29 + $0x2fa0] ss:$16 sps:$4 sm:$0xff]   ;;  %v16483_v17 = vld [vmem:[%s16954_s29 + $0x2fa8] ss:$16 sps:$4 sm:$0xff]  }
 0x632   : > { %11035 = vmatprep.subr.bf16.mxu0 %v16397_v36  ;;  %12060 = vmatprep.subr.bf16.mxu1 %v16400_v8  ;;  %v16488_v36 = vld [vmem:[%s16954_s29 + $0x2fc4] ss:$16 sps:$4 sm:$0xff]   ;;  %v16491_v8 = vld [vmem:[%s16954_s29 + $0x2fcc] ss:$16 sps:$4 sm:$0xff]  }
 0x635   : > { %11036 = vmatpush1.bf16.msra.mxu0 %v16395_v37  ;;  %12061 = vmatpush1.bf16.msra.mxu1 %v16398_v26  ;;  %v16486_v37 = vld [vmem:[%s16954_s29 + $0x2fc0] ss:$16 sps:$4 sm:$0xff]   ;;  %v16489_v26 = vld [vmem:[%s16954_s29 + $0x2fc8] ss:$16 sps:$4 sm:$0xff]  }
 0x636   : > { %11046 = vmatprep.subr.bf16.mxu0 %v16404_v28  ;;  %12071 = vmatprep.subr.bf16.mxu1 %v16407_v38  ;;  %v16494_v28 = vld [vmem:[%s16954_s29 + $0x2fe4] ss:$16 sps:$4 sm:$0xff]   ;;  %v16497_v38 = vld [vmem:[%s16954_s29 + $0x2fec] ss:$16 sps:$4 sm:$0xff]  }
 0x638   : > { %11038 = vmatmul.mubr.bf16.vlgmr.msra.gmra.mrb[0].mxu0 %v18704_v27  ;;  %12063 = vmatmul.mubr.bf16.vlgmr.msra.gmra.mrb[0].mxu1 %v18704_v27 }
 0x639   : > { %11047 = vmatpush1.bf16.msra.mxu0 %v16402_v33  ;;  %12072 = vmatpush1.bf16.msra.mxu1 %v16405_v43  ;;  %v16492_v33 = vld [vmem:[%s16954_s29 + $0x2fe0] ss:$16 sps:$4 sm:$0xff]   ;;  %v16495_v43 = vld [vmem:[%s16954_s29 + $0x2fe8] ss:$16 sps:$4 sm:$0xff]  }
 0x63a   : > { %11048 = vmatprep.subr.bf16.mxu0 %v16410_v44  ;;  %12073 = vmatprep.subr.bf16.mxu1 %v16413_v16  ;;  %v16500_v44 = vld [vmem:[%s16954_s29 + $0x3004] ss:$16 sps:$4 sm:$0xff]   ;;  %v16503_v16 = vld [vmem:[%s16954_s29 + $0x300c] ss:$16 sps:$4 sm:$0xff]  }
 0x63b   : > { %11078 = vmatprep.mubr.bf16.mxu0 %v2199_v47  ;;  %12103 = vmatprep.mubr.bf16.mxu1 %v2199_v47  ;;  %v2197_v47 = vcombine.high %v18704_v27, %v18704_v27  ;;  %v16507_v27 = vld [vmem:[%s16954_s29 + $0x3028] ss:$16 sps:$4 sm:$0xff]  }
 0x63d   : > { %11049 = vmatpush1.bf16.msra.mxu0 %v16408_v32  ;;  %12074 = vmatpush1.bf16.msra.mxu1 %v16411_v48  ;;  %v16498_v32 = vld [vmem:[%s16954_s29 + $0x3000] ss:$16 sps:$4 sm:$0xff]   ;;  %v16501_v48 = vld [vmem:[%s16954_s29 + $0x3008] ss:$16 sps:$4 sm:$0xff]  }
 0x63e   : > { %11050 = vmatprep.subr.bf16.mxu0 %v16416_v30  ;;  %12075 = vmatprep.subr.bf16.mxu1 %v16419_v49  ;;  %v16506_v30 = vld [vmem:[%s16954_s29 + $0x3024] ss:$16 sps:$4 sm:$0xff]   ;;  %v16509_v49 = vld [vmem:[%s16954_s29 + $0x302c] ss:$16 sps:$4 sm:$0xff]  }
 0x641   : > { %11051 = vmatpush1.bf16.msra.mxu0 %v16414_v39  ;;  %12076 = vmatpush1.bf16.msra.mxu1 %v16417_v50  ;;  %v16504_v39 = vld [vmem:[%s16954_s29 + $0x3020] ss:$16 sps:$4 sm:$0xff]   ;;  %v16512_v50 = vld [vmem:[%s16954_s29 + $0x3044] ss:$16 sps:$4 sm:$0xff]  }
 0x642   : > { %11052 = vmatprep.subr.bf16.mxu0 %v16422_v40  ;;  %12077 = vmatprep.subr.bf16.mxu1 %v16425_v51  ;;  %v16515_v40 = vld [vmem:[%s16954_s29 + $0x304c] ss:$16 sps:$4 sm:$0xff]   ;;  %v16713_v51 = vmov 0  }
 0x645   : > { %11053 = vmatpush1.bf16.msra.mxu0 %v16420_v52  ;;  %12078 = vmatpush1.bf16.msra.mxu1 %v16423_v45  ;;  %v16510_v52 = vld [vmem:[%s16954_s29 + $0x3040] ss:$16 sps:$4 sm:$0xff]   ;;  %v16513_v45 = vld [vmem:[%s16954_s29 + $0x3048] ss:$16 sps:$4 sm:$0xff]  }
 0x646   : > { %11054 = vmatprep.subr.bf16.mxu0 %v16428_v56  ;;  %12079 = vmatprep.subr.bf16.mxu1 %v16431_v57  ;;  %v16518_v56 = vld [vmem:[%s16954_s29 + $0x3064] ss:$16 sps:$4 sm:$0xff]   ;;  %v16521_v57 = vld [vmem:[%s16954_s29 + $0x306c] ss:$16 sps:$4 sm:$0xff]  }
 0x649   : > { %11055 = vmatpush1.bf16.msra.mxu0 %v16426_v59  ;;  %12080 = vmatpush1.bf16.msra.mxu1 %v16429_v46  ;;  %v16516_v59 = vld [vmem:[%s16954_s29 + $0x3060] ss:$16 sps:$4 sm:$0xff]   ;;  %v16519_v46 = vld [vmem:[%s16954_s29 + $0x3068] ss:$16 sps:$4 sm:$0xff]  }
 0x64a   : > { %11056 = vmatprep.subr.bf16.mxu0 %v16434_v60  ;;  %12081 = vmatprep.subr.bf16.mxu1 %v16437_v41  ;;  %v16524_v60 = vld [vmem:[%s16954_s29 + $0x3084] ss:$16 sps:$4 sm:$0xff]   ;;  %v16527_v41 = vld [vmem:[%s16954_s29 + $0x308c] ss:$16 sps:$4 sm:$0xff]  }
 0x64d   : > { %11057 = vmatpush1.bf16.msra.mxu0 %v16432_v61  ;;  %12082 = vmatpush1.bf16.msra.mxu1 %v16435_v53  ;;  %v16522_v61 = vld [vmem:[%s16954_s29 + $0x3080] ss:$16 sps:$4 sm:$0xff]   ;;  %v16525_v53 = vld [vmem:[%s16954_s29 + $0x3088] ss:$16 sps:$4 sm:$0xff]  }
 0x64e   : > { %11058 = vmatprep.subr.bf16.mxu0 %v16440_v62  ;;  %12083 = vmatprep.subr.bf16.mxu1 %v16443_v0  ;;  %v16530_v62 = vld [vmem:[%s16954_s29 + $0x30a4] ss:$16 sps:$4 sm:$0xff]   ;;  %v16533_v0 = vld [vmem:[%s16954_s29 + $0x30ac] ss:$16 sps:$4 sm:$0xff]  }
 0x651   : > { %11059 = vmatpush1.bf16.msra.mxu0 %v16438_v42  ;;  %12084 = vmatpush1.bf16.msra.mxu1 %v16441_v3  ;;  %v16528_v42 = vld [vmem:[%s16954_s29 + $0x30a0] ss:$16 sps:$4 sm:$0xff]   ;;  %v16531_v3 = vld [vmem:[%s16954_s29 + $0x30a8] ss:$16 sps:$4 sm:$0xff]  }
 0x652   : > { %11060 = vmatprep.subr.bf16.mxu0 %v16446_v6  ;;  %12085 = vmatprep.subr.bf16.mxu1 %v16449_v35  ;;  %v16536_v6 = vld [vmem:[%s16954_s29 + $0x30c4] ss:$16 sps:$4 sm:$0xff]   ;;  %v16539_v35 = vld [vmem:[%s16954_s29 + $0x30cc] ss:$16 sps:$4 sm:$0xff]  }
 0x655   : > { %11061 = vmatpush1.bf16.msra.mxu0 %v16444_v9  ;;  %12086 = vmatpush1.bf16.msra.mxu1 %v16447_v10  ;;  %v16534_v9 = vld [vmem:[%s16954_s29 + $0x30c0] ss:$16 sps:$4 sm:$0xff]   ;;  %v16537_v10 = vld [vmem:[%s16954_s29 + $0x30c8] ss:$16 sps:$4 sm:$0xff]  }
 0x656   : > { %11062 = vmatprep.subr.bf16.mxu0 %v16452_v54  ;;  %12087 = vmatprep.subr.bf16.mxu1 %v16455_v11  ;;  %v16542_v54 = vld [vmem:[%s16954_s29 + $0x30e4] ss:$16 sps:$4 sm:$0xff]   ;;  %v16545_v11 = vld [vmem:[%s16954_s29 + $0x30ec] ss:$16 sps:$4 sm:$0xff]  }
 0x659   : > { %11063 = vmatpush1.bf16.msra.mxu0 %v16450_v58  ;;  %12088 = vmatpush1.bf16.msra.mxu1 %v16453_v1  ;;  %v16540_v58 = vld [vmem:[%s16954_s29 + $0x30e0] ss:$16 sps:$4 sm:$0xff]   ;;  %v16543_v1 = vld [vmem:[%s16954_s29 + $0x30e8] ss:$16 sps:$4 sm:$0xff]  }
 0x65a   : > { %11064 = vmatprep.subr.bf16.mxu0 %v16458_v13  ;;  %12089 = vmatprep.subr.bf16.mxu1 %v16461_v14  ;;  %v12313_v13 = vld.sshfl [vmem:[%s16970_s4 + $0x30] sm:$0x1 pattern:$0x75316420] }
 0x65b   : > { %v2213_v14 = vrot.slane %v12313_v13, %v17025_v5 }
 0x65d   : > { %11065 = vmatpush1.bf16.msra.mxu0 %v16456_v15  ;;  %12090 = vmatpush1.bf16.msra.mxu1 %v16459_v18  ;;  %v16714_v15 = vmov 1983009808  }
 0x65e   : > { %11066 = vmatprep.subr.bf16.mxu0 %v16464_v20  ;;  %12091 = vmatprep.subr.bf16.mxu1 %v16467_v21  ;;  %v12160_v18 = vunpack.c.l.s4 %v16714_v15 }
 0x660   : > { %v12161_v20 = vunpack.c.0.s8 %v12160_v18 }
 0x661   : > { %11067 = vmatpush1.bf16.msra.mxu0 %v16462_v7  ;;  %12092 = vmatpush1.bf16.msra.mxu1 %v16465_v55 }
 0x662   : > { %11068 = vmatprep.subr.bf16.mxu0 %v16470_v22  ;;  %12093 = vmatprep.subr.bf16.mxu1 %v16473_v23  ;;  %v12164_v55 = vsub.s32 %v12161_v20, %v17017_v63 }
 0x665   : > { %11069 = vmatpush1.bf16.msra.mxu0 %v16468_v4  ;;  %12094 = vmatpush1.bf16.msra.mxu1 %v16471_v24 }
 0x666   : > { %11070 = vmatprep.subr.bf16.mxu0 %v16476_v25  ;;  %12095 = vmatprep.subr.bf16.mxu1 %v16479_v2 }
 0x669   : > { %11071 = vmatpush1.bf16.msra.mxu0 %v16474_v29  ;;  %12096 = vmatpush1.bf16.msra.mxu1 %v16477_v31 }
 0x66a   : > { %11072 = vmatprep.subr.bf16.mxu0 %v16482_v12  ;;  %12097 = vmatprep.subr.bf16.mxu1 %v16485_v34  ;;  %v323_v34 = vld [vmem:[#allocation2] sm:$0xff] }
 0x66d   : > { %11073 = vmatpush1.bf16.msra.mxu0 %v16480_v19  ;;  %12098 = vmatpush1.bf16.msra.mxu1 %v16483_v17 }
 0x66e   : > { %11074 = vmatprep.subr.bf16.mxu0 %v16488_v36  ;;  %12099 = vmatprep.subr.bf16.mxu1 %v16491_v8 }
 0x671   : > { %11075 = vmatpush1.bf16.msra.mxu0 %v16486_v37  ;;  %12100 = vmatpush1.bf16.msra.mxu1 %v16489_v26 }
 0x672   : > { %11076 = vmatprep.subr.bf16.mxu0 %v16494_v28  ;;  %12101 = vmatprep.subr.bf16.mxu1 %v16497_v38 }
 0x675   : > { %11077 = vmatpush1.bf16.msra.mxu0 %v16492_v33  ;;  %12102 = vmatpush1.bf16.msra.mxu1 %v16495_v43 }
 0x676   : > { %11087 = vmatprep.subr.bf16.mxu0 %v16500_v44  ;;  %12112 = vmatprep.subr.bf16.mxu1 %v16503_v16 }
 0x678   : > { %11079 = vmatmul.mubr.bf16.vlgmr.msra.gmra.mrb[0].mxu0 %v2197_v47  ;;  %12104 = vmatmul.mubr.bf16.vlgmr.msra.gmra.mrb[0].mxu1 %v2197_v47 }
 0x679   : > { %11088 = vmatpush1.bf16.msra.mxu0 %v16498_v32  ;;  %12113 = vmatpush1.bf16.msra.mxu1 %v16501_v48 }
 0x67a   : > { %11089 = vmatprep.subr.bf16.mxu0 %v16506_v30  ;;  %12114 = vmatprep.subr.bf16.mxu1 %v16509_v49 }
 0x67b   : > { %11119 = vmatprep.mubr.bf16.mxu0 %v16713_v51  ;;  %12144 = vmatprep.mubr.bf16.mxu1 %v16713_v51 }
 0x67d   : > { %11090 = vmatpush1.bf16.msra.mxu0 %v16504_v39  ;;  %12115 = vmatpush1.bf16.msra.mxu1 %v16507_v27 }
 0x67e   : > { %11091 = vmatprep.subr.bf16.mxu0 %v16512_v50  ;;  %12116 = vmatprep.subr.bf16.mxu1 %v16515_v40 }
 0x681   : > { %11092 = vmatpush1.bf16.msra.mxu0 %v16510_v52  ;;  %12117 = vmatpush1.bf16.msra.mxu1 %v16513_v45 }
 0x682   : > { %11093 = vmatprep.subr.bf16.mxu0 %v16518_v56  ;;  %12118 = vmatprep.subr.bf16.mxu1 %v16521_v57 }
 0x685   : > { %11094 = vmatpush1.bf16.msra.mxu0 %v16516_v59  ;;  %12119 = vmatpush1.bf16.msra.mxu1 %v16519_v46 }
 0x686   : > { %11095 = vmatprep.subr.bf16.mxu0 %v16524_v60  ;;  %12120 = vmatprep.subr.bf16.mxu1 %v16527_v41 }
 0x689   : > { %11096 = vmatpush1.bf16.msra.mxu0 %v16522_v61  ;;  %12121 = vmatpush1.bf16.msra.mxu1 %v16525_v53 }
 0x68a   : > { %11097 = vmatprep.subr.bf16.mxu0 %v16530_v62  ;;  %12122 = vmatprep.subr.bf16.mxu1 %v16533_v0 }
 0x68d   : > { %11098 = vmatpush1.bf16.msra.mxu0 %v16528_v42  ;;  %12123 = vmatpush1.bf16.msra.mxu1 %v16531_v3 }
 0x68e   : > { %11099 = vmatprep.subr.bf16.mxu0 %v16536_v6  ;;  %12124 = vmatprep.subr.bf16.mxu1 %v16539_v35 }
 0x691   : > { %11100 = vmatpush1.bf16.msra.mxu0 %v16534_v9  ;;  %12125 = vmatpush1.bf16.msra.mxu1 %v16537_v10 }
 0x692   : > { %11101 = vmatprep.subr.bf16.mxu0 %v16542_v54  ;;  %12126 = vmatprep.subr.bf16.mxu1 %v16545_v11 }
 0x695   : > { %11102 = vmatpush1.bf16.msra.mxu0 %v16540_v58  ;;  %12127 = vmatpush1.bf16.msra.mxu1 %v16543_v1 }
 0x698   : > { %11120 = vmatmul.mubr.bf16.vlgmr.msra.gmra.mrb[0].mxu0 %v2213_v14  ;;  %12145 = vmatmul.mubr.bf16.vlgmr.msra.gmra.mrb[0].mxu1 %v2213_v14 }
 0x76b   : > { %v11121_v21 = vpop.f32.mrb[0].mxu0  ;;  %v12146_v7 = vpop.f32.mrb[0].mxu1 }
 0x76c   : > { %v11123_v22 = vpop.f32.mrb[1].mxu0  ;;  %v12148_v23 = vpop.f32.mrb[1].mxu1 }
 0x76d   : > { %v12157_v4 = vcombine.low %v11121_v21, %v11123_v22  ;;  %v12158_v24 = vcombine.low %v12146_v7, %v12148_v23  ;;  %v11125_v25 = vpop.f32.mrb[2].mxu0  ;;  %v12150_v2 = vpop.f32.mrb[2].mxu1 }
 0x76e   : > { %v11126_v29 = vpop.f32.mrb[3].mxu0  ;;  %v12151_v31 = vpop.f32.mrb[3].mxu1 }
 0x76f   : > { %v12165_v5 = vrot.slane %v12157_v4, %v12164_v55  ;;  %v12172_v12 = vrot.slane %v12158_v24, %v12164_v55  ;;  %12180 = sbr.rel (%p13882_p3) target bundleno = 1920 (0x780), region = 48 }
 0x771   : > { %v12173_v19 = vcombine.low %v12165_v5, %v12172_v12 }
 0x773   : > { %v12175_v17 = vadd.f32 %v12173_v19, %v323_v34 }
 0x775   : > { %12176 = vst [vmem:[#allocation2] sm:$0xff] %v12175_v17 }
 0x77c   : > { %v12181_v36 = vld [vmem:[#allocation2] sm:$0xff] }
 0x77d   : > { %v12182_v63 = vmax.f32 %v12181_v36, 0.0 }
 0x77f   : > { %12183 = vst [vmem:[%s16975_s26] sm:$0xff] %v12182_v63 }
 0x780 PF: > { %s19_s22 = sadd.s32 1, %s16704_s22   ;;  %s18871_s9 = sld [smem:[#allocation9_spill]] }
 0x781   : > { %p16_p11 = scmp.ge.s32.totalorder %s19_s22, 10   ;;  %s18872_s12 = smov %s16668_s13 }
 0x782   : > { %s18873_s13 = smov %s16672_s14  ;;  %s18874_s14 = smov %s16903_s10 }
 0x783   : > { %s18875_s15 = smov %s16680_s16  ;;  %s18876_s16 = smov %s16684_s17 }
 0x784   : > { %s18877_s17 = smov %s16908_s28  ;;  %s18878_s18 = smov %s16696_s20 }
 0x785   : > { %s18879_s19 = smov %s16700_s21  ;;  %s18880_s20 = smov %s18883_s23 }
 0x786   : > { %s18881_s21 = smov %s18871_s9  ;;  %18 = sbr.rel (!%p16_p11) target bundleno = 11 (0xb), region = 96 }
 0x78d   :  { %12206 = vsyncpa [#allocation4], 1 }
 0x78e   :  { %12208 = vsyncpa [#allocation4 + $0x1], 1 }
 0x78f   :  { %12209 = vsyncpa [#allocation6], 1 }
 0x790   :  { %12211 = vsyncpa [#allocation6 + $0x1], 1 }

</bundles_post_ra>
